<compile_context>
chip_gen: v7x
topology: tpu7x:2x2x1
jax: 0.10.0
libtpu: 0.0.40
codegen_flags: <defaults>
</compile_context>

<pallas_src>
import functools

import jax
import jax.numpy as jnp
from jax.experimental import pallas as pl
from jax.experimental.pallas import tpu as pltpu


# ---------------------------------------------------------------------------
# The single fused Pallas kernel (one batch tile of `bt` states per grid step)
# ---------------------------------------------------------------------------
def _actor_critic_kernel(p1_ref, w1_ref, b1_ref, w2_ref, b2_ref, w3_ref, b3_ref,
                         sel_ref, wh1_ref, bh1_ref, wh2_ref, bh2_ref,
                         o_ref, h1_s):
    f32, bf16 = jnp.float32, jnp.bfloat16
    bt = o_ref.shape[0]            # states in this grid step
    M = bt * 8                     # 8 per-state row offsets (rows 0,2,4 are the valid conv2 rows)

    # ---- conv1 (8x8 stride 4), exact (256,32) weight --------------------------------------
    # One matmul per output column wo; each writes its 32 channels directly into the 32-lane
    # band [wo*32, wo*32+32) of the conv2-layout scratch -> relayout folded into the stores.
    w1 = w1_ref[...]               # (64*C, 32) bf16, resident
    b1 = b1_ref[...]               # (1, 32)    f32
    for wo in range(8):
        a = jnp.dot(p1_ref[wo], w1, preferred_element_type=f32) + b1        # (M, 32)
        h1_s[0:M, wo * 32:(wo + 1) * 32] = jnp.maximum(a, 0.0)
    h1_s[M:M + 8, :] = jnp.zeros((8, h1_s.shape[1]), f32)   # pad rows for the shifted reads

    # ---- conv2 (4x4 stride 2), banded weights, kh-outer so each RHS is pushed once --------
    # Row (b*8 + h) of acc2 is the conv2 output for state b at vertical offset h; only
    # h in {0,2,4} is a real (stride-2) output, the rest are phantom rows that come for free.
    acc2 = b2_ref[...]                                      # (1, 256) f32
    for kh in range(4):
        lhs = h1_s[kh:kh + M, :].astype(bf16)               # shifted window, (M, 256)
        acc2 = acc2 + jnp.dot(lhs, w2_ref[kh], preferred_element_type=f32)
    a2 = jnp.maximum(acc2, 0.0).astype(bf16)                # (M, 256): lanes wo2*64 + c

    # ---- compact the valid rows (h = 0, 2, 4) with a 0/1 selection matmul on the MXU ------
    a2_sel = jnp.dot(sel_ref[...], a2, preferred_element_type=f32).astype(bf16)   # (3*bt, 256)

    # ---- conv3 (3x3 -> 1x1), exact per-input-row weights -----------------------------------
    acc3 = b3_ref[...]                                      # (1, 64) f32
    for r in range(3):
        acc3 = acc3 + jnp.dot(a2_sel[r * bt:(r + 1) * bt, :], w3_ref[r],
                              preferred_element_type=f32)
    feat = jnp.maximum(acc3, 0.0).astype(bf16)              # (bt, 64) = conv_out

    # ---- heads, layer 1: mu|var|value fused into one lane-dense (64, 1536) matmul ----------
    hid = jnp.dot(feat, wh1_ref[...], preferred_element_type=f32) + bh1_ref[...]
    hid = jnp.maximum(hid, 0.0).astype(bf16)                # (bt, 1536)

    # ---- heads, layer 2 (three matmuls on aligned 512-lane slices) -------------------------
    mu_y = jnp.dot(hid[:, 0:512], wh2_ref[0], preferred_element_type=f32) + bh2_ref[0]
    var_y = jnp.dot(hid[:, 512:1024], wh2_ref[1], preferred_element_type=f32) + bh2_ref[1]
    val_y = jnp.dot(hid[:, 1024:1536], wh2_ref[2], preferred_element_type=f32) + bh2_ref[2]

    o_ref[:, 0:128] = jnp.tanh(mu_y)
    # numerically-stable softplus = max(y,0) + log1p(exp(-|y|)); log1p built from exp/log/where
    # (log1p-level accuracy without relying on a math.log1p lowering).
    t = jnp.exp(-jnp.abs(var_y))
    log1p_t = jnp.where(t < 1e-4, t, jnp.log(1.0 + t))
    o_ref[:, 128:256] = jnp.maximum(var_y, 0.0) + log1p_t
    o_ref[:, 256:384] = val_y


# ---------------------------------------------------------------------------
# conv1 window extraction (XLA ops, outside the kernel)
# ---------------------------------------------------------------------------
def _conv1_windows(x_nhwc):
    """(B,36,36,C) -> (8, B*8, 64*C): p1[wo, b*8+ho, kh*8C + kw*C + ci] = x[b, 4ho+kh, 4wo+kw, ci]."""
    B, H, W, C = x_nhwc.shape
    assert H == 36 and W == 36, "packing is specialized to 36x36 inputs"
    rows = jnp.stack([x_nhwc[:, 4 * ho:4 * ho + 8, :, :] for ho in range(8)], axis=1)
    cols = jnp.stack([rows[:, :, :, 4 * wo:4 * wo + 8, :] for wo in range(8)], axis=0)
    return cols.reshape(8, B * 8, 8 * 8 * C)


# ---------------------------------------------------------------------------
# Parameter construction (deterministic, synthetic; PyTorch-equivalent layout)
# ---------------------------------------------------------------------------
def _conv_out_spatial(h, w):
    h = (h - 8) // 4 + 1; w = (w - 8) // 4 + 1
    h = (h - 4) // 2 + 1; w = (w - 4) // 2 + 1
    h = (h - 3) // 1 + 1; w = (w - 3) // 1 + 1
    return h, w


def init_params(key, input_shape, n_actions):
    c_in, H, W = input_shape
    ho, wo = _conv_out_spatial(H, W)
    conv_out_size = 64 * ho * wo

    def dense(key, shape, scale=0.05):
        return scale * jax.random.normal(key, shape, dtype=jnp.float32)

    ks = jax.random.split(key, 18)
    return {
        # conv weights stored (kh, kw, Cin, Cout); linear weights stored (in, out)
        "c1_w": dense(ks[0], (8, 8, c_in, 32)), "c1_b": dense(ks[1], (32,)),
        "c2_w": dense(ks[2], (4, 4, 32, 64)),   "c2_b": dense(ks[3], (64,)),
        "c3_w": dense(ks[4], (3, 3, 64, 64)),   "c3_b": dense(ks[5], (64,)),
        "mu_w1": dense(ks[6], (conv_out_size, 512)),   "mu_b1": dense(ks[7], (512,)),
        "mu_w2": dense(ks[8], (512, n_actions)),       "mu_b2": dense(ks[9], (n_actions,)),
        "var_w1": dense(ks[10], (conv_out_size, 512)), "var_b1": dense(ks[11], (512,)),
        "var_w2": dense(ks[12], (512, n_actions)),     "var_b2": dense(ks[13], (n_actions,)),
        "val_w1": dense(ks[14], (conv_out_size, 512)), "val_b1": dense(ks[15], (512,)),
        "val_w2": dense(ks[16], (512, 1)),             "val_b2": dense(ks[17], (1,)),
    }


def pack_params(p):
    """One-time repack into kernel-ready, mostly-exact bf16 matrices (VMEM-resident at run time)."""
    f32, bf16 = jnp.float32, jnp.bfloat16
    C = p["c1_w"].shape[2]
    assert p["mu_w1"].shape[0] == 64, "packing assumes 1x1 final conv spatial (36x36 input)"

    # conv1: exact (64*C, 32) weight (block-diagonal packing removed per review)
    w1 = p["c1_w"].reshape(8 * 8 * C, 32)

    # conv2: banded (256 -> 256) matrix per kernel row kh; rows = wo1*32+ci, cols = wo2*64+co.
    # Kept at 256 output lanes (zero band [192:256)) to stay 256-aligned for v6e/v7x MXU tiles;
    # it is fetched once per call and stays VMEM-resident, so the zero band costs no HBM per state.
    w2 = p["c2_w"].astype(f32)
    w2row = jnp.zeros((4, 256, 256), f32)
    for kh in range(4):
        blk = w2[kh].reshape(4 * 32, 64)
        for wo2 in range(3):
            w2row = w2row.at[kh, 64 * wo2:64 * wo2 + 128, 64 * wo2:64 * wo2 + 64].set(blk)

    # conv3: exact (192,64) per input row, padded only to 256 rows to match the conv2 lane layout
    w3 = p["c3_w"].astype(f32)
    w3row = jnp.stack([jnp.pad(w3[r].reshape(3 * 64, 64), ((0, 64), (0, 0))) for r in range(3)])

    # heads layer 1: exact (64, 1536) concat of mu|var|value (no 128-row padding)
    wh1 = jnp.concatenate([p["mu_w1"], p["var_w1"], p["val_w1"]], axis=1)
    bh1 = jnp.concatenate([p["mu_b1"], p["var_b1"], p["val_b1"]]).reshape(1, 1536)

    def pad_w(w): return jnp.pad(w, ((0, 0), (0, 128 - w.shape[1])))
    def pad_b(b): return jnp.pad(b, (0, 128 - b.shape[0]))
    wh2 = jnp.stack([pad_w(p["mu_w2"]), pad_w(p["var_w2"]), pad_w(p["val_w2"])])
    bh2 = jnp.stack([pad_b(p["mu_b2"]), pad_b(p["var_b2"]), pad_b(p["val_b2"])]).reshape(3, 1, 128)

    return {
        "w1": w1.astype(bf16),
        "b1": p["c1_b"].reshape(1, 32).astype(f32),
        "w2": w2row.astype(bf16),
        "b2": jnp.pad(jnp.tile(p["c2_b"], 3), (0, 64)).reshape(1, 256).astype(f32),
        "w3": w3row.astype(bf16),
        "b3": p["c3_b"].reshape(1, 64).astype(f32),
        "wh1": wh1.astype(bf16),
        "bh1": bh1.astype(f32),
        "wh2": wh2.astype(bf16),
        "bh2": bh2.astype(f32),
    }


# ---------------------------------------------------------------------------
# Batched forward pass (mirrors ActorCritic.forward for each state in the batch)
# ---------------------------------------------------------------------------
@functools.partial(jax.jit, static_argnames=("n_actions", "batch_tile"))
def actor_critic_forward(packed, states, *, n_actions, batch_tile=32):
    B, C, H, W = states.shape
    bt = min(batch_tile, B)
    assert B % bt == 0, "batch must be a multiple of the batch tile"

    x = jnp.transpose(states.astype(jnp.float32), (0, 2, 3, 1))          # NHWC
    p1 = _conv1_windows(x).astype(jnp.bfloat16)                          # (8, B*8, 64*C)

    # 0/1 selection matrix: compacts the 8 redundant per-state rows to the 3 valid conv2
    # output rows (h = 0, 2, 4) with a single MXU matmul (avoids strided sublane gathers).
    ridx = jnp.arange(3 * bt)
    sel = jax.nn.one_hot((ridx % bt) * 8 + 2 * (ridx // bt), bt * 8, dtype=jnp.bfloat16)

    operands = (p1, packed["w1"], packed["b1"], packed["w2"], packed["b2"],
                packed["w3"], packed["b3"], sel, packed["wh1"], packed["bh1"],
                packed["wh2"], packed["bh2"])

    def const_spec(a):  # weights/biases: constant index_map -> DMA'd once, VMEM-resident
        return pl.BlockSpec(a.shape, lambda i, _nd=a.ndim: (0,) * _nd)

    in_specs = [pl.BlockSpec((8, bt * 8, 64 * C), lambda i: (0, i, 0))]
    in_specs += [const_spec(a) for a in operands[1:]]

    # VMEM budget (~6 MB total incl. double buffers) fits the default scoped limit on all of
    # v5e / v6e / v7x, so no vmem_limit_bytes override is needed.
    out = pl.pallas_call(
        _actor_critic_kernel,
        out_shape=jax.ShapeDtypeStruct((B, 384), jnp.float32),
        grid=(B // bt,),
        in_specs=in_specs,
        out_specs=pl.BlockSpec((bt, 384), lambda i: (i, 0)),
        scratch_shapes=[pltpu.VMEM((bt * 8 + 8, 256), jnp.float32)],
        compiler_params=pltpu.CompilerParams(dimension_semantics=("parallel",)),
    )(*operands)

    mu = out[:, 0:n_actions]
    var = out[:, 128:128 + n_actions]
    value = out[:, 256:257]
    return mu, var, value


# ---------------------------------------------------------------------------
# Plain-JAX reference (non-Pallas), used only to validate the fused kernel
# ---------------------------------------------------------------------------
def reference_forward(params, states):
    x = jnp.transpose(states.astype(jnp.float32), (0, 2, 3, 1))          # (B, H, W, C)
    dn = ("NHWC", "HWIO", "NHWC")
    y = jax.lax.conv_general_dilated(x, params["c1_w"], (4, 4), "VALID", dimension_numbers=dn)
    y = jax.nn.relu(y + params["c1_b"])
    y = jax.lax.conv_general_dilated(y, params["c2_w"], (2, 2), "VALID", dimension_numbers=dn)
    y = jax.nn.relu(y + params["c2_b"])
    y = jax.lax.conv_general_dilated(y, params["c3_w"], (1, 1), "VALID", dimension_numbers=dn)
    y = jax.nn.relu(y + params["c3_b"])
    feat = jnp.transpose(y, (0, 3, 1, 2)).reshape(y.shape[0], -1)        # NCHW flatten
    h_mu = jax.nn.relu(feat @ params["mu_w1"] + params["mu_b1"])
    mu = jnp.tanh(h_mu @ params["mu_w2"] + params["mu_b2"])
    h_var = jax.nn.relu(feat @ params["var_w1"] + params["var_b1"])
    var = jax.nn.softplus(h_var @ params["var_w2"] + params["var_b2"])
    h_val = jax.nn.relu(feat @ params["val_w1"] + params["val_b1"])
    value = h_val @ params["val_w2"] + params["val_b2"]
    return mu, var, value


# ---------------------------------------------------------------------------
if __name__ == "__main__":
    key = jax.random.PRNGKey(0)
    k_params, k_state = jax.random.split(key)

    input_shape = (4, 36, 36)   # (C, H, W); 36 is the smallest spatial size the conv tower accepts
    n_actions = 4
    batch = 64                  # processed in one pallas_call: 2 grid steps of 32 states

    params = init_params(k_params, input_shape, n_actions)
    packed = pack_params(params)                                         # one-time weight repack
    states = jax.random.normal(k_state, (batch,) + input_shape, dtype=jnp.float32)

    mu, var, value = actor_critic_forward(packed, states, n_actions=n_actions)
    jax.block_until_ready((mu, var, value))

    assert mu.shape == (batch, n_actions)
    assert var.shape == (batch, n_actions)
    assert value.shape == (batch, 1)
    assert bool(jnp.all(var >= 0.0))            # Softplus output is non-negative
    assert bool(jnp.all(jnp.abs(mu) <= 1.0))    # Tanh output is in [-1, 1]

    # numerical check against the plain-JAX reference (bf16 MXU operands -> loose tolerance)
    mu_r, var_r, val_r = reference_forward(params, states)
    assert bool(jnp.allclose(mu, mu_r, atol=5e-2, rtol=5e-2))
    assert bool(jnp.allclose(var, var_r, atol=5e-2, rtol=5e-2))
    assert bool(jnp.allclose(value, val_r, atol=5e-2, rtol=5e-2))

    print("KERNEL_OK")
</pallas_src>

<mosaic_0001>
module attributes {stable_mosaic.version = 11 : i64} {
  func.func @_actor_critic_kernel(%arg0: i32, %arg1: memref<8x256x256xbf16, #tpu.memory_space<vmem>>, %arg2: memref<256x32xbf16, #tpu.memory_space<vmem>>, %arg3: memref<1x32xf32, #tpu.memory_space<vmem>>, %arg4: memref<4x256x256xbf16, #tpu.memory_space<vmem>>, %arg5: memref<1x256xf32, #tpu.memory_space<vmem>>, %arg6: memref<3x256x64xbf16, #tpu.memory_space<vmem>>, %arg7: memref<1x64xf32, #tpu.memory_space<vmem>>, %arg8: memref<96x256xbf16, #tpu.memory_space<vmem>>, %arg9: memref<64x1536xbf16, #tpu.memory_space<vmem>>, %arg10: memref<1x1536xf32, #tpu.memory_space<vmem>>, %arg11: memref<3x512x128xbf16, #tpu.memory_space<vmem>>, %arg12: memref<3x1x128xf32, #tpu.memory_space<vmem>>, %arg13: memref<32x384xf32, #tpu.memory_space<vmem>>, %arg14: memref<264x256xf32, #tpu.memory_space<vmem>>) attributes {dimension_semantics = [#tpu.dimension_semantics<parallel>], iteration_bounds = array<i64: 2>, scalar_prefetch = 0 : i64, scratch_operands = 1 : i64, tpu.core_type = #tpu.core_type<tc>, window_params = [{transform_indices = @transform_0, window_bounds = array<i64: 8, 256, 256>}, {pipeline_mode = #tpu.pipeline_mode<synchronous>, transform_indices = @transform_1, window_bounds = array<i64: 256, 32>}, {pipeline_mode = #tpu.pipeline_mode<synchronous>, transform_indices = @transform_2, window_bounds = array<i64: 1, 32>}, {pipeline_mode = #tpu.pipeline_mode<synchronous>, transform_indices = @transform_3, window_bounds = array<i64: 4, 256, 256>}, {pipeline_mode = #tpu.pipeline_mode<synchronous>, transform_indices = @transform_4, window_bounds = array<i64: 1, 256>}, {pipeline_mode = #tpu.pipeline_mode<synchronous>, transform_indices = @transform_5, window_bounds = array<i64: 3, 256, 64>}, {pipeline_mode = #tpu.pipeline_mode<synchronous>, transform_indices = @transform_6, window_bounds = array<i64: 1, 64>}, {pipeline_mode = #tpu.pipeline_mode<synchronous>, transform_indices = @transform_7, window_bounds = array<i64: 96, 256>}, {pipeline_mode = #tpu.pipeline_mode<synchronous>, transform_indices = @transform_8, window_bounds = array<i64: 64, 1536>}, {pipeline_mode = #tpu.pipeline_mode<synchronous>, transform_indices = @transform_9, window_bounds = array<i64: 1, 1536>}, {pipeline_mode = #tpu.pipeline_mode<synchronous>, transform_indices = @transform_10, window_bounds = array<i64: 3, 512, 128>}, {pipeline_mode = #tpu.pipeline_mode<synchronous>, transform_indices = @transform_11, window_bounds = array<i64: 3, 1, 128>}, {transform_indices = @transform_12, window_bounds = array<i64: 32, 384>}]} {
    %c0 = arith.constant 0 : index
    %c0_0 = arith.constant 0 : index
    %0 = vector.load %arg2[%c0, %c0_0] : memref<256x32xbf16, #tpu.memory_space<vmem>>, vector<256x32xbf16>
    %c0_1 = arith.constant 0 : index
    %c0_2 = arith.constant 0 : index
    %1 = vector.load %arg3[%c0_1, %c0_2] : memref<1x32xf32, #tpu.memory_space<vmem>>, vector<1x32xf32>
    %c0_3 = arith.constant 0 : index
    %c0_4 = arith.constant 0 : index
    %c0_5 = arith.constant 0 : index
    %2 = vector.load %arg1[%c0_3, %c0_4, %c0_5] : memref<8x256x256xbf16, #tpu.memory_space<vmem>>, vector<1x256x256xbf16>
    %3 = vector.shape_cast %2 : vector<1x256x256xbf16> to vector<256x256xbf16>
    %cst = arith.constant dense<0.000000e+00> : vector<256x32xf32>
    %4 = tpu.matmul %3, %0, %cst {dimension_numbers = #tpu.dot_dimension_numbers<[1], [0], [0], [1], [0, 0, 1, 1], [], []>} : vector<256x256xbf16>, vector<256x32xbf16>, vector<256x32xf32> -> vector<256x32xf32>
    %5 = vector.broadcast %1 : vector<1x32xf32> to vector<256x32xf32>
    %6 = arith.addf %4, %5 : vector<256x32xf32>
    %cst_6 = arith.constant 0.000000e+00 : f32
    %7 = vector.broadcast %cst_6 : f32 to vector<256x32xf32>
    %8 = arith.maximumf %6, %7 : vector<256x32xf32>
    %c0_7 = arith.constant 0 : index
    %c0_8 = arith.constant 0 : index
    %9 = vector.load %arg14[%c0_7, %c0_8] : memref<264x256xf32, #tpu.memory_space<vmem>>, vector<256x32xf32>
    tpu.vector_store %arg14[%c0_7, %c0_8], %8 {strides = array<i32>} : memref<264x256xf32, #tpu.memory_space<vmem>>, vector<256x32xf32>,
    %c1 = arith.constant 1 : index
    %c0_9 = arith.constant 0 : index
    %c0_10 = arith.constant 0 : index
    %10 = vector.load %arg1[%c1, %c0_9, %c0_10] : memref<8x256x256xbf16, #tpu.memory_space<vmem>>, vector<1x256x256xbf16>
    %11 = vector.shape_cast %10 : vector<1x256x256xbf16> to vector<256x256xbf16>
    %cst_11 = arith.constant dense<0.000000e+00> : vector<256x32xf32>
    %12 = tpu.matmul %11, %0, %cst_11 {dimension_numbers = #tpu.dot_dimension_numbers<[1], [0], [0], [1], [0, 0, 1, 1], [], []>} : vector<256x256xbf16>, vector<256x32xbf16>, vector<256x32xf32> -> vector<256x32xf32>
    %13 = vector.broadcast %1 : vector<1x32xf32> to vector<256x32xf32>
    %14 = arith.addf %12, %13 : vector<256x32xf32>
    %cst_12 = arith.constant 0.000000e+00 : f32
    %15 = vector.broadcast %cst_12 : f32 to vector<256x32xf32>
    %16 = arith.maximumf %14, %15 : vector<256x32xf32>
    %c0_13 = arith.constant 0 : index
    %c32 = arith.constant 32 : index
    %17 = vector.load %arg14[%c0_13, %c32] : memref<264x256xf32, #tpu.memory_space<vmem>>, vector<256x32xf32>
    tpu.vector_store %arg14[%c0_13, %c32], %16 {strides = array<i32>} : memref<264x256xf32, #tpu.memory_space<vmem>>, vector<256x32xf32>,
    %c2 = arith.constant 2 : index
    %c0_14 = arith.constant 0 : index
    %c0_15 = arith.constant 0 : index
    %18 = vector.load %arg1[%c2, %c0_14, %c0_15] : memref<8x256x256xbf16, #tpu.memory_space<vmem>>, vector<1x256x256xbf16>
    %19 = vector.shape_cast %18 : vector<1x256x256xbf16> to vector<256x256xbf16>
    %cst_16 = arith.constant dense<0.000000e+00> : vector<256x32xf32>
    %20 = tpu.matmul %19, %0, %cst_16 {dimension_numbers = #tpu.dot_dimension_numbers<[1], [0], [0], [1], [0, 0, 1, 1], [], []>} : vector<256x256xbf16>, vector<256x32xbf16>, vector<256x32xf32> -> vector<256x32xf32>
    %21 = vector.broadcast %1 : vector<1x32xf32> to vector<256x32xf32>
    %22 = arith.addf %20, %21 : vector<256x32xf32>
    %cst_17 = arith.constant 0.000000e+00 : f32
    %23 = vector.broadcast %cst_17 : f32 to vector<256x32xf32>
    %24 = arith.maximumf %22, %23 : vector<256x32xf32>
    %c0_18 = arith.constant 0 : index
    %c64 = arith.constant 64 : index
    %25 = vector.load %arg14[%c0_18, %c64] : memref<264x256xf32, #tpu.memory_space<vmem>>, vector<256x32xf32>
    tpu.vector_store %arg14[%c0_18, %c64], %24 {strides = array<i32>} : memref<264x256xf32, #tpu.memory_space<vmem>>, vector<256x32xf32>,
    %c3 = arith.constant 3 : index
    %c0_19 = arith.constant 0 : index
    %c0_20 = arith.constant 0 : index
    %26 = vector.load %arg1[%c3, %c0_19, %c0_20] : memref<8x256x256xbf16, #tpu.memory_space<vmem>>, vector<1x256x256xbf16>
    %27 = vector.shape_cast %26 : vector<1x256x256xbf16> to vector<256x256xbf16>
    %cst_21 = arith.constant dense<0.000000e+00> : vector<256x32xf32>
    %28 = tpu.matmul %27, %0, %cst_21 {dimension_numbers = #tpu.dot_dimension_numbers<[1], [0], [0], [1], [0, 0, 1, 1], [], []>} : vector<256x256xbf16>, vector<256x32xbf16>, vector<256x32xf32> -> vector<256x32xf32>
    %29 = vector.broadcast %1 : vector<1x32xf32> to vector<256x32xf32>
    %30 = arith.addf %28, %29 : vector<256x32xf32>
    %cst_22 = arith.constant 0.000000e+00 : f32
    %31 = vector.broadcast %cst_22 : f32 to vector<256x32xf32>
    %32 = arith.maximumf %30, %31 : vector<256x32xf32>
    %c0_23 = arith.constant 0 : index
    %c96 = arith.constant 96 : index
    %33 = vector.load %arg14[%c0_23, %c96] : memref<264x256xf32, #tpu.memory_space<vmem>>, vector<256x32xf32>
    tpu.vector_store %arg14[%c0_23, %c96], %32 {strides = array<i32>} : memref<264x256xf32, #tpu.memory_space<vmem>>, vector<256x32xf32>,
    %c4 = arith.constant 4 : index
    %c0_24 = arith.constant 0 : index
    %c0_25 = arith.constant 0 : index
    %34 = vector.load %arg1[%c4, %c0_24, %c0_25] : memref<8x256x256xbf16, #tpu.memory_space<vmem>>, vector<1x256x256xbf16>
    %35 = vector.shape_cast %34 : vector<1x256x256xbf16> to vector<256x256xbf16>
    %cst_26 = arith.constant dense<0.000000e+00> : vector<256x32xf32>
    %36 = tpu.matmul %35, %0, %cst_26 {dimension_numbers = #tpu.dot_dimension_numbers<[1], [0], [0], [1], [0, 0, 1, 1], [], []>} : vector<256x256xbf16>, vector<256x32xbf16>, vector<256x32xf32> -> vector<256x32xf32>
    %37 = vector.broadcast %1 : vector<1x32xf32> to vector<256x32xf32>
    %38 = arith.addf %36, %37 : vector<256x32xf32>
    %cst_27 = arith.constant 0.000000e+00 : f32
    %39 = vector.broadcast %cst_27 : f32 to vector<256x32xf32>
    %40 = arith.maximumf %38, %39 : vector<256x32xf32>
    %c0_28 = arith.constant 0 : index
    %c128 = arith.constant 128 : index
    %41 = vector.load %arg14[%c0_28, %c128] : memref<264x256xf32, #tpu.memory_space<vmem>>, vector<256x32xf32>
    tpu.vector_store %arg14[%c0_28, %c128], %40 {strides = array<i32>} : memref<264x256xf32, #tpu.memory_space<vmem>>, vector<256x32xf32>,
    %c5 = arith.constant 5 : index
    %c0_29 = arith.constant 0 : index
    %c0_30 = arith.constant 0 : index
    %42 = vector.load %arg1[%c5, %c0_29, %c0_30] : memref<8x256x256xbf16, #tpu.memory_space<vmem>>, vector<1x256x256xbf16>
    %43 = vector.shape_cast %42 : vector<1x256x256xbf16> to vector<256x256xbf16>
    %cst_31 = arith.constant dense<0.000000e+00> : vector<256x32xf32>
    %44 = tpu.matmul %43, %0, %cst_31 {dimension_numbers = #tpu.dot_dimension_numbers<[1], [0], [0], [1], [0, 0, 1, 1], [], []>} : vector<256x256xbf16>, vector<256x32xbf16>, vector<256x32xf32> -> vector<256x32xf32>
    %45 = vector.broadcast %1 : vector<1x32xf32> to vector<256x32xf32>
    %46 = arith.addf %44, %45 : vector<256x32xf32>
    %cst_32 = arith.constant 0.000000e+00 : f32
    %47 = vector.broadcast %cst_32 : f32 to vector<256x32xf32>
    %48 = arith.maximumf %46, %47 : vector<256x32xf32>
    %c0_33 = arith.constant 0 : index
    %c160 = arith.constant 160 : index
    %49 = vector.load %arg14[%c0_33, %c160] : memref<264x256xf32, #tpu.memory_space<vmem>>, vector<256x32xf32>
    tpu.vector_store %arg14[%c0_33, %c160], %48 {strides = array<i32>} : memref<264x256xf32, #tpu.memory_space<vmem>>, vector<256x32xf32>,
    %c6 = arith.constant 6 : index
    %c0_34 = arith.constant 0 : index
    %c0_35 = arith.constant 0 : index
    %50 = vector.load %arg1[%c6, %c0_34, %c0_35] : memref<8x256x256xbf16, #tpu.memory_space<vmem>>, vector<1x256x256xbf16>
    %51 = vector.shape_cast %50 : vector<1x256x256xbf16> to vector<256x256xbf16>
    %cst_36 = arith.constant dense<0.000000e+00> : vector<256x32xf32>
    %52 = tpu.matmul %51, %0, %cst_36 {dimension_numbers = #tpu.dot_dimension_numbers<[1], [0], [0], [1], [0, 0, 1, 1], [], []>} : vector<256x256xbf16>, vector<256x32xbf16>, vector<256x32xf32> -> vector<256x32xf32>
    %53 = vector.broadcast %1 : vector<1x32xf32> to vector<256x32xf32>
    %54 = arith.addf %52, %53 : vector<256x32xf32>
    %cst_37 = arith.constant 0.000000e+00 : f32
    %55 = vector.broadcast %cst_37 : f32 to vector<256x32xf32>
    %56 = arith.maximumf %54, %55 : vector<256x32xf32>
    %c0_38 = arith.constant 0 : index
    %c192 = arith.constant 192 : index
    %57 = vector.load %arg14[%c0_38, %c192] : memref<264x256xf32, #tpu.memory_space<vmem>>, vector<256x32xf32>
    tpu.vector_store %arg14[%c0_38, %c192], %56 {strides = array<i32>} : memref<264x256xf32, #tpu.memory_space<vmem>>, vector<256x32xf32>,
    %c7 = arith.constant 7 : index
    %c0_39 = arith.constant 0 : index
    %c0_40 = arith.constant 0 : index
    %58 = vector.load %arg1[%c7, %c0_39, %c0_40] : memref<8x256x256xbf16, #tpu.memory_space<vmem>>, vector<1x256x256xbf16>
    %59 = vector.shape_cast %58 : vector<1x256x256xbf16> to vector<256x256xbf16>
    %cst_41 = arith.constant dense<0.000000e+00> : vector<256x32xf32>
    %60 = tpu.matmul %59, %0, %cst_41 {dimension_numbers = #tpu.dot_dimension_numbers<[1], [0], [0], [1], [0, 0, 1, 1], [], []>} : vector<256x256xbf16>, vector<256x32xbf16>, vector<256x32xf32> -> vector<256x32xf32>
    %61 = vector.broadcast %1 : vector<1x32xf32> to vector<256x32xf32>
    %62 = arith.addf %60, %61 : vector<256x32xf32>
    %cst_42 = arith.constant 0.000000e+00 : f32
    %63 = vector.broadcast %cst_42 : f32 to vector<256x32xf32>
    %64 = arith.maximumf %62, %63 : vector<256x32xf32>
    %c0_43 = arith.constant 0 : index
    %c224 = arith.constant 224 : index
    %65 = vector.load %arg14[%c0_43, %c224] : memref<264x256xf32, #tpu.memory_space<vmem>>, vector<256x32xf32>
    tpu.vector_store %arg14[%c0_43, %c224], %64 {strides = array<i32>} : memref<264x256xf32, #tpu.memory_space<vmem>>, vector<256x32xf32>,
    %cst_44 = arith.constant 0.000000e+00 : f32
    %66 = vector.broadcast %cst_44 : f32 to vector<8x256xf32>
    %c256 = arith.constant 256 : index
    %c0_45 = arith.constant 0 : index
    %67 = vector.load %arg14[%c256, %c0_45] : memref<264x256xf32, #tpu.memory_space<vmem>>, vector<8x256xf32>
    tpu.vector_store %arg14[%c256, %c0_45], %66 {strides = array<i32>} : memref<264x256xf32, #tpu.memory_space<vmem>>, vector<8x256xf32>,
    %c0_46 = arith.constant 0 : index
    %c0_47 = arith.constant 0 : index
    %68 = vector.load %arg5[%c0_46, %c0_47] : memref<1x256xf32, #tpu.memory_space<vmem>>, vector<1x256xf32>
    %c0_48 = arith.constant 0 : index
    %c0_49 = arith.constant 0 : index
    %69 = vector.load %arg14[%c0_48, %c0_49] : memref<264x256xf32, #tpu.memory_space<vmem>>, vector<256x256xf32>
    %70 = arith.truncf %69 : vector<256x256xf32> to vector<256x256xbf16>
    %c0_50 = arith.constant 0 : index
    %c0_51 = arith.constant 0 : index
    %c0_52 = arith.constant 0 : index
    %71 = vector.load %arg4[%c0_50, %c0_51, %c0_52] : memref<4x256x256xbf16, #tpu.memory_space<vmem>>, vector<1x256x256xbf16>
    %72 = vector.shape_cast %71 : vector<1x256x256xbf16> to vector<256x256xbf16>
    %cst_53 = arith.constant dense<0.000000e+00> : vector<256x256xf32>
    %73 = tpu.matmul %70, %72, %cst_53 {dimension_numbers = #tpu.dot_dimension_numbers<[1], [0], [0], [1], [0, 0, 1, 1], [], []>} : vector<256x256xbf16>, vector<256x256xbf16>, vector<256x256xf32> -> vector<256x256xf32>
    %74 = vector.broadcast %68 : vector<1x256xf32> to vector<256x256xf32>
    %75 = arith.addf %74, %73 : vector<256x256xf32>
    %c1_54 = arith.constant 1 : index
    %c0_55 = arith.constant 0 : index
    %76 = vector.load %arg14[%c1_54, %c0_55] : memref<264x256xf32, #tpu.memory_space<vmem>>, vector<256x256xf32>
    %77 = arith.truncf %76 : vector<256x256xf32> to vector<256x256xbf16>
    %c1_56 = arith.constant 1 : index
    %c0_57 = arith.constant 0 : index
    %c0_58 = arith.constant 0 : index
    %78 = vector.load %arg4[%c1_56, %c0_57, %c0_58] : memref<4x256x256xbf16, #tpu.memory_space<vmem>>, vector<1x256x256xbf16>
    %79 = vector.shape_cast %78 : vector<1x256x256xbf16> to vector<256x256xbf16>
    %cst_59 = arith.constant dense<0.000000e+00> : vector<256x256xf32>
    %80 = tpu.matmul %77, %79, %cst_59 {dimension_numbers = #tpu.dot_dimension_numbers<[1], [0], [0], [1], [0, 0, 1, 1], [], []>} : vector<256x256xbf16>, vector<256x256xbf16>, vector<256x256xf32> -> vector<256x256xf32>
    %81 = arith.addf %75, %80 : vector<256x256xf32>
    %c2_60 = arith.constant 2 : index
    %c0_61 = arith.constant 0 : index
    %82 = vector.load %arg14[%c2_60, %c0_61] : memref<264x256xf32, #tpu.memory_space<vmem>>, vector<256x256xf32>
    %83 = arith.truncf %82 : vector<256x256xf32> to vector<256x256xbf16>
    %c2_62 = arith.constant 2 : index
    %c0_63 = arith.constant 0 : index
    %c0_64 = arith.constant 0 : index
    %84 = vector.load %arg4[%c2_62, %c0_63, %c0_64] : memref<4x256x256xbf16, #tpu.memory_space<vmem>>, vector<1x256x256xbf16>
    %85 = vector.shape_cast %84 : vector<1x256x256xbf16> to vector<256x256xbf16>
    %cst_65 = arith.constant dense<0.000000e+00> : vector<256x256xf32>
    %86 = tpu.matmul %83, %85, %cst_65 {dimension_numbers = #tpu.dot_dimension_numbers<[1], [0], [0], [1], [0, 0, 1, 1], [], []>} : vector<256x256xbf16>, vector<256x256xbf16>, vector<256x256xf32> -> vector<256x256xf32>
    %87 = arith.addf %81, %86 : vector<256x256xf32>
    %c3_66 = arith.constant 3 : index
    %c0_67 = arith.constant 0 : index
    %88 = vector.load %arg14[%c3_66, %c0_67] : memref<264x256xf32, #tpu.memory_space<vmem>>, vector<256x256xf32>
    %89 = arith.truncf %88 : vector<256x256xf32> to vector<256x256xbf16>
    %c3_68 = arith.constant 3 : index
    %c0_69 = arith.constant 0 : index
    %c0_70 = arith.constant 0 : index
    %90 = vector.load %arg4[%c3_68, %c0_69, %c0_70] : memref<4x256x256xbf16, #tpu.memory_space<vmem>>, vector<1x256x256xbf16>
    %91 = vector.shape_cast %90 : vector<1x256x256xbf16> to vector<256x256xbf16>
    %cst_71 = arith.constant dense<0.000000e+00> : vector<256x256xf32>
    %92 = tpu.matmul %89, %91, %cst_71 {dimension_numbers = #tpu.dot_dimension_numbers<[1], [0], [0], [1], [0, 0, 1, 1], [], []>} : vector<256x256xbf16>, vector<256x256xbf16>, vector<256x256xf32> -> vector<256x256xf32>
    %93 = arith.addf %87, %92 : vector<256x256xf32>
    %cst_72 = arith.constant 0.000000e+00 : f32
    %94 = vector.broadcast %cst_72 : f32 to vector<256x256xf32>
    %95 = arith.maximumf %93, %94 : vector<256x256xf32>
    %96 = arith.truncf %95 : vector<256x256xf32> to vector<256x256xbf16>
    %c0_73 = arith.constant 0 : index
    %c0_74 = arith.constant 0 : index
    %97 = vector.load %arg8[%c0_73, %c0_74] : memref<96x256xbf16, #tpu.memory_space<vmem>>, vector<96x256xbf16>
    %cst_75 = arith.constant dense<0.000000e+00> : vector<96x256xf32>
    %98 = tpu.matmul %97, %96, %cst_75 {dimension_numbers = #tpu.dot_dimension_numbers<[1], [0], [0], [1], [0, 0, 1, 1], [], []>} : vector<96x256xbf16>, vector<256x256xbf16>, vector<96x256xf32> -> vector<96x256xf32>
    %99 = arith.truncf %98 : vector<96x256xf32> to vector<96x256xbf16>
    %c0_76 = arith.constant 0 : index
    %c0_77 = arith.constant 0 : index
    %100 = vector.load %arg7[%c0_76, %c0_77] : memref<1x64xf32, #tpu.memory_space<vmem>>, vector<1x64xf32>
    %101 = vector.extract_strided_slice %99 {offsets = [0, 0], sizes = [32, 256], strides = [1, 1]} : vector<96x256xbf16> to vector<32x256xbf16>
    %c0_78 = arith.constant 0 : index
    %c0_79 = arith.constant 0 : index
    %c0_80 = arith.constant 0 : index
    %102 = vector.load %arg6[%c0_78, %c0_79, %c0_80] : memref<3x256x64xbf16, #tpu.memory_space<vmem>>, vector<1x256x64xbf16>
    %103 = vector.shape_cast %102 : vector<1x256x64xbf16> to vector<256x64xbf16>
    %cst_81 = arith.constant dense<0.000000e+00> : vector<32x64xf32>
    %104 = tpu.matmul %101, %103, %cst_81 {dimension_numbers = #tpu.dot_dimension_numbers<[1], [0], [0], [1], [0, 0, 1, 1], [], []>} : vector<32x256xbf16>, vector<256x64xbf16>, vector<32x64xf32> -> vector<32x64xf32>
    %105 = vector.broadcast %100 : vector<1x64xf32> to vector<32x64xf32>
    %106 = arith.addf %105, %104 : vector<32x64xf32>
    %107 = vector.extract_strided_slice %99 {offsets = [32, 0], sizes = [32, 256], strides = [1, 1]} : vector<96x256xbf16> to vector<32x256xbf16>
    %c1_82 = arith.constant 1 : index
    %c0_83 = arith.constant 0 : index
    %c0_84 = arith.constant 0 : index
    %108 = vector.load %arg6[%c1_82, %c0_83, %c0_84] : memref<3x256x64xbf16, #tpu.memory_space<vmem>>, vector<1x256x64xbf16>
    %109 = vector.shape_cast %108 : vector<1x256x64xbf16> to vector<256x64xbf16>
    %cst_85 = arith.constant dense<0.000000e+00> : vector<32x64xf32>
    %110 = tpu.matmul %107, %109, %cst_85 {dimension_numbers = #tpu.dot_dimension_numbers<[1], [0], [0], [1], [0, 0, 1, 1], [], []>} : vector<32x256xbf16>, vector<256x64xbf16>, vector<32x64xf32> -> vector<32x64xf32>
    %111 = arith.addf %106, %110 : vector<32x64xf32>
    %112 = vector.extract_strided_slice %99 {offsets = [64, 0], sizes = [32, 256], strides = [1, 1]} : vector<96x256xbf16> to vector<32x256xbf16>
    %c2_86 = arith.constant 2 : index
    %c0_87 = arith.constant 0 : index
    %c0_88 = arith.constant 0 : index
    %113 = vector.load %arg6[%c2_86, %c0_87, %c0_88] : memref<3x256x64xbf16, #tpu.memory_space<vmem>>, vector<1x256x64xbf16>
    %114 = vector.shape_cast %113 : vector<1x256x64xbf16> to vector<256x64xbf16>
    %cst_89 = arith.constant dense<0.000000e+00> : vector<32x64xf32>
    %115 = tpu.matmul %112, %114, %cst_89 {dimension_numbers = #tpu.dot_dimension_numbers<[1], [0], [0], [1], [0, 0, 1, 1], [], []>} : vector<32x256xbf16>, vector<256x64xbf16>, vector<32x64xf32> -> vector<32x64xf32>
    %116 = arith.addf %111, %115 : vector<32x64xf32>
    %cst_90 = arith.constant 0.000000e+00 : f32
    %117 = vector.broadcast %cst_90 : f32 to vector<32x64xf32>
    %118 = arith.maximumf %116, %117 : vector<32x64xf32>
    %119 = arith.truncf %118 : vector<32x64xf32> to vector<32x64xbf16>
    %c0_91 = arith.constant 0 : index
    %c0_92 = arith.constant 0 : index
    %120 = vector.load %arg9[%c0_91, %c0_92] : memref<64x1536xbf16, #tpu.memory_space<vmem>>, vector<64x1536xbf16>
    %cst_93 = arith.constant dense<0.000000e+00> : vector<32x1536xf32>
    %121 = tpu.matmul %119, %120, %cst_93 {dimension_numbers = #tpu.dot_dimension_numbers<[1], [0], [0], [1], [0, 0, 1, 1], [], []>} : vector<32x64xbf16>, vector<64x1536xbf16>, vector<32x1536xf32> -> vector<32x1536xf32>
    %c0_94 = arith.constant 0 : index
    %c0_95 = arith.constant 0 : index
    %122 = vector.load %arg10[%c0_94, %c0_95] : memref<1x1536xf32, #tpu.memory_space<vmem>>, vector<1x1536xf32>
    %123 = vector.broadcast %122 : vector<1x1536xf32> to vector<32x1536xf32>
    %124 = arith.addf %121, %123 : vector<32x1536xf32>
    %cst_96 = arith.constant 0.000000e+00 : f32
    %125 = vector.broadcast %cst_96 : f32 to vector<32x1536xf32>
    %126 = arith.maximumf %124, %125 : vector<32x1536xf32>
    %127 = arith.truncf %126 : vector<32x1536xf32> to vector<32x1536xbf16>
    %128 = vector.extract_strided_slice %127 {offsets = [0, 0], sizes = [32, 512], strides = [1, 1]} : vector<32x1536xbf16> to vector<32x512xbf16>
    %c0_97 = arith.constant 0 : index
    %c0_98 = arith.constant 0 : index
    %c0_99 = arith.constant 0 : index
    %129 = vector.load %arg11[%c0_97, %c0_98, %c0_99] : memref<3x512x128xbf16, #tpu.memory_space<vmem>>, vector<1x512x128xbf16>
    %130 = vector.shape_cast %129 : vector<1x512x128xbf16> to vector<512x128xbf16>
    %cst_100 = arith.constant dense<0.000000e+00> : vector<32x128xf32>
    %131 = tpu.matmul %128, %130, %cst_100 {dimension_numbers = #tpu.dot_dimension_numbers<[1], [0], [0], [1], [0, 0, 1, 1], [], []>} : vector<32x512xbf16>, vector<512x128xbf16>, vector<32x128xf32> -> vector<32x128xf32>
    %c0_101 = arith.constant 0 : index
    %c0_102 = arith.constant 0 : index
    %c0_103 = arith.constant 0 : index
    %132 = vector.load %arg12[%c0_101, %c0_102, %c0_103] : memref<3x1x128xf32, #tpu.memory_space<vmem>>, vector<1x1x128xf32>
    %133 = vector.shape_cast %132 : vector<1x1x128xf32> to vector<1x128xf32>
    %134 = vector.broadcast %133 : vector<1x128xf32> to vector<32x128xf32>
    %135 = arith.addf %131, %134 : vector<32x128xf32>
    %136 = vector.extract_strided_slice %127 {offsets = [0, 512], sizes = [32, 512], strides = [1, 1]} : vector<32x1536xbf16> to vector<32x512xbf16>
    %c1_104 = arith.constant 1 : index
    %c0_105 = arith.constant 0 : index
    %c0_106 = arith.constant 0 : index
    %137 = vector.load %arg11[%c1_104, %c0_105, %c0_106] : memref<3x512x128xbf16, #tpu.memory_space<vmem>>, vector<1x512x128xbf16>
    %138 = vector.shape_cast %137 : vector<1x512x128xbf16> to vector<512x128xbf16>
    %cst_107 = arith.constant dense<0.000000e+00> : vector<32x128xf32>
    %139 = tpu.matmul %136, %138, %cst_107 {dimension_numbers = #tpu.dot_dimension_numbers<[1], [0], [0], [1], [0, 0, 1, 1], [], []>} : vector<32x512xbf16>, vector<512x128xbf16>, vector<32x128xf32> -> vector<32x128xf32>
    %c1_108 = arith.constant 1 : index
    %c0_109 = arith.constant 0 : index
    %c0_110 = arith.constant 0 : index
    %140 = vector.load %arg12[%c1_108, %c0_109, %c0_110] : memref<3x1x128xf32, #tpu.memory_space<vmem>>, vector<1x1x128xf32>
    %141 = vector.shape_cast %140 : vector<1x1x128xf32> to vector<1x128xf32>
    %142 = vector.broadcast %141 : vector<1x128xf32> to vector<32x128xf32>
    %143 = arith.addf %139, %142 : vector<32x128xf32>
    %144 = vector.extract_strided_slice %127 {offsets = [0, 1024], sizes = [32, 512], strides = [1, 1]} : vector<32x1536xbf16> to vector<32x512xbf16>
    %c2_111 = arith.constant 2 : index
    %c0_112 = arith.constant 0 : index
    %c0_113 = arith.constant 0 : index
    %145 = vector.load %arg11[%c2_111, %c0_112, %c0_113] : memref<3x512x128xbf16, #tpu.memory_space<vmem>>, vector<1x512x128xbf16>
    %146 = vector.shape_cast %145 : vector<1x512x128xbf16> to vector<512x128xbf16>
    %cst_114 = arith.constant dense<0.000000e+00> : vector<32x128xf32>
    %147 = tpu.matmul %144, %146, %cst_114 {dimension_numbers = #tpu.dot_dimension_numbers<[1], [0], [0], [1], [0, 0, 1, 1], [], []>} : vector<32x512xbf16>, vector<512x128xbf16>, vector<32x128xf32> -> vector<32x128xf32>
    %c2_115 = arith.constant 2 : index
    %c0_116 = arith.constant 0 : index
    %c0_117 = arith.constant 0 : index
    %148 = vector.load %arg12[%c2_115, %c0_116, %c0_117] : memref<3x1x128xf32, #tpu.memory_space<vmem>>, vector<1x1x128xf32>
    %149 = vector.shape_cast %148 : vector<1x1x128xf32> to vector<1x128xf32>
    %150 = vector.broadcast %149 : vector<1x128xf32> to vector<32x128xf32>
    %151 = arith.addf %147, %150 : vector<32x128xf32>
    %152 = math.tanh %135 : vector<32x128xf32>
    %c0_118 = arith.constant 0 : index
    %c0_119 = arith.constant 0 : index
    %153 = vector.load %arg13[%c0_118, %c0_119] : memref<32x384xf32, #tpu.memory_space<vmem>>, vector<32x128xf32>
    tpu.vector_store %arg13[%c0_118, %c0_119], %152 {strides = array<i32>} : memref<32x384xf32, #tpu.memory_space<vmem>>, vector<32x128xf32>,
    %154 = math.absf %143 : vector<32x128xf32>
    %cst_120 = arith.constant 0.000000e+00 : f32
    %155 = vector.broadcast %cst_120 : f32 to vector<32x128xf32>
    %156 = arith.subf %155, %154 : vector<32x128xf32>
    %157 = math.exp %156 : vector<32x128xf32>
    %cst_121 = arith.constant 9.99999974E-5 : f32
    %158 = vector.broadcast %cst_121 : f32 to vector<32x128xf32>
    %159 = arith.cmpf olt, %157, %158 : vector<32x128xf32>
    %cst_122 = arith.constant 1.000000e+00 : f32
    %160 = vector.broadcast %cst_122 : f32 to vector<32x128xf32>
    %161 = arith.addf %160, %157 : vector<32x128xf32>
    %162 = math.log %161 : vector<32x128xf32>
    %163 = arith.select %159, %157, %162 : vector<32x128xi1>, vector<32x128xf32>
    %cst_123 = arith.constant 0.000000e+00 : f32
    %164 = vector.broadcast %cst_123 : f32 to vector<32x128xf32>
    %165 = arith.maximumf %143, %164 : vector<32x128xf32>
    %166 = arith.addf %165, %163 : vector<32x128xf32>
    %c0_124 = arith.constant 0 : index
    %c128_125 = arith.constant 128 : index
    %167 = vector.load %arg13[%c0_124, %c128_125] : memref<32x384xf32, #tpu.memory_space<vmem>>, vector<32x128xf32>
    tpu.vector_store %arg13[%c0_124, %c128_125], %166 {strides = array<i32>} : memref<32x384xf32, #tpu.memory_space<vmem>>, vector<32x128xf32>,
    %c0_126 = arith.constant 0 : index
    %c256_127 = arith.constant 256 : index
    %168 = vector.load %arg13[%c0_126, %c256_127] : memref<32x384xf32, #tpu.memory_space<vmem>>, vector<32x128xf32>
    tpu.vector_store %arg13[%c0_126, %c256_127], %151 {strides = array<i32>} : memref<32x384xf32, #tpu.memory_space<vmem>>, vector<32x128xf32>,
    return
  }
  func.func @transform_0(%arg0: i32) -> (i32, i32, i32) {
    %c0_i32 = arith.constant 0 : i32
    %c0_i32_0 = arith.constant 0 : i32
    %c0_i32_1 = arith.constant 0 : i32
    return %c0_i32, %arg0, %c0_i32_0 : i32, i32, i32
  }
  func.func @transform_1(%arg0: i32) -> (i32, i32) {
    %c0_i32 = arith.constant 0 : i32
    %c0_i32_0 = arith.constant 0 : i32
    %c0_i32_1 = arith.constant 0 : i32
    return %c0_i32, %c0_i32_0 : i32, i32
  }
  func.func @transform_2(%arg0: i32) -> (i32, i32) {
    %c0_i32 = arith.constant 0 : i32
    %c0_i32_0 = arith.constant 0 : i32
    %c0_i32_1 = arith.constant 0 : i32
    return %c0_i32, %c0_i32_0 : i32, i32
  }
  func.func @transform_3(%arg0: i32) -> (i32, i32, i32) {
    %c0_i32 = arith.constant 0 : i32
    %c0_i32_0 = arith.constant 0 : i32
    %c0_i32_1 = arith.constant 0 : i32
    %c0_i32_2 = arith.constant 0 : i32
    return %c0_i32, %c0_i32_0, %c0_i32_1 : i32, i32, i32
  }
  func.func @transform_4(%arg0: i32) -> (i32, i32) {
    %c0_i32 = arith.constant 0 : i32
    %c0_i32_0 = arith.constant 0 : i32
    %c0_i32_1 = arith.constant 0 : i32
    return %c0_i32, %c0_i32_0 : i32, i32
  }
  func.func @transform_5(%arg0: i32) -> (i32, i32, i32) {
    %c0_i32 = arith.constant 0 : i32
    %c0_i32_0 = arith.constant 0 : i32
    %c0_i32_1 = arith.constant 0 : i32
    %c0_i32_2 = arith.constant 0 : i32
    return %c0_i32, %c0_i32_0, %c0_i32_1 : i32, i32, i32
  }
  func.func @transform_6(%arg0: i32) -> (i32, i32) {
    %c0_i32 = arith.constant 0 : i32
    %c0_i32_0 = arith.constant 0 : i32
    %c0_i32_1 = arith.constant 0 : i32
    return %c0_i32, %c0_i32_0 : i32, i32
  }
  func.func @transform_7(%arg0: i32) -> (i32, i32) {
    %c0_i32 = arith.constant 0 : i32
    %c0_i32_0 = arith.constant 0 : i32
    %c0_i32_1 = arith.constant 0 : i32
    return %c0_i32, %c0_i32_0 : i32, i32
  }
  func.func @transform_8(%arg0: i32) -> (i32, i32) {
    %c0_i32 = arith.constant 0 : i32
    %c0_i32_0 = arith.constant 0 : i32
    %c0_i32_1 = arith.constant 0 : i32
    return %c0_i32, %c0_i32_0 : i32, i32
  }
  func.func @transform_9(%arg0: i32) -> (i32, i32) {
    %c0_i32 = arith.constant 0 : i32
    %c0_i32_0 = arith.constant 0 : i32
    %c0_i32_1 = arith.constant 0 : i32
    return %c0_i32, %c0_i32_0 : i32, i32
  }
  func.func @transform_10(%arg0: i32) -> (i32, i32, i32) {
    %c0_i32 = arith.constant 0 : i32
    %c0_i32_0 = arith.constant 0 : i32
    %c0_i32_1 = arith.constant 0 : i32
    %c0_i32_2 = arith.constant 0 : i32
    return %c0_i32, %c0_i32_0, %c0_i32_1 : i32, i32, i32
  }
  func.func @transform_11(%arg0: i32) -> (i32, i32, i32) {
    %c0_i32 = arith.constant 0 : i32
    %c0_i32_0 = arith.constant 0 : i32
    %c0_i32_1 = arith.constant 0 : i32
    %c0_i32_2 = arith.constant 0 : i32
    return %c0_i32, %c0_i32_0, %c0_i32_1 : i32, i32, i32
  }
  func.func @transform_12(%arg0: i32) -> (i32, i32) {
    %c0_i32 = arith.constant 0 : i32
    %c0_i32_0 = arith.constant 0 : i32
    return %arg0, %c0_i32 : i32, i32
  }
}

</mosaic_0001>

<bundles_post_ra>
// kernel: actor_critic_forward.1
= control target key start
LH: loop header
LB: loop body
LE: loop exit
PB: predicated region body
PF: predicated region fallthrough
CT: control target
= control target key end

     0   :  { %s14728_s21 = smov 0   ;;  %s14730_s22 = smov 0   ;;  %s18506_s0 = inlined_call_operand.vmem [shape: bf16[8,512,256], index: 0, kind: input, shape index: {}]   ;;  %s18507_s1 = inlined_call_operand.vmem [shape: bf16[256,32], index: 1, kind: input, shape index: {}]   ;;  %s18508_s2 = inlined_call_operand.vmem [shape: f32[1,32], index: 2, kind: input, shape index: {}]   ;;  %s18509_s3 = inlined_call_operand.vmem [shape: bf16[4,256,256], index: 3, kind: input, shape index: {}]   ;;  %s18510_s4 = inlined_call_operand.vmem [shape: f32[1,256], index: 4, kind: input, shape index: {}]   ;;  %s18511_s5 = inlined_call_operand.vmem [shape: bf16[3,256,64], index: 5, kind: input, shape index: {}]   ;;  %s18512_s6 = inlined_call_operand.vmem [shape: f32[1,64], index: 6, kind: input, shape index: {}]   ;;  %s18513_s7 = inlined_call_operand.vmem [shape: bf16[96,256], index: 7, kind: input, shape index: {}]   ;;  %s18514_s8 = inlined_call_operand.vmem [shape: bf16[64,1536], index: 8, kind: input, shape index: {}]   ;;  %s18515_s9 = inlined_call_operand.vmem [shape: f32[1,1536], index: 9, kind: input, shape index: {}]   ;;  %s18516_s10 = inlined_call_operand.vmem [shape: bf16[3,512,128], index: 10, kind: input, shape index: {}]   ;;  %s18517_s11 = inlined_call_operand.vmem [shape: f32[3,1,128], index: 11, kind: input, shape index: {}]   ;;  %s18518_s12 = inlined_call_operand.vmem [shape: f32[64,384], index: 12, kind: output, shape index: {}]  }
   0x1   :  { %s14732_s23 = smov 0  }
   0x2 LB: > { %s11158_s24 = sadd.s32 4294967295, %s14656_s23   ;;  %s14745_s25 = sadd.s32 1, %s14656_s23   ;;  %s14656_s23 = sphi %s14732_s23, %s18652_s23   ;;  %s14652_s22 = sphi %s14730_s22, %s18651_s22   ;;  %s14648_s21 = sphi %s14728_s21, %s18650_s21  }
   0x3   : > { %s26_s26 = ssub.s32 %s14656_s23, %s14745_s25  ;;  %s29_s27 = sadd.s32 1, %s14652_s22 }
   0x4   : > { %p27_p0 = scmp.eq.s32.totalorder %s26_s26, 0  ;;  %p36_p1 = scmp.ne.s32.totalorder %s14652_s22, %s14648_s21 }
   0x5   : > { %p37_p2 = scmp.eq.s32.totalorder %s14656_s23, 0  ;;  %p11161_p4 = scmp.ge.s32.totalorder %s14656_s23, 2 }
   0x6   : > { %s14754_s28 = scalar_select %p27_p0, %s14652_s22, %s29_s27  }
   0x7   : > { %p38_p3 = por %p37_p2, %p36_p1  ;;  %352 = sbr.rel (%p11161_p4) target bundleno = 146 (0x92), region = 60 }
   0xe   : > { %355 = sbr.rel (!%p38_p3) target bundleno = 146 (0x92), region = 64  ;;  %s357_s29 = sand.u32 (%p38_p3), 1, %s14652_s22  }
   0xf   : > { %s12308_s30 = sshll.u32 (%p38_p3), %s14656_s23, 8  ;;  %s11162_s13 = sshll.u32 (%p38_p3), %s357_s29, 11 }
  0x10   : > { %s14762_s16 = scalar_lea.vmem (%p38_p3), %s18506_s0, %s12308_s30  ;;  %s14767_s17 = scalar_lea.vmem (%p38_p3), [#allocation3], %s11162_s13 }
  0x11   : > { %v901_v0 = vld [vmem:[%s14762_s16] sm:$0xff] (%p38_p3)  ;;  %v903_v1 = vld [vmem:[%s14762_s16 + $0x8] sm:$0xff] (%p38_p3)  ;;  %v905_v2 = vld [vmem:[%s14762_s16 + $0x10] sm:$0xff] (%p38_p3) }
  0x12   : > { %902 = vst [vmem:[%s14767_s17] sm:$0xff] (%p38_p3), %v901_v0  ;;  %904 = vst [vmem:[%s14767_s17 + $0x8] sm:$0xff] (%p38_p3), %v903_v1  ;;  %v907_v3 = vld [vmem:[%s14762_s16 + $0x18] sm:$0xff] (%p38_p3)  ;;  %v909_v4 = vld [vmem:[%s14762_s16 + $0x20] sm:$0xff] (%p38_p3) }
  0x13   : > { %906 = vst [vmem:[%s14767_s17 + $0x10] sm:$0xff] (%p38_p3), %v905_v2  ;;  %v911_v5 = vld [vmem:[%s14762_s16 + $0x28] sm:$0xff] (%p38_p3)  ;;  %908 = vst [vmem:[%s14767_s17 + $0x18] sm:$0xff] (%p38_p3), %v907_v3  ;;  %v913_v6 = vld [vmem:[%s14762_s16 + $0x30] sm:$0xff] (%p38_p3) }
  0x14   : > { %910 = vst [vmem:[%s14767_s17 + $0x20] sm:$0xff] (%p38_p3), %v909_v4  ;;  %912 = vst [vmem:[%s14767_s17 + $0x28] sm:$0xff] (%p38_p3), %v911_v5  ;;  %v915_v7 = vld [vmem:[%s14762_s16 + $0x38] sm:$0xff] (%p38_p3)  ;;  %v917_v8 = vld [vmem:[%s14762_s16 + $0x40] sm:$0xff] (%p38_p3) }
  0x15   : > { %914 = vst [vmem:[%s14767_s17 + $0x30] sm:$0xff] %v913_v6  ;;  %916 = vst [vmem:[%s14767_s17 + $0x38] sm:$0xff] %v915_v7  ;;  %v919_v9 = vld [vmem:[%s14762_s16 + $0x48] sm:$0xff]  ;;  %v921_v10 = vld [vmem:[%s14762_s16 + $0x50] sm:$0xff] }
  0x16   : > { %918 = vst [vmem:[%s14767_s17 + $0x40] sm:$0xff] %v917_v8  ;;  %v923_v11 = vld [vmem:[%s14762_s16 + $0x58] sm:$0xff]  ;;  %920 = vst [vmem:[%s14767_s17 + $0x48] sm:$0xff] %v919_v9  ;;  %v925_v12 = vld [vmem:[%s14762_s16 + $0x60] sm:$0xff] }
  0x17   : > { %922 = vst [vmem:[%s14767_s17 + $0x50] sm:$0xff] %v921_v10  ;;  %924 = vst [vmem:[%s14767_s17 + $0x58] sm:$0xff] %v923_v11  ;;  %v927_v13 = vld [vmem:[%s14762_s16 + $0x68] sm:$0xff]  ;;  %v929_v14 = vld [vmem:[%s14762_s16 + $0x70] sm:$0xff] }
  0x18   : > { %926 = vst [vmem:[%s14767_s17 + $0x60] sm:$0xff] %v925_v12  ;;  %928 = vst [vmem:[%s14767_s17 + $0x68] sm:$0xff] %v927_v13  ;;  %v931_v15 = vld [vmem:[%s14762_s16 + $0x78] sm:$0xff]  ;;  %v933_v16 = vld [vmem:[%s14762_s16 + $0x80] sm:$0xff] }
  0x19   : > { %930 = vst [vmem:[%s14767_s17 + $0x70] sm:$0xff] %v929_v14  ;;  %v935_v17 = vld [vmem:[%s14762_s16 + $0x88] sm:$0xff]  ;;  %932 = vst [vmem:[%s14767_s17 + $0x78] sm:$0xff] %v931_v15  ;;  %v937_v18 = vld [vmem:[%s14762_s16 + $0x90] sm:$0xff] }
  0x1a   : > { %934 = vst [vmem:[%s14767_s17 + $0x80] sm:$0xff] %v933_v16  ;;  %936 = vst [vmem:[%s14767_s17 + $0x88] sm:$0xff] %v935_v17  ;;  %v939_v19 = vld [vmem:[%s14762_s16 + $0x98] sm:$0xff]  ;;  %v941_v20 = vld [vmem:[%s14762_s16 + $0xa0] sm:$0xff] }
  0x1b   : > { %938 = vst [vmem:[%s14767_s17 + $0x90] sm:$0xff] %v937_v18  ;;  %940 = vst [vmem:[%s14767_s17 + $0x98] sm:$0xff] %v939_v19  ;;  %v943_v21 = vld [vmem:[%s14762_s16 + $0xa8] sm:$0xff]  ;;  %v945_v22 = vld [vmem:[%s14762_s16 + $0xb0] sm:$0xff] }
  0x1c   : > { %942 = vst [vmem:[%s14767_s17 + $0xa0] sm:$0xff] %v941_v20  ;;  %v947_v23 = vld [vmem:[%s14762_s16 + $0xb8] sm:$0xff]  ;;  %944 = vst [vmem:[%s14767_s17 + $0xa8] sm:$0xff] %v943_v21  ;;  %v949_v24 = vld [vmem:[%s14762_s16 + $0xc0] sm:$0xff] }
  0x1d   : > { %946 = vst [vmem:[%s14767_s17 + $0xb0] sm:$0xff] %v945_v22  ;;  %948 = vst [vmem:[%s14767_s17 + $0xb8] sm:$0xff] %v947_v23  ;;  %v951_v25 = vld [vmem:[%s14762_s16 + $0xc8] sm:$0xff]  ;;  %v953_v26 = vld [vmem:[%s14762_s16 + $0xd0] sm:$0xff] }
  0x1e   : > { %950 = vst [vmem:[%s14767_s17 + $0xc0] sm:$0xff] %v949_v24  ;;  %952 = vst [vmem:[%s14767_s17 + $0xc8] sm:$0xff] %v951_v25  ;;  %v955_v27 = vld [vmem:[%s14762_s16 + $0xd8] sm:$0xff]  ;;  %v957_v28 = vld [vmem:[%s14762_s16 + $0xe0] sm:$0xff] }
  0x1f   : > { %954 = vst [vmem:[%s14767_s17 + $0xd0] sm:$0xff] %v953_v26  ;;  %v959_v29 = vld [vmem:[%s14762_s16 + $0xe8] sm:$0xff]  ;;  %956 = vst [vmem:[%s14767_s17 + $0xd8] sm:$0xff] %v955_v27  ;;  %v961_v30 = vld [vmem:[%s14762_s16 + $0xf0] sm:$0xff] }
  0x20   : > { %958 = vst [vmem:[%s14767_s17 + $0xe0] sm:$0xff] %v957_v28  ;;  %960 = vst [vmem:[%s14767_s17 + $0xe8] sm:$0xff] %v959_v29  ;;  %v963_v31 = vld [vmem:[%s14762_s16 + $0xf8] sm:$0xff]  ;;  %v965_v32 = vld [vmem:[%s14762_s16 + $0x200] sm:$0xff] }
  0x21   : > { %962 = vst [vmem:[%s14767_s17 + $0xf0] sm:$0xff] %v961_v30  ;;  %964 = vst [vmem:[%s14767_s17 + $0xf8] sm:$0xff] %v963_v31  ;;  %v967_v33 = vld [vmem:[%s14762_s16 + $0x208] sm:$0xff]  ;;  %v969_v34 = vld [vmem:[%s14762_s16 + $0x210] sm:$0xff] }
  0x22   : > { %966 = vst [vmem:[%s14767_s17 + $0x100] sm:$0xff] %v965_v32  ;;  %v971_v35 = vld [vmem:[%s14762_s16 + $0x218] sm:$0xff]  ;;  %968 = vst [vmem:[%s14767_s17 + $0x108] sm:$0xff] %v967_v33  ;;  %v973_v36 = vld [vmem:[%s14762_s16 + $0x220] sm:$0xff] }
  0x23   : > { %970 = vst [vmem:[%s14767_s17 + $0x110] sm:$0xff] %v969_v34  ;;  %972 = vst [vmem:[%s14767_s17 + $0x118] sm:$0xff] %v971_v35  ;;  %v975_v37 = vld [vmem:[%s14762_s16 + $0x228] sm:$0xff]  ;;  %v977_v38 = vld [vmem:[%s14762_s16 + $0x230] sm:$0xff] }
  0x24   : > { %974 = vst [vmem:[%s14767_s17 + $0x120] sm:$0xff] %v973_v36  ;;  %976 = vst [vmem:[%s14767_s17 + $0x128] sm:$0xff] %v975_v37  ;;  %v979_v39 = vld [vmem:[%s14762_s16 + $0x238] sm:$0xff]  ;;  %v981_v40 = vld [vmem:[%s14762_s16 + $0x240] sm:$0xff] }
  0x25   : > { %978 = vst [vmem:[%s14767_s17 + $0x130] sm:$0xff] %v977_v38  ;;  %v983_v41 = vld [vmem:[%s14762_s16 + $0x248] sm:$0xff]  ;;  %980 = vst [vmem:[%s14767_s17 + $0x138] sm:$0xff] %v979_v39  ;;  %v985_v42 = vld [vmem:[%s14762_s16 + $0x250] sm:$0xff] }
  0x26   : > { %982 = vst [vmem:[%s14767_s17 + $0x140] sm:$0xff] %v981_v40  ;;  %984 = vst [vmem:[%s14767_s17 + $0x148] sm:$0xff] %v983_v41  ;;  %v987_v43 = vld [vmem:[%s14762_s16 + $0x258] sm:$0xff]  ;;  %v989_v44 = vld [vmem:[%s14762_s16 + $0x260] sm:$0xff] }
  0x27   : > { %986 = vst [vmem:[%s14767_s17 + $0x150] sm:$0xff] %v985_v42  ;;  %988 = vst [vmem:[%s14767_s17 + $0x158] sm:$0xff] %v987_v43  ;;  %v991_v45 = vld [vmem:[%s14762_s16 + $0x268] sm:$0xff]  ;;  %v993_v46 = vld [vmem:[%s14762_s16 + $0x270] sm:$0xff] }
  0x28   : > { %990 = vst [vmem:[%s14767_s17 + $0x160] sm:$0xff] %v989_v44  ;;  %v995_v47 = vld [vmem:[%s14762_s16 + $0x278] sm:$0xff]  ;;  %992 = vst [vmem:[%s14767_s17 + $0x168] sm:$0xff] %v991_v45  ;;  %v997_v48 = vld [vmem:[%s14762_s16 + $0x280] sm:$0xff] }
  0x29   : > { %994 = vst [vmem:[%s14767_s17 + $0x170] sm:$0xff] %v993_v46  ;;  %996 = vst [vmem:[%s14767_s17 + $0x178] sm:$0xff] %v995_v47  ;;  %v999_v49 = vld [vmem:[%s14762_s16 + $0x288] sm:$0xff]  ;;  %v1001_v50 = vld [vmem:[%s14762_s16 + $0x290] sm:$0xff] }
  0x2a   : > { %998 = vst [vmem:[%s14767_s17 + $0x180] sm:$0xff] %v997_v48  ;;  %1000 = vst [vmem:[%s14767_s17 + $0x188] sm:$0xff] %v999_v49  ;;  %v1003_v51 = vld [vmem:[%s14762_s16 + $0x298] sm:$0xff]  ;;  %v1005_v52 = vld [vmem:[%s14762_s16 + $0x2a0] sm:$0xff] }
  0x2b   : > { %1002 = vst [vmem:[%s14767_s17 + $0x190] sm:$0xff] %v1001_v50  ;;  %v1007_v53 = vld [vmem:[%s14762_s16 + $0x2a8] sm:$0xff]  ;;  %1004 = vst [vmem:[%s14767_s17 + $0x198] sm:$0xff] %v1003_v51  ;;  %v1009_v54 = vld [vmem:[%s14762_s16 + $0x2b0] sm:$0xff] }
  0x2c   : > { %1006 = vst [vmem:[%s14767_s17 + $0x1a0] sm:$0xff] %v1005_v52  ;;  %1008 = vst [vmem:[%s14767_s17 + $0x1a8] sm:$0xff] %v1007_v53  ;;  %v1011_v55 = vld [vmem:[%s14762_s16 + $0x2b8] sm:$0xff]  ;;  %v1013_v56 = vld [vmem:[%s14762_s16 + $0x2c0] sm:$0xff] }
  0x2d   : > { %1010 = vst [vmem:[%s14767_s17 + $0x1b0] sm:$0xff] %v1009_v54  ;;  %1012 = vst [vmem:[%s14767_s17 + $0x1b8] sm:$0xff] %v1011_v55  ;;  %v1015_v57 = vld [vmem:[%s14762_s16 + $0x2c8] sm:$0xff]  ;;  %v1017_v58 = vld [vmem:[%s14762_s16 + $0x2d0] sm:$0xff] }
  0x2e   : > { %1014 = vst [vmem:[%s14767_s17 + $0x1c0] sm:$0xff] %v1013_v56  ;;  %v1019_v59 = vld [vmem:[%s14762_s16 + $0x2d8] sm:$0xff]  ;;  %1016 = vst [vmem:[%s14767_s17 + $0x1c8] sm:$0xff] %v1015_v57  ;;  %v1021_v60 = vld [vmem:[%s14762_s16 + $0x2e0] sm:$0xff] }
  0x2f   : > { %1018 = vst [vmem:[%s14767_s17 + $0x1d0] sm:$0xff] %v1017_v58  ;;  %1020 = vst [vmem:[%s14767_s17 + $0x1d8] sm:$0xff] %v1019_v59  ;;  %v1023_v61 = vld [vmem:[%s14762_s16 + $0x2e8] sm:$0xff]  ;;  %v1025_v62 = vld [vmem:[%s14762_s16 + $0x2f0] sm:$0xff] }
  0x30   : > { %1022 = vst [vmem:[%s14767_s17 + $0x1e0] sm:$0xff] %v1021_v60  ;;  %1024 = vst [vmem:[%s14767_s17 + $0x1e8] sm:$0xff] %v1023_v61  ;;  %v1027_v63 = vld [vmem:[%s14762_s16 + $0x2f8] sm:$0xff]  ;;  %v1029_v0 = vld [vmem:[%s14762_s16 + $0x400] sm:$0xff] }
  0x31   : > { %1026 = vst [vmem:[%s14767_s17 + $0x1f0] sm:$0xff] %v1025_v62  ;;  %v1031_v1 = vld [vmem:[%s14762_s16 + $0x408] sm:$0xff]  ;;  %1028 = vst [vmem:[%s14767_s17 + $0x1f8] sm:$0xff] %v1027_v63  ;;  %v1033_v2 = vld [vmem:[%s14762_s16 + $0x410] sm:$0xff] }
  0x32   : > { %1030 = vst [vmem:[%s14767_s17 + $0x200] sm:$0xff] %v1029_v0  ;;  %1032 = vst [vmem:[%s14767_s17 + $0x208] sm:$0xff] %v1031_v1  ;;  %v1035_v3 = vld [vmem:[%s14762_s16 + $0x418] sm:$0xff]  ;;  %v1037_v4 = vld [vmem:[%s14762_s16 + $0x420] sm:$0xff] }
  0x33   : > { %1034 = vst [vmem:[%s14767_s17 + $0x210] sm:$0xff] %v1033_v2  ;;  %1036 = vst [vmem:[%s14767_s17 + $0x218] sm:$0xff] %v1035_v3  ;;  %v1039_v5 = vld [vmem:[%s14762_s16 + $0x428] sm:$0xff]  ;;  %v1041_v6 = vld [vmem:[%s14762_s16 + $0x430] sm:$0xff] }
  0x34   : > { %1038 = vst [vmem:[%s14767_s17 + $0x220] sm:$0xff] %v1037_v4  ;;  %v1043_v7 = vld [vmem:[%s14762_s16 + $0x438] sm:$0xff]  ;;  %1040 = vst [vmem:[%s14767_s17 + $0x228] sm:$0xff] %v1039_v5  ;;  %v1045_v8 = vld [vmem:[%s14762_s16 + $0x440] sm:$0xff] }
  0x35   : > { %1042 = vst [vmem:[%s14767_s17 + $0x230] sm:$0xff] %v1041_v6  ;;  %1044 = vst [vmem:[%s14767_s17 + $0x238] sm:$0xff] %v1043_v7  ;;  %v1047_v9 = vld [vmem:[%s14762_s16 + $0x448] sm:$0xff]  ;;  %v1049_v10 = vld [vmem:[%s14762_s16 + $0x450] sm:$0xff] }
  0x36   : > { %1046 = vst [vmem:[%s14767_s17 + $0x240] sm:$0xff] %v1045_v8  ;;  %1048 = vst [vmem:[%s14767_s17 + $0x248] sm:$0xff] %v1047_v9  ;;  %v1051_v11 = vld [vmem:[%s14762_s16 + $0x458] sm:$0xff]  ;;  %v1053_v12 = vld [vmem:[%s14762_s16 + $0x460] sm:$0xff] }
  0x37   : > { %1050 = vst [vmem:[%s14767_s17 + $0x250] sm:$0xff] %v1049_v10  ;;  %v1055_v13 = vld [vmem:[%s14762_s16 + $0x468] sm:$0xff]  ;;  %1052 = vst [vmem:[%s14767_s17 + $0x258] sm:$0xff] %v1051_v11  ;;  %v1057_v14 = vld [vmem:[%s14762_s16 + $0x470] sm:$0xff] }
  0x38   : > { %1054 = vst [vmem:[%s14767_s17 + $0x260] sm:$0xff] %v1053_v12  ;;  %1056 = vst [vmem:[%s14767_s17 + $0x268] sm:$0xff] %v1055_v13  ;;  %v1059_v15 = vld [vmem:[%s14762_s16 + $0x478] sm:$0xff]  ;;  %v1061_v16 = vld [vmem:[%s14762_s16 + $0x480] sm:$0xff] }
  0x39   : > { %1058 = vst [vmem:[%s14767_s17 + $0x270] sm:$0xff] %v1057_v14  ;;  %1060 = vst [vmem:[%s14767_s17 + $0x278] sm:$0xff] %v1059_v15  ;;  %v1063_v17 = vld [vmem:[%s14762_s16 + $0x488] sm:$0xff]  ;;  %v1065_v18 = vld [vmem:[%s14762_s16 + $0x490] sm:$0xff] }
  0x3a   : > { %1062 = vst [vmem:[%s14767_s17 + $0x280] sm:$0xff] %v1061_v16  ;;  %v1067_v19 = vld [vmem:[%s14762_s16 + $0x498] sm:$0xff]  ;;  %1064 = vst [vmem:[%s14767_s17 + $0x288] sm:$0xff] %v1063_v17  ;;  %v1069_v20 = vld [vmem:[%s14762_s16 + $0x4a0] sm:$0xff] }
  0x3b   : > { %1066 = vst [vmem:[%s14767_s17 + $0x290] sm:$0xff] %v1065_v18  ;;  %1068 = vst [vmem:[%s14767_s17 + $0x298] sm:$0xff] %v1067_v19  ;;  %v1071_v21 = vld [vmem:[%s14762_s16 + $0x4a8] sm:$0xff]  ;;  %v1073_v22 = vld [vmem:[%s14762_s16 + $0x4b0] sm:$0xff] }
  0x3c   : > { %1070 = vst [vmem:[%s14767_s17 + $0x2a0] sm:$0xff] %v1069_v20  ;;  %1072 = vst [vmem:[%s14767_s17 + $0x2a8] sm:$0xff] %v1071_v21  ;;  %v1075_v23 = vld [vmem:[%s14762_s16 + $0x4b8] sm:$0xff]  ;;  %v1077_v24 = vld [vmem:[%s14762_s16 + $0x4c0] sm:$0xff] }
  0x3d   : > { %1074 = vst [vmem:[%s14767_s17 + $0x2b0] sm:$0xff] %v1073_v22  ;;  %v1079_v25 = vld [vmem:[%s14762_s16 + $0x4c8] sm:$0xff]  ;;  %1076 = vst [vmem:[%s14767_s17 + $0x2b8] sm:$0xff] %v1075_v23  ;;  %v1081_v26 = vld [vmem:[%s14762_s16 + $0x4d0] sm:$0xff] }
  0x3e   : > { %1078 = vst [vmem:[%s14767_s17 + $0x2c0] sm:$0xff] %v1077_v24  ;;  %1080 = vst [vmem:[%s14767_s17 + $0x2c8] sm:$0xff] %v1079_v25  ;;  %v1083_v27 = vld [vmem:[%s14762_s16 + $0x4d8] sm:$0xff]  ;;  %v1085_v28 = vld [vmem:[%s14762_s16 + $0x4e0] sm:$0xff] }
  0x3f   : > { %1082 = vst [vmem:[%s14767_s17 + $0x2d0] sm:$0xff] %v1081_v26  ;;  %1084 = vst [vmem:[%s14767_s17 + $0x2d8] sm:$0xff] %v1083_v27  ;;  %v1087_v29 = vld [vmem:[%s14762_s16 + $0x4e8] sm:$0xff]  ;;  %v1089_v30 = vld [vmem:[%s14762_s16 + $0x4f0] sm:$0xff] }
  0x40   : > { %1086 = vst [vmem:[%s14767_s17 + $0x2e0] sm:$0xff] %v1085_v28  ;;  %v1091_v31 = vld [vmem:[%s14762_s16 + $0x4f8] sm:$0xff]  ;;  %1088 = vst [vmem:[%s14767_s17 + $0x2e8] sm:$0xff] %v1087_v29  ;;  %v1093_v32 = vld [vmem:[%s14762_s16 + $0x600] sm:$0xff] }
  0x41   : > { %1090 = vst [vmem:[%s14767_s17 + $0x2f0] sm:$0xff] %v1089_v30  ;;  %1092 = vst [vmem:[%s14767_s17 + $0x2f8] sm:$0xff] %v1091_v31  ;;  %v1095_v33 = vld [vmem:[%s14762_s16 + $0x608] sm:$0xff]  ;;  %v1097_v34 = vld [vmem:[%s14762_s16 + $0x610] sm:$0xff] }
  0x42   : > { %1094 = vst [vmem:[%s14767_s17 + $0x300] sm:$0xff] %v1093_v32  ;;  %1096 = vst [vmem:[%s14767_s17 + $0x308] sm:$0xff] %v1095_v33  ;;  %v1099_v35 = vld [vmem:[%s14762_s16 + $0x618] sm:$0xff]  ;;  %v1101_v36 = vld [vmem:[%s14762_s16 + $0x620] sm:$0xff] }
  0x43   : > { %1098 = vst [vmem:[%s14767_s17 + $0x310] sm:$0xff] %v1097_v34  ;;  %v1103_v37 = vld [vmem:[%s14762_s16 + $0x628] sm:$0xff]  ;;  %1100 = vst [vmem:[%s14767_s17 + $0x318] sm:$0xff] %v1099_v35  ;;  %v1105_v38 = vld [vmem:[%s14762_s16 + $0x630] sm:$0xff] }
  0x44   : > { %1102 = vst [vmem:[%s14767_s17 + $0x320] sm:$0xff] %v1101_v36  ;;  %1104 = vst [vmem:[%s14767_s17 + $0x328] sm:$0xff] %v1103_v37  ;;  %v1107_v39 = vld [vmem:[%s14762_s16 + $0x638] sm:$0xff]  ;;  %v1109_v40 = vld [vmem:[%s14762_s16 + $0x640] sm:$0xff] }
  0x45   : > { %1106 = vst [vmem:[%s14767_s17 + $0x330] sm:$0xff] %v1105_v38  ;;  %1108 = vst [vmem:[%s14767_s17 + $0x338] sm:$0xff] %v1107_v39  ;;  %v1111_v41 = vld [vmem:[%s14762_s16 + $0x648] sm:$0xff]  ;;  %v1113_v42 = vld [vmem:[%s14762_s16 + $0x650] sm:$0xff] }
  0x46   : > { %1110 = vst [vmem:[%s14767_s17 + $0x340] sm:$0xff] %v1109_v40  ;;  %v1115_v43 = vld [vmem:[%s14762_s16 + $0x658] sm:$0xff]  ;;  %1112 = vst [vmem:[%s14767_s17 + $0x348] sm:$0xff] %v1111_v41  ;;  %v1117_v44 = vld [vmem:[%s14762_s16 + $0x660] sm:$0xff] }
  0x47   : > { %1114 = vst [vmem:[%s14767_s17 + $0x350] sm:$0xff] %v1113_v42  ;;  %1116 = vst [vmem:[%s14767_s17 + $0x358] sm:$0xff] %v1115_v43  ;;  %v1119_v45 = vld [vmem:[%s14762_s16 + $0x668] sm:$0xff]  ;;  %v1121_v46 = vld [vmem:[%s14762_s16 + $0x670] sm:$0xff] }
  0x48   : > { %1118 = vst [vmem:[%s14767_s17 + $0x360] sm:$0xff] %v1117_v44  ;;  %1120 = vst [vmem:[%s14767_s17 + $0x368] sm:$0xff] %v1119_v45  ;;  %v1123_v47 = vld [vmem:[%s14762_s16 + $0x678] sm:$0xff]  ;;  %v1125_v48 = vld [vmem:[%s14762_s16 + $0x680] sm:$0xff] }
  0x49   : > { %1122 = vst [vmem:[%s14767_s17 + $0x370] sm:$0xff] %v1121_v46  ;;  %v1127_v49 = vld [vmem:[%s14762_s16 + $0x688] sm:$0xff]  ;;  %1124 = vst [vmem:[%s14767_s17 + $0x378] sm:$0xff] %v1123_v47  ;;  %v1129_v50 = vld [vmem:[%s14762_s16 + $0x690] sm:$0xff] }
  0x4a   : > { %1126 = vst [vmem:[%s14767_s17 + $0x380] sm:$0xff] %v1125_v48  ;;  %1128 = vst [vmem:[%s14767_s17 + $0x388] sm:$0xff] %v1127_v49  ;;  %v1131_v51 = vld [vmem:[%s14762_s16 + $0x698] sm:$0xff]  ;;  %v1133_v52 = vld [vmem:[%s14762_s16 + $0x6a0] sm:$0xff] }
  0x4b   : > { %1130 = vst [vmem:[%s14767_s17 + $0x390] sm:$0xff] %v1129_v50  ;;  %1132 = vst [vmem:[%s14767_s17 + $0x398] sm:$0xff] %v1131_v51  ;;  %v1135_v53 = vld [vmem:[%s14762_s16 + $0x6a8] sm:$0xff]  ;;  %v1137_v54 = vld [vmem:[%s14762_s16 + $0x6b0] sm:$0xff] }
  0x4c   : > { %1134 = vst [vmem:[%s14767_s17 + $0x3a0] sm:$0xff] %v1133_v52  ;;  %v1139_v55 = vld [vmem:[%s14762_s16 + $0x6b8] sm:$0xff]  ;;  %1136 = vst [vmem:[%s14767_s17 + $0x3a8] sm:$0xff] %v1135_v53  ;;  %v1141_v56 = vld [vmem:[%s14762_s16 + $0x6c0] sm:$0xff] }
  0x4d   : > { %1138 = vst [vmem:[%s14767_s17 + $0x3b0] sm:$0xff] %v1137_v54  ;;  %1140 = vst [vmem:[%s14767_s17 + $0x3b8] sm:$0xff] %v1139_v55  ;;  %v1143_v57 = vld [vmem:[%s14762_s16 + $0x6c8] sm:$0xff]  ;;  %v1145_v58 = vld [vmem:[%s14762_s16 + $0x6d0] sm:$0xff] }
  0x4e   : > { %1142 = vst [vmem:[%s14767_s17 + $0x3c0] sm:$0xff] %v1141_v56  ;;  %1144 = vst [vmem:[%s14767_s17 + $0x3c8] sm:$0xff] %v1143_v57  ;;  %v1147_v59 = vld [vmem:[%s14762_s16 + $0x6d8] sm:$0xff]  ;;  %v1149_v60 = vld [vmem:[%s14762_s16 + $0x6e0] sm:$0xff] }
  0x4f   : > { %1146 = vst [vmem:[%s14767_s17 + $0x3d0] sm:$0xff] %v1145_v58  ;;  %v1151_v61 = vld [vmem:[%s14762_s16 + $0x6e8] sm:$0xff]  ;;  %1148 = vst [vmem:[%s14767_s17 + $0x3d8] sm:$0xff] %v1147_v59  ;;  %v1153_v62 = vld [vmem:[%s14762_s16 + $0x6f0] sm:$0xff] }
  0x50   : > { %1150 = vst [vmem:[%s14767_s17 + $0x3e0] sm:$0xff] %v1149_v60  ;;  %1152 = vst [vmem:[%s14767_s17 + $0x3e8] sm:$0xff] %v1151_v61  ;;  %v1155_v63 = vld [vmem:[%s14762_s16 + $0x6f8] sm:$0xff]  ;;  %v1157_v0 = vld [vmem:[%s14762_s16 + $0x800] sm:$0xff] }
  0x51   : > { %1154 = vst [vmem:[%s14767_s17 + $0x3f0] sm:$0xff] %v1153_v62  ;;  %1156 = vst [vmem:[%s14767_s17 + $0x3f8] sm:$0xff] %v1155_v63  ;;  %v1159_v1 = vld [vmem:[%s14762_s16 + $0x808] sm:$0xff]  ;;  %v1161_v2 = vld [vmem:[%s14762_s16 + $0x810] sm:$0xff] }
  0x52   : > { %1158 = vst [vmem:[%s14767_s17 + $0x400] sm:$0xff] %v1157_v0  ;;  %v1163_v3 = vld [vmem:[%s14762_s16 + $0x818] sm:$0xff]  ;;  %1160 = vst [vmem:[%s14767_s17 + $0x408] sm:$0xff] %v1159_v1  ;;  %v1165_v4 = vld [vmem:[%s14762_s16 + $0x820] sm:$0xff] }
  0x53   : > { %1162 = vst [vmem:[%s14767_s17 + $0x410] sm:$0xff] %v1161_v2  ;;  %1164 = vst [vmem:[%s14767_s17 + $0x418] sm:$0xff] %v1163_v3  ;;  %v1167_v5 = vld [vmem:[%s14762_s16 + $0x828] sm:$0xff]  ;;  %v1169_v6 = vld [vmem:[%s14762_s16 + $0x830] sm:$0xff] }
  0x54   : > { %1166 = vst [vmem:[%s14767_s17 + $0x420] sm:$0xff] %v1165_v4  ;;  %1168 = vst [vmem:[%s14767_s17 + $0x428] sm:$0xff] %v1167_v5  ;;  %v1171_v7 = vld [vmem:[%s14762_s16 + $0x838] sm:$0xff]  ;;  %v1173_v8 = vld [vmem:[%s14762_s16 + $0x840] sm:$0xff] }
  0x55   : > { %1170 = vst [vmem:[%s14767_s17 + $0x430] sm:$0xff] %v1169_v6  ;;  %v1175_v9 = vld [vmem:[%s14762_s16 + $0x848] sm:$0xff]  ;;  %1172 = vst [vmem:[%s14767_s17 + $0x438] sm:$0xff] %v1171_v7  ;;  %v1177_v10 = vld [vmem:[%s14762_s16 + $0x850] sm:$0xff] }
  0x56   : > { %1174 = vst [vmem:[%s14767_s17 + $0x440] sm:$0xff] %v1173_v8  ;;  %1176 = vst [vmem:[%s14767_s17 + $0x448] sm:$0xff] %v1175_v9  ;;  %v1179_v11 = vld [vmem:[%s14762_s16 + $0x858] sm:$0xff]  ;;  %v1181_v12 = vld [vmem:[%s14762_s16 + $0x860] sm:$0xff] }
  0x57   : > { %1178 = vst [vmem:[%s14767_s17 + $0x450] sm:$0xff] %v1177_v10  ;;  %1180 = vst [vmem:[%s14767_s17 + $0x458] sm:$0xff] %v1179_v11  ;;  %v1183_v13 = vld [vmem:[%s14762_s16 + $0x868] sm:$0xff]  ;;  %v1185_v14 = vld [vmem:[%s14762_s16 + $0x870] sm:$0xff] }
  0x58   : > { %1182 = vst [vmem:[%s14767_s17 + $0x460] sm:$0xff] %v1181_v12  ;;  %v1187_v15 = vld [vmem:[%s14762_s16 + $0x878] sm:$0xff]  ;;  %1184 = vst [vmem:[%s14767_s17 + $0x468] sm:$0xff] %v1183_v13  ;;  %v1189_v16 = vld [vmem:[%s14762_s16 + $0x880] sm:$0xff] }
  0x59   : > { %1186 = vst [vmem:[%s14767_s17 + $0x470] sm:$0xff] %v1185_v14  ;;  %1188 = vst [vmem:[%s14767_s17 + $0x478] sm:$0xff] %v1187_v15  ;;  %v1191_v17 = vld [vmem:[%s14762_s16 + $0x888] sm:$0xff]  ;;  %v1193_v18 = vld [vmem:[%s14762_s16 + $0x890] sm:$0xff] }
  0x5a   : > { %1190 = vst [vmem:[%s14767_s17 + $0x480] sm:$0xff] %v1189_v16  ;;  %1192 = vst [vmem:[%s14767_s17 + $0x488] sm:$0xff] %v1191_v17  ;;  %v1195_v19 = vld [vmem:[%s14762_s16 + $0x898] sm:$0xff]  ;;  %v1197_v20 = vld [vmem:[%s14762_s16 + $0x8a0] sm:$0xff] }
  0x5b   : > { %1194 = vst [vmem:[%s14767_s17 + $0x490] sm:$0xff] %v1193_v18  ;;  %v1199_v21 = vld [vmem:[%s14762_s16 + $0x8a8] sm:$0xff]  ;;  %1196 = vst [vmem:[%s14767_s17 + $0x498] sm:$0xff] %v1195_v19  ;;  %v1201_v22 = vld [vmem:[%s14762_s16 + $0x8b0] sm:$0xff] }
  0x5c   : > { %1198 = vst [vmem:[%s14767_s17 + $0x4a0] sm:$0xff] %v1197_v20  ;;  %1200 = vst [vmem:[%s14767_s17 + $0x4a8] sm:$0xff] %v1199_v21  ;;  %v1203_v23 = vld [vmem:[%s14762_s16 + $0x8b8] sm:$0xff]  ;;  %v1205_v24 = vld [vmem:[%s14762_s16 + $0x8c0] sm:$0xff] }
  0x5d   : > { %1202 = vst [vmem:[%s14767_s17 + $0x4b0] sm:$0xff] %v1201_v22  ;;  %1204 = vst [vmem:[%s14767_s17 + $0x4b8] sm:$0xff] %v1203_v23  ;;  %v1207_v25 = vld [vmem:[%s14762_s16 + $0x8c8] sm:$0xff]  ;;  %v1209_v26 = vld [vmem:[%s14762_s16 + $0x8d0] sm:$0xff] }
  0x5e   : > { %1206 = vst [vmem:[%s14767_s17 + $0x4c0] sm:$0xff] %v1205_v24  ;;  %v1211_v27 = vld [vmem:[%s14762_s16 + $0x8d8] sm:$0xff]  ;;  %1208 = vst [vmem:[%s14767_s17 + $0x4c8] sm:$0xff] %v1207_v25  ;;  %v1213_v28 = vld [vmem:[%s14762_s16 + $0x8e0] sm:$0xff] }
  0x5f   : > { %1210 = vst [vmem:[%s14767_s17 + $0x4d0] sm:$0xff] %v1209_v26  ;;  %1212 = vst [vmem:[%s14767_s17 + $0x4d8] sm:$0xff] %v1211_v27  ;;  %v1215_v29 = vld [vmem:[%s14762_s16 + $0x8e8] sm:$0xff]  ;;  %v1217_v30 = vld [vmem:[%s14762_s16 + $0x8f0] sm:$0xff] }
  0x60   : > { %1214 = vst [vmem:[%s14767_s17 + $0x4e0] sm:$0xff] %v1213_v28  ;;  %1216 = vst [vmem:[%s14767_s17 + $0x4e8] sm:$0xff] %v1215_v29  ;;  %v1219_v31 = vld [vmem:[%s14762_s16 + $0x8f8] sm:$0xff]  ;;  %v1221_v32 = vld [vmem:[%s14762_s16 + $0xa00] sm:$0xff] }
  0x61   : > { %1218 = vst [vmem:[%s14767_s17 + $0x4f0] sm:$0xff] %v1217_v30  ;;  %v1223_v33 = vld [vmem:[%s14762_s16 + $0xa08] sm:$0xff]  ;;  %1220 = vst [vmem:[%s14767_s17 + $0x4f8] sm:$0xff] %v1219_v31  ;;  %v1225_v34 = vld [vmem:[%s14762_s16 + $0xa10] sm:$0xff] }
  0x62   : > { %1222 = vst [vmem:[%s14767_s17 + $0x500] sm:$0xff] %v1221_v32  ;;  %1224 = vst [vmem:[%s14767_s17 + $0x508] sm:$0xff] %v1223_v33  ;;  %v1227_v35 = vld [vmem:[%s14762_s16 + $0xa18] sm:$0xff]  ;;  %v1229_v36 = vld [vmem:[%s14762_s16 + $0xa20] sm:$0xff] }
  0x63   : > { %1226 = vst [vmem:[%s14767_s17 + $0x510] sm:$0xff] %v1225_v34  ;;  %1228 = vst [vmem:[%s14767_s17 + $0x518] sm:$0xff] %v1227_v35  ;;  %v1231_v37 = vld [vmem:[%s14762_s16 + $0xa28] sm:$0xff]  ;;  %v1233_v38 = vld [vmem:[%s14762_s16 + $0xa30] sm:$0xff] }
  0x64   : > { %1230 = vst [vmem:[%s14767_s17 + $0x520] sm:$0xff] %v1229_v36  ;;  %v1235_v39 = vld [vmem:[%s14762_s16 + $0xa38] sm:$0xff]  ;;  %1232 = vst [vmem:[%s14767_s17 + $0x528] sm:$0xff] %v1231_v37  ;;  %v1237_v40 = vld [vmem:[%s14762_s16 + $0xa40] sm:$0xff] }
  0x65   : > { %1234 = vst [vmem:[%s14767_s17 + $0x530] sm:$0xff] %v1233_v38  ;;  %1236 = vst [vmem:[%s14767_s17 + $0x538] sm:$0xff] %v1235_v39  ;;  %v1239_v41 = vld [vmem:[%s14762_s16 + $0xa48] sm:$0xff]  ;;  %v1241_v42 = vld [vmem:[%s14762_s16 + $0xa50] sm:$0xff] }
  0x66   : > { %1238 = vst [vmem:[%s14767_s17 + $0x540] sm:$0xff] %v1237_v40  ;;  %1240 = vst [vmem:[%s14767_s17 + $0x548] sm:$0xff] %v1239_v41  ;;  %v1243_v43 = vld [vmem:[%s14762_s16 + $0xa58] sm:$0xff]  ;;  %v1245_v44 = vld [vmem:[%s14762_s16 + $0xa60] sm:$0xff] }
  0x67   : > { %1242 = vst [vmem:[%s14767_s17 + $0x550] sm:$0xff] %v1241_v42  ;;  %v1247_v45 = vld [vmem:[%s14762_s16 + $0xa68] sm:$0xff]  ;;  %1244 = vst [vmem:[%s14767_s17 + $0x558] sm:$0xff] %v1243_v43  ;;  %v1249_v46 = vld [vmem:[%s14762_s16 + $0xa70] sm:$0xff] }
  0x68   : > { %1246 = vst [vmem:[%s14767_s17 + $0x560] sm:$0xff] %v1245_v44  ;;  %1248 = vst [vmem:[%s14767_s17 + $0x568] sm:$0xff] %v1247_v45  ;;  %v1251_v47 = vld [vmem:[%s14762_s16 + $0xa78] sm:$0xff]  ;;  %v1253_v48 = vld [vmem:[%s14762_s16 + $0xa80] sm:$0xff] }
  0x69   : > { %1250 = vst [vmem:[%s14767_s17 + $0x570] sm:$0xff] %v1249_v46  ;;  %1252 = vst [vmem:[%s14767_s17 + $0x578] sm:$0xff] %v1251_v47  ;;  %v1255_v49 = vld [vmem:[%s14762_s16 + $0xa88] sm:$0xff]  ;;  %v1257_v50 = vld [vmem:[%s14762_s16 + $0xa90] sm:$0xff] }
  0x6a   : > { %1254 = vst [vmem:[%s14767_s17 + $0x580] sm:$0xff] %v1253_v48  ;;  %v1259_v51 = vld [vmem:[%s14762_s16 + $0xa98] sm:$0xff]  ;;  %1256 = vst [vmem:[%s14767_s17 + $0x588] sm:$0xff] %v1255_v49  ;;  %v1261_v52 = vld [vmem:[%s14762_s16 + $0xaa0] sm:$0xff] }
  0x6b   : > { %1258 = vst [vmem:[%s14767_s17 + $0x590] sm:$0xff] %v1257_v50  ;;  %1260 = vst [vmem:[%s14767_s17 + $0x598] sm:$0xff] %v1259_v51  ;;  %v1263_v53 = vld [vmem:[%s14762_s16 + $0xaa8] sm:$0xff]  ;;  %v1265_v54 = vld [vmem:[%s14762_s16 + $0xab0] sm:$0xff] }
  0x6c   : > { %1262 = vst [vmem:[%s14767_s17 + $0x5a0] sm:$0xff] %v1261_v52  ;;  %1264 = vst [vmem:[%s14767_s17 + $0x5a8] sm:$0xff] %v1263_v53  ;;  %v1267_v55 = vld [vmem:[%s14762_s16 + $0xab8] sm:$0xff]  ;;  %v1269_v56 = vld [vmem:[%s14762_s16 + $0xac0] sm:$0xff] }
  0x6d   : > { %1266 = vst [vmem:[%s14767_s17 + $0x5b0] sm:$0xff] %v1265_v54  ;;  %v1271_v57 = vld [vmem:[%s14762_s16 + $0xac8] sm:$0xff]  ;;  %1268 = vst [vmem:[%s14767_s17 + $0x5b8] sm:$0xff] %v1267_v55  ;;  %v1273_v58 = vld [vmem:[%s14762_s16 + $0xad0] sm:$0xff] }
  0x6e   : > { %1270 = vst [vmem:[%s14767_s17 + $0x5c0] sm:$0xff] %v1269_v56  ;;  %1272 = vst [vmem:[%s14767_s17 + $0x5c8] sm:$0xff] %v1271_v57  ;;  %v1275_v59 = vld [vmem:[%s14762_s16 + $0xad8] sm:$0xff]  ;;  %v1277_v60 = vld [vmem:[%s14762_s16 + $0xae0] sm:$0xff] }
  0x6f   : > { %1274 = vst [vmem:[%s14767_s17 + $0x5d0] sm:$0xff] %v1273_v58  ;;  %1276 = vst [vmem:[%s14767_s17 + $0x5d8] sm:$0xff] %v1275_v59  ;;  %v1279_v61 = vld [vmem:[%s14762_s16 + $0xae8] sm:$0xff]  ;;  %v1281_v62 = vld [vmem:[%s14762_s16 + $0xaf0] sm:$0xff] }
  0x70   : > { %1278 = vst [vmem:[%s14767_s17 + $0x5e0] sm:$0xff] %v1277_v60  ;;  %v1283_v63 = vld [vmem:[%s14762_s16 + $0xaf8] sm:$0xff]  ;;  %1280 = vst [vmem:[%s14767_s17 + $0x5e8] sm:$0xff] %v1279_v61  ;;  %v1285_v0 = vld [vmem:[%s14762_s16 + $0xc00] sm:$0xff] }
  0x71   : > { %1282 = vst [vmem:[%s14767_s17 + $0x5f0] sm:$0xff] %v1281_v62  ;;  %1284 = vst [vmem:[%s14767_s17 + $0x5f8] sm:$0xff] %v1283_v63  ;;  %v1287_v1 = vld [vmem:[%s14762_s16 + $0xc08] sm:$0xff]  ;;  %v1289_v2 = vld [vmem:[%s14762_s16 + $0xc10] sm:$0xff] }
  0x72   : > { %1286 = vst [vmem:[%s14767_s17 + $0x600] sm:$0xff] %v1285_v0  ;;  %1288 = vst [vmem:[%s14767_s17 + $0x608] sm:$0xff] %v1287_v1  ;;  %v1291_v3 = vld [vmem:[%s14762_s16 + $0xc18] sm:$0xff]  ;;  %v1293_v4 = vld [vmem:[%s14762_s16 + $0xc20] sm:$0xff] }
  0x73   : > { %1290 = vst [vmem:[%s14767_s17 + $0x610] sm:$0xff] %v1289_v2  ;;  %v1295_v5 = vld [vmem:[%s14762_s16 + $0xc28] sm:$0xff]  ;;  %1292 = vst [vmem:[%s14767_s17 + $0x618] sm:$0xff] %v1291_v3  ;;  %v1297_v6 = vld [vmem:[%s14762_s16 + $0xc30] sm:$0xff] }
  0x74   : > { %1294 = vst [vmem:[%s14767_s17 + $0x620] sm:$0xff] %v1293_v4  ;;  %1296 = vst [vmem:[%s14767_s17 + $0x628] sm:$0xff] %v1295_v5  ;;  %v1299_v7 = vld [vmem:[%s14762_s16 + $0xc38] sm:$0xff]  ;;  %v1301_v8 = vld [vmem:[%s14762_s16 + $0xc40] sm:$0xff] }
  0x75   : > { %1298 = vst [vmem:[%s14767_s17 + $0x630] sm:$0xff] %v1297_v6  ;;  %1300 = vst [vmem:[%s14767_s17 + $0x638] sm:$0xff] %v1299_v7  ;;  %v1303_v9 = vld [vmem:[%s14762_s16 + $0xc48] sm:$0xff]  ;;  %v1305_v10 = vld [vmem:[%s14762_s16 + $0xc50] sm:$0xff] }
  0x76   : > { %1302 = vst [vmem:[%s14767_s17 + $0x640] sm:$0xff] %v1301_v8  ;;  %v1307_v11 = vld [vmem:[%s14762_s16 + $0xc58] sm:$0xff]  ;;  %1304 = vst [vmem:[%s14767_s17 + $0x648] sm:$0xff] %v1303_v9  ;;  %v1309_v12 = vld [vmem:[%s14762_s16 + $0xc60] sm:$0xff] }
  0x77   : > { %1306 = vst [vmem:[%s14767_s17 + $0x650] sm:$0xff] %v1305_v10  ;;  %1308 = vst [vmem:[%s14767_s17 + $0x658] sm:$0xff] %v1307_v11  ;;  %v1311_v13 = vld [vmem:[%s14762_s16 + $0xc68] sm:$0xff]  ;;  %v1313_v14 = vld [vmem:[%s14762_s16 + $0xc70] sm:$0xff] }
  0x78   : > { %1310 = vst [vmem:[%s14767_s17 + $0x660] sm:$0xff] %v1309_v12  ;;  %1312 = vst [vmem:[%s14767_s17 + $0x668] sm:$0xff] %v1311_v13  ;;  %v1315_v15 = vld [vmem:[%s14762_s16 + $0xc78] sm:$0xff]  ;;  %v1317_v16 = vld [vmem:[%s14762_s16 + $0xc80] sm:$0xff] }
  0x79   : > { %1314 = vst [vmem:[%s14767_s17 + $0x670] sm:$0xff] %v1313_v14  ;;  %v1319_v17 = vld [vmem:[%s14762_s16 + $0xc88] sm:$0xff]  ;;  %1316 = vst [vmem:[%s14767_s17 + $0x678] sm:$0xff] %v1315_v15  ;;  %v1321_v18 = vld [vmem:[%s14762_s16 + $0xc90] sm:$0xff] }
  0x7a   : > { %1318 = vst [vmem:[%s14767_s17 + $0x680] sm:$0xff] %v1317_v16  ;;  %1320 = vst [vmem:[%s14767_s17 + $0x688] sm:$0xff] %v1319_v17  ;;  %v1323_v19 = vld [vmem:[%s14762_s16 + $0xc98] sm:$0xff]  ;;  %v1325_v20 = vld [vmem:[%s14762_s16 + $0xca0] sm:$0xff] }
  0x7b   : > { %1322 = vst [vmem:[%s14767_s17 + $0x690] sm:$0xff] %v1321_v18  ;;  %1324 = vst [vmem:[%s14767_s17 + $0x698] sm:$0xff] %v1323_v19  ;;  %v1327_v21 = vld [vmem:[%s14762_s16 + $0xca8] sm:$0xff]  ;;  %v1329_v22 = vld [vmem:[%s14762_s16 + $0xcb0] sm:$0xff] }
  0x7c   : > { %1326 = vst [vmem:[%s14767_s17 + $0x6a0] sm:$0xff] %v1325_v20  ;;  %v1331_v23 = vld [vmem:[%s14762_s16 + $0xcb8] sm:$0xff]  ;;  %1328 = vst [vmem:[%s14767_s17 + $0x6a8] sm:$0xff] %v1327_v21  ;;  %v1333_v24 = vld [vmem:[%s14762_s16 + $0xcc0] sm:$0xff] }
  0x7d   : > { %1330 = vst [vmem:[%s14767_s17 + $0x6b0] sm:$0xff] %v1329_v22  ;;  %1332 = vst [vmem:[%s14767_s17 + $0x6b8] sm:$0xff] %v1331_v23  ;;  %v1335_v25 = vld [vmem:[%s14762_s16 + $0xcc8] sm:$0xff]  ;;  %v1337_v26 = vld [vmem:[%s14762_s16 + $0xcd0] sm:$0xff] }
  0x7e   : > { %1334 = vst [vmem:[%s14767_s17 + $0x6c0] sm:$0xff] %v1333_v24  ;;  %1336 = vst [vmem:[%s14767_s17 + $0x6c8] sm:$0xff] %v1335_v25  ;;  %v1339_v27 = vld [vmem:[%s14762_s16 + $0xcd8] sm:$0xff]  ;;  %v1341_v28 = vld [vmem:[%s14762_s16 + $0xce0] sm:$0xff] }
  0x7f   : > { %1338 = vst [vmem:[%s14767_s17 + $0x6d0] sm:$0xff] %v1337_v26  ;;  %v1343_v29 = vld [vmem:[%s14762_s16 + $0xce8] sm:$0xff]  ;;  %1340 = vst [vmem:[%s14767_s17 + $0x6d8] sm:$0xff] %v1339_v27  ;;  %v1345_v30 = vld [vmem:[%s14762_s16 + $0xcf0] sm:$0xff] }
  0x80   : > { %1342 = vst [vmem:[%s14767_s17 + $0x6e0] sm:$0xff] %v1341_v28  ;;  %1344 = vst [vmem:[%s14767_s17 + $0x6e8] sm:$0xff] %v1343_v29  ;;  %v1347_v31 = vld [vmem:[%s14762_s16 + $0xcf8] sm:$0xff]  ;;  %v1349_v32 = vld [vmem:[%s14762_s16 + $0xe00] sm:$0xff] }
  0x81   : > { %1346 = vst [vmem:[%s14767_s17 + $0x6f0] sm:$0xff] %v1345_v30  ;;  %1348 = vst [vmem:[%s14767_s17 + $0x6f8] sm:$0xff] %v1347_v31  ;;  %v1351_v33 = vld [vmem:[%s14762_s16 + $0xe08] sm:$0xff]  ;;  %v1353_v34 = vld [vmem:[%s14762_s16 + $0xe10] sm:$0xff] }
  0x82   : > { %1350 = vst [vmem:[%s14767_s17 + $0x700] sm:$0xff] %v1349_v32  ;;  %v1355_v35 = vld [vmem:[%s14762_s16 + $0xe18] sm:$0xff]  ;;  %1352 = vst [vmem:[%s14767_s17 + $0x708] sm:$0xff] %v1351_v33  ;;  %v1357_v36 = vld [vmem:[%s14762_s16 + $0xe20] sm:$0xff] }
  0x83   : > { %1354 = vst [vmem:[%s14767_s17 + $0x710] sm:$0xff] %v1353_v34  ;;  %1356 = vst [vmem:[%s14767_s17 + $0x718] sm:$0xff] %v1355_v35  ;;  %v1359_v37 = vld [vmem:[%s14762_s16 + $0xe28] sm:$0xff]  ;;  %v1361_v38 = vld [vmem:[%s14762_s16 + $0xe30] sm:$0xff] }
  0x84   : > { %1358 = vst [vmem:[%s14767_s17 + $0x720] sm:$0xff] %v1357_v36  ;;  %1360 = vst [vmem:[%s14767_s17 + $0x728] sm:$0xff] %v1359_v37  ;;  %v1363_v39 = vld [vmem:[%s14762_s16 + $0xe38] sm:$0xff]  ;;  %v1365_v40 = vld [vmem:[%s14762_s16 + $0xe40] sm:$0xff] }
  0x85   : > { %1362 = vst [vmem:[%s14767_s17 + $0x730] sm:$0xff] %v1361_v38  ;;  %v1367_v41 = vld [vmem:[%s14762_s16 + $0xe48] sm:$0xff]  ;;  %1364 = vst [vmem:[%s14767_s17 + $0x738] sm:$0xff] %v1363_v39  ;;  %v1369_v42 = vld [vmem:[%s14762_s16 + $0xe50] sm:$0xff] }
  0x86   : > { %1366 = vst [vmem:[%s14767_s17 + $0x740] sm:$0xff] %v1365_v40  ;;  %1368 = vst [vmem:[%s14767_s17 + $0x748] sm:$0xff] %v1367_v41  ;;  %v1371_v43 = vld [vmem:[%s14762_s16 + $0xe58] sm:$0xff]  ;;  %v1373_v44 = vld [vmem:[%s14762_s16 + $0xe60] sm:$0xff] }
  0x87   : > { %1370 = vst [vmem:[%s14767_s17 + $0x750] sm:$0xff] %v1369_v42  ;;  %1372 = vst [vmem:[%s14767_s17 + $0x758] sm:$0xff] %v1371_v43  ;;  %v1375_v45 = vld [vmem:[%s14762_s16 + $0xe68] sm:$0xff]  ;;  %v1377_v46 = vld [vmem:[%s14762_s16 + $0xe70] sm:$0xff] }
  0x88   : > { %1374 = vst [vmem:[%s14767_s17 + $0x760] sm:$0xff] %v1373_v44  ;;  %v1379_v47 = vld [vmem:[%s14762_s16 + $0xe78] sm:$0xff]  ;;  %1376 = vst [vmem:[%s14767_s17 + $0x768] sm:$0xff] %v1375_v45  ;;  %v1381_v48 = vld [vmem:[%s14762_s16 + $0xe80] sm:$0xff] }
  0x89   : > { %1378 = vst [vmem:[%s14767_s17 + $0x770] sm:$0xff] %v1377_v46  ;;  %1380 = vst [vmem:[%s14767_s17 + $0x778] sm:$0xff] %v1379_v47  ;;  %v1383_v49 = vld [vmem:[%s14762_s16 + $0xe88] sm:$0xff]  ;;  %v1385_v50 = vld [vmem:[%s14762_s16 + $0xe90] sm:$0xff] }
  0x8a   : > { %1382 = vst [vmem:[%s14767_s17 + $0x780] sm:$0xff] %v1381_v48  ;;  %1384 = vst [vmem:[%s14767_s17 + $0x788] sm:$0xff] %v1383_v49  ;;  %v1387_v51 = vld [vmem:[%s14762_s16 + $0xe98] sm:$0xff]  ;;  %v1389_v52 = vld [vmem:[%s14762_s16 + $0xea0] sm:$0xff] }
  0x8b   : > { %1386 = vst [vmem:[%s14767_s17 + $0x790] sm:$0xff] %v1385_v50  ;;  %v1391_v53 = vld [vmem:[%s14762_s16 + $0xea8] sm:$0xff]  ;;  %1388 = vst [vmem:[%s14767_s17 + $0x798] sm:$0xff] %v1387_v51  ;;  %v1393_v54 = vld [vmem:[%s14762_s16 + $0xeb0] sm:$0xff] }
  0x8c   : > { %1390 = vst [vmem:[%s14767_s17 + $0x7a0] sm:$0xff] %v1389_v52  ;;  %1392 = vst [vmem:[%s14767_s17 + $0x7a8] sm:$0xff] %v1391_v53  ;;  %v1395_v55 = vld [vmem:[%s14762_s16 + $0xeb8] sm:$0xff]  ;;  %v1397_v56 = vld [vmem:[%s14762_s16 + $0xec0] sm:$0xff] }
  0x8d   : > { %1394 = vst [vmem:[%s14767_s17 + $0x7b0] sm:$0xff] %v1393_v54  ;;  %1396 = vst [vmem:[%s14767_s17 + $0x7b8] sm:$0xff] %v1395_v55  ;;  %v1399_v57 = vld [vmem:[%s14762_s16 + $0xec8] sm:$0xff]  ;;  %v1401_v58 = vld [vmem:[%s14762_s16 + $0xed0] sm:$0xff] }
  0x8e   : > { %1398 = vst [vmem:[%s14767_s17 + $0x7c0] sm:$0xff] %v1397_v56  ;;  %v1403_v59 = vld [vmem:[%s14762_s16 + $0xed8] sm:$0xff]  ;;  %1400 = vst [vmem:[%s14767_s17 + $0x7c8] sm:$0xff] %v1399_v57  ;;  %v1405_v60 = vld [vmem:[%s14762_s16 + $0xee0] sm:$0xff] }
  0x8f   : > { %1402 = vst [vmem:[%s14767_s17 + $0x7d0] sm:$0xff] %v1401_v58  ;;  %1404 = vst [vmem:[%s14767_s17 + $0x7d8] sm:$0xff] %v1403_v59  ;;  %v1407_v61 = vld [vmem:[%s14762_s16 + $0xee8] sm:$0xff]  ;;  %v1409_v62 = vld [vmem:[%s14762_s16 + $0xef0] sm:$0xff] }
  0x90   : > { %1406 = vst [vmem:[%s14767_s17 + $0x7e0] sm:$0xff] %v1405_v60  ;;  %1408 = vst [vmem:[%s14767_s17 + $0x7e8] sm:$0xff] %v1407_v61  ;;  %v1411_v63 = vld [vmem:[%s14762_s16 + $0xef8] sm:$0xff] }
  0x91   : > { %1410 = vst [vmem:[%s14767_s17 + $0x7f0] sm:$0xff] %v1409_v62  ;;  %1412 = vst [vmem:[%s14767_s17 + $0x7f8] sm:$0xff] %v1411_v63 }
  0x92 PF: > { %p11166_p5 = scmp.ge.s32.totalorder %s14656_s23, 1  ;;  %p1417_p6 = scmp.lt.s32.totalorder %s14656_s23, 3 }
  0x94   : > { %p1418_p7 = pnand %p11166_p5, %p1417_p6 }
  0x96   : > { %1421 = sbr.rel (%p1418_p7) target bundleno = 2816 (0xb00), region = 102 }
  0x9d   : > { %v15283_v0 = vld [vmem:[%s18507_s1 + $0x40] sm:$0xff]   ;;  %v15295_v2 = vld [vmem:[%s18507_s1 + $0x48] sm:$0xff]   ;;  %v15309_v4 = vld [vmem:[%s18507_s1 + $0x50] sm:$0xff]   ;;  %s1424_s20 = sand.u32 1, %s14648_s21   ;;  %vm1995_vm0 = vcmask 261120   ;;  %s14658_s21 = smov 32  }
  0x9e   : > { %v15288_v1 = vld [vmem:[%s18507_s1] sm:$0xff]   ;;  %12309 = vmatprep.subr.bf16.mxu0 %v15283_v0  ;;  %13457 = vmatprep.subr.bf16.mxu1 %v15283_v0  ;;  %v15302_v3 = vld [vmem:[%s18507_s1 + $0x8] sm:$0xff]   ;;  %v15316_v5 = vld [vmem:[%s18507_s1 + $0x10] sm:$0xff]   ;;  %s11167_s29 = sshll.u32 %s1424_s20, 11  ;;  %s14659_s16 = smov 64   ;;  %vm2542_vm1 = vcmask 523520  }
  0x9f   : > { %12310 = vmatpush3.bf16.msra.mxu0 %v15288_v1  ;;  %13465 = vmatpush3.bf16.msra.mxu1 %v15288_v1  ;;  %v15323_v6 = vld [vmem:[%s18507_s1 + $0x58] sm:$0xff]   ;;  %v15338_v8 = vld [vmem:[%s18507_s1 + $0x60] sm:$0xff]   ;;  %v15352_v10 = vld [vmem:[%s18507_s1 + $0x68] sm:$0xff]   ;;  %s15354_s17 = scalar_lea.vmem [#allocation3], %s11167_s29  ;;  %s14660_s18 = smov 96   ;;  %vm3089_vm2 = vcmask 785920  }
  0xa0   : > { %12311 = vmatprep.subr.bf16.mxu0 %v15295_v2  ;;  %13458 = vmatprep.subr.bf16.mxu1 %v15295_v2  ;;  %v15331_v7 = vld [vmem:[%s18507_s1 + $0x18] sm:$0xff]   ;;  %v15345_v9 = vld [vmem:[%s18507_s1 + $0x20] sm:$0xff]   ;;  %v15363_v13 = vld [vmem:[%s18507_s1 + $0x28] sm:$0xff]   ;;  %vm3636_vm3 = vcmask 1048320   ;;  %vm7763_vm4 = vsmask.f32 6400 }
  0xa1   : > { %v13777_v11 = vld [vmem:[%s15354_s17 + $0x4] ss:$8 sps:$4 sm:$0xff]   ;;  %v13775_v18 = vld [vmem:[%s15354_s17] ss:$8 sps:$4 sm:$0xff]   ;;  %v13781_v20 = vld [vmem:[%s15354_s17 + $0x14] ss:$8 sps:$4 sm:$0xff]  }
  0xa2   : > { %v13780_v12 = vld [vmem:[%s15354_s17 + $0xa4] ss:$8 sps:$4 sm:$0xff]   ;;  %1834 = vmatprep.mubr.bf16.mxu0 %v13777_v11  ;;  %v13778_v19 = vld [vmem:[%s15354_s17 + $0xa0] ss:$8 sps:$4 sm:$0xff]   ;;  %v13783_v21 = vld [vmem:[%s15354_s17 + $0xb4] ss:$8 sps:$4 sm:$0xff]  }
  0xa3   : > { %12312 = vmatpush3.bf16.msra.mxu0 %v15302_v3  ;;  %13466 = vmatpush3.bf16.msra.mxu1 %v15302_v3  ;;  %v15370_v14 = vld [vmem:[%s18507_s1 + $0x70] sm:$0xff]   ;;  %v15384_v16 = vld [vmem:[%s18507_s1 + $0x78] sm:$0xff]   ;;  %v13785_v22 = vld [vmem:[%s15354_s17 + $0x10] ss:$8 sps:$4 sm:$0xff]   ;;  %vm7206_vm5 = vcmask 1046528   ;;  %vm9550_vm7 = vcmask 523264  }
  0xa4   : > { %12313 = vmatprep.subr.bf16.mxu0 %v15309_v4  ;;  %13459 = vmatprep.subr.bf16.mxu1 %v15309_v4  ;;  %v15377_v15 = vld [vmem:[%s18507_s1 + $0x30] sm:$0xff]   ;;  %v15391_v17 = vld [vmem:[%s18507_s1 + $0x38] sm:$0xff]   ;;  %v13786_v23 = vld [vmem:[%s15354_s17 + $0xb0] ss:$8 sps:$4 sm:$0xff]   ;;  %vm6417_vm6 = vsmask.f32 7424 }
  0xa5   : > { %1914 = vmatprep.mubr.bf16.mxu1 %v13780_v12  ;;  %v13787_v24 = vld [vmem:[%s15354_s17 + $0x24] ss:$8 sps:$4 sm:$0xff]   ;;  %v13791_v26 = vld [vmem:[%s15354_s17 + $0x20] ss:$8 sps:$4 sm:$0xff]   ;;  %v13793_v28 = vld [vmem:[%s15354_s17 + $0x34] ss:$8 sps:$4 sm:$0xff]  }
  0xa6   : > { %v13789_v25 = vld [vmem:[%s15354_s17 + $0xc4] ss:$8 sps:$4 sm:$0xff]   ;;  %v13792_v27 = vld [vmem:[%s15354_s17 + $0xc0] ss:$8 sps:$4 sm:$0xff]   ;;  %v13795_v29 = vld [vmem:[%s15354_s17 + $0xd4] ss:$8 sps:$4 sm:$0xff]  }
  0xa7   : > { %12314 = vmatpush3.bf16.msra.mxu0 %v15316_v5  ;;  %13467 = vmatpush3.bf16.msra.mxu1 %v15316_v5  ;;  %v13797_v30 = vld [vmem:[%s15354_s17 + $0x30] ss:$8 sps:$4 sm:$0xff]   ;;  %v13799_v32 = vld [vmem:[%s15354_s17 + $0x44] ss:$8 sps:$4 sm:$0xff]   ;;  %v13803_v34 = vld [vmem:[%s15354_s17 + $0x40] ss:$8 sps:$4 sm:$0xff]  }
  0xa8   : > { %12315 = vmatprep.subr.bf16.mxu0 %v15323_v6  ;;  %13460 = vmatprep.subr.bf16.mxu1 %v15323_v6  ;;  %v13798_v31 = vld [vmem:[%s15354_s17 + $0xd0] ss:$8 sps:$4 sm:$0xff]   ;;  %v13801_v33 = vld [vmem:[%s15354_s17 + $0xe4] ss:$8 sps:$4 sm:$0xff]   ;;  %v13804_v35 = vld [vmem:[%s15354_s17 + $0xe0] ss:$8 sps:$4 sm:$0xff]  }
  0xa9   : > { %v13805_v36 = vld [vmem:[%s15354_s17 + $0x54] ss:$8 sps:$4 sm:$0xff]   ;;  %v13809_v38 = vld [vmem:[%s15354_s17 + $0x50] ss:$8 sps:$4 sm:$0xff]   ;;  %v13811_v40 = vld [vmem:[%s15354_s17 + $0x64] ss:$8 sps:$4 sm:$0xff]  }
  0xaa   : > { %v13807_v37 = vld [vmem:[%s15354_s17 + $0xf4] ss:$8 sps:$4 sm:$0xff]   ;;  %v13810_v39 = vld [vmem:[%s15354_s17 + $0xf0] ss:$8 sps:$4 sm:$0xff]   ;;  %v13815_v41 = vld [vmem:[%s15354_s17 + $0x104] ss:$8 sps:$4 sm:$0xff]  }
  0xab   : > { %12316 = vmatpush3.bf16.msra.mxu0 %v15331_v7  ;;  %13468 = vmatpush3.bf16.msra.mxu1 %v15331_v7  ;;  %v13813_v42 = vld [vmem:[%s15354_s17 + $0x100] ss:$8 sps:$4 sm:$0xff]   ;;  %v13817_v44 = vld [vmem:[%s15354_s17 + $0x74] ss:$8 sps:$4 sm:$0xff]   ;;  %v13821_v46 = vld [vmem:[%s15354_s17 + $0x70] ss:$8 sps:$4 sm:$0xff]  }
  0xac   : > { %12317 = vmatprep.subr.bf16.mxu0 %v15338_v8  ;;  %13461 = vmatprep.subr.bf16.mxu1 %v15338_v8  ;;  %v13816_v43 = vld [vmem:[%s15354_s17 + $0x60] ss:$8 sps:$4 sm:$0xff]   ;;  %v13819_v45 = vld [vmem:[%s15354_s17 + $0x114] ss:$8 sps:$4 sm:$0xff]   ;;  %v13822_v47 = vld [vmem:[%s15354_s17 + $0x110] ss:$8 sps:$4 sm:$0xff]  }
  0xad   : > { %v13823_v48 = vld [vmem:[%s15354_s17 + $0x84] ss:$8 sps:$4 sm:$0xff]   ;;  %v13827_v50 = vld [vmem:[%s15354_s17 + $0x80] ss:$8 sps:$4 sm:$0xff]   ;;  %v13829_v52 = vld [vmem:[%s15354_s17 + $0x94] ss:$8 sps:$4 sm:$0xff]  }
  0xae   : > { %v13825_v49 = vld [vmem:[%s15354_s17 + $0x124] ss:$8 sps:$4 sm:$0xff]   ;;  %v13828_v51 = vld [vmem:[%s15354_s17 + $0x120] ss:$8 sps:$4 sm:$0xff]   ;;  %v13831_v53 = vld [vmem:[%s15354_s17 + $0x134] ss:$8 sps:$4 sm:$0xff]  }
  0xaf   : > { %12318 = vmatpush3.bf16.msra.mxu0 %v15345_v9  ;;  %13469 = vmatpush3.bf16.msra.mxu1 %v15345_v9  ;;  %v13833_v54 = vld [vmem:[%s15354_s17 + $0x90] ss:$8 sps:$4 sm:$0xff]   ;;  %v13835_v56 = vld [vmem:[%s15354_s17 + $0x144] ss:$8 sps:$4 sm:$0xff]   ;;  %v13837_v58 = vld [vmem:[%s15354_s17 + $0x200] ss:$8 sps:$4 sm:$0xff]  }
  0xb0   : > { %12319 = vmatprep.subr.bf16.mxu0 %v15352_v10  ;;  %13462 = vmatprep.subr.bf16.mxu1 %v15352_v10  ;;  %v13834_v55 = vld [vmem:[%s15354_s17 + $0x130] ss:$8 sps:$4 sm:$0xff]   ;;  %v13839_v57 = vld [vmem:[%s15354_s17 + $0x204] ss:$8 sps:$4 sm:$0xff]   ;;  %v13840_v59 = vld [vmem:[%s15354_s17 + $0x140] ss:$8 sps:$4 sm:$0xff]  }
  0xb1   : > { %v13841_v60 = vld [vmem:[%s15354_s17 + $0x154] ss:$8 sps:$4 sm:$0xff]   ;;  %v13845_v62 = vld [vmem:[%s15354_s17 + $0x150] ss:$8 sps:$4 sm:$0xff]   ;;  %v13847_v11 = vld [vmem:[%s15354_s17 + $0x164] ss:$8 sps:$4 sm:$0xff]  }
  0xb2   : > { %v13843_v61 = vld [vmem:[%s15354_s17 + $0x214] ss:$8 sps:$4 sm:$0xff]   ;;  %v13846_v63 = vld [vmem:[%s15354_s17 + $0x210] ss:$8 sps:$4 sm:$0xff]   ;;  %v13849_v12 = vld [vmem:[%s15354_s17 + $0x224] ss:$8 sps:$4 sm:$0xff]  }
  0xb3   : > { %12320 = vmatpush3.bf16.msra.mxu0 %v15363_v13  ;;  %13470 = vmatpush3.bf16.msra.mxu1 %v15363_v13  ;;  %s11168_s19 = sshll.u32 %s11158_s24, 2 }
  0xb4   : > { %12321 = vmatprep.subr.bf16.mxu0 %v15370_v14  ;;  %13463 = vmatprep.subr.bf16.mxu1 %v15370_v14  ;;  %p1468_p8 = scmp.lt.s32.totalorder %s11168_s19, 7 }
  0xb6   : > { %s18654_s19 = smov (!%p1468_p8, %s11168_s19), 7 }
  0xb7   : > { %12322 = vmatpush3.bf16.msra.mxu0 %v15377_v15  ;;  %13471 = vmatpush3.bf16.msra.mxu1 %v15377_v15  ;;  %s13729_s20 = smul.u32 24, %s18654_s19 }
  0xb8   : > { %12323 = vmatprep.subr.bf16.mxu0 %v15384_v16  ;;  %13464 = vmatprep.subr.bf16.mxu1 %v15384_v16 }
  0xb9   : > { %s18476_s26 = scalar_lea.vmem %s18518_s12, %s13729_s20 }
  0xbb   : > { %12324 = vmatpush3.bf16.msra.mxu0 %v15391_v17  ;;  %13472 = vmatpush3.bf16.msra.mxu1 %v15391_v17 }
  0xbc   : > { %12421 = vmatprep.subr.bf16.mxu1 %v15283_v0  ;;  %12533 = vmatprep.subr.bf16.mxu0 %v15283_v0 }
  0xbe   : > { %1835 = vmatmul.mubr.bf16.vlgmr.msra.gmra.mrb[0].mxu0 %v13775_v18  ;;  %1915 = vmatmul.mubr.bf16.vlgmr.msra.gmra.mrb[0].mxu1 %v13778_v19  ;;  %v13852_v18 = vld [vmem:[%s15354_s17 + $0x220] ss:$8 sps:$4 sm:$0xff]  }
  0xbf   : > { %12422 = vmatpush3.bf16.msra.mxu1 %v15288_v1  ;;  %1842 = vmatprep.mubr.bf16.mxu0 %v13781_v20  ;;  %v13875_v19 = vld [vmem:[%s15354_s17 + $0x1a0] ss:$8 sps:$4 sm:$0xff]  }
  0xc0   : > { %1922 = vmatprep.mubr.bf16.mxu1 %v13783_v21  ;;  %12534 = vmatpush3.bf16.msra.mxu0 %v15288_v1  ;;  %v13876_v20 = vld [vmem:[%s15354_s17 + $0x260] ss:$8 sps:$4 sm:$0xff]   ;;  %v13877_v21 = vld [vmem:[%s15354_s17 + $0x1b4] ss:$8 sps:$4 sm:$0xff]  }
  0xc1   : > { %12423 = vmatprep.subr.bf16.mxu1 %v15295_v2  ;;  %12535 = vmatprep.subr.bf16.mxu0 %v15295_v2 }
  0xc3   : > { %12424 = vmatpush3.bf16.msra.mxu1 %v15302_v3 }
  0xc4   : > { %12425 = vmatprep.subr.bf16.mxu1 %v15309_v4  ;;  %12536 = vmatpush3.bf16.msra.mxu0 %v15302_v3 }
  0xc5   : > { %12537 = vmatprep.subr.bf16.mxu0 %v15309_v4 }
  0xc6   : > { %1843 = vmatmul.mubr.bf16.gmra.mrb[4].mxu0 %v13785_v22  ;;  %1923 = vmatmul.mubr.bf16.gmra.mrb[4].mxu1 %v13786_v23  ;;  %v13879_v22 = vld [vmem:[%s15354_s17 + $0x274] ss:$8 sps:$4 sm:$0xff]   ;;  %v13881_v23 = vld [vmem:[%s15354_s17 + $0x1b0] ss:$8 sps:$4 sm:$0xff]  }
  0xc7   : > { %1850 = vmatprep.mubr.bf16.mxu0 %v13787_v24  ;;  %1930 = vmatprep.mubr.bf16.mxu1 %v13789_v25  ;;  %v13882_v24 = vld [vmem:[%s15354_s17 + $0x270] ss:$8 sps:$4 sm:$0xff]   ;;  %v13883_v25 = vld [vmem:[%s15354_s17 + $0x1c4] ss:$8 sps:$4 sm:$0xff]  }
  0xc8   : > { %12426 = vmatpush3.bf16.msra.mxu1 %v15316_v5  ;;  %12538 = vmatpush3.bf16.msra.mxu0 %v15316_v5 }
  0xc9   : > { %12427 = vmatprep.subr.bf16.mxu1 %v15323_v6  ;;  %12539 = vmatprep.subr.bf16.mxu0 %v15323_v6 }
  0xcc   : > { %12428 = vmatpush3.bf16.msra.mxu1 %v15331_v7  ;;  %12540 = vmatpush3.bf16.msra.mxu0 %v15331_v7 }
  0xcd   : > { %12429 = vmatprep.subr.bf16.mxu1 %v15338_v8  ;;  %12541 = vmatprep.subr.bf16.mxu0 %v15338_v8 }
  0xce   : > { %1851 = vmatmul.mubr.bf16.gmra.mrb[8].mxu0 %v13791_v26  ;;  %1931 = vmatmul.mubr.bf16.gmra.mrb[8].mxu1 %v13792_v27  ;;  %v13885_v26 = vld [vmem:[%s15354_s17 + $0x284] ss:$8 sps:$4 sm:$0xff]   ;;  %v13887_v27 = vld [vmem:[%s15354_s17 + $0x1c0] ss:$8 sps:$4 sm:$0xff]  }
  0xcf   : > { %1858 = vmatprep.mubr.bf16.mxu0 %v13793_v28  ;;  %1938 = vmatprep.mubr.bf16.mxu1 %v13795_v29  ;;  %v13888_v28 = vld [vmem:[%s15354_s17 + $0x280] ss:$8 sps:$4 sm:$0xff]   ;;  %v13889_v29 = vld [vmem:[%s15354_s17 + $0x1d4] ss:$8 sps:$4 sm:$0xff]  }
  0xd0   : > { %12430 = vmatpush3.bf16.msra.mxu1 %v15345_v9  ;;  %12542 = vmatpush3.bf16.msra.mxu0 %v15345_v9 }
  0xd1   : > { %12431 = vmatprep.subr.bf16.mxu1 %v15352_v10  ;;  %12543 = vmatprep.subr.bf16.mxu0 %v15352_v10 }
  0xd4   : > { %12432 = vmatpush3.bf16.msra.mxu1 %v15363_v13  ;;  %12544 = vmatpush3.bf16.msra.mxu0 %v15363_v13 }
  0xd5   : > { %12433 = vmatprep.subr.bf16.mxu1 %v15370_v14  ;;  %12545 = vmatprep.subr.bf16.mxu0 %v15370_v14 }
  0xd6   : > { %1859 = vmatmul.mubr.bf16.gmra.mrb[12].mxu0 %v13797_v30  ;;  %1939 = vmatmul.mubr.bf16.gmra.mrb[12].mxu1 %v13798_v31  ;;  %v13891_v30 = vld [vmem:[%s15354_s17 + $0x294] ss:$8 sps:$4 sm:$0xff]   ;;  %v13893_v31 = vld [vmem:[%s15354_s17 + $0x1d0] ss:$8 sps:$4 sm:$0xff]  }
  0xd7   : > { %1866 = vmatprep.mubr.bf16.mxu0 %v13799_v32  ;;  %1946 = vmatprep.mubr.bf16.mxu1 %v13801_v33  ;;  %v13894_v32 = vld [vmem:[%s15354_s17 + $0x290] ss:$8 sps:$4 sm:$0xff]   ;;  %v13895_v33 = vld [vmem:[%s15354_s17 + $0x1e4] ss:$8 sps:$4 sm:$0xff]  }
  0xd8   : > { %12434 = vmatpush3.bf16.msra.mxu1 %v15377_v15  ;;  %12546 = vmatpush3.bf16.msra.mxu0 %v15377_v15 }
  0xd9   : > { %12435 = vmatprep.subr.bf16.mxu1 %v15384_v16  ;;  %12547 = vmatprep.subr.bf16.mxu0 %v15384_v16 }
  0xdc   : > { %12436 = vmatpush3.bf16.msra.mxu1 %v15391_v17  ;;  %12548 = vmatpush3.bf16.msra.mxu0 %v15391_v17 }
  0xdd   : > { %12645 = vmatprep.subr.bf16.mxu1 %v15283_v0  ;;  %12757 = vmatprep.subr.bf16.mxu0 %v15283_v0 }
  0xde   : > { %1867 = vmatmul.mubr.bf16.gmra.mrb[16].mxu0 %v13803_v34  ;;  %1947 = vmatmul.mubr.bf16.gmra.mrb[16].mxu1 %v13804_v35  ;;  %v13897_v34 = vld [vmem:[%s15354_s17 + $0x2a4] ss:$8 sps:$4 sm:$0xff]   ;;  %v13899_v35 = vld [vmem:[%s15354_s17 + $0x1e0] ss:$8 sps:$4 sm:$0xff]  }
  0xdf   : > { %1874 = vmatprep.mubr.bf16.mxu0 %v13805_v36  ;;  %1954 = vmatprep.mubr.bf16.mxu1 %v13807_v37  ;;  %v13900_v36 = vld [vmem:[%s15354_s17 + $0x2a0] ss:$8 sps:$4 sm:$0xff]   ;;  %v13901_v37 = vld [vmem:[%s15354_s17 + $0x1f4] ss:$8 sps:$4 sm:$0xff]  }
  0xe6   : > { %1875 = vmatmul.mubr.bf16.gmra.mrb[20].mxu0 %v13809_v38  ;;  %1955 = vmatmul.mubr.bf16.gmra.mrb[20].mxu1 %v13810_v39  ;;  %v13903_v38 = vld [vmem:[%s15354_s17 + $0x2b4] ss:$8 sps:$4 sm:$0xff]   ;;  %v13905_v39 = vld [vmem:[%s15354_s17 + $0x1f0] ss:$8 sps:$4 sm:$0xff]  }
  0xe7   : > { %1882 = vmatprep.mubr.bf16.mxu0 %v13811_v40  ;;  %2253 = vmatprep.mubr.bf16.mxu1 %v13815_v41  ;;  %v13906_v40 = vld [vmem:[%s15354_s17 + $0x2b0] ss:$8 sps:$4 sm:$0xff]   ;;  %v13907_v41 = vld [vmem:[%s15354_s17 + $0x2c4] ss:$8 sps:$4 sm:$0xff]  }
  0xee   : > { %1883 = vmatmul.mubr.bf16.gmra.mrb[24].mxu0 %v13816_v43  ;;  %2254 = vmatmul.mubr.bf16.vlgmr.msra.gmra.mrb[24].mxu1 %v13813_v42  ;;  %v13911_v42 = vld [vmem:[%s15354_s17 + $0x304] ss:$8 sps:$4 sm:$0xff]   ;;  %v13909_v43 = vld [vmem:[%s15354_s17 + $0x300] ss:$8 sps:$4 sm:$0xff]  }
  0xef   : > { %12646 = vmatpush3.bf16.msra.mxu1 %v15288_v1  ;;  %1890 = vmatprep.mubr.bf16.mxu0 %v13817_v44  ;;  %v13912_v44 = vld [vmem:[%s15354_s17 + $0x2c0] ss:$8 sps:$4 sm:$0xff]  }
  0xf0   : > { %2261 = vmatprep.mubr.bf16.mxu1 %v13819_v45  ;;  %12647 = vmatprep.subr.bf16.mxu1 %v15295_v2  ;;  %v13913_v45 = vld [vmem:[%s15354_s17 + $0x2d4] ss:$8 sps:$4 sm:$0xff]  }
  0xf3   : > { %12648 = vmatpush3.bf16.msra.mxu1 %v15302_v3 }
  0xf4   : > { %12649 = vmatprep.subr.bf16.mxu1 %v15309_v4 }
  0xf6   : > { %1891 = vmatmul.mubr.bf16.gmra.mrb[28].mxu0 %v13821_v46  ;;  %2262 = vmatmul.mubr.bf16.gmra.mrb[28].mxu1 %v13822_v47  ;;  %v13915_v46 = vld [vmem:[%s15354_s17 + $0x314] ss:$8 sps:$4 sm:$0xff]  }
  0xf7   : > { %1898 = vmatprep.mubr.bf16.mxu0 %v13823_v48  ;;  %2269 = vmatprep.mubr.bf16.mxu1 %v13825_v49  ;;  %v15563_v47 = vld [vmem:[%s18507_s1] sm:$0xff]  }
  0xf8   : > { %12650 = vmatpush3.bf16.msra.mxu1 %v15316_v5  ;;  %v13917_v48 = vld [vmem:[%s15354_s17 + $0x2d0] ss:$8 sps:$4 sm:$0xff]  }
  0xf9   : > { %12651 = vmatprep.subr.bf16.mxu1 %v15323_v6  ;;  %v13918_v49 = vld [vmem:[%s15354_s17 + $0x310] ss:$8 sps:$4 sm:$0xff]  }
  0xfc   : > { %12652 = vmatpush3.bf16.msra.mxu1 %v15331_v7 }
  0xfd   : > { %12653 = vmatprep.subr.bf16.mxu1 %v15338_v8 }
  0xfe   : > { %1899 = vmatmul.mubr.bf16.gmra.mrb[32].mxu0 %v13827_v50  ;;  %2270 = vmatmul.mubr.bf16.gmra.mrb[32].mxu1 %v13828_v51  ;;  %v15571_v50 = vld [vmem:[%s18507_s1 + $0x48] sm:$0xff]   ;;  %v13919_v51 = vld [vmem:[%s15354_s17 + $0x2e4] ss:$8 sps:$4 sm:$0xff]  }
  0xff   : > { %1906 = vmatprep.mubr.bf16.mxu0 %v13829_v52  ;;  %2277 = vmatprep.mubr.bf16.mxu1 %v13831_v53  ;;  %v13921_v52 = vld [vmem:[%s15354_s17 + $0x324] ss:$8 sps:$4 sm:$0xff]   ;;  %v15579_v53 = vld [vmem:[%s18507_s1 + $0x8] sm:$0xff]  }
 0x100   : > { %12654 = vmatpush3.bf16.msra.mxu1 %v15345_v9 }
 0x101   : > { %12655 = vmatprep.subr.bf16.mxu1 %v15352_v10 }
 0x104   : > { %12656 = vmatpush3.bf16.msra.mxu1 %v15363_v13 }
 0x105   : > { %12657 = vmatprep.subr.bf16.mxu1 %v15370_v14 }
 0x106   : > { %1907 = vmatmul.mubr.bf16.gmra.mrb[36].mxu0 %v13833_v54  ;;  %2278 = vmatmul.mubr.bf16.gmra.mrb[36].mxu1 %v13834_v55  ;;  %v15585_v54 = vld [vmem:[%s18507_s1 + $0x50] sm:$0xff]  }
 0x107   : > { %2285 = vmatprep.mubr.bf16.mxu1 %v13835_v56  ;;  %2800 = vmatprep.mubr.bf16.mxu0 %v13839_v57  ;;  %v13923_v55 = vld [vmem:[%s15354_s17 + $0x2e0] ss:$8 sps:$4 sm:$0xff]  }
 0x108   : > { %12658 = vmatpush3.bf16.msra.mxu1 %v15377_v15  ;;  %v13924_v56 = vld [vmem:[%s15354_s17 + $0x320] ss:$8 sps:$4 sm:$0xff]  }
 0x109   : > { %12659 = vmatprep.subr.bf16.mxu1 %v15384_v16  ;;  %v15593_v57 = vld [vmem:[%s18507_s1 + $0x10] sm:$0xff]  }
 0x10c   : > { %12660 = vmatpush3.bf16.msra.mxu1 %v15391_v17 }
 0x10d   : > { %12869 = vmatprep.subr.bf16.mxu1 %v15283_v0  ;;  %v13851_v0 = vld [vmem:[%s15354_s17 + $0x160] ss:$8 sps:$4 sm:$0xff]  }
 0x10e   : > { %2286 = vmatmul.mubr.bf16.gmra.mrb[40].mxu1 %v13840_v59  ;;  %2801 = vmatmul.mubr.bf16.vlgmr.msra.gmra.mrb[40].mxu0 %v13837_v58  ;;  %v15599_v58 = vld [vmem:[%s18507_s1 + $0x58] sm:$0xff]   ;;  %v13925_v59 = vld [vmem:[%s15354_s17 + $0x2f4] ss:$8 sps:$4 sm:$0xff]  }
 0x10f   : > { %2293 = vmatprep.mubr.bf16.mxu1 %v13841_v60  ;;  %2808 = vmatprep.mubr.bf16.mxu0 %v13843_v61  ;;  %v13927_v60 = vld [vmem:[%s15354_s17 + $0x334] ss:$8 sps:$4 sm:$0xff]   ;;  %v15607_v61 = vld [vmem:[%s18507_s1 + $0x18] sm:$0xff]  }
 0x110   : > { %12758 = vmatpush3.bf16.msra.mxu0 %v15288_v1  ;;  %v13853_v1 = vld [vmem:[%s15354_s17 + $0x174] ss:$8 sps:$4 sm:$0xff]  }
 0x111   : > { %12759 = vmatprep.subr.bf16.mxu0 %v15295_v2  ;;  %v13855_v2 = vld [vmem:[%s15354_s17 + $0x234] ss:$8 sps:$4 sm:$0xff]  }
 0x114   : > { %12760 = vmatpush3.bf16.msra.mxu0 %v15302_v3  ;;  %v13857_v3 = vld [vmem:[%s15354_s17 + $0x170] ss:$8 sps:$4 sm:$0xff]  }
 0x115   : > { %12761 = vmatprep.subr.bf16.mxu0 %v15309_v4  ;;  %v13858_v4 = vld [vmem:[%s15354_s17 + $0x230] ss:$8 sps:$4 sm:$0xff]  }
 0x116   : > { %2294 = vmatmul.mubr.bf16.gmra.mrb[44].mxu1 %v13845_v62  ;;  %2809 = vmatmul.mubr.bf16.gmra.mrb[44].mxu0 %v13846_v63  ;;  %v15613_v62 = vld [vmem:[%s18507_s1 + $0x60] sm:$0xff]  }
 0x117   : > { %2301 = vmatprep.mubr.bf16.mxu1 %v13847_v11  ;;  %2816 = vmatprep.mubr.bf16.mxu0 %v13849_v12  ;;  %v13929_v63 = vld [vmem:[%s15354_s17 + $0x2f0] ss:$8 sps:$4 sm:$0xff]  }
 0x118   : > { %12762 = vmatpush3.bf16.msra.mxu0 %v15316_v5  ;;  %v13859_v5 = vld [vmem:[%s15354_s17 + $0x184] ss:$8 sps:$4 sm:$0xff]   ;;  %v13930_v11 = vld [vmem:[%s15354_s17 + $0x330] ss:$8 sps:$4 sm:$0xff]  }
 0x119   : > { %12763 = vmatprep.subr.bf16.mxu0 %v15323_v6  ;;  %v13861_v6 = vld [vmem:[%s15354_s17 + $0x244] ss:$8 sps:$4 sm:$0xff]   ;;  %v15621_v12 = vld [vmem:[%s18507_s1 + $0x20] sm:$0xff]  }
 0x11c   : > { %12764 = vmatpush3.bf16.msra.mxu0 %v15331_v7  ;;  %v13863_v7 = vld [vmem:[%s15354_s17 + $0x180] ss:$8 sps:$4 sm:$0xff]  }
 0x11d   : > { %12765 = vmatprep.subr.bf16.mxu0 %v15338_v8  ;;  %v13864_v8 = vld [vmem:[%s15354_s17 + $0x240] ss:$8 sps:$4 sm:$0xff]  }
 0x11e   : > { %2302 = vmatmul.mubr.bf16.gmra.mrb[48].mxu1 %v13851_v0  ;;  %2817 = vmatmul.mubr.bf16.gmra.mrb[48].mxu0 %v13852_v18  ;;  %v15627_v0 = vld [vmem:[%s18507_s1 + $0x68] sm:$0xff]   ;;  %v13931_v18 = vld [vmem:[%s15354_s17 + $0x344] ss:$8 sps:$4 sm:$0xff]  }
 0x11f   : > { %2309 = vmatprep.mubr.bf16.mxu1 %v13853_v1  ;;  %2824 = vmatprep.mubr.bf16.mxu0 %v13855_v2  ;;  %v13935_v1 = vld [vmem:[%s15354_s17 + $0x404] ss:$8 sps:$4 sm:$0xff]   ;;  %v15635_v2 = vld [vmem:[%s18507_s1 + $0x28] sm:$0xff]  }
 0x120   : > { %12766 = vmatpush3.bf16.msra.mxu0 %v15345_v9  ;;  %v13865_v9 = vld [vmem:[%s15354_s17 + $0x194] ss:$8 sps:$4 sm:$0xff]  }
 0x121   : > { %12767 = vmatprep.subr.bf16.mxu0 %v15352_v10  ;;  %v13867_v10 = vld [vmem:[%s15354_s17 + $0x254] ss:$8 sps:$4 sm:$0xff]  }
 0x124   : > { %12768 = vmatpush3.bf16.msra.mxu0 %v15363_v13  ;;  %v15525_v13 = vld [vmem:[%s18507_s1 + $0x40] sm:$0xff]  }
 0x125   : > { %12769 = vmatprep.subr.bf16.mxu0 %v15370_v14  ;;  %v13869_v14 = vld [vmem:[%s15354_s17 + $0x190] ss:$8 sps:$4 sm:$0xff]  }
 0x126   : > { %2310 = vmatmul.mubr.bf16.gmra.mrb[52].mxu1 %v13857_v3  ;;  %2825 = vmatmul.mubr.bf16.gmra.mrb[52].mxu0 %v13858_v4  ;;  %v15641_v3 = vld [vmem:[%s18507_s1 + $0x70] sm:$0xff]  }
 0x127   : > { %2317 = vmatprep.mubr.bf16.mxu1 %v13859_v5  ;;  %2832 = vmatprep.mubr.bf16.mxu0 %v13861_v6  ;;  %v13933_v4 = vld [vmem:[%s15354_s17 + $0x400] ss:$8 sps:$4 sm:$0xff]  }
 0x128   : > { %12770 = vmatpush3.bf16.msra.mxu0 %v15377_v15  ;;  %v13870_v15 = vld [vmem:[%s15354_s17 + $0x250] ss:$8 sps:$4 sm:$0xff]   ;;  %v13936_v5 = vld [vmem:[%s15354_s17 + $0x340] ss:$8 sps:$4 sm:$0xff]  }
 0x129   : > { %12771 = vmatprep.subr.bf16.mxu0 %v15384_v16  ;;  %v13871_v16 = vld [vmem:[%s15354_s17 + $0x1a4] ss:$8 sps:$4 sm:$0xff]  }
 0x12a   : > { %v15649_v6 = vld [vmem:[%s18507_s1 + $0x30] sm:$0xff]  }
 0x12c   : > { %12772 = vmatpush3.bf16.msra.mxu0 %v15391_v17  ;;  %v13873_v17 = vld [vmem:[%s15354_s17 + $0x264] ss:$8 sps:$4 sm:$0xff]  }
 0x12d   : > { %12981 = vmatprep.subr.bf16.mxu0 %v15525_v13 }
 0x12e   : > { %2318 = vmatmul.mubr.bf16.gmra.mrb[56].mxu1 %v13863_v7  ;;  %2833 = vmatmul.mubr.bf16.gmra.mrb[56].mxu0 %v13864_v8  ;;  %v15655_v7 = vld [vmem:[%s18507_s1 + $0x78] sm:$0xff]   ;;  %v13937_v8 = vld [vmem:[%s15354_s17 + $0x354] ss:$8 sps:$4 sm:$0xff]  }
 0x12f   : > { %2325 = vmatprep.mubr.bf16.mxu1 %v13865_v9  ;;  %2840 = vmatprep.mubr.bf16.mxu0 %v13867_v10  ;;  %v13939_v9 = vld [vmem:[%s15354_s17 + $0x414] ss:$8 sps:$4 sm:$0xff]   ;;  %v15663_v10 = vld [vmem:[%s18507_s1 + $0x38] sm:$0xff]  }
 0x136   : > { %2326 = vmatmul.mubr.bf16.gmra.mrb[60].mxu1 %v13869_v14  ;;  %2841 = vmatmul.mubr.bf16.gmra.mrb[60].mxu0 %v13870_v15  ;;  %v15670_v14 = vld [vmem:[%s18508_s2] ss:$0 sm:$0xff] }
 0x137   : > { %2333 = vmatprep.mubr.bf16.mxu1 %v13871_v16  ;;  %2848 = vmatprep.mubr.bf16.mxu0 %v13873_v17  ;;  %v13941_v15 = vld [vmem:[%s15354_s17 + $0x350] ss:$8 sps:$4 sm:$0xff]  }
 0x138   : > { %v13942_v16 = vld [vmem:[%s15354_s17 + $0x410] ss:$8 sps:$4 sm:$0xff]  }
 0x13e   : > { %2334 = vmatmul.mubr.bf16.gmra.mrb[64].mxu1 %v13875_v19  ;;  %2849 = vmatmul.mubr.bf16.gmra.mrb[64].mxu0 %v13876_v20 }
 0x13f   : > { %2341 = vmatprep.mubr.bf16.mxu1 %v13877_v21  ;;  %2856 = vmatprep.mubr.bf16.mxu0 %v13879_v22 }
 0x146   : > { %2342 = vmatmul.mubr.bf16.gmra.mrb[68].mxu1 %v13881_v23  ;;  %2857 = vmatmul.mubr.bf16.gmra.mrb[68].mxu0 %v13882_v24  ;;  %v13943_v24 = vld [vmem:[%s15354_s17 + $0x364] ss:$8 sps:$4 sm:$0xff]  }
 0x147   : > { %2349 = vmatprep.mubr.bf16.mxu1 %v13883_v25  ;;  %2864 = vmatprep.mubr.bf16.mxu0 %v13885_v26  ;;  %v13945_v25 = vld [vmem:[%s15354_s17 + $0x424] ss:$8 sps:$4 sm:$0xff]  }
 0x14e   : > { %2350 = vmatmul.mubr.bf16.gmra.mrb[72].mxu1 %v13887_v27  ;;  %2865 = vmatmul.mubr.bf16.gmra.mrb[72].mxu0 %v13888_v28 }
 0x14f   : > { %2357 = vmatprep.mubr.bf16.mxu1 %v13889_v29  ;;  %2872 = vmatprep.mubr.bf16.mxu0 %v13891_v30 }
 0x156   : > { %2358 = vmatmul.mubr.bf16.gmra.mrb[76].mxu1 %v13893_v31  ;;  %2873 = vmatmul.mubr.bf16.gmra.mrb[76].mxu0 %v13894_v32 }
 0x157   : > { %2365 = vmatprep.mubr.bf16.mxu1 %v13895_v33  ;;  %2880 = vmatprep.mubr.bf16.mxu0 %v13897_v34 }
 0x15e   : > { %2366 = vmatmul.mubr.bf16.gmra.mrb[80].mxu1 %v13899_v35  ;;  %2881 = vmatmul.mubr.bf16.gmra.mrb[80].mxu0 %v13900_v36 }
 0x15f   : > { %2373 = vmatprep.mubr.bf16.mxu1 %v13901_v37  ;;  %2888 = vmatprep.mubr.bf16.mxu0 %v13903_v38  ;;  %v13947_v37 = vld [vmem:[%s15354_s17 + $0x360] ss:$8 sps:$4 sm:$0xff]  }
 0x160   : > { %v13948_v38 = vld [vmem:[%s15354_s17 + $0x420] ss:$8 sps:$4 sm:$0xff]  }
 0x166   : > { %2374 = vmatmul.mubr.bf16.gmra.mrb[84].mxu1 %v13905_v39  ;;  %2889 = vmatmul.mubr.bf16.gmra.mrb[84].mxu0 %v13906_v40 }
 0x167   : > { %2896 = vmatprep.mubr.bf16.mxu0 %v13907_v41  ;;  %3347 = vmatprep.mubr.bf16.mxu1 %v13911_v42 }
 0x16e   : > { %2897 = vmatmul.mubr.bf16.gmra.mrb[88].mxu0 %v13912_v44  ;;  %3348 = vmatmul.mubr.bf16.vlgmr.msra.gmra.mrb[88].mxu1 %v13909_v43 }
 0x16f   : > { %12870 = vmatpush3.bf16.msra.mxu1 %v15563_v47  ;;  %2904 = vmatprep.mubr.bf16.mxu0 %v13913_v45 }
 0x170   : > { %3355 = vmatprep.mubr.bf16.mxu1 %v13915_v46  ;;  %12871 = vmatprep.subr.bf16.mxu1 %v15571_v50 }
 0x173   : > { %12872 = vmatpush3.bf16.msra.mxu1 %v15579_v53 }
 0x174   : > { %12873 = vmatprep.subr.bf16.mxu1 %v15585_v54 }
 0x176   : > { %2905 = vmatmul.mubr.bf16.gmra.mrb[92].mxu0 %v13917_v48  ;;  %3356 = vmatmul.mubr.bf16.gmra.mrb[92].mxu1 %v13918_v49  ;;  %v13949_v48 = vld [vmem:[%s15354_s17 + $0x374] ss:$8 sps:$4 sm:$0xff]  }
 0x177   : > { %2912 = vmatprep.mubr.bf16.mxu0 %v13919_v51  ;;  %3363 = vmatprep.mubr.bf16.mxu1 %v13921_v52  ;;  %v13951_v49 = vld [vmem:[%s15354_s17 + $0x434] ss:$8 sps:$4 sm:$0xff]  }
 0x178   : > { %12874 = vmatpush3.bf16.msra.mxu1 %v15593_v57 }
 0x179   : > { %12875 = vmatprep.subr.bf16.mxu1 %v15599_v58 }
 0x17c   : > { %12876 = vmatpush3.bf16.msra.mxu1 %v15607_v61 }
 0x17d   : > { %12877 = vmatprep.subr.bf16.mxu1 %v15613_v62 }
 0x17e   : > { %2913 = vmatmul.mubr.bf16.gmra.mrb[96].mxu0 %v13923_v55  ;;  %3364 = vmatmul.mubr.bf16.gmra.mrb[96].mxu1 %v13924_v56 }
 0x17f   : > { %2920 = vmatprep.mubr.bf16.mxu0 %v13925_v59  ;;  %3371 = vmatprep.mubr.bf16.mxu1 %v13927_v60 }
 0x180   : > { %12878 = vmatpush3.bf16.msra.mxu1 %v15621_v12 }
 0x181   : > { %12879 = vmatprep.subr.bf16.mxu1 %v15627_v0 }
 0x184   : > { %12880 = vmatpush3.bf16.msra.mxu1 %v15635_v2 }
 0x185   : > { %12881 = vmatprep.subr.bf16.mxu1 %v15641_v3 }
 0x186   : > { %2921 = vmatmul.mubr.bf16.gmra.mrb[100].mxu0 %v13929_v63  ;;  %3372 = vmatmul.mubr.bf16.gmra.mrb[100].mxu1 %v13930_v11  ;;  %v13954_v63 = vld [vmem:[%s15354_s17 + $0x430] ss:$8 sps:$4 sm:$0xff]  }
 0x187   : > { %3379 = vmatprep.mubr.bf16.mxu1 %v13931_v18  ;;  %3894 = vmatprep.mubr.bf16.mxu0 %v13935_v1 }
 0x188   : > { %12882 = vmatpush3.bf16.msra.mxu1 %v15649_v6 }
 0x189   : > { %12883 = vmatprep.subr.bf16.mxu1 %v15655_v7 }
 0x18c   : > { %12884 = vmatpush3.bf16.msra.mxu1 %v15663_v10 }
 0x18d   : > { %13093 = vmatprep.subr.bf16.mxu1 %v15525_v13 }
 0x18e   : > { %3380 = vmatmul.mubr.bf16.gmra.mrb[104].mxu1 %v13936_v5  ;;  %3895 = vmatmul.mubr.bf16.vlgmr.msra.gmra.mrb[104].mxu0 %v13933_v4 }
 0x18f   : > { %3387 = vmatprep.mubr.bf16.mxu1 %v13937_v8  ;;  %3902 = vmatprep.mubr.bf16.mxu0 %v13939_v9 }
 0x190   : > { %12982 = vmatpush3.bf16.msra.mxu0 %v15563_v47 }
 0x191   : > { %v12385_v17 = vpop.f32.mrb[0].mxu1  ;;  %v12325_v19 = vpop.f32.mrb[0].mxu0  ;;  %12983 = vmatprep.subr.bf16.mxu0 %v15571_v50 }
 0x192   : > { %v12386_v13 = vpop.f32.mrb[1].mxu1  ;;  %v12326_v20 = vpop.f32.mrb[1].mxu0 }
 0x193   : > { %v12387_v21 = vadd.f32 %v12386_v13, %v12385_v17  ;;  %v12388_v22 = vpop.f32.mrb[2].mxu1  ;;  %v12328_v23 = vpop.f32.mrb[2].mxu0  ;;  %v12327_v26 = vadd.f32 %v12326_v20, %v12325_v19  ;;  %v13957_v17 = vld [vmem:[%s15354_s17 + $0x444] ss:$8 sps:$4 sm:$0xff]  }
 0x194   : > { %v12389_v27 = vpop.f32.mrb[3].mxu1  ;;  %v12329_v28 = vpop.f32.mrb[3].mxu0  ;;  %12984 = vmatpush3.bf16.msra.mxu0 %v15579_v53 }
 0x195   : > { %v1917_v29 = vadd.f32 %v12387_v21, %v15670_v14  ;;  %v12390_v30 = vadd.f32 %v12389_v27, %v12388_v22  ;;  %12985 = vmatprep.subr.bf16.mxu0 %v15585_v54  ;;  %v1837_v31 = vadd.f32 %v12327_v26, %v15670_v14  ;;  %v12330_v32 = vadd.f32 %v12329_v28, %v12328_v23  ;;  %v13960_v27 = vld [vmem:[%s15354_s17 + $0x440] ss:$8 sps:$4 sm:$0xff]  }
 0x196   : > { %3388 = vmatmul.mubr.bf16.gmra.mrb[108].mxu1 %v13941_v15  ;;  %3903 = vmatmul.mubr.bf16.gmra.mrb[108].mxu0 %v13942_v16  ;;  %v13955_v16 = vld [vmem:[%s15354_s17 + $0x384] ss:$8 sps:$4 sm:$0xff]  }
 0x197   : > { %v1920_v33 = vadd.f32 %v12390_v30, %v15670_v14  ;;  %3395 = vmatprep.mubr.bf16.mxu1 %v13943_v24  ;;  %3910 = vmatprep.mubr.bf16.mxu0 %v13945_v25  ;;  %v1963_v34 = vmax.f32 %v1837_v31, 0.0  ;;  %v1840_v35 = vadd.f32 %v12330_v32, %v15670_v14  ;;  %v1983_v36 = vmax.f32 %v1917_v29, 0.0 }
 0x198   : > { %12986 = vmatpush3.bf16.msra.mxu0 %v15593_v57 }
 0x199   : > { %v12391_v39 = vpop.f32.mrb[4].mxu1  ;;  %v12331_v40 = vpop.f32.mrb[4].mxu0  ;;  %12987 = vmatprep.subr.bf16.mxu0 %v15599_v58  ;;  %1996 = vst.msk [vmem:[#allocation2] sm:$0xff] %vm1995_vm0, %v1963_v34  ;;  %v1964_v41 = vmax.f32 %v1840_v35, 0.0  ;;  %2016 = vst.msk [vmem:[#allocation2 + $0x140] sm:$0xff] %vm1995_vm0, %v1983_v36  ;;  %v1984_v42 = vmax.f32 %v1920_v33, 0.0 }
 0x19a   : > { %v12392_v43 = vpop.f32.mrb[5].mxu1  ;;  %v12332_v44 = vpop.f32.mrb[5].mxu0  ;;  %v13961_v36 = vld [vmem:[%s15354_s17 + $0x394] ss:$8 sps:$4 sm:$0xff]  }
 0x19b   : > { %v12393_v45 = vadd.f32 %v12392_v43, %v12391_v39  ;;  %v12394_v46 = vpop.f32.mrb[6].mxu1  ;;  %v12334_v47 = vpop.f32.mrb[6].mxu0  ;;  %1997 = vst.msk [vmem:[#allocation2 + $0x10] sm:$0xff] %vm1995_vm0, %v1964_v41  ;;  %v12333_v50 = vadd.f32 %v12332_v44, %v12331_v40  ;;  %2017 = vst.msk [vmem:[#allocation2 + $0x150] sm:$0xff] %vm1995_vm0, %v1984_v42 }
 0x19c   : > { %v12395_v51 = vpop.f32.mrb[7].mxu1  ;;  %v12335_v52 = vpop.f32.mrb[7].mxu0  ;;  %12988 = vmatpush3.bf16.msra.mxu0 %v15607_v61  ;;  %v13953_v61 = vld [vmem:[%s15354_s17 + $0x370] ss:$8 sps:$4 sm:$0xff]  }
 0x19d   : > { %v1925_v53 = vadd.f32 %v12393_v45, %v15670_v14  ;;  %v12396_v54 = vadd.f32 %v12395_v51, %v12394_v46  ;;  %12989 = vmatprep.subr.bf16.mxu0 %v15613_v62  ;;  %v1845_v55 = vadd.f32 %v12333_v50, %v15670_v14  ;;  %v12336_v56 = vadd.f32 %v12335_v52, %v12334_v47  ;;  %v13965_v47 = vld [vmem:[%s15354_s17 + $0x390] ss:$8 sps:$4 sm:$0xff]  }
 0x19e   : > { %3396 = vmatmul.mubr.bf16.gmra.mrb[112].mxu1 %v13947_v37  ;;  %3911 = vmatmul.mubr.bf16.gmra.mrb[112].mxu0 %v13948_v38  ;;  %v13963_v37 = vld [vmem:[%s15354_s17 + $0x454] ss:$8 sps:$4 sm:$0xff]  }
 0x19f   : > { %v1928_v57 = vadd.f32 %v12396_v54, %v15670_v14  ;;  %3403 = vmatprep.mubr.bf16.mxu1 %v13949_v48  ;;  %3918 = vmatprep.mubr.bf16.mxu0 %v13951_v49  ;;  %v1965_v58 = vmax.f32 %v1845_v55, 0.0  ;;  %v1848_v59 = vadd.f32 %v12336_v56, %v15670_v14  ;;  %v1985_v60 = vmax.f32 %v1925_v53, 0.0 }
 0x1a0   : > { %12990 = vmatpush3.bf16.msra.mxu0 %v15621_v12 }
 0x1a1   : > { %v12397_v62 = vpop.f32.mrb[8].mxu1  ;;  %v12337_v11 = vpop.f32.mrb[8].mxu0  ;;  %12991 = vmatprep.subr.bf16.mxu0 %v15627_v0  ;;  %1998 = vst.msk [vmem:[#allocation2 + $0x20] sm:$0xff] %vm1995_vm0, %v1965_v58  ;;  %v1966_v18 = vmax.f32 %v1848_v59, 0.0  ;;  %2018 = vst.msk [vmem:[#allocation2 + $0x160] sm:$0xff] %vm1995_vm0, %v1985_v60  ;;  %v1986_v1 = vmax.f32 %v1928_v57, 0.0 }
 0x1a2   : > { %v12398_v4 = vpop.f32.mrb[9].mxu1  ;;  %v12338_v5 = vpop.f32.mrb[9].mxu0  ;;  %v13967_v57 = vld [vmem:[%s15354_s17 + $0x3a4] ss:$8 sps:$4 sm:$0xff]  }
 0x1a3   : > { %v12399_v8 = vadd.f32 %v12398_v4, %v12397_v62  ;;  %v12400_v9 = vpop.f32.mrb[10].mxu1  ;;  %v12340_v15 = vpop.f32.mrb[10].mxu0  ;;  %1999 = vst.msk [vmem:[#allocation2 + $0x30] sm:$0xff] %vm1995_vm0, %v1966_v18  ;;  %v12339_v12 = vadd.f32 %v12338_v5, %v12337_v11  ;;  %2019 = vst.msk [vmem:[#allocation2 + $0x170] sm:$0xff] %vm1995_vm0, %v1986_v1  ;;  %v13969_v58 = vld [vmem:[%s15354_s17 + $0x464] ss:$8 sps:$4 sm:$0xff]  }
 0x1a4   : > { %v12401_v19 = vpop.f32.mrb[11].mxu1  ;;  %v12341_v0 = vpop.f32.mrb[11].mxu0  ;;  %12992 = vmatpush3.bf16.msra.mxu0 %v15635_v2  ;;  %v13959_v2 = vld [vmem:[%s15354_s17 + $0x380] ss:$8 sps:$4 sm:$0xff]  }
 0x1a5   : > { %v1933_v13 = vadd.f32 %v12399_v8, %v15670_v14  ;;  %v12402_v20 = vadd.f32 %v12401_v19, %v12400_v9  ;;  %12993 = vmatprep.subr.bf16.mxu0 %v15641_v3  ;;  %v1853_v21 = vadd.f32 %v12339_v12, %v15670_v14  ;;  %v12342_v22 = vadd.f32 %v12341_v0, %v12340_v15  ;;  %v13971_v9 = vld [vmem:[%s15354_s17 + $0x3a0] ss:$8 sps:$4 sm:$0xff]  }
 0x1a6   : > { %3404 = vmatmul.mubr.bf16.gmra.mrb[116].mxu1 %v13953_v61  ;;  %3919 = vmatmul.mubr.bf16.gmra.mrb[116].mxu0 %v13954_v63  ;;  %v13972_v15 = vld [vmem:[%s15354_s17 + $0x460] ss:$8 sps:$4 sm:$0xff]  }
 0x1a7   : > { %v1936_v23 = vadd.f32 %v12402_v20, %v15670_v14  ;;  %3411 = vmatprep.mubr.bf16.mxu1 %v13955_v16  ;;  %3926 = vmatprep.mubr.bf16.mxu0 %v13957_v17  ;;  %v1967_v24 = vmax.f32 %v1853_v21, 0.0  ;;  %v1856_v25 = vadd.f32 %v12342_v22, %v15670_v14  ;;  %v1987_v26 = vmax.f32 %v1933_v13, 0.0 }
 0x1a8   : > { %12994 = vmatpush3.bf16.msra.mxu0 %v15649_v6 }
 0x1a9   : > { %v12403_v3 = vpop.f32.mrb[12].mxu1  ;;  %v12343_v28 = vpop.f32.mrb[12].mxu0  ;;  %12995 = vmatprep.subr.bf16.mxu0 %v15655_v7  ;;  %2000 = vst.msk [vmem:[#allocation2 + $0x40] sm:$0xff] %vm1995_vm0, %v1967_v24  ;;  %v1968_v29 = vmax.f32 %v1856_v25, 0.0  ;;  %2020 = vst.msk [vmem:[#allocation2 + $0x180] sm:$0xff] %vm1995_vm0, %v1987_v26  ;;  %v1988_v30 = vmax.f32 %v1936_v23, 0.0 }
 0x1aa   : > { %v12404_v31 = vpop.f32.mrb[13].mxu1  ;;  %v12344_v32 = vpop.f32.mrb[13].mxu0  ;;  %v13973_v23 = vld [vmem:[%s15354_s17 + $0x3b4] ss:$8 sps:$4 sm:$0xff]  }
 0x1ab   : > { %v12405_v33 = vadd.f32 %v12404_v31, %v12403_v3  ;;  %v12406_v34 = vpop.f32.mrb[14].mxu1  ;;  %v12346_v35 = vpop.f32.mrb[14].mxu0  ;;  %2001 = vst.msk [vmem:[#allocation2 + $0x50] sm:$0xff] %vm1995_vm0, %v1968_v29  ;;  %v12345_v6 = vadd.f32 %v12344_v32, %v12343_v28  ;;  %2021 = vst.msk [vmem:[#allocation2 + $0x190] sm:$0xff] %vm1995_vm0, %v1988_v30  ;;  %v13975_v24 = vld [vmem:[%s15354_s17 + $0x474] ss:$8 sps:$4 sm:$0xff]  }
 0x1ac   : > { %v12407_v7 = vpop.f32.mrb[15].mxu1  ;;  %v12347_v38 = vpop.f32.mrb[15].mxu0  ;;  %12996 = vmatpush3.bf16.msra.mxu0 %v15663_v10  ;;  %v13966_v10 = vld [vmem:[%s15354_s17 + $0x450] ss:$8 sps:$4 sm:$0xff]  }
 0x1ad   : > { %v1941_v39 = vadd.f32 %v12405_v33, %v15670_v14  ;;  %v12408_v40 = vadd.f32 %v12407_v7, %v12406_v34  ;;  %v1861_v41 = vadd.f32 %v12345_v6, %v15670_v14  ;;  %v12348_v42 = vadd.f32 %v12347_v38, %v12346_v35  ;;  %v13977_v34 = vld [vmem:[%s15354_s17 + $0x3b0] ss:$8 sps:$4 sm:$0xff]  }
 0x1ae   : > { %3412 = vmatmul.mubr.bf16.gmra.mrb[120].mxu1 %v13959_v2  ;;  %3927 = vmatmul.mubr.bf16.gmra.mrb[120].mxu0 %v13960_v27  ;;  %v13978_v35 = vld [vmem:[%s15354_s17 + $0x470] ss:$8 sps:$4 sm:$0xff]  }
 0x1af   : > { %v1944_v43 = vadd.f32 %v12408_v40, %v15670_v14  ;;  %3419 = vmatprep.mubr.bf16.mxu1 %v13961_v36  ;;  %3934 = vmatprep.mubr.bf16.mxu0 %v13963_v37  ;;  %v1969_v44 = vmax.f32 %v1861_v41, 0.0  ;;  %v1864_v45 = vadd.f32 %v12348_v42, %v15670_v14  ;;  %v1989_v46 = vmax.f32 %v1941_v39, 0.0 }
 0x1b1   : > { %v12409_v48 = vpop.f32.mrb[16].mxu1  ;;  %v12349_v49 = vpop.f32.mrb[16].mxu0  ;;  %2002 = vst.msk [vmem:[#allocation2 + $0x60] sm:$0xff] %vm1995_vm0, %v1969_v44  ;;  %v1970_v50 = vmax.f32 %v1864_v45, 0.0  ;;  %2022 = vst.msk [vmem:[#allocation2 + $0x1a0] sm:$0xff] %vm1995_vm0, %v1989_v46  ;;  %v1990_v51 = vmax.f32 %v1944_v43, 0.0 }
 0x1b2   : > { %v12410_v52 = vpop.f32.mrb[17].mxu1  ;;  %v12350_v53 = vpop.f32.mrb[17].mxu0  ;;  %v13979_v43 = vld [vmem:[%s15354_s17 + $0x3c4] ss:$8 sps:$4 sm:$0xff]  }
 0x1b3   : > { %v12411_v54 = vadd.f32 %v12410_v52, %v12409_v48  ;;  %v12412_v55 = vpop.f32.mrb[18].mxu1  ;;  %v12352_v56 = vpop.f32.mrb[18].mxu0  ;;  %2003 = vst.msk [vmem:[#allocation2 + $0x70] sm:$0xff] %vm1995_vm0, %v1970_v50  ;;  %v12351_v59 = vadd.f32 %v12350_v53, %v12349_v49  ;;  %2023 = vst.msk [vmem:[#allocation2 + $0x1b0] sm:$0xff] %vm1995_vm0, %v1990_v51  ;;  %v13981_v44 = vld [vmem:[%s15354_s17 + $0x484] ss:$8 sps:$4 sm:$0xff]  }
 0x1b4   : > { %v12413_v60 = vpop.f32.mrb[19].mxu1  ;;  %v12353_v61 = vpop.f32.mrb[19].mxu0 }
 0x1b5   : > { %v1949_v63 = vadd.f32 %v12411_v54, %v15670_v14  ;;  %v12414_v62 = vadd.f32 %v12413_v60, %v12412_v55  ;;  %v1869_v11 = vadd.f32 %v12351_v59, %v15670_v14  ;;  %v12354_v18 = vadd.f32 %v12353_v61, %v12352_v56  ;;  %v13983_v55 = vld [vmem:[%s15354_s17 + $0x3c0] ss:$8 sps:$4 sm:$0xff]   ;;  %v13985_v59 = vld [vmem:[%s15354_s17 + $0x3d4] ss:$8 sps:$4 sm:$0xff]  }
 0x1b6   : > { %3420 = vmatmul.mubr.bf16.gmra.mrb[124].mxu1 %v13965_v47  ;;  %3935 = vmatmul.mubr.bf16.gmra.mrb[124].mxu0 %v13966_v10  ;;  %v13984_v56 = vld [vmem:[%s15354_s17 + $0x480] ss:$8 sps:$4 sm:$0xff]  }
 0x1b7   : > { %v1952_v1 = vadd.f32 %v12414_v62, %v15670_v14  ;;  %3427 = vmatprep.mubr.bf16.mxu1 %v13967_v57  ;;  %3942 = vmatprep.mubr.bf16.mxu0 %v13969_v58  ;;  %v1971_v4 = vmax.f32 %v1869_v11, 0.0  ;;  %v1872_v5 = vadd.f32 %v12354_v18, %v15670_v14  ;;  %v1991_v8 = vmax.f32 %v1949_v63, 0.0 }
 0x1b9   : > { %v12415_v16 = vpop.f32.mrb[20].mxu1  ;;  %v12355_v17 = vpop.f32.mrb[20].mxu0  ;;  %2004 = vst.msk [vmem:[#allocation2 + $0x80] sm:$0xff] %vm1995_vm0, %v1971_v4  ;;  %v1972_v12 = vmax.f32 %v1872_v5, 0.0  ;;  %2024 = vst.msk [vmem:[#allocation2 + $0x1c0] sm:$0xff] %vm1995_vm0, %v1991_v8  ;;  %v1992_v19 = vmax.f32 %v1952_v1, 0.0 }
 0x1ba   : > { %v12416_v0 = vpop.f32.mrb[21].mxu1  ;;  %v12356_v13 = vpop.f32.mrb[21].mxu0  ;;  %v13987_v4 = vld [vmem:[%s15354_s17 + $0x494] ss:$8 sps:$4 sm:$0xff]  }
 0x1bb   : > { %v12417_v20 = vadd.f32 %v12416_v0, %v12415_v16  ;;  %v12418_v21 = vpop.f32.mrb[22].mxu1  ;;  %v12358_v22 = vpop.f32.mrb[22].mxu0  ;;  %2005 = vst.msk [vmem:[#allocation2 + $0x90] sm:$0xff] %vm1995_vm0, %v1972_v12  ;;  %v12357_v25 = vadd.f32 %v12356_v13, %v12355_v17  ;;  %2025 = vst.msk [vmem:[#allocation2 + $0x1d0] sm:$0xff] %vm1995_vm0, %v1992_v19 }
 0x1bc   : > { %v12419_v26 = vpop.f32.mrb[23].mxu1  ;;  %v12359_v2 = vpop.f32.mrb[23].mxu0 }
 0x1bd   : > { %v1957_v27 = vadd.f32 %v12417_v20, %v15670_v14  ;;  %v12420_v3 = vadd.f32 %v12419_v26, %v12418_v21  ;;  %v1877_v28 = vadd.f32 %v12357_v25, %v15670_v14  ;;  %v12360_v29 = vadd.f32 %v12359_v2, %v12358_v22  ;;  %v13989_v21 = vld [vmem:[%s15354_s17 + $0x3d0] ss:$8 sps:$4 sm:$0xff]  }
 0x1be   : > { %3428 = vmatmul.mubr.bf16.gmra.mrb[128].mxu1 %v13971_v9  ;;  %3943 = vmatmul.mubr.bf16.gmra.mrb[128].mxu0 %v13972_v15  ;;  %v13990_v22 = vld [vmem:[%s15354_s17 + $0x490] ss:$8 sps:$4 sm:$0xff]  }
 0x1bf   : > { %v1960_v30 = vadd.f32 %v12420_v3, %v15670_v14  ;;  %3435 = vmatprep.mubr.bf16.mxu1 %v13973_v23  ;;  %3950 = vmatprep.mubr.bf16.mxu0 %v13975_v24  ;;  %v1973_v31 = vmax.f32 %v1877_v28, 0.0  ;;  %v1880_v32 = vadd.f32 %v12360_v29, %v15670_v14  ;;  %v1993_v33 = vmax.f32 %v1957_v27, 0.0 }
 0x1c1   : > { %v12437_v36 = vpop.f32.mrb[24].mxu1  ;;  %v12361_v37 = vpop.f32.mrb[24].mxu0  ;;  %2006 = vst.msk [vmem:[#allocation2 + $0xa0] sm:$0xff] %vm1995_vm0, %v1973_v31  ;;  %v1974_v6 = vmax.f32 %v1880_v32, 0.0  ;;  %2026 = vst.msk [vmem:[#allocation2 + $0x1e0] sm:$0xff] %vm1995_vm0, %v1993_v33  ;;  %v1994_v7 = vmax.f32 %v1960_v30, 0.0 }
 0x1c2   : > { %v12438_v38 = vpop.f32.mrb[25].mxu1  ;;  %v12362_v39 = vpop.f32.mrb[25].mxu0  ;;  %v13991_v30 = vld [vmem:[%s15354_s17 + $0x3e4] ss:$8 sps:$4 sm:$0xff]  }
 0x1c3   : > { %v12439_v40 = vadd.f32 %v12438_v38, %v12437_v36  ;;  %v12440_v41 = vpop.f32.mrb[26].mxu1  ;;  %v12364_v42 = vpop.f32.mrb[26].mxu0  ;;  %2007 = vst.msk [vmem:[#allocation2 + $0xb0] sm:$0xff] %vm1995_vm0, %v1974_v6  ;;  %v12363_v45 = vadd.f32 %v12362_v39, %v12361_v37  ;;  %2027 = vst.msk [vmem:[#allocation2 + $0x1f0] sm:$0xff] %vm1995_vm0, %v1994_v7  ;;  %v13993_v31 = vld [vmem:[%s15354_s17 + $0x4a4] ss:$8 sps:$4 sm:$0xff]  }
 0x1c4   : > { %v12441_v46 = vpop.f32.mrb[27].mxu1  ;;  %v12365_v47 = vpop.f32.mrb[27].mxu0 }
 0x1c5   : > { %v12442_v10 = vadd.f32 %v12441_v46, %v12440_v41  ;;  %v2256_v48 = vadd.f32 %v12439_v40, %v15670_v14  ;;  %v1885_v49 = vadd.f32 %v12363_v45, %v15670_v14  ;;  %v12366_v50 = vadd.f32 %v12365_v47, %v12364_v42  ;;  %v13995_v41 = vld [vmem:[%s15354_s17 + $0x3e0] ss:$8 sps:$4 sm:$0xff]  }
 0x1c6   : > { %3436 = vmatmul.mubr.bf16.gmra.mrb[132].mxu1 %v13977_v34  ;;  %3951 = vmatmul.mubr.bf16.gmra.mrb[132].mxu0 %v13978_v35  ;;  %v13996_v42 = vld [vmem:[%s15354_s17 + $0x4a0] ss:$8 sps:$4 sm:$0xff]  }
 0x1c7   : > { %v2382_v51 = vmax.f32 %v2256_v48, 0.0  ;;  %3443 = vmatprep.mubr.bf16.mxu1 %v13979_v43  ;;  %v2259_v52 = vadd.f32 %v12442_v10, %v15670_v14  ;;  %3958 = vmatprep.mubr.bf16.mxu0 %v13981_v44  ;;  %v1975_v53 = vmax.f32 %v1885_v49, 0.0  ;;  %v1888_v54 = vadd.f32 %v12366_v50, %v15670_v14 }
 0x1c9   : > { %v12443_v57 = vpop.f32.mrb[28].mxu1  ;;  %2446 = vrot.lane.b32.xlu1 %v2382_v51, %s14658_s21  ;;  %v12367_v58 = vpop.f32.mrb[28].mxu0  ;;  %2008 = vst.msk [vmem:[#allocation2 + $0xc0] sm:$0xff] %vm1995_vm0, %v1975_v53  ;;  %v1976_v60 = vmax.f32 %v1888_v54, 0.0  ;;  %v2383_v1 = vmax.f32 %v2259_v52, 0.0 }
 0x1ca   : > { %v12444_v61 = vpop.f32.mrb[29].mxu1  ;;  %v12368_v63 = vpop.f32.mrb[29].mxu0  ;;  %v13997_v51 = vld [vmem:[%s15354_s17 + $0x3f4] ss:$8 sps:$4 sm:$0xff]  }
 0x1cb   : > { %v12445_v62 = vadd.f32 %v12444_v61, %v12443_v57  ;;  %v12446_v11 = vpop.f32.mrb[30].mxu1  ;;  %v12370_v18 = vpop.f32.mrb[30].mxu0  ;;  %2009 = vst.msk [vmem:[#allocation2 + $0xd0] sm:$0xff] %vm1995_vm0, %v1976_v60  ;;  %v12369_v5 = vadd.f32 %v12368_v63, %v12367_v58  ;;  %v13999_v52 = vld [vmem:[%s15354_s17 + $0x4b4] ss:$8 sps:$4 sm:$0xff]  }
 0x1cc   : > { %v12447_v8 = vpop.f32.mrb[31].mxu1  ;;  %v12371_v9 = vpop.f32.mrb[31].mxu0 }
 0x1cd   : > { %v12448_v15 = vadd.f32 %v12447_v8, %v12446_v11  ;;  %2448 = vrot.lane.b32.xlu1 %v2383_v1, %s14658_s21  ;;  %v2264_v16 = vadd.f32 %v12445_v62, %v15670_v14  ;;  %v1893_v17 = vadd.f32 %v12369_v5, %v15670_v14  ;;  %v12372_v12 = vadd.f32 %v12371_v9, %v12370_v18  ;;  %v14001_v11 = vld [vmem:[%s15354_s17 + $0x3f0] ss:$8 sps:$4 sm:$0xff]   ;;  %v14003_v8 = vld [vmem:[%s15354_s17 + $0x4c4] ss:$8 sps:$4 sm:$0xff]  }
 0x1ce   : > { %3444 = vmatmul.mubr.bf16.gmra.mrb[136].mxu1 %v13983_v55  ;;  %3959 = vmatmul.mubr.bf16.gmra.mrb[136].mxu0 %v13984_v56  ;;  %v14002_v18 = vld [vmem:[%s15354_s17 + $0x4b0] ss:$8 sps:$4 sm:$0xff]   ;;  %v14007_v9 = vld [vmem:[%s15354_s17 + $0x504] ss:$8 sps:$4 sm:$0xff]  }
 0x1cf   : > { %v2384_v19 = vmax.f32 %v2264_v16, 0.0  ;;  %v2267_v0 = vadd.f32 %v12448_v15, %v15670_v14  ;;  %3451 = vmatprep.mubr.bf16.mxu1 %v13985_v59  ;;  %3966 = vmatprep.mubr.bf16.mxu0 %v13987_v4  ;;  %v1977_v13 = vmax.f32 %v1893_v17, 0.0  ;;  %v1896_v20 = vadd.f32 %v12372_v12, %v15670_v14 }
 0x1d1   : > { %v12449_v23 = vpop.f32.mrb[32].mxu1  ;;  %2450 = vrot.lane.b32.xlu0 %v2384_v19, %s14658_s21  ;;  %v12373_v24 = vpop.f32.mrb[32].mxu0  ;;  %v2385_v25 = vmax.f32 %v2267_v0, 0.0  ;;  %2010 = vst.msk [vmem:[#allocation2 + $0xe0] sm:$0xff] %vm1995_vm0, %v1977_v13  ;;  %v1978_v26 = vmax.f32 %v1896_v20, 0.0 }
 0x1d2   : > { %v12450_v2 = vpop.f32.mrb[33].mxu1  ;;  %v12374_v27 = vpop.f32.mrb[33].mxu0 }
 0x1d3   : > { %v12451_v3 = vadd.f32 %v12450_v2, %v12449_v23  ;;  %v12452_v28 = vpop.f32.mrb[34].mxu1  ;;  %2452 = vrot.lane.b32.xlu1 %v2385_v25, %s14658_s21  ;;  %v12376_v29 = vpop.f32.mrb[34].mxu0  ;;  %2011 = vst.msk [vmem:[#allocation2 + $0xf0] sm:$0xff] %vm1995_vm0, %v1978_v26  ;;  %v12375_v32 = vadd.f32 %v12374_v27, %v12373_v24  ;;  %v14005_v27 = vld [vmem:[%s15354_s17 + $0x500] ss:$8 sps:$4 sm:$0xff]  }
 0x1d4   : > { %v12453_v33 = vpop.f32.mrb[35].mxu1  ;;  %v12377_v34 = vpop.f32.mrb[35].mxu0 }
 0x1d5   : > { %v12454_v35 = vadd.f32 %v12453_v33, %v12452_v28  ;;  %v2272_v36 = vadd.f32 %v12451_v3, %v15670_v14  ;;  %v1901_v37 = vadd.f32 %v12375_v32, %v15670_v14  ;;  %v12378_v6 = vadd.f32 %v12377_v34, %v12376_v29  ;;  %v14008_v3 = vld [vmem:[%s15354_s17 + $0x4c0] ss:$8 sps:$4 sm:$0xff]   ;;  %v15819_v28 = vld [vmem:[%s18508_s2] ss:$0 sm:$0xff] }
 0x1d6   : > { %3452 = vmatmul.mubr.bf16.gmra.mrb[140].mxu1 %v13989_v21  ;;  %3967 = vmatmul.mubr.bf16.gmra.mrb[140].mxu0 %v13990_v22 }
 0x1d7   : > { %v2386_v7 = vmax.f32 %v2272_v36, 0.0  ;;  %v2275_v38 = vadd.f32 %v12454_v35, %v15670_v14  ;;  %3459 = vmatprep.mubr.bf16.mxu1 %v13991_v30  ;;  %3974 = vmatprep.mubr.bf16.mxu0 %v13993_v31  ;;  %v1979_v39 = vmax.f32 %v1901_v37, 0.0  ;;  %v1904_v40 = vadd.f32 %v12378_v6, %v15670_v14  ;;  %v14009_v35 = vld [vmem:[%s15354_s17 + $0x4d4] ss:$8 sps:$4 sm:$0xff]  }
 0x1d8   : > { %v14011_v36 = vld [vmem:[%s15354_s17 + $0x514] ss:$8 sps:$4 sm:$0xff]  }
 0x1d9   : > { %v12455_v43 = vpop.f32.mrb[36].mxu1  ;;  %2454 = vrot.lane.b32.xlu0 %v2386_v7, %s14658_s21  ;;  %v12379_v44 = vpop.f32.mrb[36].mxu0  ;;  %v2387_v45 = vmax.f32 %v2275_v38, 0.0  ;;  %2012 = vst.msk [vmem:[#allocation2 + $0x100] sm:$0xff] %vm1995_vm0, %v1979_v39  ;;  %v1980_v46 = vmax.f32 %v1904_v40, 0.0 }
 0x1da   : > { %v12456_v47 = vpop.f32.mrb[37].mxu1  ;;  %v12380_v10 = vpop.f32.mrb[37].mxu0 }
 0x1db   : > { %v12457_v48 = vadd.f32 %v12456_v47, %v12455_v43  ;;  %v12458_v49 = vpop.f32.mrb[38].mxu1  ;;  %2456 = vrot.lane.b32.xlu1 %v2387_v45, %s14658_s21  ;;  %v12382_v50 = vpop.f32.mrb[38].mxu0  ;;  %2013 = vst.msk [vmem:[#allocation2 + $0x110] sm:$0xff] %vm1995_vm0, %v1980_v46  ;;  %v12381_v53 = vadd.f32 %v12380_v10, %v12379_v44  ;;  %v14614_v10 = vld [vmem:[%s18507_s1] sm:$0xff]  }
 0x1dc   : > { %v12459_v54 = vpop.f32.mrb[39].mxu1  ;;  %v12383_v55 = vpop.f32.mrb[39].mxu0 }
 0x1dd   : > { %v12460_v56 = vadd.f32 %v12459_v54, %v12458_v49  ;;  %v2280_v57 = vadd.f32 %v12457_v48, %v15670_v14  ;;  %v1909_v58 = vadd.f32 %v12381_v53, %v15670_v14  ;;  %v12384_v59 = vadd.f32 %v12383_v55, %v12382_v50  ;;  %v14013_v48 = vld [vmem:[%s15354_s17 + $0x4d0] ss:$8 sps:$4 sm:$0xff]   ;;  %v14015_v55 = vld [vmem:[%s15354_s17 + $0x4e4] ss:$8 sps:$4 sm:$0xff]  }
 0x1de   : > { %3460 = vmatmul.mubr.bf16.gmra.mrb[144].mxu1 %v13995_v41  ;;  %3975 = vmatmul.mubr.bf16.gmra.mrb[144].mxu0 %v13996_v42  ;;  %v14014_v49 = vld [vmem:[%s15354_s17 + $0x510] ss:$8 sps:$4 sm:$0xff]  }
 0x1df   : > { %v2388_v60 = vmax.f32 %v2280_v57, 0.0  ;;  %v2283_v61 = vadd.f32 %v12460_v56, %v15670_v14  ;;  %3467 = vmatprep.mubr.bf16.mxu1 %v13997_v51  ;;  %3982 = vmatprep.mubr.bf16.mxu0 %v13999_v52  ;;  %v1981_v63 = vmax.f32 %v1909_v58, 0.0  ;;  %v1912_v62 = vadd.f32 %v12384_v59, %v15670_v14  ;;  %v14615_v56 = vld [vmem:[%s18507_s1 + $0x48] sm:$0xff]  }
 0x1e1   : > { %v12461_v1 = vpop.f32.mrb[40].mxu1  ;;  %2458 = vrot.lane.b32.xlu0 %v2388_v60, %s14658_s21  ;;  %v12549_v4 = vpop.f32.mrb[40].mxu0  ;;  %v2389_v5 = vmax.f32 %v2283_v61, 0.0  ;;  %2014 = vst.msk [vmem:[#allocation2 + $0x120] sm:$0xff] %vm1995_vm0, %v1981_v63  ;;  %v1982_v15 = vmax.f32 %v1912_v62, 0.0  ;;  %v14616_v62 = vld [vmem:[%s18507_s1 + $0x8] sm:$0xff]  }
 0x1e2   : > { %v12462_v16 = vpop.f32.mrb[41].mxu1  ;;  %v12550_v17 = vpop.f32.mrb[41].mxu0 }
 0x1e3   : > { %v12463_v12 = vadd.f32 %v12462_v16, %v12461_v1  ;;  %v12551_v19 = vadd.f32 %v12550_v17, %v12549_v4  ;;  %v12464_v0 = vpop.f32.mrb[42].mxu1  ;;  %2460 = vrot.lane.b32.xlu1 %v2389_v5, %s14658_s21  ;;  %v12552_v13 = vpop.f32.mrb[42].mxu0  ;;  %2015 = vst.msk [vmem:[#allocation2 + $0x130] sm:$0xff] %vm1995_vm0, %v1982_v15  ;;  %v14017_v4 = vld [vmem:[%s15354_s17 + $0x524] ss:$8 sps:$4 sm:$0xff]  }
 0x1e4   : > { %v12465_v20 = vpop.f32.mrb[43].mxu1  ;;  %v12553_v21 = vpop.f32.mrb[43].mxu0  ;;  %v14617_v5 = vld [vmem:[%s18507_s1 + $0x50] sm:$0xff]  }
 0x1e5   : > { %v2803_v22 = vadd.f32 %v12551_v19, %v15670_v14  ;;  %v12466_v23 = vadd.f32 %v12465_v20, %v12464_v0  ;;  %v12554_v24 = vadd.f32 %v12553_v21, %v12552_v13  ;;  %v2288_v25 = vadd.f32 %v12463_v12, %v15670_v14  ;;  %v14019_v19 = vld [vmem:[%s15354_s17 + $0x4e0] ss:$8 sps:$4 sm:$0xff]  }
 0x1e6   : > { %3468 = vmatmul.mubr.bf16.gmra.mrb[148].mxu1 %v14001_v11  ;;  %3983 = vmatmul.mubr.bf16.gmra.mrb[148].mxu0 %v14002_v18  ;;  %v14020_v0 = vld [vmem:[%s15354_s17 + $0x520] ss:$8 sps:$4 sm:$0xff]  }
 0x1e7   : > { %v2929_v26 = vmax.f32 %v2803_v22, 0.0  ;;  %v2806_v2 = vadd.f32 %v12554_v24, %v15670_v14  ;;  %3990 = vmatprep.mubr.bf16.mxu0 %v14003_v8  ;;  %4312 = vmatprep.mubr.bf16.mxu1 %v14007_v9  ;;  %v2291_v29 = vadd.f32 %v15819_v28, %v12466_v23  ;;  %v2390_v33 = vmax.f32 %v2288_v25, 0.0  ;;  %v14618_v20 = vld [vmem:[%s18507_s1 + $0x10] sm:$0xff]   ;;  %v14021_v25 = vld [vmem:[%s15354_s17 + $0x4f4] ss:$8 sps:$4 sm:$0xff]  }
 0x1e9   : > { %v2930_v30 = vmax.f32 %v2806_v2, 0.0  ;;  %v12467_v31 = vpop.f32.mrb[44].mxu1  ;;  %v12555_v32 = vpop.f32.mrb[44].mxu0  ;;  %2993 = vrot.lane.b32.xlu0 %v2929_v26, %s14659_s16  ;;  %v2391_v41 = vmax.f32 %v2291_v29, 0.0  ;;  %v14619_v26 = vld [vmem:[%s18507_s1 + $0x58] sm:$0xff]  }
 0x1ea   : > { %v12468_v14 = vpop.f32.mrb[45].mxu1  ;;  %v12556_v34 = vpop.f32.mrb[45].mxu0 }
 0x1eb   : > { %v12469_v37 = vadd.f32 %v12468_v14, %v12467_v31  ;;  %v12557_v6 = vadd.f32 %v12556_v34, %v12555_v32  ;;  %v12470_v7 = vpop.f32.mrb[46].mxu1  ;;  %v12558_v38 = vpop.f32.mrb[46].mxu0  ;;  %2995 = vrot.lane.b32.xlu1 %v2930_v30, %s14659_s16  ;;  %v14023_v34 = vld [vmem:[%s15354_s17 + $0x534] ss:$8 sps:$4 sm:$0xff]  }
 0x1ec   : > { %v12471_v39 = vpop.f32.mrb[47].mxu1  ;;  %v12559_v40 = vpop.f32.mrb[47].mxu0 }
 0x1ed   : > { %v2811_v42 = vadd.f32 %v15819_v28, %v12557_v6  ;;  %v12472_v43 = vadd.f32 %v12471_v39, %v12470_v7  ;;  %v12560_v44 = vadd.f32 %v12559_v40, %v12558_v38  ;;  %2462 = vrot.lane.b32.xlu0 %v2390_v33, %s14658_s21  ;;  %v2296_v45 = vadd.f32 %v15819_v28, %v12469_v37  ;;  %v14621_v40 = vld [vmem:[%s18507_s1 + $0x60] sm:$0xff]  }
 0x1ee   : > { %3991 = vmatmul.mubr.bf16.gmra.mrb[152].mxu0 %v14008_v3  ;;  %4313 = vmatmul.mubr.bf16.vlgmr.msra.gmra.mrb[152].mxu1 %v14005_v27 }
 0x1ef   : > { %v2931_v46 = vmax.f32 %v2811_v42, 0.0  ;;  %v2814_v47 = vadd.f32 %v15819_v28, %v12560_v44  ;;  %2464 = vrot.lane.b32.xlu1 %v2391_v41, %s14658_s21  ;;  %13094 = vmatpush3.bf16.msra.mxu1 %v14614_v10  ;;  %v2299_v50 = vadd.f32 %v15819_v28, %v12472_v43  ;;  %v2392_v54 = vmax.f32 %v2296_v45, 0.0  ;;  %v14622_v45 = vld [vmem:[%s18507_s1 + $0x20] sm:$0xff]  }
 0x1f0   : > { %3998 = vmatprep.mubr.bf16.mxu0 %v14009_v35  ;;  %4320 = vmatprep.mubr.bf16.mxu1 %v14011_v36  ;;  %v14620_v35 = vld [vmem:[%s18507_s1 + $0x18] sm:$0xff]   ;;  %v14025_v10 = vld [vmem:[%s15354_s17 + $0x4f0] ss:$8 sps:$4 sm:$0xff]  }
 0x1f1   : > { %v2932_v51 = vmax.f32 %v2814_v47, 0.0  ;;  %v12473_v52 = vpop.f32.mrb[48].mxu1  ;;  %v12561_v53 = vpop.f32.mrb[48].mxu0  ;;  %2997 = vrot.lane.b32.xlu0 %v2931_v46, %s14659_s16  ;;  %13095 = vmatprep.subr.bf16.mxu1 %v14615_v56  ;;  %v2393_v1 = vmax.f32 %v2299_v50, 0.0 }
 0x1f2   : > { %v12474_v57 = vpop.f32.mrb[49].mxu1  ;;  %v12562_v58 = vpop.f32.mrb[49].mxu0 }
 0x1f3   : > { %v12475_v59 = vadd.f32 %v12474_v57, %v12473_v52  ;;  %v12563_v60 = vadd.f32 %v12562_v58, %v12561_v53  ;;  %v12476_v61 = vpop.f32.mrb[50].mxu1  ;;  %v12564_v63 = vpop.f32.mrb[50].mxu0  ;;  %2999 = vrot.lane.b32.xlu1 %v2932_v51, %s14659_s16  ;;  %13096 = vmatpush3.bf16.msra.mxu1 %v14616_v62  ;;  %v14031_v58 = vld [vmem:[%s15354_s17 + $0x604] ss:$8 sps:$4 sm:$0xff]  }
 0x1f4   : > { %v12477_v11 = vpop.f32.mrb[51].mxu1  ;;  %v12565_v18 = vpop.f32.mrb[51].mxu0  ;;  %13097 = vmatprep.subr.bf16.mxu1 %v14617_v5 }
 0x1f5   : > { %v2819_v8 = vadd.f32 %v15819_v28, %v12563_v60  ;;  %v12478_v9 = vadd.f32 %v12477_v11, %v12476_v61  ;;  %v12566_v15 = vadd.f32 %v12565_v18, %v12564_v63  ;;  %2466 = vrot.lane.b32.xlu0 %v2392_v54, %s14658_s21  ;;  %v2304_v16 = vadd.f32 %v15819_v28, %v12475_v59 }
 0x1f6   : > { %3999 = vmatmul.mubr.bf16.gmra.mrb[156].mxu0 %v14013_v48  ;;  %4321 = vmatmul.mubr.bf16.gmra.mrb[156].mxu1 %v14014_v49  ;;  %v14026_v48 = vld [vmem:[%s15354_s17 + $0x530] ss:$8 sps:$4 sm:$0xff]  }
 0x1f7   : > { %v2933_v17 = vmax.f32 %v2819_v8, 0.0  ;;  %v2822_v12 = vadd.f32 %v15819_v28, %v12566_v15  ;;  %2468 = vrot.lane.b32.xlu1 %v2393_v1, %s14658_s21  ;;  %4006 = vmatprep.mubr.bf16.mxu0 %v14015_v55  ;;  %v2307_v13 = vadd.f32 %v15819_v28, %v12478_v9  ;;  %v2394_v24 = vmax.f32 %v2304_v16, 0.0  ;;  %v14623_v49 = vld [vmem:[%s18507_s1 + $0x68] sm:$0xff]   ;;  %v14027_v55 = vld [vmem:[%s15354_s17 + $0x544] ss:$8 sps:$4 sm:$0xff]  }
 0x1f8   : > { %4328 = vmatprep.mubr.bf16.mxu1 %v14017_v4  ;;  %13098 = vmatpush3.bf16.msra.mxu1 %v14618_v20  ;;  %v14624_v1 = vld [vmem:[%s18507_s1 + $0x28] sm:$0xff]   ;;  %v14625_v15 = vld [vmem:[%s18507_s1 + $0x70] sm:$0xff]  }
 0x1f9   : > { %v2934_v21 = vmax.f32 %v2822_v12, 0.0  ;;  %v12479_v22 = vpop.f32.mrb[52].mxu1  ;;  %v12567_v23 = vpop.f32.mrb[52].mxu0  ;;  %3001 = vrot.lane.b32.xlu0 %v2933_v17, %s14659_s16  ;;  %13099 = vmatprep.subr.bf16.mxu1 %v14619_v26  ;;  %v2395_v14 = vmax.f32 %v2307_v13, 0.0  ;;  %v14029_v12 = vld [vmem:[%s15354_s17 + $0x600] ss:$8 sps:$4 sm:$0xff]  }
 0x1fa   : > { %v12480_v2 = vpop.f32.mrb[53].mxu1  ;;  %v12568_v27 = vpop.f32.mrb[53].mxu0  ;;  %v14035_v26 = vld [vmem:[%s15354_s17 + $0x614] ss:$8 sps:$4 sm:$0xff]  }
 0x1fb   : > { %v12481_v3 = vadd.f32 %v12480_v2, %v12479_v22  ;;  %v12569_v29 = vadd.f32 %v12568_v27, %v12567_v23  ;;  %v12482_v30 = vpop.f32.mrb[54].mxu1  ;;  %v12570_v31 = vpop.f32.mrb[54].mxu0  ;;  %3003 = vrot.lane.b32.xlu1 %v2934_v21, %s14659_s16  ;;  %v14033_v23 = vld [vmem:[%s15354_s17 + $0x554] ss:$8 sps:$4 sm:$0xff]   ;;  %v14626_v2 = vld [vmem:[%s18507_s1 + $0x30] sm:$0xff]  }
 0x1fc   : > { %v12483_v32 = vpop.f32.mrb[55].mxu1  ;;  %v12571_v33 = vpop.f32.mrb[55].mxu0  ;;  %13100 = vmatpush3.bf16.msra.mxu1 %v14620_v35 }
 0x1fd   : > { %v2827_v36 = vadd.f32 %v15819_v28, %v12569_v29  ;;  %v12484_v37 = vadd.f32 %v12483_v32, %v12482_v30  ;;  %v12572_v6 = vadd.f32 %v12571_v33, %v12570_v31  ;;  %2470 = vrot.lane.b32.xlu0 %v2394_v24, %s14658_s21  ;;  %v2312_v39 = vadd.f32 %v15819_v28, %v12481_v3 }
 0x1fe   : > { %4007 = vmatmul.mubr.bf16.gmra.mrb[160].mxu0 %v14019_v19  ;;  %4329 = vmatmul.mubr.bf16.gmra.mrb[160].mxu1 %v14020_v0  ;;  %v14032_v19 = vld [vmem:[%s15354_s17 + $0x540] ss:$8 sps:$4 sm:$0xff]  }
 0x1ff   : > { %v2935_v7 = vmax.f32 %v2827_v36, 0.0  ;;  %v2830_v38 = vadd.f32 %v15819_v28, %v12572_v6  ;;  %2472 = vrot.lane.b32.xlu1 %v2395_v14, %s14658_s21  ;;  %4014 = vmatprep.mubr.bf16.mxu0 %v14021_v25  ;;  %v2315_v44 = vadd.f32 %v15819_v28, %v12484_v37  ;;  %v2396_v54 = vmax.f32 %v2312_v39, 0.0  ;;  %v14627_v14 = vld [vmem:[%s18507_s1 + $0x78] sm:$0xff]   ;;  %v14037_v39 = vld [vmem:[%s15354_s17 + $0x550] ss:$8 sps:$4 sm:$0xff]  }
 0x200   : > { %4336 = vmatprep.mubr.bf16.mxu1 %v14023_v34  ;;  %13101 = vmatprep.subr.bf16.mxu1 %v14621_v40  ;;  %v14628_v6 = vld [vmem:[%s18507_s1 + $0x38] sm:$0xff]   ;;  %v14038_v40 = vld [vmem:[%s15354_s17 + $0x610] ss:$8 sps:$4 sm:$0xff]  }
 0x201   : > { %v2936_v41 = vmax.f32 %v2830_v38, 0.0  ;;  %v12485_v42 = vpop.f32.mrb[56].mxu1  ;;  %v12573_v43 = vpop.f32.mrb[56].mxu0  ;;  %3005 = vrot.lane.b32.xlu0 %v2935_v7, %s14659_s16  ;;  %13102 = vmatpush3.bf16.msra.mxu1 %v14622_v45  ;;  %v2397_v63 = vmax.f32 %v2315_v44, 0.0 }
 0x202   : > { %v12486_v46 = vpop.f32.mrb[57].mxu1  ;;  %v12574_v47 = vpop.f32.mrb[57].mxu0  ;;  %13103 = vmatprep.subr.bf16.mxu1 %v14623_v49 }
 0x203   : > { %v12487_v50 = vadd.f32 %v12486_v46, %v12485_v42  ;;  %v12575_v51 = vadd.f32 %v12574_v47, %v12573_v43  ;;  %v12488_v52 = vpop.f32.mrb[58].mxu1  ;;  %v12576_v53 = vpop.f32.mrb[58].mxu0  ;;  %3007 = vrot.lane.b32.xlu1 %v2936_v41, %s14659_s16  ;;  %v14039_v46 = vld [vmem:[%s15354_s17 + $0x564] ss:$8 sps:$4 sm:$0xff]  }
 0x204   : > { %v12489_v56 = vpop.f32.mrb[59].mxu1  ;;  %v12577_v57 = vpop.f32.mrb[59].mxu0 }
 0x205   : > { %v2835_v59 = vadd.f32 %v15819_v28, %v12575_v51  ;;  %v12490_v60 = vadd.f32 %v12489_v56, %v12488_v52  ;;  %v12578_v61 = vadd.f32 %v12577_v57, %v12576_v53  ;;  %2474 = vrot.lane.b32.xlu0 %v2396_v54, %s14658_s21  ;;  %v2320_v18 = vadd.f32 %v15819_v28, %v12487_v50 }
 0x206   : > { %4015 = vmatmul.mubr.bf16.gmra.mrb[164].mxu0 %v14025_v10  ;;  %4337 = vmatmul.mubr.bf16.gmra.mrb[164].mxu1 %v14026_v48  ;;  %v14041_v48 = vld [vmem:[%s15354_s17 + $0x624] ss:$8 sps:$4 sm:$0xff]  }
 0x207   : > { %v2937_v62 = vmax.f32 %v2835_v59, 0.0  ;;  %v2838_v11 = vadd.f32 %v15819_v28, %v12578_v61  ;;  %2476 = vrot.lane.b32.xlu1 %v2397_v63, %s14658_s21  ;;  %4344 = vmatprep.mubr.bf16.mxu1 %v14027_v55  ;;  %v2323_v9 = vadd.f32 %v15819_v28, %v12490_v60  ;;  %v2398_v22 = vmax.f32 %v2320_v18, 0.0  ;;  %v14043_v63 = vld [vmem:[%s15354_s17 + $0x560] ss:$8 sps:$4 sm:$0xff]  }
 0x208   : > { %4858 = vmatprep.mubr.bf16.mxu0 %v14031_v58  ;;  %13104 = vmatpush3.bf16.msra.mxu1 %v14624_v1 }
 0x209   : > { %v2938_v4 = vmax.f32 %v2838_v11, 0.0  ;;  %v12491_v5 = vpop.f32.mrb[60].mxu1  ;;  %v12579_v8 = vpop.f32.mrb[60].mxu0  ;;  %3009 = vrot.lane.b32.xlu0 %v2937_v62, %s14659_s16  ;;  %13105 = vmatprep.subr.bf16.mxu1 %v14625_v15  ;;  %v2399_v30 = vmax.f32 %v2323_v9, 0.0  ;;  %v14044_v62 = vld [vmem:[%s15354_s17 + $0x620] ss:$8 sps:$4 sm:$0xff]  }
 0x20a   : > { %v12492_v16 = vpop.f32.mrb[61].mxu1  ;;  %v12580_v17 = vpop.f32.mrb[61].mxu0 }
 0x20b   : > { %v12493_v0 = vadd.f32 %v12492_v16, %v12491_v5  ;;  %v12581_v13 = vadd.f32 %v12580_v17, %v12579_v8  ;;  %v12494_v20 = vpop.f32.mrb[62].mxu1  ;;  %v12582_v21 = vpop.f32.mrb[62].mxu0  ;;  %3011 = vrot.lane.b32.xlu1 %v2938_v4, %s14659_s16  ;;  %v14045_v8 = vld [vmem:[%s15354_s17 + $0x574] ss:$8 sps:$4 sm:$0xff]  }
 0x20c   : > { %v12495_v24 = vpop.f32.mrb[63].mxu1  ;;  %v12583_v25 = vpop.f32.mrb[63].mxu0  ;;  %13106 = vmatpush3.bf16.msra.mxu1 %v14626_v2  ;;  %v14047_v16 = vld [vmem:[%s15354_s17 + $0x634] ss:$8 sps:$4 sm:$0xff]  }
 0x20d   : > { %v2843_v27 = vadd.f32 %v15819_v28, %v12581_v13  ;;  %v12496_v3 = vadd.f32 %v12495_v24, %v12494_v20  ;;  %v12584_v29 = vadd.f32 %v12583_v25, %v12582_v21  ;;  %2478 = vrot.lane.b32.xlu0 %v2398_v22, %s14658_s21  ;;  %v2328_v33 = vadd.f32 %v15819_v28, %v12493_v0 }
 0x20e   : > { %4345 = vmatmul.mubr.bf16.gmra.mrb[168].mxu1 %v14032_v19  ;;  %4859 = vmatmul.mubr.bf16.vlgmr.msra.gmra.mrb[168].mxu0 %v14029_v12 }
 0x20f   : > { %v2939_v31 = vmax.f32 %v2843_v27, 0.0  ;;  %v2846_v32 = vadd.f32 %v15819_v28, %v12584_v29  ;;  %2480 = vrot.lane.b32.xlu1 %v2399_v30, %s14658_s21  ;;  %4352 = vmatprep.mubr.bf16.mxu1 %v14033_v23  ;;  %v2331_v37 = vadd.f32 %v15819_v28, %v12496_v3  ;;  %v2400_v45 = vmax.f32 %v2328_v33, 0.0  ;;  %v14049_v27 = vld [vmem:[%s15354_s17 + $0x570] ss:$8 sps:$4 sm:$0xff]  }
 0x210   : > { %4866 = vmatprep.mubr.bf16.mxu0 %v14035_v26  ;;  %13107 = vmatprep.subr.bf16.mxu1 %v14627_v14  ;;  %v14050_v3 = vld [vmem:[%s15354_s17 + $0x630] ss:$8 sps:$4 sm:$0xff]   ;;  %v14051_v14 = vld [vmem:[%s15354_s17 + $0x584] ss:$8 sps:$4 sm:$0xff]  }
 0x211   : > { %v2940_v34 = vmax.f32 %v2846_v32, 0.0  ;;  %v12497_v35 = vpop.f32.mrb[64].mxu1  ;;  %v12585_v36 = vpop.f32.mrb[64].mxu0  ;;  %3013 = vrot.lane.b32.xlu0 %v2939_v31, %s14659_s16  ;;  %13108 = vmatpush3.bf16.msra.mxu1 %v14628_v6  ;;  %v2401_v52 = vmax.f32 %v2331_v37, 0.0 }
 0x212   : > { %v12498_v7 = vpop.f32.mrb[65].mxu1  ;;  %v12586_v38 = vpop.f32.mrb[65].mxu0 }
 0x213   : > { %v12499_v41 = vadd.f32 %v12498_v7, %v12497_v35  ;;  %v12587_v42 = vadd.f32 %v12586_v38, %v12585_v36  ;;  %v12500_v43 = vpop.f32.mrb[66].mxu1  ;;  %v12588_v44 = vpop.f32.mrb[66].mxu0  ;;  %3015 = vrot.lane.b32.xlu1 %v2940_v34, %s14659_s16  ;;  %v14053_v36 = vld [vmem:[%s15354_s17 + $0x644] ss:$8 sps:$4 sm:$0xff]  }
 0x214   : > { %v12501_v47 = vpop.f32.mrb[67].mxu1  ;;  %v12589_v10 = vpop.f32.mrb[67].mxu0 }
 0x215   : > { %v2851_v49 = vadd.f32 %v15819_v28, %v12587_v42  ;;  %v12502_v50 = vadd.f32 %v12501_v47, %v12500_v43  ;;  %v12590_v51 = vadd.f32 %v12589_v10, %v12588_v44  ;;  %2482 = vrot.lane.b32.xlu0 %v2400_v45, %s14658_s21  ;;  %v2336_v55 = vadd.f32 %v15819_v28, %v12499_v41  ;;  %v14055_v10 = vld [vmem:[%s15354_s17 + $0x580] ss:$8 sps:$4 sm:$0xff]  }
 0x216   : > { %4353 = vmatmul.mubr.bf16.gmra.mrb[172].mxu1 %v14037_v39  ;;  %4867 = vmatmul.mubr.bf16.gmra.mrb[172].mxu0 %v14038_v40 }
 0x217   : > { %v2941_v53 = vmax.f32 %v2851_v49, 0.0  ;;  %v2854_v54 = vadd.f32 %v15819_v28, %v12590_v51  ;;  %2484 = vrot.lane.b32.xlu1 %v2401_v52, %s14658_s21  ;;  %4360 = vmatprep.mubr.bf16.mxu1 %v14039_v46  ;;  %v2339_v59 = vadd.f32 %v15819_v28, %v12502_v50  ;;  %v2402_v5 = vmax.f32 %v2336_v55, 0.0 }
 0x218   : > { %4874 = vmatprep.mubr.bf16.mxu0 %v14041_v48  ;;  %v14056_v48 = vld [vmem:[%s15354_s17 + $0x640] ss:$8 sps:$4 sm:$0xff]  }
 0x219   : > { %v2942_v56 = vmax.f32 %v2854_v54, 0.0  ;;  %v12503_v57 = vpop.f32.mrb[68].mxu1  ;;  %v12591_v58 = vpop.f32.mrb[68].mxu0  ;;  %3017 = vrot.lane.b32.xlu0 %v2941_v53, %s14659_s16  ;;  %v2403_v0 = vmax.f32 %v2339_v59, 0.0  ;;  %v14057_v54 = vld [vmem:[%s15354_s17 + $0x594] ss:$8 sps:$4 sm:$0xff]  }
 0x21a   : > { %v12504_v60 = vpop.f32.mrb[69].mxu1  ;;  %v12592_v61 = vpop.f32.mrb[69].mxu0 }
 0x21b   : > { %v12505_v11 = vadd.f32 %v12504_v60, %v12503_v57  ;;  %v12593_v18 = vadd.f32 %v12592_v61, %v12591_v58  ;;  %v12506_v1 = vpop.f32.mrb[70].mxu1  ;;  %v12594_v4 = vpop.f32.mrb[70].mxu0  ;;  %3019 = vrot.lane.b32.xlu1 %v2942_v56, %s14659_s16  ;;  %v14059_v57 = vld [vmem:[%s15354_s17 + $0x654] ss:$8 sps:$4 sm:$0xff]  }
 0x21c   : > { %v12507_v9 = vpop.f32.mrb[71].mxu1  ;;  %v12595_v15 = vpop.f32.mrb[71].mxu0 }
 0x21d   : > { %v2859_v17 = vadd.f32 %v15819_v28, %v12593_v18  ;;  %v12508_v12 = vadd.f32 %v12507_v9, %v12506_v1  ;;  %v12596_v19 = vadd.f32 %v12595_v15, %v12594_v4  ;;  %2486 = vrot.lane.b32.xlu0 %v2402_v5, %s14658_s21  ;;  %v2344_v21 = vadd.f32 %v15819_v28, %v12505_v11  ;;  %v14062_v9 = vld [vmem:[%s15354_s17 + $0x650] ss:$8 sps:$4 sm:$0xff]  }
 0x21e   : > { %4361 = vmatmul.mubr.bf16.gmra.mrb[176].mxu1 %v14043_v63  ;;  %4875 = vmatmul.mubr.bf16.gmra.mrb[176].mxu0 %v14044_v62 }
 0x21f   : > { %v2943_v13 = vmax.f32 %v2859_v17, 0.0  ;;  %v2862_v20 = vadd.f32 %v15819_v28, %v12596_v19  ;;  %2488 = vrot.lane.b32.xlu1 %v2403_v0, %s14658_s21  ;;  %4368 = vmatprep.mubr.bf16.mxu1 %v14045_v8  ;;  %v2347_v25 = vadd.f32 %v15819_v28, %v12508_v12  ;;  %v2404_v33 = vmax.f32 %v2344_v21, 0.0  ;;  %v14061_v8 = vld [vmem:[%s15354_s17 + $0x590] ss:$8 sps:$4 sm:$0xff]   ;;  %v14063_v19 = vld [vmem:[%s15354_s17 + $0x5a4] ss:$8 sps:$4 sm:$0xff]  }
 0x220   : > { %4882 = vmatprep.mubr.bf16.mxu0 %v14047_v16  ;;  %v14065_v0 = vld [vmem:[%s15354_s17 + $0x664] ss:$8 sps:$4 sm:$0xff]  }
 0x221   : > { %v2944_v22 = vmax.f32 %v2862_v20, 0.0  ;;  %v12509_v23 = vpop.f32.mrb[72].mxu1  ;;  %v12597_v24 = vpop.f32.mrb[72].mxu0  ;;  %3021 = vrot.lane.b32.xlu0 %v2943_v13, %s14659_s16  ;;  %v2405_v38 = vmax.f32 %v2347_v25, 0.0 }
 0x222   : > { %v12510_v26 = vpop.f32.mrb[73].mxu1  ;;  %v12598_v2 = vpop.f32.mrb[73].mxu0 }
 0x223   : > { %v12511_v29 = vadd.f32 %v12510_v26, %v12509_v23  ;;  %v12599_v30 = vadd.f32 %v12598_v2, %v12597_v24  ;;  %v12512_v31 = vpop.f32.mrb[74].mxu1  ;;  %v12600_v32 = vpop.f32.mrb[74].mxu0  ;;  %3023 = vrot.lane.b32.xlu1 %v2944_v22, %s14659_s16 }
 0x224   : > { %v12513_v34 = vpop.f32.mrb[75].mxu1  ;;  %v12601_v35 = vpop.f32.mrb[75].mxu0 }
 0x225   : > { %v2867_v37 = vadd.f32 %v15819_v28, %v12599_v30  ;;  %v12514_v6 = vadd.f32 %v12513_v34, %v12512_v31  ;;  %v12602_v7 = vadd.f32 %v12601_v35, %v12600_v32  ;;  %2490 = vrot.lane.b32.xlu0 %v2404_v33, %s14658_s21  ;;  %v2352_v41 = vadd.f32 %v15819_v28, %v12511_v29  ;;  %v14067_v30 = vld [vmem:[%s15354_s17 + $0x5a0] ss:$8 sps:$4 sm:$0xff]   ;;  %v14069_v35 = vld [vmem:[%s15354_s17 + $0x5b4] ss:$8 sps:$4 sm:$0xff]  }
 0x226   : > { %4369 = vmatmul.mubr.bf16.gmra.mrb[180].mxu1 %v14049_v27  ;;  %4883 = vmatmul.mubr.bf16.gmra.mrb[180].mxu0 %v14050_v3  ;;  %v14068_v31 = vld [vmem:[%s15354_s17 + $0x660] ss:$8 sps:$4 sm:$0xff]  }
 0x227   : > { %v2945_v39 = vmax.f32 %v2867_v37, 0.0  ;;  %v2870_v40 = vadd.f32 %v15819_v28, %v12602_v7  ;;  %2492 = vrot.lane.b32.xlu1 %v2405_v38, %s14658_s21  ;;  %4376 = vmatprep.mubr.bf16.mxu1 %v14051_v14  ;;  %v2355_v45 = vadd.f32 %v15819_v28, %v12514_v6  ;;  %v2406_v53 = vmax.f32 %v2352_v41, 0.0 }
 0x228   : > { %4890 = vmatprep.mubr.bf16.mxu0 %v14053_v36  ;;  %v14071_v36 = vld [vmem:[%s15354_s17 + $0x674] ss:$8 sps:$4 sm:$0xff]  }
 0x229   : > { %v2946_v42 = vmax.f32 %v2870_v40, 0.0  ;;  %v12515_v43 = vpop.f32.mrb[76].mxu1  ;;  %3025 = vrot.lane.b32.xlu0 %v2945_v39, %s14659_s16  ;;  %v12603_v44 = vpop.f32.mrb[76].mxu0  ;;  %v2407_v61 = vmax.f32 %v2355_v45, 0.0 }
 0x22a   : > { %v12516_v46 = vpop.f32.mrb[77].mxu1  ;;  %v12604_v47 = vpop.f32.mrb[77].mxu0 }
 0x22b   : > { %v15964_v49 = vadd.f32 %v12516_v46, %v12515_v43  ;;  %v12518_v50 = vpop.f32.mrb[78].mxu1  ;;  %v12605_v51 = vadd.f32 %v12604_v47, %v12603_v44  ;;  %3027 = vrot.lane.b32.xlu1 %v2946_v42, %s14659_s16  ;;  %v12606_v52 = vpop.f32.mrb[78].mxu0  ;;  %v11497_v43 = vld [vmem:[%s15354_s17 + $0x5b0] sm:$0xff]  ;;  %v11498_v44 = vld [vmem:[%s15354_s17 + $0x5b8] sm:$0xff] }
 0x22c   : > { %v12519_v55 = vpop.f32.mrb[79].mxu1  ;;  %v12607_v56 = vpop.f32.mrb[79].mxu0 }
 0x22d   : > { %v2875_v58 = vadd.f32 %v15819_v28, %v12605_v51  ;;  %v15970_v59 = vadd.f32 %v12519_v55, %v12518_v50  ;;  %v12608_v60 = vadd.f32 %v12607_v56, %v12606_v52  ;;  %2494 = vrot.lane.b32.xlu0 %v2406_v53, %s14658_s21  ;;  %v11529_v51 = vcombine.low %v11497_v43, %v11498_v44  ;;  %v14073_v52 = vld [vmem:[%s15354_s17 + $0x670] ss:$8 sps:$4 sm:$0xff]  }
 0x22e   : > { %4377 = vmatmul.mubr.bf16.gmra.mrb[184].mxu1 %v14055_v10  ;;  %4891 = vmatmul.mubr.bf16.gmra.mrb[184].mxu0 %v14056_v48 }
 0x22f   : > { %v2947_v63 = vmax.f32 %v2875_v58, 0.0  ;;  %v2878_v62 = vadd.f32 %v15819_v28, %v12608_v60  ;;  %2496 = vrot.lane.b32.xlu1 %v2407_v61, %s14658_s21  ;;  %4384 = vmatprep.mubr.bf16.mxu1 %v14057_v54  ;;  %v14076_v58 = vld [vmem:[%s15354_s17 + $0x684] ss:$8 sps:$4 sm:$0xff]  }
 0x230   : > { %4898 = vmatprep.mubr.bf16.mxu0 %v14059_v57  ;;  %v14074_v57 = vld [vmem:[%s15354_s17 + $0x5c4] ss:$8 sps:$4 sm:$0xff]  }
 0x231   : > { %v2948_v11 = vmax.f32 %v2878_v62, 0.0  ;;  %v12521_v18 = vpop.f32.mrb[80].mxu1  ;;  %v12609_v1 = vpop.f32.mrb[80].mxu0  ;;  %3029 = vrot.lane.b32.xlu0 %v2947_v63, %s14659_s16 }
 0x232   : > { %v12522_v4 = vpop.f32.mrb[81].mxu1  ;;  %v12610_v5 = vpop.f32.mrb[81].mxu0 }
 0x233   : > { %v15978_v15 = vadd.f32 %v12522_v4, %v12521_v18  ;;  %v12524_v16 = vpop.f32.mrb[82].mxu1  ;;  %v12611_v17 = vadd.f32 %v12610_v5, %v12609_v1  ;;  %v12612_v12 = vpop.f32.mrb[82].mxu0  ;;  %3031 = vrot.lane.b32.xlu1 %v2948_v11, %s14659_s16 }
 0x234   : > { %v12525_v13 = vpop.f32.mrb[83].mxu1  ;;  %v12613_v20 = vpop.f32.mrb[83].mxu0 }
 0x235   : > { %v2883_v21 = vadd.f32 %v15819_v28, %v12611_v17  ;;  %v15984_v22 = vadd.f32 %v12525_v13, %v12524_v16  ;;  %v12614_v23 = vadd.f32 %v12613_v20, %v12612_v12  ;;  %v11500_v16 = vld [vmem:[%s15354_s17 + $0x5c8] sm:$0xff] }
 0x236   : > { %4385 = vmatmul.mubr.bf16.gmra.mrb[188].mxu1 %v14061_v8  ;;  %4899 = vmatmul.mubr.bf16.gmra.mrb[188].mxu0 %v14062_v9  ;;  %v11499_v9 = vld [vmem:[%s15354_s17 + $0x5c0] sm:$0xff] }
 0x237   : > { %v2949_v24 = vmax.f32 %v2883_v21, 0.0  ;;  %v2886_v25 = vadd.f32 %v15819_v28, %v12614_v23  ;;  %4392 = vmatprep.mubr.bf16.mxu1 %v14063_v19  ;;  %4906 = vmatprep.mubr.bf16.mxu0 %v14065_v0  ;;  %v11531_v23 = vcombine.low %v11499_v9, %v11500_v16 }
 0x239   : > { %v2950_v26 = vmax.f32 %v2886_v25, 0.0  ;;  %v12527_v2 = vpop.f32.mrb[84].mxu1  ;;  %v12615_v27 = vpop.f32.mrb[84].mxu0  ;;  %3033 = vrot.lane.b32.xlu0 %v2949_v24, %s14659_s16  ;;  %v14078_v24 = vld [vmem:[%s15354_s17 + $0x680] ss:$8 sps:$4 sm:$0xff]  }
 0x23a   : > { %v12528_v3 = vpop.f32.mrb[85].mxu1  ;;  %v12616_v29 = vpop.f32.mrb[85].mxu0 }
 0x23b   : > { %v15990_v32 = vadd.f32 %v12528_v3, %v12527_v2  ;;  %v12530_v33 = vpop.f32.mrb[86].mxu1  ;;  %v2447_v14 = vpop.permute.xlu1 %2446  ;;  %v12617_v34 = vadd.f32 %v12616_v29, %v12615_v27  ;;  %3035 = vrot.lane.b32.xlu1 %v2950_v26, %s14659_s16  ;;  %v14079_v3 = vld [vmem:[%s15354_s17 + $0x5d4] ss:$8 sps:$4 sm:$0xff]  }
 0x23c   : > { %2543 = vst.msk [vmem:[#allocation2] sm:$0xff] %vm2542_vm1, %v2447_v14  ;;  %v12531_v37 = vpop.f32.mrb[87].mxu1  ;;  %v12618_v6 = vpop.f32.mrb[86].mxu0 }
 0x23d   : > { %v2891_v7 = vadd.f32 %v15819_v28, %v12617_v34  ;;  %v15997_v38 = vadd.f32 %v12531_v37, %v12530_v33  ;;  %v12619_v39 = vpop.f32.mrb[87].mxu0 }
 0x23e   : > { %v12620_v40 = vadd.f32 %v12619_v39, %v12618_v6  ;;  %4393 = vmatmul.mubr.bf16.gmra.mrb[192].mxu1 %v14067_v30  ;;  %4907 = vmatmul.mubr.bf16.gmra.mrb[192].mxu0 %v14068_v31  ;;  %v14081_v31 = vld [vmem:[%s15354_s17 + $0x694] ss:$8 sps:$4 sm:$0xff]  }
 0x23f   : > { %v2951_v41 = vmax.f32 %v2891_v7, 0.0  ;;  %v2449_v42 = vpop.permute.xlu1 %2448  ;;  %4400 = vmatprep.mubr.bf16.mxu1 %v14069_v35  ;;  %4914 = vmatprep.mubr.bf16.mxu0 %v14071_v36  ;;  %v11501_v39 = vld [vmem:[%s15354_s17 + $0x5d0] sm:$0xff] }
 0x240   : > { %v2894_v45 = vadd.f32 %v15819_v28, %v12620_v40  ;;  %2544 = vst.msk [vmem:[#allocation2 + $0x10] sm:$0xff] %vm2542_vm1, %v2449_v42  ;;  %v11502_v40 = vld [vmem:[%s15354_s17 + $0x5d8] sm:$0xff] }
 0x241   : > { %v12661_v46 = vpop.f32.mrb[88].mxu1  ;;  %v12621_v47 = vpop.f32.mrb[88].mxu0  ;;  %3037 = vrot.lane.b32.xlu0 %v2951_v41, %s14659_s16 }
 0x242   : > { %v2952_v10 = vmax.f32 %v2894_v45, 0.0  ;;  %v12662_v48 = vpop.f32.mrb[89].mxu1  ;;  %v12622_v50 = vpop.f32.mrb[89].mxu0 }
 0x243   : > { %v12663_v53 = vadd.f32 %v12662_v48, %v12661_v46  ;;  %v12664_v54 = vpop.f32.mrb[90].mxu1  ;;  %v2451_v55 = vpop.permute.xlu0 %2450  ;;  %v12623_v56 = vadd.f32 %v12622_v50, %v12621_v47  ;;  %v11533_v46 = vcombine.low %v11501_v39, %v11502_v40  ;;  %v14083_v47 = vld [vmem:[%s15354_s17 + $0x690] ss:$8 sps:$4 sm:$0xff]  }
 0x244   : > { %2545 = vst.msk [vmem:[#allocation2 + $0x20] sm:$0xff] %vm2542_vm1, %v2451_v55  ;;  %v12624_v60 = vpop.f32.mrb[90].mxu0  ;;  %v12665_v61 = vpop.f32.mrb[91].mxu1  ;;  %3039 = vrot.lane.b32.xlu1 %v2952_v10, %s14659_s16 }
 0x245   : > { %v2899_v63 = vadd.f32 %v15819_v28, %v12623_v56  ;;  %v12666_v62 = vadd.f32 %v12665_v61, %v12664_v54  ;;  %v2453_v11 = vpop.permute.xlu1 %2452  ;;  %v12625_v18 = vpop.f32.mrb[91].mxu0  ;;  %v3350_v1 = vadd.f32 %v15819_v28, %v12663_v53  ;;  %v14086_v53 = vld [vmem:[%s15354_s17 + $0x6a4] ss:$8 sps:$4 sm:$0xff]  }
 0x246   : > { %2546 = vst.msk [vmem:[#allocation2 + $0x30] sm:$0xff] %vm2542_vm1, %v2453_v11  ;;  %v12626_v4 = vadd.f32 %v12625_v18, %v12624_v60  ;;  %4401 = vmatmul.mubr.bf16.gmra.mrb[196].mxu1 %v11529_v51  ;;  %4915 = vmatmul.mubr.bf16.gmra.mrb[196].mxu0 %v14073_v52  ;;  %v14084_v52 = vld [vmem:[%s15354_s17 + $0x5e4] ss:$8 sps:$4 sm:$0xff]  }
 0x247   : > { %v3476_v5 = vmax.f32 %v3350_v1, 0.0  ;;  %v3353_v8 = vadd.f32 %v15819_v28, %v12666_v62  ;;  %4408 = vmatprep.mubr.bf16.mxu1 %v14074_v57  ;;  %4922 = vmatprep.mubr.bf16.mxu0 %v14076_v58  ;;  %v2953_v17 = vmax.f32 %v2899_v63, 0.0  ;;  %v11503_v11 = vld [vmem:[%s15354_s17 + $0x5e0] sm:$0xff]  ;;  %v11504_v18 = vld [vmem:[%s15354_s17 + $0x5e8] sm:$0xff] }
 0x248   : > { %v2902_v12 = vadd.f32 %v15819_v28, %v12626_v4  ;;  %v11535_v16 = vcombine.low %v11503_v11, %v11504_v18 }
 0x249   : > { %v12667_v19 = vpop.f32.mrb[92].mxu1  ;;  %3540 = vrot.lane.b32.xlu0 %v3476_v5, %s14660_s18  ;;  %v12627_v0 = vpop.f32.mrb[92].mxu0  ;;  %v3477_v13 = vmax.f32 %v3353_v8, 0.0 }
 0x24a   : > { %v12668_v20 = vpop.f32.mrb[93].mxu1  ;;  %v12628_v21 = vpop.f32.mrb[93].mxu0  ;;  %v2954_v33 = vmax.f32 %v2902_v12, 0.0 }
 0x24b   : > { %v12669_v25 = vadd.f32 %v12668_v20, %v12667_v19  ;;  %v12670_v26 = vpop.f32.mrb[94].mxu1  ;;  %v2455_v2 = vpop.permute.xlu0 %2454  ;;  %v16018_v27 = vadd.f32 %v12628_v21, %v12627_v0  ;;  %3542 = vrot.lane.b32.xlu1 %v3477_v13, %s14660_s18  ;;  %v14089_v13 = vld [vmem:[%s15354_s17 + $0x5f4] ss:$8 sps:$4 sm:$0xff]  }
 0x24c   : > { %2547 = vst.msk [vmem:[#allocation2 + $0x40] sm:$0xff] %vm2542_vm1, %v2455_v2  ;;  %v12630_v29 = vpop.f32.mrb[94].mxu0  ;;  %v12671_v30 = vpop.f32.mrb[95].mxu1  ;;  %v14091_v20 = vld [vmem:[%s15354_s17 + $0x6b4] ss:$8 sps:$4 sm:$0xff]  }
 0x24d   : > { %v12672_v14 = vadd.f32 %v12671_v30, %v12670_v26  ;;  %v2457_v34 = vpop.permute.xlu1 %2456  ;;  %v12631_v35 = vpop.f32.mrb[95].mxu0  ;;  %3041 = vrot.lane.b32.xlu0 %v2953_v17, %s14659_s16  ;;  %v3358_v36 = vadd.f32 %v15819_v28, %v12669_v25  ;;  %v14088_v17 = vld [vmem:[%s15354_s17 + $0x6a0] ss:$8 sps:$4 sm:$0xff]   ;;  %v16059_v2 = vld [vmem:[%s18508_s2] ss:$0 sm:$0xff] }
 0x24e   : > { %2548 = vst.msk [vmem:[#allocation2 + $0x50] sm:$0xff] %vm2542_vm1, %v2457_v34  ;;  %v16027_v37 = vadd.f32 %v12631_v35, %v12630_v29  ;;  %4409 = vmatmul.mubr.bf16.gmra.mrb[200].mxu1 %v11531_v23  ;;  %4923 = vmatmul.mubr.bf16.gmra.mrb[200].mxu0 %v14078_v24  ;;  %v11506_v34 = vld [vmem:[%s15354_s17 + $0x5f8] sm:$0xff] }
 0x24f   : > { %3043 = vrot.lane.b32.xlu1 %v2954_v33, %s14659_s16  ;;  %v3478_v6 = vmax.f32 %v3358_v36, 0.0  ;;  %v3361_v7 = vadd.f32 %v15819_v28, %v12672_v14  ;;  %4416 = vmatprep.mubr.bf16.mxu1 %v14079_v3  ;;  %v11505_v14 = vld [vmem:[%s15354_s17 + $0x5f0] sm:$0xff] }
 0x250   : > { %4930 = vmatprep.mubr.bf16.mxu0 %v14081_v31  ;;  %v11537_v40 = vcombine.low %v11505_v14, %v11506_v34 }
 0x251   : > { %v12673_v41 = vpop.f32.mrb[96].mxu1  ;;  %3544 = vrot.lane.b32.xlu0 %v3478_v6, %s14660_s18  ;;  %v12633_v42 = vpop.f32.mrb[96].mxu0  ;;  %v3479_v43 = vmax.f32 %v3361_v7, 0.0 }
 0x252   : > { %v12674_v44 = vpop.f32.mrb[97].mxu1  ;;  %v12634_v45 = vpop.f32.mrb[97].mxu0 }
 0x253   : > { %v12675_v10 = vadd.f32 %v12674_v44, %v12673_v41  ;;  %v12676_v48 = vpop.f32.mrb[98].mxu1  ;;  %v2459_v50 = vpop.permute.xlu0 %2458  ;;  %v16035_v51 = vadd.f32 %v12634_v45, %v12633_v42  ;;  %3546 = vrot.lane.b32.xlu1 %v3479_v43, %s14660_s18  ;;  %v14093_v41 = vld [vmem:[%s15354_s17 + $0x6b0] ss:$8 sps:$4 sm:$0xff]   ;;  %v14096_v45 = vld [vmem:[%s15354_s17 + $0x704] ss:$8 sps:$4 sm:$0xff]  }
 0x254   : > { %2549 = vst.msk [vmem:[#allocation2 + $0x60] sm:$0xff] %vm2542_vm1, %v2459_v50  ;;  %v12636_v54 = vpop.f32.mrb[98].mxu0  ;;  %v12677_v55 = vpop.f32.mrb[99].mxu1 }
 0x255   : > { %v12678_v56 = vadd.f32 %v12677_v55, %v12676_v48  ;;  %v2461_v57 = vpop.permute.xlu1 %2460  ;;  %v12637_v58 = vpop.f32.mrb[99].mxu0  ;;  %v3366_v60 = vadd.f32 %v15819_v28, %v12675_v10 }
 0x256   : > { %2550 = vst.msk [vmem:[#allocation2 + $0x70] sm:$0xff] %vm2542_vm1, %v2461_v57  ;;  %v16043_v61 = vadd.f32 %v12637_v58, %v12636_v54  ;;  %4417 = vmatmul.mubr.bf16.gmra.mrb[204].mxu1 %v11533_v46  ;;  %4931 = vmatmul.mubr.bf16.gmra.mrb[204].mxu0 %v14083_v47  ;;  %v14097_v46 = vld [vmem:[%s15354_s17 + $0x6c4] ss:$8 sps:$4 sm:$0xff]  }
 0x257   : > { %v3480_v63 = vmax.f32 %v3366_v60, 0.0  ;;  %v3369_v62 = vadd.f32 %v15819_v28, %v12678_v56  ;;  %4424 = vmatprep.mubr.bf16.mxu1 %v14084_v52  ;;  %4938 = vmatprep.mubr.bf16.mxu0 %v14086_v53 }
 0x259   : > { %v12679_v1 = vpop.f32.mrb[100].mxu1  ;;  %3548 = vrot.lane.b32.xlu0 %v3480_v63, %s14660_s18  ;;  %v12639_v4 = vpop.f32.mrb[100].mxu0  ;;  %v3481_v5 = vmax.f32 %v3369_v62, 0.0 }
 0x25a   : > { %v12680_v8 = vpop.f32.mrb[101].mxu1  ;;  %v12640_v9 = vpop.f32.mrb[101].mxu0 }
 0x25b   : > { %v12681_v12 = vadd.f32 %v12680_v8, %v12679_v1  ;;  %v16050_v19 = vadd.f32 %v12640_v9, %v12639_v4  ;;  %v12682_v28 = vpop.f32.mrb[102].mxu1  ;;  %3550 = vrot.lane.b32.xlu1 %v3481_v5, %s14660_s18  ;;  %v2994_v0 = vpop.permute.xlu0 %2993  ;;  %v14094_v5 = vld [vmem:[%s15354_s17 + $0x700] ss:$8 sps:$4 sm:$0xff]  }
 0x25c   : > { %3090 = vst.msk [vmem:[#allocation2] sm:$0xff] %vm3089_vm2, %v2994_v0  ;;  %v12642_v21 = vpop.f32.mrb[102].mxu0  ;;  %v12683_v23 = vpop.f32.mrb[103].mxu1 }
 0x25d   : > { %v12684_v24 = vadd.f32 %v12683_v23, %v12682_v28  ;;  %v12643_v25 = vpop.f32.mrb[103].mxu0  ;;  %v2996_v26 = vpop.permute.xlu1 %2995  ;;  %v3374_v3 = vadd.f32 %v16059_v2, %v12681_v12 }
 0x25e   : > { %v16062_v29 = vadd.f32 %v12643_v25, %v12642_v21  ;;  %3091 = vst.msk [vmem:[#allocation2 + $0x10] sm:$0xff] %vm3089_vm2, %v2996_v26  ;;  %4425 = vmatmul.mubr.bf16.gmra.mrb[208].mxu1 %v11535_v16  ;;  %4939 = vmatmul.mubr.bf16.gmra.mrb[208].mxu0 %v14088_v17  ;;  %v14099_v16 = vld [vmem:[%s15354_s17 + $0x6c0] ss:$8 sps:$4 sm:$0xff]   ;;  %v14100_v17 = vld [vmem:[%s15354_s17 + $0x714] ss:$8 sps:$4 sm:$0xff]  }
 0x25f   : > { %v2463_v30 = vpop.permute.xlu0 %2462  ;;  %v3482_v31 = vmax.f32 %v3374_v3, 0.0  ;;  %v3377_v33 = vadd.f32 %v16059_v2, %v12684_v24  ;;  %4432 = vmatprep.mubr.bf16.mxu1 %v14089_v13  ;;  %4946 = vmatprep.mubr.bf16.mxu0 %v14091_v20  ;;  %v14106_v20 = vld [vmem:[%s15354_s17 + $0x6d4] ss:$8 sps:$4 sm:$0xff]  }
 0x260   : > { %2551 = vst.msk [vmem:[#allocation2 + $0x80] sm:$0xff] %vm2542_vm1, %v2463_v30 }
 0x261   : > { %v12685_v35 = vpop.f32.mrb[104].mxu1  ;;  %v2465_v36 = vpop.permute.xlu1 %2464  ;;  %3552 = vrot.lane.b32.xlu0 %v3482_v31, %s14660_s18  ;;  %v3483_v6 = vmax.f32 %v3377_v33, 0.0 }
 0x262   : > { %2552 = vst.msk [vmem:[#allocation2 + $0x90] sm:$0xff] %vm2542_vm1, %v2465_v36  ;;  %v12686_v7 = vpop.f32.mrb[105].mxu1  ;;  %v12773_v39 = vpop.f32.mrb[104].mxu0  ;;  %v11605_v36 = vld [vmem:[%s15354_s17 + $0x710] sm:$0xff] }
 0x263   : > { %v12687_v42 = vadd.f32 %v12686_v7, %v12685_v35  ;;  %v12688_v43 = vpop.f32.mrb[106].mxu1  ;;  %v12774_v44 = vpop.f32.mrb[105].mxu0  ;;  %3554 = vrot.lane.b32.xlu1 %v3483_v6, %s14660_s18  ;;  %v11606_v6 = vld [vmem:[%s15354_s17 + $0x718] sm:$0xff] }
 0x264   : > { %v12775_v47 = vadd.f32 %v12774_v44, %v12773_v39  ;;  %v2998_v10 = vpop.permute.xlu0 %2997  ;;  %v12689_v48 = vpop.f32.mrb[107].mxu1 }
 0x265   : > { %3092 = vst.msk [vmem:[#allocation2 + $0x20] sm:$0xff] %vm3089_vm2, %v2998_v10  ;;  %v12690_v50 = vadd.f32 %v12689_v48, %v12688_v43  ;;  %v12776_v52 = vpop.f32.mrb[106].mxu0  ;;  %v3000_v53 = vpop.permute.xlu1 %2999  ;;  %v3382_v54 = vadd.f32 %v16059_v2, %v12687_v42  ;;  %v14108_v10 = vld [vmem:[%s15354_s17 + $0x6d0] ss:$8 sps:$4 sm:$0xff]  }
 0x266   : > { %v3897_v55 = vadd.f32 %v16059_v2, %v12775_v47  ;;  %v12777_v56 = vpop.f32.mrb[107].mxu0  ;;  %3093 = vst.msk [vmem:[#allocation2 + $0x30] sm:$0xff] %vm3089_vm2, %v3000_v53  ;;  %4433 = vmatmul.mubr.bf16.gmra.mrb[212].mxu1 %v11537_v40  ;;  %4947 = vmatmul.mubr.bf16.gmra.mrb[212].mxu0 %v14093_v41  ;;  %v14102_v47 = vld [vmem:[%s15354_s17 + $0x724] ss:$8 sps:$4 sm:$0xff]  }
 0x267   : > { %v12778_v57 = vadd.f32 %v12777_v56, %v12776_v52  ;;  %v3484_v58 = vmax.f32 %v3382_v54, 0.0  ;;  %v3385_v60 = vadd.f32 %v16059_v2, %v12690_v50  ;;  %5404 = vmatprep.mubr.bf16.mxu1 %v14096_v45  ;;  %4954 = vmatprep.mubr.bf16.mxu0 %v14097_v46  ;;  %v11637_v46 = vcombine.low %v11605_v36, %v11606_v6  ;;  %v14120_v54 = vld [vmem:[%s15354_s17 + $0x6e4] ss:$8 sps:$4 sm:$0xff]  }
 0x268   : > { %v4023_v63 = vmax.f32 %v3897_v55, 0.0  ;;  %v2467_v62 = vpop.permute.xlu0 %2466 }
 0x269   : > { %v3900_v11 = vadd.f32 %v16059_v2, %v12778_v57  ;;  %2553 = vst.msk [vmem:[#allocation2 + $0xa0] sm:$0xff] %vm2542_vm1, %v2467_v62  ;;  %v12691_v18 = vpop.f32.mrb[108].mxu1  ;;  %v2469_v1 = vpop.permute.xlu1 %2468  ;;  %3556 = vrot.lane.b32.xlu0 %v3484_v58, %s14660_s18  ;;  %v3485_v4 = vmax.f32 %v3385_v60, 0.0 }
 0x26a   : > { %4055 = vst.msk [vmem:[#allocation2 + $0x8] sm:$0xff] %vm1995_vm0, %v4023_v63  ;;  %v12692_v8 = vpop.f32.mrb[109].mxu1  ;;  %v12779_v9 = vpop.f32.mrb[108].mxu0 }
 0x26b   : > { %2554 = vst.msk [vmem:[#allocation2 + $0xb0] sm:$0xff] %vm2542_vm1, %v2469_v1  ;;  %v4024_v12 = vmax.f32 %v3900_v11, 0.0  ;;  %v12693_v28 = vadd.f32 %v12692_v8, %v12691_v18  ;;  %v12694_v0 = vpop.f32.mrb[110].mxu1  ;;  %v12780_v13 = vpop.f32.mrb[109].mxu0  ;;  %3558 = vrot.lane.b32.xlu1 %v3485_v4, %s14660_s18  ;;  %v11607_v1 = vld [vmem:[%s15354_s17 + $0x720] sm:$0xff] }
 0x26c   : > { %v12781_v21 = vadd.f32 %v12780_v13, %v12779_v9  ;;  %v3002_v23 = vpop.permute.xlu0 %3001  ;;  %v12695_v24 = vpop.f32.mrb[111].mxu1  ;;  %v11608_v9 = vld [vmem:[%s15354_s17 + $0x728] sm:$0xff] }
 0x26d   : > { %4056 = vst.msk [vmem:[#allocation2 + $0x18] sm:$0xff] %vm1995_vm0, %v4024_v12  ;;  %v12696_v25 = vadd.f32 %v12695_v24, %v12694_v0  ;;  %v12782_v26 = vpop.f32.mrb[110].mxu0  ;;  %v3004_v3 = vpop.permute.xlu1 %3003  ;;  %v3390_v30 = vadd.f32 %v16059_v2, %v12693_v28 }
 0x26e   : > { %3094 = vst.msk [vmem:[#allocation2 + $0x40] sm:$0xff] %vm3089_vm2, %v3002_v23  ;;  %v3905_v31 = vadd.f32 %v16059_v2, %v12781_v21  ;;  %v12783_v33 = vpop.f32.mrb[111].mxu0  ;;  %3095 = vst.msk [vmem:[#allocation2 + $0x50] sm:$0xff] %vm3089_vm2, %v3004_v3  ;;  %5405 = vmatmul.mubr.bf16.vlgmr.msra.gmra.mrb[216].mxu1 %v14094_v5  ;;  %4955 = vmatmul.mubr.bf16.gmra.mrb[216].mxu0 %v14099_v16  ;;  %v11567_v16 = vld [vmem:[%s15354_s17 + $0x6e0] sm:$0xff] }
 0x26f   : > { %v12784_v14 = vadd.f32 %v12783_v33, %v12782_v26  ;;  %v3486_v34 = vmax.f32 %v3390_v30, 0.0  ;;  %v3393_v35 = vadd.f32 %v16059_v2, %v12696_v25  ;;  %5412 = vmatprep.mubr.bf16.mxu1 %v14100_v17  ;;  %4962 = vmatprep.mubr.bf16.mxu0 %v14106_v20  ;;  %v11568_v17 = vld [vmem:[%s15354_s17 + $0x6e8] sm:$0xff]  ;;  %v11639_v25 = vcombine.low %v11607_v1, %v11608_v9  ;;  %v14104_v26 = vld [vmem:[%s15354_s17 + $0x734] ss:$8 sps:$4 sm:$0xff]  }
 0x270   : > { %v4025_v7 = vmax.f32 %v3905_v31, 0.0  ;;  %v2471_v39 = vpop.permute.xlu0 %2470  ;;  %v11599_v3 = vcombine.low %v11567_v16, %v11568_v17  ;;  %v14109_v1 = vld [vmem:[%s15354_s17 + $0x744] ss:$8 sps:$4 sm:$0xff]  }
 0x271   : > { %v3908_v40 = vadd.f32 %v16059_v2, %v12784_v14  ;;  %2555 = vst.msk [vmem:[#allocation2 + $0xc0] sm:$0xff] %vm2542_vm1, %v2471_v39  ;;  %v12697_v41 = vpop.f32.mrb[112].mxu1  ;;  %v2473_v42 = vpop.permute.xlu1 %2472  ;;  %3560 = vrot.lane.b32.xlu0 %v3486_v34, %s14660_s18  ;;  %v3487_v43 = vmax.f32 %v3393_v35, 0.0  ;;  %v14138_v34 = vld [vmem:[%s15354_s17 + $0x6f4] ss:$8 sps:$4 sm:$0xff]  }
 0x272   : > { %4057 = vst.msk [vmem:[#allocation2 + $0x28] sm:$0xff] %vm1995_vm0, %v4025_v7  ;;  %v12698_v44 = vpop.f32.mrb[113].mxu1  ;;  %v12785_v45 = vpop.f32.mrb[112].mxu0 }
 0x273   : > { %2556 = vst.msk [vmem:[#allocation2 + $0xd0] sm:$0xff] %vm2542_vm1, %v2473_v42  ;;  %v4026_v48 = vmax.f32 %v3908_v40, 0.0  ;;  %v12699_v50 = vadd.f32 %v12698_v44, %v12697_v41  ;;  %v12700_v52 = vpop.f32.mrb[114].mxu1  ;;  %v12786_v53 = vpop.f32.mrb[113].mxu0  ;;  %3562 = vrot.lane.b32.xlu1 %v3487_v43, %s14660_s18 }
 0x274   : > { %v12787_v55 = vadd.f32 %v12786_v53, %v12785_v45  ;;  %v3006_v56 = vpop.permute.xlu0 %3005  ;;  %v12701_v57 = vpop.f32.mrb[115].mxu1 }
 0x275   : > { %4058 = vst.msk [vmem:[#allocation2 + $0x38] sm:$0xff] %vm1995_vm0, %v4026_v48  ;;  %v12702_v58 = vadd.f32 %v12701_v57, %v12700_v52  ;;  %v12788_v60 = vpop.f32.mrb[114].mxu0  ;;  %v3008_v63 = vpop.permute.xlu1 %3007  ;;  %v3398_v62 = vadd.f32 %v16059_v2, %v12699_v50 }
 0x276   : > { %3096 = vst.msk [vmem:[#allocation2 + $0x60] sm:$0xff] %vm3089_vm2, %v3006_v56  ;;  %v3913_v11 = vadd.f32 %v16059_v2, %v12787_v55  ;;  %v12789_v18 = vpop.f32.mrb[115].mxu0  ;;  %3097 = vst.msk [vmem:[#allocation2 + $0x70] sm:$0xff] %vm3089_vm2, %v3008_v63  ;;  %5413 = vmatmul.mubr.bf16.gmra.mrb[220].mxu1 %v11637_v46  ;;  %4963 = vmatmul.mubr.bf16.gmra.mrb[220].mxu0 %v14108_v10  ;;  %v11610_v10 = vld [vmem:[%s15354_s17 + $0x738] sm:$0xff] }
 0x277   : > { %v12790_v4 = vadd.f32 %v12789_v18, %v12788_v60  ;;  %v3488_v5 = vmax.f32 %v3398_v62, 0.0  ;;  %v3401_v8 = vadd.f32 %v16059_v2, %v12702_v58  ;;  %5420 = vmatprep.mubr.bf16.mxu1 %v14102_v47  ;;  %4970 = vmatprep.mubr.bf16.mxu0 %v14120_v54  ;;  %v11609_v47 = vld [vmem:[%s15354_s17 + $0x730] sm:$0xff] }
 0x278   : > { %v4027_v12 = vmax.f32 %v3913_v11, 0.0  ;;  %v2475_v28 = vpop.permute.xlu0 %2474  ;;  %v11641_v58 = vcombine.low %v11609_v47, %v11610_v10  ;;  %v14140_v60 = vld [vmem:[%s15354_s17 + $0x6f0] ss:$8 sps:$4 sm:$0xff]  }
 0x279   : > { %v3916_v0 = vadd.f32 %v16059_v2, %v12790_v4  ;;  %2557 = vst.msk [vmem:[#allocation2 + $0xe0] sm:$0xff] %vm2542_vm1, %v2475_v28  ;;  %v12703_v13 = vpop.f32.mrb[116].mxu1  ;;  %v2477_v20 = vpop.permute.xlu1 %2476  ;;  %3564 = vrot.lane.b32.xlu0 %v3488_v5, %s14660_s18  ;;  %v3489_v21 = vmax.f32 %v3401_v8, 0.0 }
 0x27a   : > { %4059 = vst.msk [vmem:[#allocation2 + $0x48] sm:$0xff] %vm1995_vm0, %v4027_v12  ;;  %v12704_v23 = vpop.f32.mrb[117].mxu1  ;;  %v12791_v24 = vpop.f32.mrb[116].mxu0 }
 0x27b   : > { %2558 = vst.msk [vmem:[#allocation2 + $0xf0] sm:$0xff] %vm2542_vm1, %v2477_v20  ;;  %v4028_v30 = vmax.f32 %v3916_v0, 0.0  ;;  %v12705_v31 = vadd.f32 %v12704_v23, %v12703_v13  ;;  %v12706_v33 = vpop.f32.mrb[118].mxu1  ;;  %v12792_v14 = vpop.f32.mrb[117].mxu0  ;;  %3566 = vrot.lane.b32.xlu1 %v3489_v21, %s14660_s18  ;;  %v11611_v23 = vld [vmem:[%s15354_s17 + $0x740] sm:$0xff] }
 0x27c   : > { %v12793_v35 = vadd.f32 %v12792_v14, %v12791_v24  ;;  %v3010_v36 = vpop.permute.xlu0 %3009  ;;  %v12707_v6 = vpop.f32.mrb[119].mxu1  ;;  %v11612_v24 = vld [vmem:[%s15354_s17 + $0x748] sm:$0xff] }
 0x27d   : > { %4060 = vst.msk [vmem:[#allocation2 + $0x58] sm:$0xff] %vm1995_vm0, %v4028_v30  ;;  %v12708_v7 = vadd.f32 %v12707_v6, %v12706_v33  ;;  %v12794_v39 = vpop.f32.mrb[118].mxu0  ;;  %v3012_v40 = vpop.permute.xlu1 %3011  ;;  %v3406_v41 = vadd.f32 %v16059_v2, %v12705_v31 }
 0x27e   : > { %3098 = vst.msk [vmem:[#allocation2 + $0x80] sm:$0xff] %vm3089_vm2, %v3010_v36  ;;  %v3921_v42 = vadd.f32 %v16059_v2, %v12793_v35  ;;  %v12795_v43 = vpop.f32.mrb[119].mxu0  ;;  %3099 = vst.msk [vmem:[#allocation2 + $0x90] sm:$0xff] %vm3089_vm2, %v3012_v40  ;;  %5421 = vmatmul.mubr.bf16.gmra.mrb[224].mxu1 %v11639_v25  ;;  %4971 = vmatmul.mubr.bf16.gmra.mrb[224].mxu0 %v11599_v3  ;;  %v11643_v35 = vcombine.low %v11611_v23, %v11612_v24  ;;  %v14111_v40 = vld [vmem:[%s15354_s17 + $0x754] ss:$8 sps:$4 sm:$0xff]  }
 0x27f   : > { %v12796_v44 = vadd.f32 %v12795_v43, %v12794_v39  ;;  %v3490_v45 = vmax.f32 %v3406_v41, 0.0  ;;  %v3409_v46 = vadd.f32 %v16059_v2, %v12708_v7  ;;  %5428 = vmatprep.mubr.bf16.mxu1 %v14104_v26  ;;  %4978 = vmatprep.mubr.bf16.mxu0 %v14138_v34 }
 0x280   : > { %v4029_v48 = vmax.f32 %v3921_v42, 0.0  ;;  %v2479_v50 = vpop.permute.xlu0 %2478 }
 0x281   : > { %v3924_v52 = vadd.f32 %v16059_v2, %v12796_v44  ;;  %2559 = vst.msk [vmem:[#allocation2 + $0x100] sm:$0xff] %vm2542_vm1, %v2479_v50  ;;  %v12709_v53 = vpop.f32.mrb[120].mxu1  ;;  %v2481_v54 = vpop.permute.xlu1 %2480  ;;  %3568 = vrot.lane.b32.xlu0 %v3490_v45, %s14660_s18  ;;  %v3491_v55 = vmax.f32 %v3409_v46, 0.0 }
 0x282   : > { %4061 = vst.msk [vmem:[#allocation2 + $0x68] sm:$0xff] %vm1995_vm0, %v4029_v48  ;;  %v12710_v56 = vpop.f32.mrb[121].mxu1  ;;  %v12797_v57 = vpop.f32.mrb[120].mxu0 }
 0x283   : > { %2560 = vst.msk [vmem:[#allocation2 + $0x110] sm:$0xff] %vm2542_vm1, %v2481_v54  ;;  %v4030_v63 = vmax.f32 %v3924_v52, 0.0  ;;  %v12711_v62 = vadd.f32 %v12710_v56, %v12709_v53  ;;  %v12712_v11 = vpop.f32.mrb[122].mxu1  ;;  %v12798_v18 = vpop.f32.mrb[121].mxu0  ;;  %3570 = vrot.lane.b32.xlu1 %v3491_v55, %s14660_s18  ;;  %v11613_v54 = vld [vmem:[%s15354_s17 + $0x750] sm:$0xff]  ;;  %v11614_v55 = vld [vmem:[%s15354_s17 + $0x758] sm:$0xff] }
 0x284   : > { %v12799_v4 = vadd.f32 %v12798_v18, %v12797_v57  ;;  %v3014_v5 = vpop.permute.xlu0 %3013  ;;  %v12713_v8 = vpop.f32.mrb[123].mxu1 }
 0x285   : > { %4062 = vst.msk [vmem:[#allocation2 + $0x78] sm:$0xff] %vm1995_vm0, %v4030_v63  ;;  %v12714_v9 = vadd.f32 %v12713_v8, %v12712_v11  ;;  %v12800_v16 = vpop.f32.mrb[122].mxu0  ;;  %v3016_v17 = vpop.permute.xlu1 %3015  ;;  %v3414_v12 = vadd.f32 %v16059_v2, %v12711_v62 }
 0x286   : > { %3100 = vst.msk [vmem:[#allocation2 + $0xa0] sm:$0xff] %vm3089_vm2, %v3014_v5  ;;  %v3929_v28 = vadd.f32 %v16059_v2, %v12799_v4  ;;  %v12801_v0 = vpop.f32.mrb[123].mxu0  ;;  %3101 = vst.msk [vmem:[#allocation2 + $0xb0] sm:$0xff] %vm3089_vm2, %v3016_v17  ;;  %5429 = vmatmul.mubr.bf16.gmra.mrb[228].mxu1 %v11641_v58  ;;  %4979 = vmatmul.mubr.bf16.gmra.mrb[228].mxu0 %v14140_v60 }
 0x287   : > { %v12802_v13 = vadd.f32 %v12801_v0, %v12800_v16  ;;  %v3492_v20 = vmax.f32 %v3414_v12, 0.0  ;;  %v3417_v21 = vadd.f32 %v16059_v2, %v12714_v9  ;;  %5436 = vmatprep.mubr.bf16.mxu1 %v14109_v1  ;;  %v11645_v1 = vcombine.low %v11613_v54, %v11614_v55  ;;  %v14113_v16 = vld [vmem:[%s15354_s17 + $0x764] ss:$8 sps:$4 sm:$0xff]  }
 0x288   : > { %v4031_v25 = vmax.f32 %v3929_v28, 0.0  ;;  %v2483_v26 = vpop.permute.xlu0 %2482 }
 0x289   : > { %v3932_v3 = vadd.f32 %v16059_v2, %v12802_v13  ;;  %2561 = vst.msk [vmem:[#allocation2 + $0x120] sm:$0xff] %vm2542_vm1, %v2483_v26  ;;  %v12715_v30 = vpop.f32.mrb[124].mxu1  ;;  %v2485_v31 = vpop.permute.xlu1 %2484  ;;  %3572 = vrot.lane.b32.xlu0 %v3492_v20, %s14660_s18  ;;  %v3493_v33 = vmax.f32 %v3417_v21, 0.0 }
 0x28a   : > { %4063 = vst.msk [vmem:[#allocation2 + $0x88] sm:$0xff] %vm1995_vm0, %v4031_v25  ;;  %v12716_v14 = vpop.f32.mrb[125].mxu1  ;;  %v12803_v34 = vpop.f32.mrb[124].mxu0 }
 0x28b   : > { %2562 = vst.msk [vmem:[#allocation2 + $0x130] sm:$0xff] %vm2542_vm1, %v2485_v31  ;;  %v4032_v36 = vmax.f32 %v3932_v3, 0.0  ;;  %v12717_v6 = vadd.f32 %v12716_v14, %v12715_v30  ;;  %v12718_v7 = vpop.f32.mrb[126].mxu1  ;;  %v12804_v39 = vpop.f32.mrb[125].mxu0  ;;  %3574 = vrot.lane.b32.xlu1 %v3493_v33, %s14660_s18  ;;  %v11615_v30 = vld [vmem:[%s15354_s17 + $0x760] sm:$0xff]  ;;  %v11616_v31 = vld [vmem:[%s15354_s17 + $0x768] sm:$0xff] }
 0x28c   : > { %v12805_v41 = vadd.f32 %v12804_v39, %v12803_v34  ;;  %v3018_v42 = vpop.permute.xlu0 %3017  ;;  %v12719_v43 = vpop.f32.mrb[127].mxu1 }
 0x28d   : > { %4064 = vst.msk [vmem:[#allocation2 + $0x98] sm:$0xff] %vm1995_vm0, %v4032_v36  ;;  %v12720_v44 = vadd.f32 %v12719_v43, %v12718_v7  ;;  %v12806_v45 = vpop.f32.mrb[126].mxu0  ;;  %v3020_v46 = vpop.permute.xlu1 %3019  ;;  %v3422_v47 = vadd.f32 %v16059_v2, %v12717_v6 }
 0x28e   : > { %3102 = vst.msk [vmem:[#allocation2 + $0xc0] sm:$0xff] %vm3089_vm2, %v3018_v42  ;;  %v3937_v10 = vadd.f32 %v16059_v2, %v12805_v41  ;;  %v12807_v48 = vpop.f32.mrb[127].mxu0  ;;  %3103 = vst.msk [vmem:[#allocation2 + $0xd0] sm:$0xff] %vm3089_vm2, %v3020_v46  ;;  %5437 = vmatmul.mubr.bf16.gmra.mrb[232].mxu1 %v11643_v35 }
 0x28f   : > { %v12808_v50 = vadd.f32 %v12807_v48, %v12806_v45  ;;  %v3494_v52 = vmax.f32 %v3422_v47, 0.0  ;;  %v3425_v53 = vadd.f32 %v16059_v2, %v12720_v44  ;;  %5444 = vmatprep.mubr.bf16.mxu1 %v14111_v40  ;;  %v11647_v40 = vcombine.low %v11615_v30, %v11616_v31  ;;  %v14115_v45 = vld [vmem:[%s15354_s17 + $0x774] ss:$8 sps:$4 sm:$0xff]  }
 0x290   : > { %v4033_v56 = vmax.f32 %v3937_v10, 0.0  ;;  %v2487_v57 = vpop.permute.xlu0 %2486 }
 0x291   : > { %v3940_v58 = vadd.f32 %v16059_v2, %v12808_v50  ;;  %2563 = vst.msk [vmem:[#allocation2 + $0x140] sm:$0xff] %vm2542_vm1, %v2487_v57  ;;  %v12721_v60 = vpop.f32.mrb[128].mxu1  ;;  %v2489_v63 = vpop.permute.xlu1 %2488  ;;  %3576 = vrot.lane.b32.xlu0 %v3494_v52, %s14660_s18  ;;  %v3495_v62 = vmax.f32 %v3425_v53, 0.0 }
 0x292   : > { %4065 = vst.msk [vmem:[#allocation2 + $0xa8] sm:$0xff] %vm1995_vm0, %v4033_v56  ;;  %v12722_v11 = vpop.f32.mrb[129].mxu1  ;;  %v12809_v18 = vpop.f32.mrb[128].mxu0 }
 0x293   : > { %2564 = vst.msk [vmem:[#allocation2 + $0x150] sm:$0xff] %vm2542_vm1, %v2489_v63  ;;  %v4034_v4 = vmax.f32 %v3940_v58, 0.0  ;;  %v12723_v5 = vadd.f32 %v12722_v11, %v12721_v60  ;;  %v12724_v8 = vpop.f32.mrb[130].mxu1  ;;  %v12810_v9 = vpop.f32.mrb[129].mxu0  ;;  %3578 = vrot.lane.b32.xlu1 %v3495_v62, %s14660_s18 }
 0x294   : > { %v12811_v17 = vadd.f32 %v12810_v9, %v12809_v18  ;;  %v3022_v12 = vpop.permute.xlu0 %3021  ;;  %v12725_v28 = vpop.f32.mrb[131].mxu1 }
 0x295   : > { %4066 = vst.msk [vmem:[#allocation2 + $0xb8] sm:$0xff] %vm1995_vm0, %v4034_v4  ;;  %v12726_v0 = vadd.f32 %v12725_v28, %v12724_v8  ;;  %v12812_v13 = vpop.f32.mrb[130].mxu0  ;;  %v3024_v20 = vpop.permute.xlu1 %3023  ;;  %v3430_v21 = vadd.f32 %v16059_v2, %v12723_v5  ;;  %v14117_v8 = vld [vmem:[%s15354_s17 + $0x770] ss:$8 sps:$4 sm:$0xff]   ;;  %v14118_v28 = vld [vmem:[%s15354_s17 + $0x784] ss:$8 sps:$4 sm:$0xff]  }
 0x296   : > { %3104 = vst.msk [vmem:[#allocation2 + $0xe0] sm:$0xff] %vm3089_vm2, %v3022_v12  ;;  %v3945_v23 = vadd.f32 %v16059_v2, %v12811_v17  ;;  %v12813_v24 = vpop.f32.mrb[131].mxu0  ;;  %3105 = vst.msk [vmem:[#allocation2 + $0xf0] sm:$0xff] %vm3089_vm2, %v3024_v20  ;;  %5445 = vmatmul.mubr.bf16.gmra.mrb[236].mxu1 %v11645_v1 }
 0x297   : > { %v12814_v25 = vadd.f32 %v12813_v24, %v12812_v13  ;;  %v3496_v26 = vmax.f32 %v3430_v21, 0.0  ;;  %v3433_v3 = vadd.f32 %v16059_v2, %v12726_v0  ;;  %5452 = vmatprep.mubr.bf16.mxu1 %v14113_v16 }
 0x298   : > { %v4035_v33 = vmax.f32 %v3945_v23, 0.0  ;;  %v2491_v14 = vpop.permute.xlu0 %2490 }
 0x299   : > { %v3948_v34 = vadd.f32 %v16059_v2, %v12814_v25  ;;  %2565 = vst.msk [vmem:[#allocation2 + $0x160] sm:$0xff] %vm2542_vm1, %v2491_v14  ;;  %v12727_v35 = vpop.f32.mrb[132].mxu1  ;;  %v2493_v36 = vpop.permute.xlu1 %2492  ;;  %3580 = vrot.lane.b32.xlu0 %v3496_v26, %s14660_s18  ;;  %v3497_v6 = vmax.f32 %v3433_v3, 0.0 }
 0x29a   : > { %4067 = vst.msk [vmem:[#allocation2 + $0xc8] sm:$0xff] %vm1995_vm0, %v4035_v33  ;;  %v12728_v7 = vpop.f32.mrb[133].mxu1  ;;  %v12815_v39 = vpop.f32.mrb[132].mxu0 }
 0x29b   : > { %2566 = vst.msk [vmem:[#allocation2 + $0x170] sm:$0xff] %vm2542_vm1, %v2493_v36  ;;  %v4036_v41 = vmax.f32 %v3948_v34, 0.0  ;;  %v12729_v42 = vadd.f32 %v12728_v7, %v12727_v35  ;;  %v12730_v43 = vpop.f32.mrb[134].mxu1  ;;  %v12816_v44 = vpop.f32.mrb[133].mxu0  ;;  %3582 = vrot.lane.b32.xlu1 %v3497_v6, %s14660_s18 }
 0x29c   : > { %v12817_v46 = vadd.f32 %v12816_v44, %v12815_v39  ;;  %v3026_v47 = vpop.permute.xlu0 %3025  ;;  %v12731_v10 = vpop.f32.mrb[135].mxu1 }
 0x29d   : > { %4068 = vst.msk [vmem:[#allocation2 + $0xd8] sm:$0xff] %vm1995_vm0, %v4036_v41  ;;  %v12732_v48 = vadd.f32 %v12731_v10, %v12730_v43  ;;  %v12818_v50 = vpop.f32.mrb[134].mxu0  ;;  %v3028_v52 = vpop.permute.xlu1 %3027  ;;  %v3438_v53 = vadd.f32 %v16059_v2, %v12729_v42  ;;  %v14122_v41 = vld [vmem:[%s15354_s17 + $0x780] ss:$8 sps:$4 sm:$0xff]  }
 0x29e   : > { %3106 = vst.msk [vmem:[#allocation2 + $0x100] sm:$0xff] %vm3089_vm2, %v3026_v47  ;;  %v3953_v54 = vadd.f32 %v16059_v2, %v12817_v46  ;;  %v12819_v55 = vpop.f32.mrb[135].mxu0  ;;  %3107 = vst.msk [vmem:[#allocation2 + $0x110] sm:$0xff] %vm3089_vm2, %v3028_v52  ;;  %5453 = vmatmul.mubr.bf16.gmra.mrb[240].mxu1 %v11647_v40  ;;  %v14123_v46 = vld [vmem:[%s15354_s17 + $0x794] ss:$8 sps:$4 sm:$0xff]  }
 0x29f   : > { %v12820_v56 = vadd.f32 %v12819_v55, %v12818_v50  ;;  %v3498_v57 = vmax.f32 %v3438_v53, 0.0  ;;  %v3441_v58 = vadd.f32 %v16059_v2, %v12732_v48  ;;  %5460 = vmatprep.mubr.bf16.mxu1 %v14115_v45 }
 0x2a0   : > { %v4037_v60 = vmax.f32 %v3953_v54, 0.0  ;;  %v2495_v63 = vpop.permute.xlu0 %2494 }
 0x2a1   : > { %v3956_v62 = vadd.f32 %v16059_v2, %v12820_v56  ;;  %2567 = vst.msk [vmem:[#allocation2 + $0x180] sm:$0xff] %vm2542_vm1, %v2495_v63  ;;  %v12733_v11 = vpop.f32.mrb[136].mxu1  ;;  %v2497_v18 = vpop.permute.xlu1 %2496  ;;  %3584 = vrot.lane.b32.xlu0 %v3498_v57, %s14660_s18  ;;  %v3499_v1 = vmax.f32 %v3441_v58, 0.0 }
 0x2a2   : > { %4069 = vst.msk [vmem:[#allocation2 + $0xe8] sm:$0xff] %vm1995_vm0, %v4037_v60  ;;  %v12734_v4 = vpop.f32.mrb[137].mxu1  ;;  %v12821_v5 = vpop.f32.mrb[136].mxu0 }
 0x2a3   : > { %2568 = vst.msk [vmem:[#allocation2 + $0x190] sm:$0xff] %vm2542_vm1, %v2497_v18  ;;  %v4038_v9 = vmax.f32 %v3956_v62, 0.0  ;;  %v12735_v16 = vadd.f32 %v12734_v4, %v12733_v11  ;;  %v12736_v17 = vpop.f32.mrb[138].mxu1  ;;  %v12822_v12 = vpop.f32.mrb[137].mxu0  ;;  %3586 = vrot.lane.b32.xlu1 %v3499_v1, %s14660_s18  ;;  %v14125_v11 = vld [vmem:[%s15354_s17 + $0x790] ss:$8 sps:$4 sm:$0xff]  }
 0x2a4   : > { %v12823_v0 = vadd.f32 %v12822_v12, %v12821_v5  ;;  %v12737_v13 = vpop.f32.mrb[139].mxu1  ;;  %v12824_v20 = vpop.f32.mrb[138].mxu0 }
 0x2a5   : > { %4070 = vst.msk [vmem:[#allocation2 + $0xf8] sm:$0xff] %vm1995_vm0, %v4038_v9  ;;  %v12738_v21 = vadd.f32 %v12737_v13, %v12736_v17  ;;  %v12825_v23 = vpop.f32.mrb[139].mxu0  ;;  %v3032_v24 = vpop.permute.xlu1 %3031  ;;  %v3446_v25 = vadd.f32 %v16059_v2, %v12735_v16 }
 0x2a6   : > { %v3961_v26 = vadd.f32 %v16059_v2, %v12823_v0  ;;  %v12826_v3 = vadd.f32 %v12825_v23, %v12824_v20  ;;  %5461 = vmatmul.mubr.bf16.gmra.mrb[244].mxu1 %v14117_v8  ;;  %3109 = vst.msk [vmem:[#allocation2 + $0x130] sm:$0xff] %vm3089_vm2, %v3032_v24  ;;  %v3030_v30 = vpop.permute.xlu0 %3029  ;;  %v14128_v8 = vld [vmem:[%s15354_s17 + $0x7a4] ss:$8 sps:$4 sm:$0xff]  }
 0x2a7   : > { %3108 = vst.msk [vmem:[#allocation2 + $0x120] sm:$0xff] %vm3089_vm2, %v3030_v30  ;;  %v3500_v31 = vmax.f32 %v3446_v25, 0.0  ;;  %v3449_v33 = vadd.f32 %v16059_v2, %v12738_v21  ;;  %5468 = vmatprep.mubr.bf16.mxu1 %v14118_v28  ;;  %v14126_v30 = vld [vmem:[%s15354_s17 + $0x7a0] ss:$8 sps:$4 sm:$0xff]  }
 0x2a8   : > { %v4039_v14 = vmax.f32 %v3961_v26, 0.0  ;;  %v3964_v34 = vadd.f32 %v16059_v2, %v12826_v3 }
 0x2a9   : > { %v12739_v35 = vpop.f32.mrb[140].mxu1  ;;  %3588 = vrot.lane.b32.xlu0 %v3500_v31, %s14660_s18  ;;  %v12827_v36 = vpop.f32.mrb[140].mxu0  ;;  %v3501_v6 = vmax.f32 %v3449_v33, 0.0 }
 0x2aa   : > { %4071 = vst.msk [vmem:[#allocation2 + $0x108] sm:$0xff] %vm1995_vm0, %v4039_v14  ;;  %v4040_v7 = vmax.f32 %v3964_v34, 0.0  ;;  %v12740_v39 = vpop.f32.mrb[141].mxu1  ;;  %v12828_v40 = vpop.f32.mrb[141].mxu0 }
 0x2ab   : > { %v16210_v42 = vadd.f32 %v12740_v39, %v12739_v35  ;;  %v12742_v43 = vpop.f32.mrb[142].mxu1  ;;  %v12829_v44 = vadd.f32 %v12828_v40, %v12827_v36  ;;  %3590 = vrot.lane.b32.xlu1 %v3501_v6, %s14660_s18  ;;  %v12830_v45 = vpop.f32.mrb[142].mxu0  ;;  %v14131_v35 = vld [vmem:[%s15354_s17 + $0x7b4] ss:$8 sps:$4 sm:$0xff]  }
 0x2ac   : > { %4072 = vst.msk [vmem:[#allocation2 + $0x118] sm:$0xff] %vm1995_vm0, %v4040_v7  ;;  %v12743_v47 = vpop.f32.mrb[143].mxu1  ;;  %v12831_v10 = vpop.f32.mrb[143].mxu0 }
 0x2ad   : > { %v3969_v48 = vadd.f32 %v16059_v2, %v12829_v44  ;;  %v16216_v50 = vadd.f32 %v12743_v47, %v12742_v43  ;;  %v12832_v52 = vadd.f32 %v12831_v10, %v12830_v45  ;;  %v3036_v53 = vpop.permute.xlu1 %3035  ;;  %v3034_v54 = vpop.permute.xlu0 %3033 }
 0x2ae   : > { %5469 = vmatmul.mubr.bf16.gmra.mrb[248].mxu1 %v14122_v41  ;;  %3111 = vst.msk [vmem:[#allocation2 + $0x150] sm:$0xff] %vm3089_vm2, %v3036_v53  ;;  %3110 = vst.msk [vmem:[#allocation2 + $0x140] sm:$0xff] %vm3089_vm2, %v3034_v54  ;;  %v14129_v54 = vld [vmem:[%s15354_s17 + $0x7b0] ss:$8 sps:$4 sm:$0xff]  }
 0x2af   : > { %v4041_v55 = vmax.f32 %v3969_v48, 0.0  ;;  %v3972_v56 = vadd.f32 %v16059_v2, %v12832_v52  ;;  %5476 = vmatprep.mubr.bf16.mxu1 %v14123_v46 }
 0x2b1   : > { %4073 = vst.msk [vmem:[#allocation2 + $0x128] sm:$0xff] %vm1995_vm0, %v4041_v55  ;;  %v4042_v57 = vmax.f32 %v3972_v56, 0.0  ;;  %v12745_v58 = vpop.f32.mrb[144].mxu1  ;;  %v12833_v60 = vpop.f32.mrb[144].mxu0 }
 0x2b2   : > { %v12746_v63 = vpop.f32.mrb[145].mxu1  ;;  %v12834_v62 = vpop.f32.mrb[145].mxu0 }
 0x2b3   : > { %4074 = vst.msk [vmem:[#allocation2 + $0x138] sm:$0xff] %vm1995_vm0, %v4042_v57  ;;  %v16224_v18 = vadd.f32 %v12746_v63, %v12745_v58  ;;  %v12748_v1 = vpop.f32.mrb[146].mxu1  ;;  %v12835_v4 = vadd.f32 %v12834_v62, %v12833_v60  ;;  %v12836_v5 = vpop.f32.mrb[146].mxu0  ;;  %v14134_v58 = vld [vmem:[%s15354_s17 + $0x7c4] ss:$8 sps:$4 sm:$0xff]  }
 0x2b4   : > { %v12749_v9 = vpop.f32.mrb[147].mxu1  ;;  %v12837_v16 = vpop.f32.mrb[147].mxu0 }
 0x2b5   : > { %v3977_v17 = vadd.f32 %v16059_v2, %v12835_v4  ;;  %v16228_v12 = vadd.f32 %v12749_v9, %v12748_v1  ;;  %v12838_v28 = vadd.f32 %v12837_v16, %v12836_v5  ;;  %v3038_v0 = vpop.permute.xlu0 %3037 }
 0x2b6   : > { %5477 = vmatmul.mubr.bf16.gmra.mrb[252].mxu1 %v14125_v11  ;;  %v3040_v13 = vpop.permute.xlu1 %3039  ;;  %3112 = vst.msk [vmem:[#allocation2 + $0x160] sm:$0xff] %vm3089_vm2, %v3038_v0 }
 0x2b7   : > { %v4043_v20 = vmax.f32 %v3977_v17, 0.0  ;;  %v3980_v21 = vadd.f32 %v16059_v2, %v12838_v28  ;;  %3113 = vst.msk [vmem:[#allocation2 + $0x170] sm:$0xff] %vm3089_vm2, %v3040_v13  ;;  %5484 = vmatprep.mubr.bf16.mxu1 %v14128_v8 }
 0x2b9   : > { %4075 = vst.msk [vmem:[#allocation2 + $0x148] sm:$0xff] %vm1995_vm0, %v4043_v20  ;;  %v4044_v23 = vmax.f32 %v3980_v21, 0.0  ;;  %v12751_v24 = vpop.f32.mrb[148].mxu1  ;;  %v12839_v25 = vpop.f32.mrb[148].mxu0 }
 0x2ba   : > { %v12752_v26 = vpop.f32.mrb[149].mxu1  ;;  %v12840_v3 = vpop.f32.mrb[149].mxu0 }
 0x2bb   : > { %4076 = vst.msk [vmem:[#allocation2 + $0x158] sm:$0xff] %vm1995_vm0, %v4044_v23  ;;  %v16236_v31 = vadd.f32 %v12752_v26, %v12751_v24  ;;  %v12754_v33 = vpop.f32.mrb[150].mxu1  ;;  %v12841_v14 = vadd.f32 %v12840_v3, %v12839_v25  ;;  %v3541_v34 = vpop.permute.xlu0 %3540 }
 0x2bc   : > { %3637 = vst.msk [vmem:[#allocation2] sm:$0xff] %vm3636_vm3, %v3541_v34  ;;  %v12755_v36 = vpop.f32.mrb[151].mxu1  ;;  %v12842_v6 = vpop.f32.mrb[150].mxu0 }
 0x2bd   : > { %v3985_v7 = vadd.f32 %v16059_v2, %v12841_v14  ;;  %v16241_v39 = vadd.f32 %v12755_v36, %v12754_v33  ;;  %v12843_v40 = vpop.f32.mrb[151].mxu0  ;;  %v3543_v41 = vpop.permute.xlu1 %3542  ;;  %v14132_v33 = vld [vmem:[%s15354_s17 + $0x7c0] ss:$8 sps:$4 sm:$0xff]  }
 0x2be   : > { %v12844_v43 = vadd.f32 %v12843_v40, %v12842_v6  ;;  %3638 = vst.msk [vmem:[#allocation2 + $0x10] sm:$0xff] %vm3636_vm3, %v3543_v41  ;;  %5485 = vmatmul.mubr.bf16.gmra.mrb[0].mxu1 %v14126_v30 }
 0x2bf   : > { %v4045_v44 = vmax.f32 %v3985_v7, 0.0  ;;  %v3042_v45 = vpop.permute.xlu0 %3041  ;;  %5492 = vmatprep.mubr.bf16.mxu1 %v14131_v35  ;;  %v14137_v7 = vld [vmem:[%s15354_s17 + $0x7d4] ss:$8 sps:$4 sm:$0xff]  }
 0x2c0   : > { %v3988_v46 = vadd.f32 %v16059_v2, %v12844_v43  ;;  %3114 = vst.msk [vmem:[#allocation2 + $0x180] sm:$0xff] %vm3089_vm2, %v3042_v45 }
 0x2c1   : > { %4077 = vst.msk [vmem:[#allocation2 + $0x168] sm:$0xff] %vm1995_vm0, %v4045_v44  ;;  %v12885_v47 = vpop.f32.mrb[152].mxu1  ;;  %v3044_v10 = vpop.permute.xlu1 %3043 }
 0x2c2   : > { %v4046_v48 = vmax.f32 %v3988_v46, 0.0  ;;  %3115 = vst.msk [vmem:[#allocation2 + $0x190] sm:$0xff] %vm3089_vm2, %v3044_v10  ;;  %v12845_v52 = vpop.f32.mrb[152].mxu0  ;;  %v12886_v53 = vpop.f32.mrb[153].mxu1 }
 0x2c3   : > { %v12887_v55 = vadd.f32 %v12886_v53, %v12885_v47  ;;  %v12846_v56 = vpop.f32.mrb[153].mxu0  ;;  %v12888_v57 = vpop.f32.mrb[154].mxu1  ;;  %v7722_v0 = vld [vmem:[#allocation2] sm:$0xf8] }
 0x2c4   : > { %4078 = vst.msk [vmem:[#allocation2 + $0x178] sm:$0xff] %vm1995_vm0, %v4046_v48  ;;  %v12847_v60 = vadd.f32 %v12846_v56, %v12845_v52  ;;  %v3545_v63 = vpop.permute.xlu0 %3544  ;;  %v12848_v62 = vpop.f32.mrb[154].mxu0 }
 0x2c5   : > { %3639 = vst.msk [vmem:[#allocation2 + $0x20] sm:$0xff] %vm3636_vm3, %v3545_v63  ;;  %v12889_v11 = vpop.f32.mrb[155].mxu1  ;;  %v12849_v1 = vpop.f32.mrb[155].mxu0  ;;  %v4315_v4 = vadd.f32 %v16059_v2, %v12887_v55  ;;  %v5730_v5 = vld [vmem:[#allocation2 + $0x10] sm:$0xff]  ;;  %v14135_v63 = vld [vmem:[%s15354_s17 + $0x7d0] ss:$8 sps:$4 sm:$0xff]  }
 0x2c6   : > { %v3993_v8 = vadd.f32 %v16059_v2, %v12847_v60  ;;  %v12890_v9 = vadd.f32 %v12889_v11, %v12888_v57  ;;  %v12850_v16 = vadd.f32 %v12849_v1, %v12848_v62  ;;  %v3547_v17 = vpop.permute.xlu1 %3546  ;;  %5493 = vmatmul.mubr.bf16.gmra.mrb[4].mxu1 %v14129_v54  ;;  %v7726_v23 = vpack.c.bf16 %v5730_v5, %v7722_v0  ;;  %v16270_v57 = vld [vmem:[%s18508_s2] ss:$0 sm:$0xff]  ;;  %v14149_v0 = vld [vmem:[%s18509_s3 + $0x4] ss:$8 sps:$4 sm:$0xff]  }
 0x2c7   : > { %3640 = vst.msk [vmem:[#allocation2 + $0x30] sm:$0xff] %vm3636_vm3, %v3547_v17  ;;  %v4441_v28 = vmax.f32 %v4315_v4, 0.0  ;;  %5500 = vmatprep.mubr.bf16.mxu1 %v14134_v58  ;;  %6016 = vmatprep.subr.bf16.mxu0 %v14149_v0 }
 0x2c8   : > { %v4047_v13 = vmax.f32 %v3993_v8, 0.0  ;;  %v3996_v20 = vadd.f32 %v16059_v2, %v12850_v16  ;;  %v4318_v21 = vadd.f32 %v16059_v2, %v12890_v9  ;;  %v7765_v43 = vshrl.u32 %v7726_v23, 16  ;;  %v14147_v8 = vld [vmem:[%s18509_s3] ss:$8 sps:$4 sm:$0xff]  }
 0x2c9   : > { %v12891_v24 = vpop.f32.mrb[156].mxu1  ;;  %4505 = vrot.lane.b32.xlu0 %v4441_v28, %s14658_s21  ;;  %v12851_v25 = vpop.f32.mrb[156].mxu0  ;;  %v7768_v44 = vshll.u32 %v7726_v23, 16  ;;  %6017 = vmatpush1.bf16.msra.mxu0 %v14147_v8 }
 0x2ca   : > { %4079 = vst.msk [vmem:[#allocation2 + $0x188] sm:$0xff] %vm1995_vm0, %v4047_v13  ;;  %v4048_v26 = vmax.f32 %v3996_v20, 0.0  ;;  %v12892_v3 = vpop.f32.mrb[157].mxu1  ;;  %v12852_v30 = vpop.f32.mrb[157].mxu0  ;;  %v4442_v6 = vmax.f32 %v4318_v21, 0.0  ;;  %v7767_v62 = vrot.slane %v7765_v43, 1 }
 0x2cb   : > { %v12893_v14 = vadd.f32 %v12892_v3, %v12891_v24  ;;  %v12853_v34 = vadd.f32 %v12852_v30, %v12851_v25  ;;  %v12894_v35 = vpop.f32.mrb[158].mxu1  ;;  %v3549_v36 = vpop.permute.xlu0 %3548  ;;  %v7770_v11 = vrot.slane %v7768_v44, 2  ;;  %v14143_v25 = vld [vmem:[%s15354_s17 + $0x7e4] ss:$8 sps:$4 sm:$0xff]  }
 0x2cc   : > { %4080 = vst.msk [vmem:[#allocation2 + $0x198] sm:$0xff] %vm1995_vm0, %v4048_v26  ;;  %v12854_v40 = vpop.f32.mrb[158].mxu0  ;;  %v12895_v41 = vpop.f32.mrb[159].mxu1  ;;  %v5732_v53 = vld [vmem:[#allocation2 + $0x20] sm:$0xff] }
 0x2cd   : > { %3641 = vst.msk [vmem:[#allocation2 + $0x40] sm:$0xff] %vm3636_vm3, %v3549_v36  ;;  %v4001_v45 = vadd.f32 %v16059_v2, %v12853_v34  ;;  %v12896_v46 = vadd.f32 %v12895_v41, %v12894_v35  ;;  %v12855_v47 = vpop.f32.mrb[159].mxu0  ;;  %v3551_v10 = vpop.permute.xlu1 %3550  ;;  %4507 = vrot.lane.b32.xlu0 %v4442_v6, %s14658_s21  ;;  %v4323_v48 = vadd.f32 %v16059_v2, %v12893_v14 }
 0x2ce   : > { %v12856_v52 = vadd.f32 %v12855_v47, %v12854_v40  ;;  %3642 = vst.msk [vmem:[#allocation2 + $0x50] sm:$0xff] %vm3636_vm3, %v3551_v10  ;;  %5501 = vmatmul.mubr.bf16.gmra.mrb[8].mxu1 %v14132_v33  ;;  %v5734_v54 = vld [vmem:[#allocation2 + $0x30] sm:$0xff]  ;;  %v7771_v44 = vor.u32 %v7770_v11, %v7767_v62 }
 0x2cf   : > { %v4049_v55 = vmax.f32 %v4001_v45, 0.0  ;;  %v4443_v56 = vmax.f32 %v4323_v48, 0.0  ;;  %v4326_v58 = vadd.f32 %v16270_v57, %v12896_v46  ;;  %5508 = vmatprep.mubr.bf16.mxu1 %v14137_v7  ;;  %v16273_v60 = vpack.c.bf16 %v5734_v54, %v5732_v53 }
 0x2d0   : > { %v4004_v2 = vadd.f32 %v16270_v57, %v12856_v52  ;;  %v14141_v52 = vld [vmem:[%s15354_s17 + $0x7e0] ss:$8 sps:$4 sm:$0xff]  }
 0x2d1   : > { %4081 = vst.msk [vmem:[#allocation2 + $0x1a8] sm:$0xff] %vm1995_vm0, %v4049_v55  ;;  %v12897_v1 = vpop.f32.mrb[160].mxu1  ;;  %4509 = vrot.lane.b32.xlu0 %v4443_v56, %s14658_s21  ;;  %v12857_v4 = vpop.f32.mrb[160].mxu0  ;;  %v4444_v5 = vmax.f32 %v4326_v58, 0.0  ;;  %v18540_v9 = vshll.u32 %v16273_v60, 16  ;;  %v18536_v13 = vshrl.u32 %v16273_v60, 16 }
 0x2d2   : > { %v4050_v16 = vmax.f32 %v4004_v2, 0.0  ;;  %v12898_v17 = vpop.f32.mrb[161].mxu1  ;;  %v12858_v28 = vpop.f32.mrb[161].mxu0  ;;  %v14150_v2 = vld [vmem:[%s18509_s3 + $0x10] ss:$8 sps:$4 sm:$0xff]  }
 0x2d3   : > { %v12899_v20 = vadd.f32 %v12898_v17, %v12897_v1  ;;  %v12859_v21 = vadd.f32 %v12858_v28, %v12857_v4  ;;  %v12900_v23 = vpop.f32.mrb[162].mxu1  ;;  %4511 = vrot.lane.b32.xlu1 %v4444_v5, %s14658_s21  ;;  %v3553_v24 = vpop.permute.xlu0 %3552  ;;  %v7772_v30 = vrot.slane %v18536_v13, 1  ;;  %v7773_v33 = vrot.slane %v18540_v9, 2  ;;  %v14152_v4 = vld [vmem:[%s18509_s3 + $0x14] ss:$8 sps:$4 sm:$0xff]  }
 0x2d4   : > { %4082 = vst.msk [vmem:[#allocation2 + $0x1b8] sm:$0xff] %vm1995_vm0, %v4050_v16  ;;  %v12860_v26 = vpop.f32.mrb[162].mxu0  ;;  %v12901_v3 = vpop.f32.mrb[163].mxu1  ;;  %v5736_v7 = vld [vmem:[#allocation2 + $0x40] sm:$0xff]  ;;  %6018 = vmatprep.subr.bf16.mxu0 %v14152_v4 }
 0x2d5   : > { %3643 = vst.msk [vmem:[#allocation2 + $0x60] sm:$0xff] %vm3636_vm3, %v3553_v24  ;;  %v4009_v14 = vadd.f32 %v16270_v57, %v12859_v21  ;;  %v12902_v34 = vadd.f32 %v12901_v3, %v12900_v23  ;;  %v12861_v35 = vpop.f32.mrb[163].mxu0  ;;  %v3555_v36 = vpop.permute.xlu1 %3554  ;;  %v4331_v6 = vadd.f32 %v16270_v57, %v12899_v20  ;;  %v5738_v40 = vld [vmem:[#allocation2 + $0x50] sm:$0xff]  ;;  %v7774_v10 = vor.u32 %v7773_v33, %v7772_v30  ;;  %v14146_v28 = vld [vmem:[%s15354_s17 + $0x7f4] ss:$8 sps:$4 sm:$0xff]  }
 0x2d6   : > { %v12862_v41 = vadd.f32 %v12861_v35, %v12860_v26  ;;  %3644 = vst.msk [vmem:[#allocation2 + $0x70] sm:$0xff] %vm3636_vm3, %v3555_v36  ;;  %5509 = vmatmul.mubr.bf16.gmra.mrb[12].mxu1 %v14135_v63  ;;  %v16298_v43 = vpack.c.bf16 %v5738_v40, %v5736_v7  ;;  %6019 = vmatpush1.bf16.msra.mxu0 %v14150_v2 }
 0x2d7   : > { %v4051_v45 = vmax.f32 %v4009_v14, 0.0  ;;  %v4445_v46 = vmax.f32 %v4331_v6, 0.0  ;;  %v4334_v47 = vadd.f32 %v16270_v57, %v12902_v34  ;;  %5516 = vmatprep.mubr.bf16.mxu1 %v14143_v25  ;;  %v16311_v63 = vsel %vm7763_vm4, %v7771_v44, %v7774_v10 }
 0x2d8   : > { %v4012_v48 = vadd.f32 %v16270_v57, %v12862_v41  ;;  %v18537_v53 = vshll.u32 %v16298_v43, 16  ;;  %v18532_v54 = vshrl.u32 %v16298_v43, 16  ;;  %18551 = vst [vmem:[#allocation4_spill] sm:$0xff] %v16311_v63 }
 0x2d9   : > { %4083 = vst.msk [vmem:[#allocation2 + $0x1c8] sm:$0xff] %vm1995_vm0, %v4051_v45  ;;  %v12903_v55 = vpop.f32.mrb[164].mxu1  ;;  %4513 = vrot.lane.b32.xlu0 %v4445_v46, %s14658_s21  ;;  %v12863_v56 = vpop.f32.mrb[164].mxu0  ;;  %v4446_v58 = vmax.f32 %v4334_v47, 0.0  ;;  %v14144_v45 = vld [vmem:[%s15354_s17 + $0x7f0] ss:$8 sps:$4 sm:$0xff]  }
 0x2da   : > { %v4052_v62 = vmax.f32 %v4012_v48, 0.0  ;;  %v12904_v11 = vpop.f32.mrb[165].mxu1  ;;  %v12864_v1 = vpop.f32.mrb[165].mxu0  ;;  %v7788_v0 = vrot.slane %v18532_v54, 1  ;;  %v7789_v20 = vrot.slane %v18537_v53, 2 }
 0x2db   : > { %v12905_v5 = vadd.f32 %v12904_v11, %v12903_v55  ;;  %v12865_v8 = vadd.f32 %v12864_v1, %v12863_v56  ;;  %v12906_v16 = vpop.f32.mrb[166].mxu1  ;;  %4515 = vrot.lane.b32.xlu1 %v4446_v58, %s14658_s21  ;;  %v3557_v17 = vpop.permute.xlu0 %3556  ;;  %v14153_v56 = vld [vmem:[%s18509_s3 + $0x20] ss:$8 sps:$4 sm:$0xff]  }
 0x2dc   : > { %4084 = vst.msk [vmem:[#allocation2 + $0x1d8] sm:$0xff] %vm1995_vm0, %v4052_v62  ;;  %v12866_v21 = vpop.f32.mrb[166].mxu0  ;;  %v12907_v23 = vpop.f32.mrb[167].mxu1  ;;  %v5740_v33 = vld [vmem:[#allocation2 + $0x60] sm:$0xff]  ;;  %v7790_v34 = vor.u32 %v7789_v20, %v7788_v0 }
 0x2dd   : > { %3645 = vst.msk [vmem:[#allocation2 + $0x80] sm:$0xff] %vm3636_vm3, %v3557_v17  ;;  %v4017_v24 = vadd.f32 %v16270_v57, %v12865_v8  ;;  %v12908_v25 = vadd.f32 %v12907_v23, %v12906_v16  ;;  %v12867_v26 = vpop.f32.mrb[167].mxu0  ;;  %v3559_v3 = vpop.permute.xlu1 %3558  ;;  %v4339_v30 = vadd.f32 %v16270_v57, %v12905_v5  ;;  %v5742_v14 = vld [vmem:[#allocation2 + $0x70] sm:$0xff]  ;;  %v14155_v62 = vld [vmem:[%s18509_s3 + $0x24] ss:$8 sps:$4 sm:$0xff]  }
 0x2de   : > { %v12868_v35 = vadd.f32 %v12867_v26, %v12866_v21  ;;  %3646 = vst.msk [vmem:[#allocation2 + $0x90] sm:$0xff] %vm3636_vm3, %v3559_v3  ;;  %5517 = vmatmul.mubr.bf16.gmra.mrb[16].mxu1 %v14141_v52  ;;  %v16327_v36 = vpack.c.bf16 %v5742_v14, %v5740_v33  ;;  %v16331_v41 = vsel %vm7763_vm4, %v7774_v10, %v7790_v34 }
 0x2df   : > { %v4053_v6 = vmax.f32 %v4017_v24, 0.0  ;;  %v4447_v7 = vmax.f32 %v4339_v30, 0.0  ;;  %v4342_v40 = vadd.f32 %v16270_v57, %v12908_v25  ;;  %5524 = vmatprep.mubr.bf16.mxu1 %v14146_v28  ;;  %18552 = vst [vmem:[#allocation5_spill] sm:$0xff] %v16331_v41  ;;  %6020 = vmatprep.subr.bf16.mxu0 %v14155_v62 }
 0x2e0   : > { %v4020_v44 = vadd.f32 %v16270_v57, %v12868_v35  ;;  %v18535_v46 = vshll.u32 %v16327_v36, 16  ;;  %v18528_v47 = vshrl.u32 %v16327_v36, 16  ;;  %6021 = vmatpush1.bf16.msra.mxu0 %v14153_v56 }
 0x2e1   : > { %4085 = vst.msk [vmem:[#allocation2 + $0x1e8] sm:$0xff] %vm1995_vm0, %v4053_v6  ;;  %v12909_v48 = vpop.f32.mrb[168].mxu1  ;;  %v12997_v52 = vpop.f32.mrb[168].mxu0  ;;  %4517 = vrot.lane.b32.xlu0 %v4447_v7, %s14658_s21  ;;  %v4448_v55 = vmax.f32 %v4342_v40, 0.0 }
 0x2e2   : > { %v4054_v10 = vmax.f32 %v4020_v44, 0.0  ;;  %v12910_v58 = vpop.f32.mrb[169].mxu1  ;;  %v12998_v2 = vpop.f32.mrb[169].mxu0  ;;  %v7796_v8 = vrot.slane %v18528_v47, 1  ;;  %v7797_v16 = vrot.slane %v18535_v46, 2 }
 0x2e3   : > { %v12911_v11 = vadd.f32 %v12910_v58, %v12909_v48  ;;  %v12999_v1 = vadd.f32 %v12998_v2, %v12997_v52  ;;  %v12912_v4 = vpop.f32.mrb[170].mxu1  ;;  %v13000_v5 = vpop.f32.mrb[170].mxu0  ;;  %4519 = vrot.lane.b32.xlu1 %v4448_v55, %s14658_s21  ;;  %v14158_v58 = vld [vmem:[%s18509_s3 + $0x34] ss:$8 sps:$4 sm:$0xff]  }
 0x2e4   : > { %4086 = vst.msk [vmem:[#allocation2 + $0x1f8] sm:$0xff] %vm1995_vm0, %v4054_v10  ;;  %v3561_v17 = vpop.permute.xlu0 %3560  ;;  %v12913_v28 = vpop.f32.mrb[171].mxu1  ;;  %v5744_v24 = vld [vmem:[#allocation2 + $0x80] sm:$0xff]  ;;  %v7798_v26 = vor.u32 %v7797_v16, %v7796_v8  ;;  %6022 = vmatprep.subr.bf16.mxu0 %v14158_v58 }
 0x2e5   : > { %v4861_v0 = vadd.f32 %v16270_v57, %v12999_v1  ;;  %3647 = vst.msk [vmem:[#allocation2 + $0xa0] sm:$0xff] %vm3636_vm3, %v3561_v17  ;;  %v12914_v20 = vadd.f32 %v12913_v28, %v12912_v4  ;;  %v13001_v21 = vpop.f32.mrb[171].mxu0  ;;  %v3563_v23 = vpop.permute.xlu1 %3562  ;;  %v5746_v25 = vld [vmem:[#allocation2 + $0x90] sm:$0xff]  ;;  %v4347_v3 = vadd.f32 %v16270_v57, %v12911_v11 }
 0x2e6   : > { %v13002_v30 = vadd.f32 %v13001_v21, %v13000_v5  ;;  %3648 = vst.msk [vmem:[#allocation2 + $0xb0] sm:$0xff] %vm3636_vm3, %v3563_v23  ;;  %5525 = vmatmul.mubr.bf16.gmra.mrb[20].mxu1 %v14144_v45  ;;  %v16355_v33 = vpack.c.bf16 %v5746_v25, %v5744_v24  ;;  %v16358_v35 = vsel %vm7763_vm4, %v7790_v34, %v7798_v26  ;;  %v14156_v45 = vld [vmem:[%s18509_s3 + $0x30] ss:$8 sps:$4 sm:$0xff]  }
 0x2e7   : > { %v4987_v14 = vmax.f32 %v4861_v0, 0.0  ;;  %18553 = vst [vmem:[#allocation6_spill] sm:$0xff] %v16358_v35  ;;  %v4350_v44 = vadd.f32 %v16270_v57, %v12914_v20  ;;  %v4449_v55 = vmax.f32 %v4347_v3, 0.0  ;;  %6023 = vmatpush1.bf16.msra.mxu0 %v14156_v45 }
 0x2e8   : > { %v4864_v6 = vadd.f32 %v16270_v57, %v13002_v30  ;;  %v18531_v7 = vshll.u32 %v16355_v33, 16  ;;  %v18524_v40 = vshrl.u32 %v16355_v33, 16 }
 0x2e9   : > { %v12915_v48 = vpop.f32.mrb[172].mxu1  ;;  %v13003_v52 = vpop.f32.mrb[172].mxu0  ;;  %5051 = vrot.lane.b32.xlu0 %v4987_v14, %s14659_s16  ;;  %v4450_v17 = vmax.f32 %v4350_v44, 0.0 }
 0x2ea   : > { %v4988_v56 = vmax.f32 %v4864_v6, 0.0  ;;  %v12916_v34 = vpop.f32.mrb[173].mxu1  ;;  %v13004_v10 = vpop.f32.mrb[173].mxu0  ;;  %v7804_v4 = vrot.slane %v18524_v40, 1  ;;  %v7805_v5 = vrot.slane %v18531_v7, 2 }
 0x2eb   : > { %v12917_v2 = vadd.f32 %v12916_v34, %v12915_v48  ;;  %v13005_v62 = vadd.f32 %v13004_v10, %v13003_v52  ;;  %v12918_v11 = vpop.f32.mrb[174].mxu1  ;;  %v13006_v1 = vpop.f32.mrb[174].mxu0  ;;  %v14159_v34 = vld [vmem:[%s18509_s3 + $0x40] ss:$8 sps:$4 sm:$0xff]  }
 0x2ec   : > { %5053 = vrot.lane.b32.xlu1 %v4988_v56, %s14659_s16  ;;  %v3565_v8 = vpop.permute.xlu0 %3564  ;;  %v12919_v16 = vpop.f32.mrb[175].mxu1  ;;  %v5748_v23 = vld [vmem:[#allocation2 + $0xa0] sm:$0xff]  ;;  %v7806_v14 = vor.u32 %v7805_v5, %v7804_v4 }
 0x2ed   : > { %v4869_v28 = vadd.f32 %v16270_v57, %v13005_v62  ;;  %3649 = vst.msk [vmem:[#allocation2 + $0xc0] sm:$0xff] %vm3636_vm3, %v3565_v8  ;;  %v12920_v0 = vadd.f32 %v12919_v16, %v12918_v11  ;;  %v13007_v20 = vpop.f32.mrb[175].mxu0  ;;  %v3567_v21 = vpop.permute.xlu1 %3566  ;;  %4521 = vrot.lane.b32.xlu0 %v4449_v55, %s14658_s21  ;;  %v5750_v24 = vld [vmem:[#allocation2 + $0xb0] sm:$0xff]  ;;  %v4355_v25 = vadd.f32 %v16270_v57, %v12917_v2 }
 0x2ee   : > { %v13008_v3 = vadd.f32 %v13007_v20, %v13006_v1  ;;  %3650 = vst.msk [vmem:[#allocation2 + $0xd0] sm:$0xff] %vm3636_vm3, %v3567_v21  ;;  %v16381_v30 = vpack.c.bf16 %v5750_v24, %v5748_v23  ;;  %v16393_v10 = vsel %vm7763_vm4, %v7798_v26, %v7806_v14  ;;  %v14161_v1 = vld [vmem:[%s18509_s3 + $0x44] ss:$8 sps:$4 sm:$0xff]  }
 0x2ef   : > { %v4989_v6 = vmax.f32 %v4869_v28, 0.0  ;;  %v4358_v45 = vadd.f32 %v16270_v57, %v12920_v0  ;;  %18554 = vst [vmem:[#allocation7_spill] sm:$0xff] %v16393_v10  ;;  %v4451_v58 = vmax.f32 %v4355_v25, 0.0  ;;  %6024 = vmatprep.subr.bf16.mxu0 %v14161_v1 }
 0x2f0   : > { %v4872_v44 = vadd.f32 %v16270_v57, %v13008_v3  ;;  %4523 = vrot.lane.b32.xlu1 %v4450_v17, %s14658_s21  ;;  %v18527_v48 = vshll.u32 %v16381_v30, 16  ;;  %v18520_v52 = vshrl.u32 %v16381_v30, 16  ;;  %6025 = vmatpush1.bf16.msra.mxu0 %v14159_v34 }
 0x2f1   : > { %v12921_v55 = vpop.f32.mrb[176].mxu1  ;;  %v13009_v56 = vpop.f32.mrb[176].mxu0  ;;  %5055 = vrot.lane.b32.xlu0 %v4989_v6, %s14659_s16  ;;  %v4452_v20 = vmax.f32 %v4358_v45, 0.0 }
 0x2f2   : > { %v4990_v2 = vmax.f32 %v4872_v44, 0.0  ;;  %v12922_v62 = vpop.f32.mrb[177].mxu1  ;;  %v13010_v11 = vpop.f32.mrb[177].mxu0  ;;  %v7812_v17 = vrot.slane %v18520_v52, 1  ;;  %v7813_v28 = vrot.slane %v18527_v48, 2 }
 0x2f3   : > { %v12923_v4 = vadd.f32 %v12922_v62, %v12921_v55  ;;  %v13011_v5 = vadd.f32 %v13010_v11, %v13009_v56  ;;  %v12924_v8 = vpop.f32.mrb[178].mxu1  ;;  %v13012_v16 = vpop.f32.mrb[178].mxu0 }
 0x2f4   : > { %5057 = vrot.lane.b32.xlu1 %v4990_v2, %s14659_s16  ;;  %v3569_v26 = vpop.permute.xlu0 %3568  ;;  %v12925_v0 = vpop.f32.mrb[179].mxu1  ;;  %v5752_v3 = vld [vmem:[#allocation2 + $0xc0] sm:$0xff]  ;;  %v7814_v45 = vor.u32 %v7813_v28, %v7812_v17 }
 0x2f5   : > { %v4877_v21 = vadd.f32 %v16270_v57, %v13011_v5  ;;  %3651 = vst.msk [vmem:[#allocation2 + $0xe0] sm:$0xff] %vm3636_vm3, %v3569_v26  ;;  %v12926_v23 = vadd.f32 %v12925_v0, %v12924_v8  ;;  %v13013_v24 = vpop.f32.mrb[179].mxu0  ;;  %v3571_v25 = vpop.permute.xlu1 %3570  ;;  %4525 = vrot.lane.b32.xlu0 %v4451_v58, %s14658_s21  ;;  %v5754_v6 = vld [vmem:[#allocation2 + $0xd0] sm:$0xff]  ;;  %v4363_v44 = vadd.f32 %v16270_v57, %v12923_v4 }
 0x2f6   : > { %v13014_v55 = vadd.f32 %v13013_v24, %v13012_v16  ;;  %3652 = vst.msk [vmem:[#allocation2 + $0xf0] sm:$0xff] %vm3636_vm3, %v3571_v25  ;;  %v16408_v56 = vpack.c.bf16 %v5754_v6, %v5752_v3  ;;  %v14162_v4 = vld [vmem:[%s18509_s3 + $0x50] ss:$8 sps:$4 sm:$0xff]   ;;  %v16420_v8 = vsel %vm7763_vm4, %v7806_v14, %v7814_v45  ;;  %v14164_v0 = vld [vmem:[%s18509_s3 + $0x54] ss:$8 sps:$4 sm:$0xff]  }
 0x2f7   : > { %v4991_v2 = vmax.f32 %v4877_v21, 0.0  ;;  %v4366_v34 = vadd.f32 %v16270_v57, %v12926_v23  ;;  %18555 = vst [vmem:[#allocation8_spill] sm:$0xff] %v16420_v8  ;;  %v4453_v16 = vmax.f32 %v4363_v44, 0.0  ;;  %6026 = vmatprep.subr.bf16.mxu0 %v14164_v0 }
 0x2f8   : > { %v4880_v62 = vadd.f32 %v16270_v57, %v13014_v55  ;;  %4527 = vrot.lane.b32.xlu1 %v4452_v20, %s14658_s21  ;;  %v18523_v11 = vshll.u32 %v16408_v56, 16  ;;  %v18519_v58 = vshrl.u32 %v16408_v56, 16  ;;  %6027 = vmatpush1.bf16.msra.mxu0 %v14162_v4 }
 0x2f9   : > { %v12927_v1 = vpop.f32.mrb[180].mxu1  ;;  %v13015_v5 = vpop.f32.mrb[180].mxu0  ;;  %5059 = vrot.lane.b32.xlu0 %v4991_v2, %s14659_s16  ;;  %v4454_v44 = vmax.f32 %v4366_v34, 0.0 }
 0x2fa   : > { %v4992_v17 = vmax.f32 %v4880_v62, 0.0  ;;  %v12928_v28 = vpop.f32.mrb[181].mxu1  ;;  %v13016_v26 = vpop.f32.mrb[181].mxu0  ;;  %v7820_v25 = vrot.slane %v18519_v58, 1  ;;  %v7821_v3 = vrot.slane %v18523_v11, 2 }
 0x2fb   : > { %v12929_v20 = vadd.f32 %v12928_v28, %v12927_v1  ;;  %v13017_v21 = vadd.f32 %v13016_v26, %v13015_v5  ;;  %v12930_v23 = vpop.f32.mrb[182].mxu1  ;;  %v13018_v24 = vpop.f32.mrb[182].mxu0 }
 0x2fc   : > { %5061 = vrot.lane.b32.xlu1 %v4992_v17, %s14659_s16  ;;  %v3573_v14 = vpop.permute.xlu0 %3572  ;;  %v12931_v6 = vpop.f32.mrb[183].mxu1  ;;  %v5756_v5 = vld [vmem:[#allocation2 + $0xe0] sm:$0xff]  ;;  %v7822_v34 = vor.u32 %v7821_v3, %v7820_v25 }
 0x2fd   : > { %v4885_v55 = vadd.f32 %v16270_v57, %v13017_v21  ;;  %3653 = vst.msk [vmem:[#allocation2 + $0x100] sm:$0xff] %vm3636_vm3, %v3573_v14  ;;  %v12932_v2 = vadd.f32 %v12931_v6, %v12930_v23  ;;  %v13019_v62 = vpop.f32.mrb[183].mxu0  ;;  %v3575_v1 = vpop.permute.xlu1 %3574  ;;  %4529 = vrot.lane.b32.xlu0 %v4453_v16, %s14658_s21  ;;  %v5758_v28 = vld [vmem:[#allocation2 + $0xf0] sm:$0xff]  ;;  %v4371_v26 = vadd.f32 %v16270_v57, %v12929_v20  ;;  %v14165_v20 = vld [vmem:[%s18509_s3 + $0x60] ss:$8 sps:$4 sm:$0xff]  }
 0x2fe   : > { %v13020_v58 = vadd.f32 %v13019_v62, %v13018_v24  ;;  %3654 = vst.msk [vmem:[#allocation2 + $0x110] sm:$0xff] %vm3636_vm3, %v3575_v1  ;;  %v16435_v17 = vpack.c.bf16 %v5758_v28, %v5756_v5  ;;  %v16447_v24 = vsel %vm7763_vm4, %v7814_v45, %v7822_v34 }
 0x2ff   : > { %v4993_v0 = vmax.f32 %v4885_v55, 0.0  ;;  %v4374_v4 = vadd.f32 %v16270_v57, %v12932_v2  ;;  %18556 = vst [vmem:[#allocation9_spill] sm:$0xff] %v16447_v24  ;;  %v14167_v55 = vld [vmem:[%s18509_s3 + $0x64] ss:$8 sps:$4 sm:$0xff]  }
 0x300   : > { %v4888_v21 = vadd.f32 %v16270_v57, %v13020_v58  ;;  %4531 = vrot.lane.b32.xlu1 %v4454_v44, %s14658_s21  ;;  %v18522_v23 = vshll.u32 %v16435_v17, 16  ;;  %v18521_v16 = vshrl.u32 %v16435_v17, 16  ;;  %v4455_v58 = vmax.f32 %v4371_v26, 0.0  ;;  %6028 = vmatprep.subr.bf16.mxu0 %v14167_v55 }
 0x301   : > { %v12933_v14 = vpop.f32.mrb[184].mxu1  ;;  %v13021_v6 = vpop.f32.mrb[184].mxu0  ;;  %5063 = vrot.lane.b32.xlu0 %v4993_v0, %s14659_s16  ;;  %6029 = vmatpush1.bf16.msra.mxu0 %v14165_v20 }
 0x302   : > { %v4994_v25 = vmax.f32 %v4888_v21, 0.0  ;;  %v12934_v3 = vpop.f32.mrb[185].mxu1  ;;  %v13022_v44 = vpop.f32.mrb[185].mxu0  ;;  %v7828_v28 = vrot.slane %v18521_v16, 1  ;;  %v7829_v0 = vrot.slane %v18522_v23, 2  ;;  %v4456_v21 = vmax.f32 %v4374_v4, 0.0 }
 0x303   : > { %v12935_v2 = vadd.f32 %v12934_v3, %v12933_v14  ;;  %v13023_v62 = vadd.f32 %v13022_v44, %v13021_v6  ;;  %v12936_v1 = vpop.f32.mrb[186].mxu1  ;;  %v13024_v5 = vpop.f32.mrb[186].mxu0 }
 0x304   : > { %5065 = vrot.lane.b32.xlu1 %v4994_v25, %s14659_s16  ;;  %v3577_v45 = vpop.permute.xlu0 %3576  ;;  %v12937_v26 = vpop.f32.mrb[187].mxu1  ;;  %v5760_v44 = vld [vmem:[#allocation2 + $0x100] sm:$0xff]  ;;  %v7830_v4 = vor.u32 %v7829_v0, %v7828_v28  ;;  %v14170_v0 = vld [vmem:[%s18509_s3 + $0x74] ss:$8 sps:$4 sm:$0xff]  }
 0x305   : > { %v4893_v52 = vadd.f32 %v16270_v57, %v13023_v62  ;;  %3655 = vst.msk [vmem:[#allocation2 + $0x120] sm:$0xff] %vm3636_vm3, %v3577_v45  ;;  %v12938_v14 = vadd.f32 %v12937_v26, %v12936_v1  ;;  %v13025_v6 = vpop.f32.mrb[187].mxu0  ;;  %v3579_v3 = vpop.permute.xlu1 %3578  ;;  %4533 = vrot.lane.b32.xlu0 %v4455_v58, %s14658_s21  ;;  %v5762_v16 = vld [vmem:[#allocation2 + $0x110] sm:$0xff]  ;;  %v4379_v23 = vadd.f32 %v16270_v57, %v12935_v2 }
 0x306   : > { %v13026_v11 = vadd.f32 %v13025_v6, %v13024_v5  ;;  %3656 = vst.msk [vmem:[#allocation2 + $0x130] sm:$0xff] %vm3636_vm3, %v3579_v3  ;;  %v16462_v25 = vpack.c.bf16 %v5762_v16, %v5760_v44  ;;  %v14168_v16 = vld [vmem:[%s18509_s3 + $0x70] ss:$8 sps:$4 sm:$0xff]   ;;  %6030 = vmatprep.subr.bf16.mxu0 %v14170_v0 }
 0x307   : > { %v4995_v55 = vmax.f32 %v4893_v52, 0.0  ;;  %v4382_v20 = vadd.f32 %v16270_v57, %v12938_v14  ;;  %v16474_v52 = vsel %vm7763_vm4, %v7822_v34, %v7830_v4  ;;  %6031 = vmatpush1.bf16.msra.mxu0 %v14168_v16 }
 0x308   : > { %v4896_v62 = vadd.f32 %v16270_v57, %v13026_v11  ;;  %4535 = vrot.lane.b32.xlu1 %v4456_v21, %s14658_s21  ;;  %v18526_v1 = vshll.u32 %v16462_v25, 16  ;;  %v18525_v58 = vshrl.u32 %v16462_v25, 16  ;;  %18557 = vst [vmem:[#allocation10_spill] sm:$0xff] %v16474_v52  ;;  %v4457_v11 = vmax.f32 %v4379_v23, 0.0 }
 0x309   : > { %v12939_v45 = vpop.f32.mrb[188].mxu1  ;;  %v13027_v26 = vpop.f32.mrb[188].mxu0  ;;  %5067 = vrot.lane.b32.xlu0 %v4995_v55, %s14659_s16 }
 0x30a   : > { %v4996_v2 = vmax.f32 %v4896_v62, 0.0  ;;  %v12940_v5 = vpop.f32.mrb[189].mxu1  ;;  %v13028_v28 = vpop.f32.mrb[189].mxu0  ;;  %v7836_v44 = vrot.slane %v18525_v58, 1  ;;  %v7837_v55 = vrot.slane %v18526_v1, 2  ;;  %v4458_v62 = vmax.f32 %v4382_v20, 0.0 }
 0x30b   : > { %v12941_v21 = vadd.f32 %v12940_v5, %v12939_v45  ;;  %v13029_v14 = vadd.f32 %v13028_v28, %v13027_v26  ;;  %v12942_v6 = vpop.f32.mrb[190].mxu1  ;;  %v13030_v3 = vpop.f32.mrb[190].mxu0 }
 0x30c   : > { %5069 = vrot.lane.b32.xlu1 %v4996_v2, %s14659_s16  ;;  %v3581_v34 = vpop.permute.xlu0 %3580  ;;  %v12943_v23 = vpop.f32.mrb[191].mxu1  ;;  %v5764_v28 = vld [vmem:[#allocation2 + $0x120] sm:$0xff]  ;;  %v7838_v20 = vor.u32 %v7837_v55, %v7836_v44 }
 0x30d   : > { %v4901_v40 = vadd.f32 %v16270_v57, %v13029_v14  ;;  %3657 = vst.msk [vmem:[#allocation2 + $0x140] sm:$0xff] %vm3636_vm3, %v3581_v34  ;;  %v12944_v45 = vadd.f32 %v12943_v23, %v12942_v6  ;;  %v13031_v26 = vpop.f32.mrb[191].mxu0  ;;  %v3583_v5 = vpop.permute.xlu1 %3582  ;;  %4537 = vrot.lane.b32.xlu0 %v4457_v11, %s14658_s21  ;;  %v5766_v58 = vld [vmem:[#allocation2 + $0x130] sm:$0xff]  ;;  %v4387_v1 = vadd.f32 %v16270_v57, %v12941_v21  ;;  %v14173_v55 = vld [vmem:[%s18509_s3 + $0x84] ss:$8 sps:$4 sm:$0xff]  }
 0x30e   : > { %v13032_v48 = vadd.f32 %v13031_v26, %v13030_v3  ;;  %3658 = vst.msk [vmem:[#allocation2 + $0x150] sm:$0xff] %vm3636_vm3, %v3583_v5  ;;  %v16489_v2 = vpack.c.bf16 %v5766_v58, %v5764_v28  ;;  %v14171_v58 = vld [vmem:[%s18509_s3 + $0x80] ss:$8 sps:$4 sm:$0xff]   ;;  %6032 = vmatprep.subr.bf16.mxu0 %v14173_v55 }
 0x30f   : > { %v4997_v0 = vmax.f32 %v4901_v40, 0.0  ;;  %v4390_v16 = vadd.f32 %v16270_v57, %v12944_v45  ;;  %v16501_v40 = vsel %vm7763_vm4, %v7830_v4, %v7838_v20  ;;  %6033 = vmatpush1.bf16.msra.mxu0 %v14171_v58 }
 0x310   : > { %v4904_v14 = vadd.f32 %v16270_v57, %v13032_v48  ;;  %4539 = vrot.lane.b32.xlu1 %v4458_v62, %s14658_s21  ;;  %v18530_v6 = vshll.u32 %v16489_v2, 16  ;;  %v18529_v11 = vshrl.u32 %v16489_v2, 16  ;;  %18558 = vst [vmem:[#allocation11_spill] sm:$0xff] %v16501_v40  ;;  %v4459_v48 = vmax.f32 %v4387_v1, 0.0 }
 0x311   : > { %v12945_v34 = vpop.f32.mrb[192].mxu1  ;;  %v13033_v23 = vpop.f32.mrb[192].mxu0  ;;  %5071 = vrot.lane.b32.xlu0 %v4997_v0, %s14659_s16 }
 0x312   : > { %v4998_v21 = vmax.f32 %v4904_v14, 0.0  ;;  %v12946_v3 = vpop.f32.mrb[193].mxu1  ;;  %v13034_v44 = vpop.f32.mrb[193].mxu0  ;;  %v7844_v28 = vrot.slane %v18529_v11, 1  ;;  %v7845_v0 = vrot.slane %v18530_v6, 2  ;;  %v4460_v14 = vmax.f32 %v4390_v16, 0.0 }
 0x313   : > { %v12947_v62 = vadd.f32 %v12946_v3, %v12945_v34  ;;  %v13035_v45 = vadd.f32 %v13034_v44, %v13033_v23  ;;  %v12948_v26 = vpop.f32.mrb[194].mxu1  ;;  %v13036_v5 = vpop.f32.mrb[194].mxu0 }
 0x314   : > { %5073 = vrot.lane.b32.xlu1 %v4998_v21, %s14659_s16  ;;  %v3585_v4 = vpop.permute.xlu0 %3584  ;;  %v12949_v1 = vpop.f32.mrb[195].mxu1  ;;  %v5768_v44 = vld [vmem:[#allocation2 + $0x140] sm:$0xff]  ;;  %v7846_v16 = vor.u32 %v7845_v0, %v7844_v28  ;;  %v14176_v0 = vld [vmem:[%s18509_s3 + $0x94] ss:$8 sps:$4 sm:$0xff]  }
 0x315   : > { %v4909_v47 = vadd.f32 %v16270_v57, %v13035_v45  ;;  %3659 = vst.msk [vmem:[#allocation2 + $0x160] sm:$0xff] %vm3636_vm3, %v3585_v4  ;;  %v12950_v34 = vadd.f32 %v12949_v1, %v12948_v26  ;;  %v13037_v23 = vpop.f32.mrb[195].mxu0  ;;  %v3587_v3 = vpop.permute.xlu1 %3586  ;;  %4541 = vrot.lane.b32.xlu0 %v4459_v48, %s14658_s21  ;;  %v5770_v11 = vld [vmem:[#allocation2 + $0x150] sm:$0xff]  ;;  %v4395_v6 = vadd.f32 %v16270_v57, %v12947_v62 }
 0x316   : > { %v13038_v7 = vadd.f32 %v13037_v23, %v13036_v5  ;;  %3660 = vst.msk [vmem:[#allocation2 + $0x170] sm:$0xff] %vm3636_vm3, %v3587_v3  ;;  %v16516_v21 = vpack.c.bf16 %v5770_v11, %v5768_v44  ;;  %v14174_v11 = vld [vmem:[%s18509_s3 + $0x90] ss:$8 sps:$4 sm:$0xff]   ;;  %6034 = vmatprep.subr.bf16.mxu0 %v14176_v0 }
 0x317   : > { %v4999_v55 = vmax.f32 %v4909_v47, 0.0  ;;  %v4398_v58 = vadd.f32 %v16270_v57, %v12950_v34  ;;  %v16528_v47 = vsel %vm7763_vm4, %v7838_v20, %v7846_v16  ;;  %6035 = vmatpush1.bf16.msra.mxu0 %v14174_v11 }
 0x318   : > { %v4912_v45 = vadd.f32 %v16270_v57, %v13038_v7  ;;  %4543 = vrot.lane.b32.xlu1 %v4460_v14, %s14658_s21  ;;  %v18534_v26 = vshll.u32 %v16516_v21, 16  ;;  %v18533_v48 = vshrl.u32 %v16516_v21, 16  ;;  %18559 = vst [vmem:[#allocation12_spill] sm:$0xff] %v16528_v47  ;;  %v4461_v7 = vmax.f32 %v4395_v6, 0.0 }
 0x319   : > { %v12951_v4 = vpop.f32.mrb[196].mxu1  ;;  %v13039_v1 = vpop.f32.mrb[196].mxu0  ;;  %5075 = vrot.lane.b32.xlu0 %v4999_v55, %s14659_s16 }
 0x31a   : > { %v5000_v62 = vmax.f32 %v4912_v45, 0.0  ;;  %v12952_v5 = vpop.f32.mrb[197].mxu1  ;;  %v13040_v28 = vpop.f32.mrb[197].mxu0  ;;  %v7852_v44 = vrot.slane %v18533_v48, 1  ;;  %v7853_v55 = vrot.slane %v18534_v26, 2  ;;  %v4462_v45 = vmax.f32 %v4398_v58, 0.0 }
 0x31b   : > { %v12953_v14 = vadd.f32 %v12952_v5, %v12951_v4  ;;  %v13041_v34 = vadd.f32 %v13040_v28, %v13039_v1  ;;  %v12954_v23 = vpop.f32.mrb[198].mxu1  ;;  %v13042_v3 = vpop.f32.mrb[198].mxu0 }
 0x31c   : > { %5077 = vrot.lane.b32.xlu1 %v5000_v62, %s14659_s16  ;;  %v3589_v20 = vpop.permute.xlu0 %3588  ;;  %v12955_v6 = vpop.f32.mrb[199].mxu1  ;;  %v5772_v28 = vld [vmem:[#allocation2 + $0x160] sm:$0xff]  ;;  %v7854_v58 = vor.u32 %v7853_v55, %v7852_v44 }
 0x31d   : > { %v4917_v54 = vadd.f32 %v16270_v57, %v13041_v34  ;;  %3661 = vst.msk [vmem:[#allocation2 + $0x180] sm:$0xff] %vm3636_vm3, %v3589_v20  ;;  %v12956_v4 = vadd.f32 %v12955_v6, %v12954_v23  ;;  %v13043_v1 = vpop.f32.mrb[199].mxu0  ;;  %v3591_v5 = vpop.permute.xlu1 %3590  ;;  %4545 = vrot.lane.b32.xlu0 %v4461_v7, %s14658_s21  ;;  %v5774_v48 = vld [vmem:[#allocation2 + $0x170] sm:$0xff]  ;;  %v4403_v26 = vadd.f32 %v16270_v57, %v12953_v14  ;;  %v14177_v14 = vld [vmem:[%s18509_s3 + $0xa0] ss:$8 sps:$4 sm:$0xff]  }
 0x31e   : > { %v13044_v46 = vadd.f32 %v13043_v1, %v13042_v3  ;;  %3662 = vst.msk [vmem:[#allocation2 + $0x190] sm:$0xff] %vm3636_vm3, %v3591_v5  ;;  %v16543_v62 = vpack.c.bf16 %v5774_v48, %v5772_v28  ;;  %v16554_v48 = vsel %vm7763_vm4, %v7846_v16, %v7854_v58  ;;  %v14179_v6 = vld [vmem:[%s18509_s3 + $0xa4] ss:$8 sps:$4 sm:$0xff]  }
 0x31f   : > { %v5001_v0 = vmax.f32 %v4917_v54, 0.0  ;;  %18560 = vst [vmem:[#allocation13_spill] sm:$0xff] %v16554_v48  ;;  %v4463_v54 = vmax.f32 %v4403_v26, 0.0  ;;  %6036 = vmatprep.subr.bf16.mxu0 %v14179_v6 }
 0x320   : > { %v4920_v34 = vadd.f32 %v16270_v57, %v13044_v46  ;;  %4547 = vrot.lane.b32.xlu1 %v4462_v45, %s14658_s21  ;;  %v18539_v23 = vshll.u32 %v16543_v62, 16  ;;  %v18538_v7 = vshrl.u32 %v16543_v62, 16  ;;  %v4406_v46 = vadd.f32 %v16270_v57, %v12956_v4  ;;  %6037 = vmatpush1.bf16.msra.mxu0 %v14177_v14 }
 0x321   : > { %v12957_v11 = vpop.f32.mrb[200].mxu1  ;;  %v13045_v20 = vpop.f32.mrb[200].mxu0  ;;  %5079 = vrot.lane.b32.xlu0 %v5001_v0, %s14659_s16 }
 0x322   : > { %v5002_v3 = vmax.f32 %v4920_v34, 0.0  ;;  %v12958_v44 = vpop.f32.mrb[201].mxu1  ;;  %v13046_v55 = vpop.f32.mrb[201].mxu0  ;;  %v7860_v0 = vrot.slane %v18538_v7, 1  ;;  %v7861_v16 = vrot.slane %v18539_v23, 2 }
 0x323   : > { %v12959_v45 = vadd.f32 %v12958_v44, %v12957_v11  ;;  %v13047_v1 = vadd.f32 %v13046_v55, %v13045_v20  ;;  %v12960_v5 = vpop.f32.mrb[202].mxu1  ;;  %v13048_v28 = vpop.f32.mrb[202].mxu0  ;;  %v4464_v44 = vmax.f32 %v4406_v46, 0.0 }
 0x324   : > { %5081 = vrot.lane.b32.xlu1 %v5002_v3, %s14659_s16  ;;  %v12961_v26 = vpop.f32.mrb[203].mxu1  ;;  %v13049_v4 = vpop.f32.mrb[203].mxu0  ;;  %v5776_v11 = vld [vmem:[#allocation2 + $0x180] sm:$0xff]  ;;  %v7862_v7 = vor.u32 %v7861_v16, %v7860_v0  ;;  %v14182_v16 = vld [vmem:[%s18509_s3 + $0xb4] ss:$8 sps:$4 sm:$0xff]  }
 0x325   : > { %v4925_v34 = vadd.f32 %v16270_v57, %v13047_v1  ;;  %v12962_v13 = vadd.f32 %v12961_v26, %v12960_v5  ;;  %v13050_v53 = vadd.f32 %v13049_v4, %v13048_v28  ;;  %4549 = vrot.lane.b32.xlu0 %v4463_v54, %s14658_s21  ;;  %v5778_v20 = vld [vmem:[#allocation2 + $0x190] sm:$0xff]  ;;  %v4411_v23 = vadd.f32 %v16270_v57, %v12959_v45 }
 0x326   : > { %v16567_v55 = vpack.c.bf16 %v5778_v20, %v5776_v11  ;;  %v16575_v54 = vsel %vm7763_vm4, %v7854_v58, %v7862_v7  ;;  %v14180_v45 = vld [vmem:[%s18509_s3 + $0xb0] ss:$8 sps:$4 sm:$0xff]   ;;  %6038 = vmatprep.subr.bf16.mxu0 %v14182_v16 }
 0x327   : > { %v5003_v9 = vmax.f32 %v4925_v34, 0.0  ;;  %v4928_v3 = vadd.f32 %v16270_v57, %v13050_v53  ;;  %18561 = vst [vmem:[#allocation14_spill] sm:$0xff] %v16575_v54  ;;  %v4414_v53 = vadd.f32 %v16270_v57, %v12962_v13  ;;  %v4465_v26 = vmax.f32 %v4411_v23, 0.0  ;;  %6039 = vmatpush1.bf16.msra.mxu0 %v14180_v45  ;;  %v14183_v45 = vld [vmem:[%s18509_s3 + $0xc0] ss:$8 sps:$4 sm:$0xff]  }
 0x328   : > { %4551 = vrot.lane.b32.xlu1 %v4464_v44, %s14658_s21  ;;  %v18542_v6 = vshll.u32 %v16567_v55, 16  ;;  %v18541_v1 = vshrl.u32 %v16567_v55, 16 }
 0x329   : > { %v5004_v5 = vmax.f32 %v4928_v3, 0.0  ;;  %v12963_v46 = vpop.f32.mrb[204].mxu1  ;;  %5083 = vrot.lane.b32.xlu0 %v5003_v9, %s14659_s16  ;;  %v13051_v14 = vpop.f32.mrb[204].mxu0  ;;  %v4466_v23 = vmax.f32 %v4414_v53, 0.0 }
 0x32a   : > { %v12964_v28 = vpop.f32.mrb[205].mxu1  ;;  %v13052_v0 = vpop.f32.mrb[205].mxu0  ;;  %v7868_v58 = vrot.slane %v18541_v1, 1  ;;  %v7869_v20 = vrot.slane %v18542_v6, 2 }
 0x32b   : > { %v16587_v4 = vadd.f32 %v12964_v28, %v12963_v46  ;;  %v12966_v9 = vpop.f32.mrb[206].mxu1  ;;  %v13053_v34 = vadd.f32 %v13052_v0, %v13051_v14  ;;  %v13054_v11 = vpop.f32.mrb[206].mxu0 }
 0x32c   : > { %5085 = vrot.lane.b32.xlu1 %v5004_v5, %s14659_s16  ;;  %v12967_v13 = vpop.f32.mrb[207].mxu1  ;;  %v13055_v44 = vpop.f32.mrb[207].mxu0  ;;  %v16596_v46 = vor.u32 %v7869_v20, %v7868_v58 }
 0x32d   : > { %v4933_v3 = vadd.f32 %v16270_v57, %v13053_v34  ;;  %v16593_v54 = vadd.f32 %v12967_v13, %v12966_v9  ;;  %v13056_v48 = vadd.f32 %v13055_v44, %v13054_v11  ;;  %4553 = vrot.lane.b32.xlu0 %v4465_v26, %s14658_s21  ;;  %v16617_v13 = vld [vmem:[%s18508_s2] ss:$0 sm:$0xff] }
 0x32e   : > { %v16602_v5 = vsel %vm7763_vm4, %v7862_v7, %v16596_v46 }
 0x32f   : > { %v5005_v14 = vmax.f32 %v4933_v3, 0.0  ;;  %v4936_v28 = vadd.f32 %v16270_v57, %v13056_v48  ;;  %18562 = vst [vmem:[#allocation15_spill] sm:$0xff] %v16602_v5  ;;  %v14185_v57 = vld [vmem:[%s18509_s3 + $0xc4] ss:$8 sps:$4 sm:$0xff]  }
 0x330   : > { %4555 = vrot.lane.b32.xlu1 %v4466_v23, %s14658_s21  ;;  %6040 = vmatprep.subr.bf16.mxu0 %v14185_v57 }
 0x331   : > { %v5006_v0 = vmax.f32 %v4936_v28, 0.0  ;;  %v12969_v16 = vpop.f32.mrb[208].mxu1  ;;  %v13057_v9 = vpop.f32.mrb[208].mxu0  ;;  %5087 = vrot.lane.b32.xlu0 %v5005_v14, %s14659_s16  ;;  %6041 = vmatpush1.bf16.msra.mxu0 %v14183_v45 }
 0x332   : > { %v12970_v53 = vpop.f32.mrb[209].mxu1  ;;  %v13058_v58 = vpop.f32.mrb[209].mxu0 }
 0x333   : > { %v16611_v48 = vadd.f32 %v12970_v53, %v12969_v16  ;;  %v12972_v26 = vpop.f32.mrb[210].mxu1  ;;  %v13059_v7 = vadd.f32 %v13058_v58, %v13057_v9  ;;  %v13060_v34 = vpop.f32.mrb[210].mxu0 }
 0x334   : > { %v12973_v11 = vpop.f32.mrb[211].mxu1  ;;  %5089 = vrot.lane.b32.xlu1 %v5006_v0, %s14659_s16  ;;  %v13061_v20 = vpop.f32.mrb[211].mxu0  ;;  %v14186_v0 = vld [vmem:[%s18509_s3 + $0xd0] ss:$8 sps:$4 sm:$0xff]  }
 0x335   : > { %v4941_v44 = vadd.f32 %v16617_v13, %v13059_v7  ;;  %v16620_v3 = vadd.f32 %v12973_v11, %v12972_v26  ;;  %v13062_v23 = vadd.f32 %v13061_v20, %v13060_v34  ;;  %v14188_v26 = vld [vmem:[%s18509_s3 + $0xd4] ss:$8 sps:$4 sm:$0xff]  }
 0x336   : > { %6042 = vmatprep.subr.bf16.mxu0 %v14188_v26  ;;  %v14189_v26 = vld [vmem:[%s18509_s3 + $0xe0] ss:$8 sps:$4 sm:$0xff]  }
 0x337   : > { %v5007_v14 = vmax.f32 %v4941_v44, 0.0  ;;  %v4944_v28 = vadd.f32 %v16617_v13, %v13062_v23  ;;  %6043 = vmatpush1.bf16.msra.mxu0 %v14186_v0 }
 0x339   : > { %v5008_v16 = vmax.f32 %v4944_v28, 0.0  ;;  %v12975_v9 = vpop.f32.mrb[212].mxu1  ;;  %v13063_v53 = vpop.f32.mrb[212].mxu0  ;;  %5091 = vrot.lane.b32.xlu0 %v5007_v14, %s14659_s16 }
 0x33a   : > { %v12976_v58 = vpop.f32.mrb[213].mxu1  ;;  %v13064_v57 = vpop.f32.mrb[213].mxu0 }
 0x33b   : > { %v16630_v7 = vadd.f32 %v12976_v58, %v12975_v9  ;;  %v12978_v45 = vpop.f32.mrb[214].mxu1  ;;  %v13065_v34 = vadd.f32 %v13064_v57, %v13063_v53  ;;  %v4506_v11 = vpop.permute.xlu0 %4505  ;;  %5093 = vrot.lane.b32.xlu1 %v5008_v16, %s14659_s16  ;;  %v14191_v16 = vld [vmem:[%s18509_s3 + $0xe4] ss:$8 sps:$4 sm:$0xff]  }
 0x33c   : > { %4601 = vst.msk [vmem:[#allocation2 + $0x8] sm:$0xff] %vm2542_vm1, %v4506_v11  ;;  %v12979_v20 = vpop.f32.mrb[215].mxu1  ;;  %v13066_v44 = vpop.f32.mrb[214].mxu0  ;;  %6044 = vmatprep.subr.bf16.mxu0 %v14191_v16 }
 0x33d   : > { %v4949_v23 = vadd.f32 %v16617_v13, %v13065_v34  ;;  %v16635_v14 = vadd.f32 %v12979_v20, %v12978_v45  ;;  %v13067_v28 = vpop.f32.mrb[215].mxu0  ;;  %6045 = vmatpush1.bf16.msra.mxu0 %v14189_v26 }
 0x33e   : > { %v13068_v1 = vadd.f32 %v13067_v28, %v13066_v44 }
 0x33f   : > { %v5009_v6 = vmax.f32 %v4949_v23, 0.0  ;;  %v4508_v9 = vpop.permute.xlu0 %4507 }
 0x340   : > { %v4952_v58 = vadd.f32 %v16617_v13, %v13068_v1  ;;  %4602 = vst.msk [vmem:[#allocation2 + $0x18] sm:$0xff] %vm2542_vm1, %v4508_v9  ;;  %v14194_v9 = vld [vmem:[%s18509_s3 + $0xf4] ss:$8 sps:$4 sm:$0xff]  }
 0x341   : > { %v13109_v53 = vpop.f32.mrb[216].mxu1  ;;  %v13069_v57 = vpop.f32.mrb[216].mxu0  ;;  %5095 = vrot.lane.b32.xlu0 %v5009_v6, %s14659_s16  ;;  %v14192_v6 = vld [vmem:[%s18509_s3 + $0xf0] ss:$8 sps:$4 sm:$0xff]   ;;  %6046 = vmatprep.subr.bf16.mxu0 %v14194_v9 }
 0x342   : > { %v5010_v0 = vmax.f32 %v4952_v58, 0.0  ;;  %v13110_v45 = vpop.f32.mrb[217].mxu1  ;;  %v13070_v34 = vpop.f32.mrb[217].mxu0  ;;  %6047 = vmatpush1.bf16.msra.mxu0 %v14192_v6 }
 0x343   : > { %v13111_v11 = vadd.f32 %v13110_v45, %v13109_v53  ;;  %v13071_v1 = vadd.f32 %v13070_v34, %v13069_v57  ;;  %v13112_v20 = vpop.f32.mrb[218].mxu1  ;;  %v4510_v44 = vpop.permute.xlu0 %4509 }
 0x344   : > { %4603 = vst.msk [vmem:[#allocation2 + $0x28] sm:$0xff] %vm2542_vm1, %v4510_v44  ;;  %v13072_v23 = vpop.f32.mrb[218].mxu0  ;;  %v13113_v28 = vpop.f32.mrb[219].mxu1  ;;  %5097 = vrot.lane.b32.xlu1 %v5010_v0, %s14659_s16 }
 0x345   : > { %v5407_v58 = vadd.f32 %v16617_v13, %v13111_v11  ;;  %v4957_v16 = vadd.f32 %v16617_v13, %v13071_v1  ;;  %v13114_v53 = vadd.f32 %v13113_v28, %v13112_v20  ;;  %v13073_v57 = vpop.f32.mrb[219].mxu0  ;;  %v4512_v26 = vpop.permute.xlu1 %4511 }
 0x346   : > { %v13074_v45 = vadd.f32 %v13073_v57, %v13072_v23  ;;  %4604 = vst.msk [vmem:[#allocation2 + $0x38] sm:$0xff] %vm2542_vm1, %v4512_v26 }
 0x347   : > { %v5533_v0 = vmax.f32 %v5407_v58, 0.0  ;;  %v5410_v34 = vadd.f32 %v16617_v13, %v13114_v53  ;;  %v5011_v44 = vmax.f32 %v4957_v16, 0.0 }
 0x348   : > { %v4960_v47 = vadd.f32 %v16617_v13, %v13074_v45 }
 0x349   : > { %v5534_v5 = vmax.f32 %v5410_v34, 0.0  ;;  %v13115_v40 = vpop.f32.mrb[220].mxu1  ;;  %5597 = vrot.lane.b32.xlu0 %v5533_v0, %s14660_s18  ;;  %v13075_v11 = vpop.f32.mrb[220].mxu0 }
 0x34a   : > { %v13116_v1 = vpop.f32.mrb[221].mxu1  ;;  %v13076_v20 = vpop.f32.mrb[221].mxu0  ;;  %v5012_v16 = vmax.f32 %v4960_v47, 0.0  ;;  %v4422_v47 = vadd.f32 %v16617_v13, %v16593_v54 }
 0x34b   : > { %v13117_v28 = vadd.f32 %v13116_v1, %v13115_v40  ;;  %v13118_v52 = vpop.f32.mrb[222].mxu1  ;;  %5599 = vrot.lane.b32.xlu1 %v5534_v5, %s14660_s18  ;;  %v4514_v23 = vpop.permute.xlu0 %4513  ;;  %v16661_v9 = vadd.f32 %v13076_v20, %v13075_v11  ;;  %v4419_v5 = vadd.f32 %v16617_v13, %v16587_v4 }
 0x34c   : > { %4605 = vst.msk [vmem:[#allocation2 + $0x48] sm:$0xff] %vm2542_vm1, %v4514_v23  ;;  %v13119_v6 = vpop.f32.mrb[223].mxu1  ;;  %v13078_v58 = vpop.f32.mrb[222].mxu0 }
 0x34d   : > { %v5415_v53 = vadd.f32 %v16617_v13, %v13117_v28  ;;  %v13120_v57 = vadd.f32 %v13119_v6, %v13118_v52  ;;  %v4516_v26 = vpop.permute.xlu1 %4515  ;;  %5099 = vrot.lane.b32.xlu0 %v5011_v44, %s14659_s16  ;;  %v13079_v45 = vpop.f32.mrb[223].mxu0  ;;  %v14197_v52 = vld [vmem:[%s18509_s3 + $0x104] ss:$8 sps:$4 sm:$0xff]   ;;  %v4467_v4 = vmax.f32 %v4419_v5, 0.0 }
 0x34e   : > { %4606 = vst.msk [vmem:[#allocation2 + $0x58] sm:$0xff] %vm2542_vm1, %v4516_v26  ;;  %v16667_v40 = vadd.f32 %v13079_v45, %v13078_v58  ;;  %6874 = vmatprep.subr.bf16.mxu0 %v14197_v52  ;;  %v2360_v52 = vadd.f32 %v16617_v13, %v15964_v49 }
 0x34f   : > { %v5535_v0 = vmax.f32 %v5415_v53, 0.0  ;;  %v5418_v34 = vadd.f32 %v16617_v13, %v13120_v57  ;;  %5101 = vrot.lane.b32.xlu1 %v5012_v16, %s14659_s16  ;;  %v4468_v57 = vmax.f32 %v4422_v47, 0.0  ;;  %v2363_v47 = vadd.f32 %v16617_v13, %v15970_v59 }
 0x351   : > { %v5536_v44 = vmax.f32 %v5418_v34, 0.0  ;;  %v13121_v11 = vpop.f32.mrb[224].mxu1  ;;  %5601 = vrot.lane.b32.xlu0 %v5535_v0, %s14660_s18  ;;  %v13081_v1 = vpop.f32.mrb[224].mxu0  ;;  %v2409_v59 = vmax.f32 %v2363_v47, 0.0 }
 0x352   : > { %v13122_v20 = vpop.f32.mrb[225].mxu1  ;;  %v13082_v28 = vpop.f32.mrb[225].mxu0 }
 0x353   : > { %v13123_v23 = vadd.f32 %v13122_v20, %v13121_v11  ;;  %v13124_v6 = vpop.f32.mrb[226].mxu1  ;;  %5603 = vrot.lane.b32.xlu1 %v5536_v44, %s14660_s18  ;;  %v4518_v58 = vpop.permute.xlu0 %4517  ;;  %v16680_v16 = vadd.f32 %v13082_v28, %v13081_v1 }
 0x354   : > { %4607 = vst.msk [vmem:[#allocation2 + $0x68] sm:$0xff] %vm2542_vm1, %v4518_v58  ;;  %v13125_v53 = vpop.f32.mrb[227].mxu1  ;;  %v13084_v54 = vpop.f32.mrb[226].mxu0 }
 0x355   : > { %v5423_v26 = vadd.f32 %v16617_v13, %v13123_v23  ;;  %v13126_v45 = vadd.f32 %v13125_v53, %v13124_v6  ;;  %v4520_v0 = vpop.permute.xlu1 %4519  ;;  %4557 = vrot.lane.b32.xlu0 %v4467_v4, %s14658_s21  ;;  %v13085_v34 = vpop.f32.mrb[227].mxu0  ;;  %v2408_v6 = vmax.f32 %v2360_v52, 0.0 }
 0x356   : > { %4608 = vst.msk [vmem:[#allocation2 + $0x78] sm:$0xff] %vm2542_vm1, %v4520_v0  ;;  %v16686_v5 = vadd.f32 %v13085_v34, %v13084_v54  ;;  %v4965_v0 = vadd.f32 %v16617_v13, %v16661_v9  ;;  %v4968_v9 = vadd.f32 %v16617_v13, %v16667_v40 }
 0x357   : > { %v5537_v44 = vmax.f32 %v5423_v26, 0.0  ;;  %v5426_v11 = vadd.f32 %v16617_v13, %v13126_v45  ;;  %4559 = vrot.lane.b32.xlu1 %v4468_v57, %s14658_s21 }
 0x359   : > { %v5538_v1 = vmax.f32 %v5426_v11, 0.0  ;;  %v13127_v20 = vpop.f32.mrb[228].mxu1  ;;  %5605 = vrot.lane.b32.xlu0 %v5537_v44, %s14660_s18  ;;  %v13087_v28 = vpop.f32.mrb[228].mxu0 }
 0x35a   : > { %v13128_v4 = vpop.f32.mrb[229].mxu1  ;;  %v13088_v23 = vpop.f32.mrb[229].mxu0 }
 0x35b   : > { %v13129_v58 = vadd.f32 %v13128_v4, %v13127_v20  ;;  %v13130_v53 = vpop.f32.mrb[230].mxu1  ;;  %5607 = vrot.lane.b32.xlu1 %v5538_v1, %s14660_s18  ;;  %v5052_v49 = vpop.permute.xlu0 %5051  ;;  %v16696_v54 = vadd.f32 %v13088_v23, %v13087_v28  ;;  %v5013_v28 = vmax.f32 %v4965_v0, 0.0 }
 0x35c   : > { %5147 = vst.msk [vmem:[#allocation2 + $0x8] sm:$0xff] %vm3089_vm2, %v5052_v49  ;;  %v13131_v57 = vpop.f32.mrb[231].mxu1  ;;  %v13090_v26 = vpop.f32.mrb[230].mxu0 }
 0x35d   : > { %v5431_v45 = vadd.f32 %v16617_v13, %v13129_v58  ;;  %v13132_v34 = vadd.f32 %v13131_v57, %v13130_v53  ;;  %2498 = vrot.lane.b32.xlu0 %v2408_v6, %s14658_s21  ;;  %v13091_v52 = vpop.f32.mrb[231].mxu0 }
 0x35e   : > { %v5054_v44 = vpop.permute.xlu1 %5053  ;;  %v16703_v11 = vadd.f32 %v13091_v52, %v13090_v26 }
 0x35f   : > { %v5539_v1 = vmax.f32 %v5431_v45, 0.0  ;;  %v5434_v20 = vadd.f32 %v16617_v13, %v13132_v34  ;;  %5148 = vst.msk [vmem:[#allocation2 + $0x18] sm:$0xff] %vm3089_vm2, %v5054_v44  ;;  %2500 = vrot.lane.b32.xlu1 %v2409_v59, %s14658_s21  ;;  %v4522_v47 = vpop.permute.xlu0 %4521  ;;  %v5014_v59 = vmax.f32 %v4968_v9, 0.0  ;;  %v2907_v34 = vadd.f32 %v16617_v13, %v16018_v27 }
 0x360   : > { %4609 = vst.msk [vmem:[#allocation2 + $0x88] sm:$0xff] %vm2542_vm1, %v4522_v47 }
 0x361   : > { %v5540_v4 = vmax.f32 %v5434_v20, 0.0  ;;  %v13133_v23 = vpop.f32.mrb[232].mxu1  ;;  %5609 = vrot.lane.b32.xlu0 %v5539_v1, %s14660_s18  ;;  %v2910_v20 = vadd.f32 %v16617_v13, %v16027_v37  ;;  %v2955_v27 = vmax.f32 %v2907_v34, 0.0  ;;  %v3457_v34 = vadd.f32 %v16617_v13, %v16216_v50 }
 0x362   : > { %v4524_v6 = vpop.permute.xlu1 %4523  ;;  %v13134_v58 = vpop.f32.mrb[233].mxu1 }
 0x363   : > { %4610 = vst.msk [vmem:[#allocation2 + $0x98] sm:$0xff] %vm2542_vm1, %v4524_v6  ;;  %v13135_v53 = vadd.f32 %v13134_v58, %v13133_v23  ;;  %v13136_v49 = vpop.f32.mrb[234].mxu1  ;;  %5611 = vrot.lane.b32.xlu1 %v5540_v4, %s14660_s18  ;;  %v5056_v57 = vpop.permute.xlu0 %5055 }
 0x364   : > { %5149 = vst.msk [vmem:[#allocation2 + $0x28] sm:$0xff] %vm3089_vm2, %v5056_v57  ;;  %v13137_v26 = vpop.f32.mrb[235].mxu1 }
 0x365   : > { %v5439_v45 = vadd.f32 %v16617_v13, %v13135_v53  ;;  %v13138_v0 = vadd.f32 %v13137_v26, %v13136_v49  ;;  %5103 = vrot.lane.b32.xlu0 %v5013_v28, %s14659_s16  ;;  %v2956_v49 = vmax.f32 %v2910_v20, 0.0 }
 0x366   : > { %v5058_v40 = vpop.permute.xlu1 %5057 }
 0x367   : > { %v5541_v52 = vmax.f32 %v5439_v45, 0.0  ;;  %v5442_v44 = vadd.f32 %v16617_v13, %v13138_v0  ;;  %5150 = vst.msk [vmem:[#allocation2 + $0x38] sm:$0xff] %vm3089_vm2, %v5058_v40  ;;  %5105 = vrot.lane.b32.xlu1 %v5014_v59, %s14659_s16  ;;  %v4526_v1 = vpop.permute.xlu0 %4525  ;;  %v3454_v59 = vadd.f32 %v16617_v13, %v16210_v42 }
 0x368   : > { %4611 = vst.msk [vmem:[#allocation2 + $0xa8] sm:$0xff] %vm2542_vm1, %v4526_v1 }
 0x369   : > { %v5542_v47 = vmax.f32 %v5442_v44, 0.0  ;;  %v13139_v4 = vpop.f32.mrb[236].mxu1  ;;  %5613 = vrot.lane.b32.xlu0 %v5541_v52, %s14660_s18  ;;  %v3502_v42 = vmax.f32 %v3454_v59, 0.0 }
 0x36a   : > { %v4528_v28 = vpop.permute.xlu1 %4527  ;;  %v13140_v9 = vpop.f32.mrb[237].mxu1 }
 0x36b   : > { %4612 = vst.msk [vmem:[#allocation2 + $0xb8] sm:$0xff] %vm2542_vm1, %v4528_v28  ;;  %v13141_v23 = vadd.f32 %v13140_v9, %v13139_v4  ;;  %v13142_v6 = vpop.f32.mrb[238].mxu1  ;;  %5615 = vrot.lane.b32.xlu1 %v5542_v47, %s14660_s18  ;;  %v5060_v58 = vpop.permute.xlu0 %5059 }
 0x36c   : > { %5151 = vst.msk [vmem:[#allocation2 + $0x48] sm:$0xff] %vm3089_vm2, %v5060_v58  ;;  %v13143_v53 = vpop.f32.mrb[239].mxu1  ;;  %v4427_v58 = vadd.f32 %v16617_v13, %v16611_v48 }
 0x36d   : > { %v5447_v37 = vadd.f32 %v16617_v13, %v13141_v23  ;;  %v13144_v57 = vadd.f32 %v13143_v53, %v13142_v6  ;;  %3045 = vrot.lane.b32.xlu0 %v2955_v27, %s14659_s16  ;;  %v3503_v27 = vmax.f32 %v3457_v34, 0.0 }
 0x36e   : > { %v5062_v26 = vpop.permute.xlu1 %5061  ;;  %v4469_v48 = vmax.f32 %v4427_v58, 0.0 }
 0x36f   : > { %v5543_v45 = vmax.f32 %v5447_v37, 0.0  ;;  %v5450_v0 = vadd.f32 %v16617_v13, %v13144_v57  ;;  %5152 = vst.msk [vmem:[#allocation2 + $0x58] sm:$0xff] %vm3089_vm2, %v5062_v26  ;;  %3047 = vrot.lane.b32.xlu1 %v2956_v49, %s14659_s16  ;;  %v4530_v40 = vpop.permute.xlu0 %4529  ;;  %v4430_v57 = vadd.f32 %v16617_v13, %v16620_v3 }
 0x370   : > { %4613 = vst.msk [vmem:[#allocation2 + $0xc8] sm:$0xff] %vm2542_vm1, %v4530_v40 }
 0x371   : > { %v5544_v52 = vmax.f32 %v5450_v0, 0.0  ;;  %v13145_v44 = vpop.f32.mrb[240].mxu1  ;;  %5617 = vrot.lane.b32.xlu0 %v5543_v45, %s14660_s18 }
 0x372   : > { %v4532_v1 = vpop.permute.xlu1 %4531  ;;  %v13146_v20 = vpop.f32.mrb[241].mxu1 }
 0x373   : > { %4614 = vst.msk [vmem:[#allocation2 + $0xd8] sm:$0xff] %vm2542_vm1, %v4532_v1  ;;  %v13147_v47 = vadd.f32 %v13146_v20, %v13145_v44  ;;  %v13148_v4 = vpop.f32.mrb[242].mxu1  ;;  %5619 = vrot.lane.b32.xlu1 %v5544_v52, %s14660_s18  ;;  %v5064_v28 = vpop.permute.xlu0 %5063  ;;  %v4470_v1 = vmax.f32 %v4430_v57, 0.0 }
 0x374   : > { %5153 = vst.msk [vmem:[#allocation2 + $0x68] sm:$0xff] %vm3089_vm2, %v5064_v28  ;;  %v13149_v9 = vpop.f32.mrb[243].mxu1 }
 0x375   : > { %v5455_v50 = vadd.f32 %v16617_v13, %v13147_v47  ;;  %v13150_v23 = vadd.f32 %v13149_v9, %v13148_v4  ;;  %3592 = vrot.lane.b32.xlu0 %v3502_v42, %s14660_s18  ;;  %v2368_v47 = vadd.f32 %v16617_v13, %v15978_v15 }
 0x376   : > { %v5066_v6 = vpop.permute.xlu1 %5065 }
 0x377   : > { %v5545_v53 = vmax.f32 %v5455_v50, 0.0  ;;  %v5458_v49 = vadd.f32 %v16617_v13, %v13150_v23  ;;  %5154 = vst.msk [vmem:[#allocation2 + $0x78] sm:$0xff] %vm3089_vm2, %v5066_v6  ;;  %3594 = vrot.lane.b32.xlu1 %v3503_v27, %s14660_s18  ;;  %v4534_v37 = vpop.permute.xlu0 %4533  ;;  %v2371_v27 = vadd.f32 %v16617_v13, %v15984_v22  ;;  %v2410_v15 = vmax.f32 %v2368_v47, 0.0 }
 0x378   : > { %4615 = vst.msk [vmem:[#allocation2 + $0xe8] sm:$0xff] %vm2542_vm1, %v4534_v37 }
 0x379   : > { %v5546_v26 = vmax.f32 %v5458_v49, 0.0  ;;  %v13151_v59 = vpop.f32.mrb[244].mxu1  ;;  %5621 = vrot.lane.b32.xlu0 %v5545_v53, %s14660_s18 }
 0x37a   : > { %v4536_v45 = vpop.permute.xlu1 %4535  ;;  %v13152_v0 = vpop.f32.mrb[245].mxu1 }
 0x37b   : > { %4616 = vst.msk [vmem:[#allocation2 + $0xf8] sm:$0xff] %vm2542_vm1, %v4536_v45  ;;  %v13153_v40 = vadd.f32 %v13152_v0, %v13151_v59  ;;  %v13154_v34 = vpop.f32.mrb[246].mxu1  ;;  %5623 = vrot.lane.b32.xlu1 %v5546_v26, %s14660_s18  ;;  %v5068_v52 = vpop.permute.xlu0 %5067  ;;  %v2411_v26 = vmax.f32 %v2371_v27, 0.0  ;;  %v4973_v59 = vadd.f32 %v16617_v13, %v16680_v16 }
 0x37c   : > { %5155 = vst.msk [vmem:[#allocation2 + $0x88] sm:$0xff] %vm3089_vm2, %v5068_v52  ;;  %v13155_v44 = vpop.f32.mrb[247].mxu1 }
 0x37d   : > { %v5463_v3 = vadd.f32 %v16617_v13, %v13153_v40  ;;  %v13156_v20 = vadd.f32 %v13155_v44, %v13154_v34  ;;  %4561 = vrot.lane.b32.xlu0 %v4469_v48, %s14658_s21  ;;  %v5015_v52 = vmax.f32 %v4973_v59, 0.0 }
 0x37e   : > { %v5070_v42 = vpop.permute.xlu1 %5069 }
 0x37f   : > { %v5547_v4 = vmax.f32 %v5463_v3, 0.0  ;;  %v5466_v28 = vadd.f32 %v16617_v13, %v13156_v20  ;;  %5156 = vst.msk [vmem:[#allocation2 + $0x98] sm:$0xff] %vm3089_vm2, %v5070_v42  ;;  %4563 = vrot.lane.b32.xlu1 %v4470_v1, %s14658_s21  ;;  %v4538_v9 = vpop.permute.xlu0 %4537  ;;  %v4976_v1 = vadd.f32 %v16617_v13, %v16686_v5 }
 0x380   : > { %4617 = vst.msk [vmem:[#allocation2 + $0x108] sm:$0xff] %vm2542_vm1, %v4538_v9 }
 0x381   : > { %v5548_v50 = vmax.f32 %v5466_v28, 0.0  ;;  %v13157_v23 = vpop.f32.mrb[248].mxu1  ;;  %5625 = vrot.lane.b32.xlu0 %v5547_v4, %s14660_s18  ;;  %v5016_v9 = vmax.f32 %v4976_v1, 0.0 }
 0x382   : > { %v4540_v6 = vpop.permute.xlu1 %4539  ;;  %v13158_v58 = vpop.f32.mrb[249].mxu1 }
 0x383   : > { %4618 = vst.msk [vmem:[#allocation2 + $0x118] sm:$0xff] %vm2542_vm1, %v4540_v6  ;;  %v13159_v53 = vadd.f32 %v13158_v58, %v13157_v23  ;;  %v13160_v49 = vpop.f32.mrb[250].mxu1  ;;  %5627 = vrot.lane.b32.xlu1 %v5548_v50, %s14660_s18  ;;  %v5072_v37 = vpop.permute.xlu0 %5071  ;;  %v2915_v23 = vadd.f32 %v16617_v13, %v16035_v51 }
 0x384   : > { %5157 = vst.msk [vmem:[#allocation2 + $0xa8] sm:$0xff] %vm3089_vm2, %v5072_v37  ;;  %v13161_v57 = vpop.f32.mrb[251].mxu1 }
 0x385   : > { %v5471_v22 = vadd.f32 %v16617_v13, %v13159_v53  ;;  %v13162_v45 = vadd.f32 %v13161_v57, %v13160_v49  ;;  %2502 = vrot.lane.b32.xlu0 %v2410_v15, %s14658_s21  ;;  %v2918_v53 = vadd.f32 %v16617_v13, %v16043_v61  ;;  %v2957_v51 = vmax.f32 %v2915_v23, 0.0 }
 0x386   : > { %v5074_v0 = vpop.permute.xlu1 %5073 }
 0x387   : > { %v5549_v48 = vmax.f32 %v5471_v22, 0.0  ;;  %v5474_v40 = vadd.f32 %v16617_v13, %v13162_v45  ;;  %5158 = vst.msk [vmem:[#allocation2 + $0xb8] sm:$0xff] %vm3089_vm2, %v5074_v0  ;;  %2504 = vrot.lane.b32.xlu1 %v2411_v26, %s14658_s21  ;;  %v4542_v34 = vpop.permute.xlu0 %4541 }
 0x388   : > { %4619 = vst.msk [vmem:[#allocation2 + $0x128] sm:$0xff] %vm2542_vm1, %v4542_v34 }
 0x389   : > { %v5550_v44 = vmax.f32 %v5474_v40, 0.0  ;;  %v13163_v16 = vpop.f32.mrb[252].mxu1  ;;  %5629 = vrot.lane.b32.xlu0 %v5549_v48, %s14660_s18  ;;  %v2958_v48 = vmax.f32 %v2918_v53, 0.0 }
 0x38a   : > { %v4544_v3 = vpop.permute.xlu1 %4543  ;;  %v13164_v20 = vpop.f32.mrb[253].mxu1 }
 0x38b   : > { %4620 = vst.msk [vmem:[#allocation2 + $0x138] sm:$0xff] %vm2542_vm1, %v4544_v3  ;;  %v13165_v42 = vadd.f32 %v13164_v20, %v13163_v16  ;;  %v13166_v47 = vpop.f32.mrb[254].mxu1  ;;  %5631 = vrot.lane.b32.xlu1 %v5550_v44, %s14660_s18  ;;  %v5076_v4 = vpop.permute.xlu0 %5075  ;;  %v3465_v3 = vadd.f32 %v16617_v13, %v16228_v12 }
 0x38c   : > { %5159 = vst.msk [vmem:[#allocation2 + $0xc8] sm:$0xff] %vm3089_vm2, %v5076_v4  ;;  %v13167_v28 = vpop.f32.mrb[255].mxu1 }
 0x38d   : > { %v5479_v27 = vadd.f32 %v16617_v13, %v13165_v42  ;;  %v13168_v50 = vadd.f32 %v13167_v28, %v13166_v47  ;;  %5107 = vrot.lane.b32.xlu0 %v5015_v52, %s14659_s16  ;;  %v3462_v52 = vadd.f32 %v16617_v13, %v16224_v18 }
 0x38e   : > { %v5078_v5 = vpop.permute.xlu1 %5077 }
 0x38f   : > { %v5551_v6 = vmax.f32 %v5479_v27, 0.0  ;;  %v5482_v58 = vadd.f32 %v16617_v13, %v13168_v50  ;;  %5160 = vst.msk [vmem:[#allocation2 + $0xd8] sm:$0xff] %vm3089_vm2, %v5078_v5  ;;  %5109 = vrot.lane.b32.xlu1 %v5016_v9, %s14659_s16  ;;  %v4546_v15 = vpop.permute.xlu0 %4545  ;;  %v3504_v18 = vmax.f32 %v3462_v52, 0.0  ;;  %v3505_v5 = vmax.f32 %v3465_v3, 0.0 }
 0x390   : > { %4621 = vst.msk [vmem:[#allocation2 + $0x148] sm:$0xff] %vm2542_vm1, %v4546_v15  ;;  %v2376_v52 = vadd.f32 %v16617_v13, %v15990_v32 }
 0x391   : > { %v5552_v49 = vmax.f32 %v5482_v58, 0.0  ;;  %v13169_v37 = vpop.f32.mrb[0].mxu1  ;;  %5633 = vrot.lane.b32.xlu0 %v5551_v6, %s14660_s18  ;;  %v4435_v58 = vadd.f32 %v16617_v13, %v16630_v7 }
 0x392   : > { %v4548_v57 = vpop.permute.xlu1 %4547  ;;  %v13170_v26 = vpop.f32.mrb[1].mxu1 }
 0x393   : > { %4622 = vst.msk [vmem:[#allocation2 + $0x158] sm:$0xff] %vm2542_vm1, %v4548_v57  ;;  %v13171_v22 = vadd.f32 %v13170_v26, %v13169_v37  ;;  %v13172_v59 = vpop.f32.mrb[2].mxu1  ;;  %5635 = vrot.lane.b32.xlu1 %v5552_v49, %s14660_s18  ;;  %v5080_v45 = vpop.permute.xlu0 %5079  ;;  %v4438_v37 = vadd.f32 %v16617_v13, %v16635_v14  ;;  %v4471_v7 = vmax.f32 %v4435_v58, 0.0 }
 0x394   : > { %5161 = vst.msk [vmem:[#allocation2 + $0xe8] sm:$0xff] %vm3089_vm2, %v5080_v45  ;;  %v13173_v0 = vpop.f32.mrb[3].mxu1 }
 0x395   : > { %v5487_v61 = vadd.f32 %v16617_v13, %v13171_v22  ;;  %v13174_v40 = vadd.f32 %v13173_v0, %v13172_v59  ;;  %3049 = vrot.lane.b32.xlu0 %v2957_v51, %s14659_s16 }
 0x396   : > { %v5082_v34 = vpop.permute.xlu1 %5081 }
 0x397   : > { %v5553_v44 = vmax.f32 %v5487_v61, 0.0  ;;  %v5490_v1 = vadd.f32 %v16617_v13, %v13174_v40  ;;  %5162 = vst.msk [vmem:[#allocation2 + $0xf8] sm:$0xff] %vm3089_vm2, %v5082_v34  ;;  %3051 = vrot.lane.b32.xlu1 %v2958_v48, %s14659_s16  ;;  %v4550_v16 = vpop.permute.xlu0 %4549  ;;  %v4472_v61 = vmax.f32 %v4438_v37, 0.0 }
 0x398   : > { %4623 = vst.msk [vmem:[#allocation2 + $0x168] sm:$0xff] %vm2542_vm1, %v4550_v16  ;;  %v2379_v16 = vadd.f32 %v16617_v13, %v15997_v38  ;;  %v4981_v38 = vadd.f32 %v16617_v13, %v16696_v54 }
 0x399   : > { %v5554_v20 = vmax.f32 %v5490_v1, 0.0  ;;  %v13175_v42 = vpop.f32.mrb[4].mxu1  ;;  %5637 = vrot.lane.b32.xlu0 %v5553_v44, %s14660_s18 }
 0x39a   : > { %v4552_v47 = vpop.permute.xlu1 %4551  ;;  %v13176_v4 = vpop.f32.mrb[5].mxu1 }
 0x39b   : > { %4624 = vst.msk [vmem:[#allocation2 + $0x178] sm:$0xff] %vm2542_vm1, %v4552_v47  ;;  %v13177_v28 = vadd.f32 %v13176_v4, %v13175_v42  ;;  %v13178_v9 = vpop.f32.mrb[6].mxu1  ;;  %5639 = vrot.lane.b32.xlu1 %v5554_v20, %s14660_s18  ;;  %v5084_v27 = vpop.permute.xlu0 %5083  ;;  %v2412_v47 = vmax.f32 %v2376_v52, 0.0 }
 0x39c   : > { %5163 = vst.msk [vmem:[#allocation2 + $0x108] sm:$0xff] %vm3089_vm2, %v5084_v27  ;;  %v13179_v50 = vpop.f32.mrb[7].mxu1 }
 0x39d   : > { %v5495_v12 = vadd.f32 %v16617_v13, %v13177_v28  ;;  %v13180_v23 = vadd.f32 %v13179_v50, %v13178_v9  ;;  %3596 = vrot.lane.b32.xlu0 %v3504_v18, %s14660_s18  ;;  %v2413_v9 = vmax.f32 %v2379_v16, 0.0 }
 0x39e   : > { %v5086_v6 = vpop.permute.xlu1 %5085 }
 0x39f   : > { %v5555_v15 = vmax.f32 %v5495_v12, 0.0  ;;  %v5498_v53 = vadd.f32 %v16617_v13, %v13180_v23  ;;  %5164 = vst.msk [vmem:[#allocation2 + $0x118] sm:$0xff] %vm3089_vm2, %v5086_v6  ;;  %3598 = vrot.lane.b32.xlu1 %v3505_v5, %s14660_s18  ;;  %v4554_v49 = vpop.permute.xlu0 %4553  ;;  %v5017_v6 = vmax.f32 %v4981_v38, 0.0 }
 0x3a0   : > { %4625 = vst.msk [vmem:[#allocation2 + $0x188] sm:$0xff] %vm2542_vm1, %v4554_v49 }
 0x3a1   : > { %v5556_v57 = vmax.f32 %v5498_v53, 0.0  ;;  %v13181_v26 = vpop.f32.mrb[8].mxu1  ;;  %5641 = vrot.lane.b32.xlu0 %v5555_v15, %s14660_s18  ;;  %v4984_v15 = vadd.f32 %v16617_v13, %v16703_v11  ;;  %v2923_v11 = vadd.f32 %v16617_v13, %v16050_v19 }
 0x3a2   : > { %v4556_v51 = vpop.permute.xlu1 %4555  ;;  %v13182_v22 = vpop.f32.mrb[9].mxu1 }
 0x3a3   : > { %4626 = vst.msk [vmem:[#allocation2 + $0x198] sm:$0xff] %vm2542_vm1, %v4556_v51  ;;  %v13183_v59 = vadd.f32 %v13182_v22, %v13181_v26  ;;  %v13184_v45 = vpop.f32.mrb[10].mxu1  ;;  %5643 = vrot.lane.b32.xlu1 %v5556_v57, %s14660_s18  ;;  %v5088_v0 = vpop.permute.xlu0 %5087  ;;  %v5018_v51 = vmax.f32 %v4984_v15, 0.0  ;;  %v2959_v52 = vmax.f32 %v2923_v11, 0.0 }
 0x3a4   : > { %v13185_v48 = vpop.f32.mrb[11].mxu1  ;;  %5165 = vst.msk [vmem:[#allocation2 + $0x128] sm:$0xff] %vm3089_vm2, %v5088_v0 }
 0x3a5   : > { %v5503_v14 = vadd.f32 %v16617_v13, %v13183_v59  ;;  %v13186_v40 = vadd.f32 %v13185_v48, %v13184_v45  ;;  %4565 = vrot.lane.b32.xlu0 %v4471_v7, %s14658_s21  ;;  %v14661_v48 = vmov 0.0  }
 0x3a6   : > { %v5090_v34 = vpop.permute.xlu1 %5089  ;;  %5725 = vst [vmem:[#allocation2 + $0x200] sm:$0xff] %v14661_v48  ;;  %5726 = vst [vmem:[#allocation2 + $0x208] sm:$0xff] %v14661_v48 }
 0x3a7   : > { %v5557_v44 = vmax.f32 %v5503_v14, 0.0  ;;  %v5506_v1 = vadd.f32 %v16617_v13, %v13186_v40  ;;  %5166 = vst.msk [vmem:[#allocation2 + $0x138] sm:$0xff] %vm3089_vm2, %v5090_v34  ;;  %4567 = vrot.lane.b32.xlu1 %v4472_v61, %s14658_s21  ;;  %v2926_v61 = vadd.f32 %v16617_v13, %v16062_v29  ;;  %v3470_v29 = vadd.f32 %v16617_v13, %v16236_v31 }
 0x3a9   : > { %v5558_v3 = vmax.f32 %v5506_v1, 0.0  ;;  %v13187_v20 = vpop.f32.mrb[12].mxu1  ;;  %5645 = vrot.lane.b32.xlu0 %v5557_v44, %s14660_s18  ;;  %v3506_v38 = vmax.f32 %v3470_v29, 0.0 }
 0x3aa   : > { %v13188_v42 = vpop.f32.mrb[13].mxu1 }
 0x3ab   : > { %v13189_v4 = vadd.f32 %v13188_v42, %v13187_v20  ;;  %v13190_v18 = vpop.f32.mrb[14].mxu1  ;;  %5647 = vrot.lane.b32.xlu1 %v5558_v3, %s14660_s18  ;;  %v5092_v32 = vpop.permute.xlu0 %5091  ;;  %v2960_v3 = vmax.f32 %v2926_v61, 0.0 }
 0x3ac   : > { %v13191_v28 = vpop.f32.mrb[15].mxu1  ;;  %5167 = vst.msk [vmem:[#allocation2 + $0x148] sm:$0xff] %vm3089_vm2, %v5092_v32 }
 0x3ad   : > { %v5511_v27 = vadd.f32 %v16617_v13, %v13189_v4  ;;  %v13192_v50 = vadd.f32 %v13191_v28, %v13190_v18  ;;  %2506 = vrot.lane.b32.xlu0 %v2412_v47, %s14658_s21  ;;  %v5094_v5 = vpop.permute.xlu1 %5093  ;;  %v3473_v28 = vadd.f32 %v16617_v13, %v16241_v39 }
 0x3ae   : > { %5168 = vst.msk [vmem:[#allocation2 + $0x158] sm:$0xff] %vm3089_vm2, %v5094_v5 }
 0x3af   : > { %v5559_v12 = vmax.f32 %v5511_v27, 0.0  ;;  %v5514_v23 = vadd.f32 %v16617_v13, %v13192_v50  ;;  %2508 = vrot.lane.b32.xlu1 %v2413_v9, %s14658_s21  ;;  %v3507_v50 = vmax.f32 %v3473_v28, 0.0 }
 0x3b1   : > { %v5560_v58 = vmax.f32 %v5514_v23, 0.0  ;;  %v13193_v53 = vpop.f32.mrb[16].mxu1  ;;  %5649 = vrot.lane.b32.xlu0 %v5559_v12, %s14660_s18 }
 0x3b2   : > { %v13194_v54 = vpop.f32.mrb[17].mxu1 }
 0x3b3   : > { %v13195_v49 = vadd.f32 %v13194_v54, %v13193_v53  ;;  %v13196_v37 = vpop.f32.mrb[18].mxu1  ;;  %5651 = vrot.lane.b32.xlu1 %v5560_v58, %s14660_s18  ;;  %v5096_v57 = vpop.permute.xlu0 %5095  ;;  %v14195_v58 = vld [vmem:[%s18509_s3 + $0x100] ss:$8 sps:$4 sm:$0xff]  }
 0x3b4   : > { %v13197_v26 = vpop.f32.mrb[19].mxu1  ;;  %5169 = vst.msk [vmem:[#allocation2 + $0x168] sm:$0xff] %vm3089_vm2, %v5096_v57  ;;  %v14200_v57 = vld [vmem:[%s18509_s3 + $0x114] ss:$8 sps:$4 sm:$0xff]  }
 0x3b5   : > { %v5519_v22 = vadd.f32 %v16617_v13, %v13195_v49  ;;  %v13198_v7 = vadd.f32 %v13197_v26, %v13196_v37  ;;  %5111 = vrot.lane.b32.xlu0 %v5017_v6, %s14659_s16  ;;  %v16883_v49 = vld [vmem:[#allocation2 + $0x10] sm:$0xff] }
 0x3b6   : > { %v5098_v59 = vpop.permute.xlu1 %5097 }
 0x3b7   : > { %v5561_v45 = vmax.f32 %v5519_v22, 0.0  ;;  %v5522_v0 = vadd.f32 %v16617_v13, %v13198_v7  ;;  %5170 = vst.msk [vmem:[#allocation2 + $0x178] sm:$0xff] %vm3089_vm2, %v5098_v59  ;;  %5113 = vrot.lane.b32.xlu1 %v5018_v51, %s14659_s16  ;;  %v14198_v7 = vld [vmem:[%s18509_s3 + $0x110] ss:$8 sps:$4 sm:$0xff]  }
 0x3b9   : > { %v5562_v14 = vmax.f32 %v5522_v0, 0.0  ;;  %v13199_v40 = vpop.f32.mrb[20].mxu1  ;;  %5653 = vrot.lane.b32.xlu0 %v5561_v45, %s14660_s18  ;;  %v14203_v45 = vld [vmem:[%s18509_s3 + $0x124] ss:$8 sps:$4 sm:$0xff]  }
 0x3ba   : > { %v13200_v34 = vpop.f32.mrb[21].mxu1 }
 0x3bb   : > { %v13201_v19 = vadd.f32 %v13200_v34, %v13199_v40  ;;  %v13202_v44 = vpop.f32.mrb[22].mxu1  ;;  %5655 = vrot.lane.b32.xlu1 %v5562_v14, %s14660_s18  ;;  %v5598_v1 = vpop.permute.xlu0 %5597 }
 0x3bc   : > { %5693 = vst.msk [vmem:[#allocation2 + $0x8] sm:$0xff] %vm3636_vm3, %v5598_v1  ;;  %v13203_v16 = vpop.f32.mrb[23].mxu1 }
 0x3bd   : > { %v5527_v20 = vadd.f32 %v16617_v13, %v13201_v19  ;;  %v13204_v42 = vadd.f32 %v13203_v16, %v13202_v44  ;;  %v5600_v47 = vpop.permute.xlu1 %5599  ;;  %3053 = vrot.lane.b32.xlu0 %v2959_v52, %s14659_s16  ;;  %v14201_v44 = vld [vmem:[%s18509_s3 + $0x120] ss:$8 sps:$4 sm:$0xff]   ;;  %v14206_v16 = vld [vmem:[%s18509_s3 + $0x134] ss:$8 sps:$4 sm:$0xff]  }
 0x3be   : > { %5694 = vst.msk [vmem:[#allocation2 + $0x18] sm:$0xff] %vm3636_vm3, %v5600_v47 }
 0x3bf   : > { %v5563_v4 = vmax.f32 %v5527_v20, 0.0  ;;  %v5530_v18 = vadd.f32 %v16617_v13, %v13204_v42  ;;  %3055 = vrot.lane.b32.xlu1 %v2960_v3, %s14659_s16  ;;  %v5100_v32 = vpop.permute.xlu0 %5099  ;;  %v5728_v13 = vld [vmem:[#allocation2] sm:$0xff] }
 0x3c0   : > { %5171 = vst.msk [vmem:[#allocation2 + $0x188] sm:$0xff] %vm3089_vm2, %v5100_v32  ;;  %v5792_v37 = vpack.c.bf16 %v16883_v49, %v5728_v13 }
 0x3c1   : > { %v5564_v9 = vmax.f32 %v5530_v18, 0.0  ;;  %v5102_v27 = vpop.permute.xlu1 %5101  ;;  %5657 = vrot.lane.b32.xlu0 %v5563_v4, %s14660_s18 }
 0x3c2   : > { %5172 = vst.msk [vmem:[#allocation2 + $0x198] sm:$0xff] %vm3089_vm2, %v5102_v27 }
 0x3c3   : > { %5659 = vrot.lane.b32.xlu1 %v5564_v9, %s14660_s18  ;;  %v5602_v31 = vpop.permute.xlu0 %5601  ;;  %v5729_v12 = vld [vmem:[#allocation2 + $0x8] sm:$0xff]  ;;  %v14204_v9 = vld [vmem:[%s18509_s3 + $0x130] ss:$8 sps:$4 sm:$0xff]  }
 0x3c4   : > { %5695 = vst.msk [vmem:[#allocation2 + $0x28] sm:$0xff] %vm3636_vm3, %v5602_v31  ;;  %v6285_v6 = vld [vmem:[#allocation2 + $0x8] sm:$0xfe] }
 0x3c5   : > { %v5604_v5 = vpop.permute.xlu1 %5603  ;;  %3600 = vrot.lane.b32.xlu0 %v3506_v38, %s14660_s18  ;;  %v5731_v23 = vld [vmem:[#allocation2 + $0x18] sm:$0xff]  ;;  %v7723_v53 = vld [vmem:[#allocation2 + $0x8] sm:$0xf8] }
 0x3c6   : > { %5696 = vst.msk [vmem:[#allocation2 + $0x38] sm:$0xff] %vm3636_vm3, %v5604_v5  ;;  %v5793_v39 = vpack.c.bf16 %v5731_v23, %v5729_v12  ;;  %v6351_v15 = vpack.c.bf16 %v5731_v23, %v6285_v6  ;;  %v7727_v26 = vpack.c.bf16 %v5731_v23, %v7723_v53  ;;  %v7132_v59 = vld [vmem:[#allocation2 + $0x8] sm:$0xfc] }
 0x3c7   : > { %3602 = vrot.lane.b32.xlu1 %v3507_v50, %s14660_s18  ;;  %v4558_v54 = vpop.permute.xlu0 %4557  ;;  %v7136_v0 = vpack.c.bf16 %v5731_v23, %v7132_v59  ;;  %v14209_v12 = vld [vmem:[%s18509_s3 + $0x144] ss:$8 sps:$4 sm:$0xff]  }
 0x3c8   : > { %4627 = vst.msk [vmem:[#allocation2 + $0x1a8] sm:$0xff] %vm2542_vm1, %v4558_v54  ;;  %6048 = vmatprep.mubr.bf16.mxu0 %v5793_v39  ;;  %v6433_v22 = vshll.u32 %v6351_v15, 16  ;;  %v7777_v48 = vshrl.u32 %v7727_v26, 16  ;;  %v7780_v61 = vshll.u32 %v7727_v26, 16  ;;  %v6431_v3 = vshrl.u32 %v6351_v15, 16 }
 0x3c9   : > { %v4560_v51 = vpop.permute.xlu1 %4559  ;;  %6049 = vmatmul.mubr.bf16.vlgmr.msra.gmra.mrb[232].mxu0 %v5792_v37  ;;  %v7210_v20 = vrot.slane %v7136_v0, 1  ;;  %v14207_v54 = vld [vmem:[%s18509_s3 + $0x140] ss:$8 sps:$4 sm:$0xff]   ;;  %v14212_v26 = vld [vmem:[%s18509_s3 + $0x154] ss:$8 sps:$4 sm:$0xff]  }
 0x3ca   : > { %4628 = vst.msk [vmem:[#allocation2 + $0x1b8] sm:$0xff] %vm2542_vm1, %v4560_v51  ;;  %6875 = vmatpush1.bf16.msra.mxu0 %v14195_v58  ;;  %v6435_v52 = vrot.slane %v6433_v22, 1  ;;  %v7779_v42 = vrot.slane %v7777_v48, 1  ;;  %v7782_v18 = vrot.slane %v7780_v61, 2 }
 0x3cb   : > { %v5606_v11 = vpop.permute.xlu0 %5605  ;;  %6876 = vmatprep.subr.bf16.mxu0 %v14200_v57  ;;  %v5733_v40 = vld [vmem:[#allocation2 + $0x28] sm:$0xff] }
 0x3cc   : > { %5697 = vst.msk [vmem:[#allocation2 + $0x48] sm:$0xff] %vm3636_vm3, %v5606_v11  ;;  %v6436_v28 = vor.u32 %v6435_v52, %v6431_v3  ;;  %v7783_v6 = vor.u32 %v7782_v18, %v7779_v42 }
 0x3cd   : > { %v5608_v14 = vpop.permute.xlu1 %5607  ;;  %v5735_v34 = vld [vmem:[#allocation2 + $0x38] sm:$0xff] }
 0x3ce   : > { %5698 = vst.msk [vmem:[#allocation2 + $0x58] sm:$0xff] %vm3636_vm3, %v5608_v14  ;;  %v5795_v19 = vpack.c.bf16 %v5735_v34, %v5733_v40  ;;  %6877 = vmatpush1.bf16.msra.mxu0 %v14198_v7  ;;  %v14215_v34 = vld [vmem:[%s18509_s3 + $0x164] ss:$8 sps:$4 sm:$0xff]  }
 0x3cf   : > { %v2499_v1 = vpop.permute.xlu0 %2498  ;;  %6878 = vmatprep.subr.bf16.mxu0 %v14203_v45  ;;  %v14210_v45 = vld [vmem:[%s18509_s3 + $0x150] ss:$8 sps:$4 sm:$0xff]  }
 0x3d0   : > { %2569 = vst.msk [vmem:[#allocation2 + $0x1a0] sm:$0xff] %vm2542_vm1, %v2499_v1  ;;  %6058 = vmatprep.mubr.bf16.mxu0 %v5795_v19  ;;  %v6438_v47 = vshll.u32 %v5795_v19, 16  ;;  %v6450_v29 = vshrl.u32 %v5795_v19, 16  ;;  %v7211_v4 = vrot.slane %v5795_v19, 1 }
 0x3d1   : > { %v2501_v32 = vpop.permute.xlu1 %2500  ;;  %6059 = vmatmul.mubr.bf16.gmra.mrb[236].mxu0 %v16273_v60 }
 0x3d2   : > { %2570 = vst.msk [vmem:[#allocation2 + $0x1b0] sm:$0xff] %vm2542_vm1, %v2501_v32  ;;  %6879 = vmatpush1.bf16.msra.mxu0 %v14201_v44  ;;  %v6440_v27 = vrot.slane %v6438_v47, 1  ;;  %v16912_v38 = vsel %vm7206_vm5, %v7210_v20, %v7211_v4  ;;  %v7784_v31 = vrot.slane %v6450_v29, 1  ;;  %v7785_v50 = vrot.slane %v6438_v47, 2  ;;  %v14213_v20 = vld [vmem:[%s18509_s3 + $0x160] ss:$8 sps:$4 sm:$0xff]  }
 0x3d3   : > { %v5610_v5 = vpop.permute.xlu0 %5609  ;;  %6880 = vmatprep.subr.bf16.mxu0 %v14206_v16  ;;  %v5737_v58 = vld [vmem:[#allocation2 + $0x48] sm:$0xff] }
 0x3d4   : > { %5699 = vst.msk [vmem:[#allocation2 + $0x68] sm:$0xff] %vm3636_vm3, %v5610_v5  ;;  %v16919_v23 = vsel %vm6417_vm6, %v6436_v28, %v6440_v27  ;;  %v7786_v39 = vor.u32 %v7785_v50, %v7784_v31  ;;  %v6452_v11 = vor.u32 %v6450_v29, %v6440_v27  ;;  %v14218_v29 = vld [vmem:[%s18509_s3 + $0x174] ss:$8 sps:$4 sm:$0xff]   ;;  %v14216_v27 = vld [vmem:[%s18509_s3 + $0x170] ss:$8 sps:$4 sm:$0xff]  }
 0x3d5   : > { %v5612_v13 = vpop.permute.xlu1 %5611  ;;  %v5739_v15 = vld [vmem:[#allocation2 + $0x58] sm:$0xff] }
 0x3d6   : > { %5700 = vst.msk [vmem:[#allocation2 + $0x78] sm:$0xff] %vm3636_vm3, %v5612_v13  ;;  %v5797_v53 = vpack.c.bf16 %v5739_v15, %v5737_v58  ;;  %6881 = vmatpush1.bf16.msra.mxu0 %v14204_v9  ;;  %v16926_v37 = vsel %vm7763_vm4, %v7783_v6, %v7786_v39 }
 0x3d7   : > { %18563 = vst [vmem:[#allocation16_spill] sm:$0xff] %v16926_v37  ;;  %v5104_v57 = vpop.permute.xlu0 %5103  ;;  %6882 = vmatprep.subr.bf16.mxu0 %v14209_v12 }
 0x3d8   : > { %5173 = vst.msk [vmem:[#allocation2 + $0x1a8] sm:$0xff] %vm3089_vm2, %v5104_v57  ;;  %6068 = vmatprep.mubr.bf16.mxu0 %v5797_v53  ;;  %v6454_v51 = vshll.u32 %v5797_v53, 16  ;;  %v6466_v22 = vshrl.u32 %v5797_v53, 16  ;;  %v7215_v7 = vrot.slane %v5797_v53, 1 }
 0x3d9   : > { %v5106_v59 = vpop.permute.xlu1 %5105  ;;  %6069 = vmatmul.mubr.bf16.gmra.mrb[240].mxu0 %v16298_v43 }
 0x3da   : > { %5174 = vst.msk [vmem:[#allocation2 + $0x1b8] sm:$0xff] %vm3089_vm2, %v5106_v59  ;;  %6883 = vmatpush1.bf16.msra.mxu0 %v14207_v54  ;;  %v6456_v0 = vrot.slane %v6454_v51, 1  ;;  %v16938_v48 = vsel %vm7206_vm5, %v7211_v4, %v7215_v7  ;;  %v7792_v61 = vrot.slane %v6466_v22, 1  ;;  %v7793_v14 = vrot.slane %v6454_v51, 2 }
 0x3db   : > { %v5614_v40 = vpop.permute.xlu0 %5613  ;;  %6884 = vmatprep.subr.bf16.mxu0 %v14212_v26  ;;  %v5741_v1 = vld [vmem:[#allocation2 + $0x68] sm:$0xff] }
 0x3dc   : > { %5701 = vst.msk [vmem:[#allocation2 + $0x88] sm:$0xff] %vm3636_vm3, %v5614_v40  ;;  %v16945_v52 = vsel %vm6417_vm6, %v6452_v11, %v6456_v0  ;;  %v7794_v19 = vor.u32 %v7793_v14, %v7792_v61  ;;  %v6468_v9 = vor.u32 %v6466_v22, %v6456_v0  ;;  %v14219_v26 = vld [vmem:[%s18509_s3 + $0x180] ss:$8 sps:$4 sm:$0xff]   ;;  %v14222_v14 = vld [vmem:[%s18509_s3 + $0x190] ss:$8 sps:$4 sm:$0xff]  }
 0x3dd   : > { %v5616_v44 = vpop.permute.xlu1 %5615  ;;  %v5743_v16 = vld [vmem:[#allocation2 + $0x78] sm:$0xff] }
 0x3de   : > { %5702 = vst.msk [vmem:[#allocation2 + $0x98] sm:$0xff] %vm3636_vm3, %v5616_v44  ;;  %v5799_v3 = vpack.c.bf16 %v5743_v16, %v5741_v1  ;;  %6885 = vmatpush1.bf16.msra.mxu0 %v14210_v45  ;;  %v16952_v42 = vsel %vm7763_vm4, %v7786_v39, %v7794_v19  ;;  %v14221_v39 = vld [vmem:[%s18509_s3 + $0x184] ss:$8 sps:$4 sm:$0xff]  }
 0x3df   : > { %18564 = vst [vmem:[#allocation17_spill] sm:$0xff] %v16952_v42  ;;  %v3046_v47 = vpop.permute.xlu0 %3045  ;;  %6886 = vmatprep.subr.bf16.mxu0 %v14215_v34  ;;  %v14227_v16 = vld [vmem:[%s18509_s3 + $0x1a4] ss:$8 sps:$4 sm:$0xff]  }
 0x3e0   : > { %3116 = vst.msk [vmem:[#allocation2 + $0x1a0] sm:$0xff] %vm3089_vm2, %v3046_v47  ;;  %6078 = vmatprep.mubr.bf16.mxu0 %v5799_v3  ;;  %v6470_v4 = vshll.u32 %v5799_v3, 16  ;;  %v6482_v18 = vshrl.u32 %v5799_v3, 16  ;;  %v7219_v32 = vrot.slane %v5799_v3, 1 }
 0x3e1   : > { %v3048_v28 = vpop.permute.xlu1 %3047  ;;  %6079 = vmatmul.mubr.bf16.gmra.mrb[244].mxu0 %v16327_v36 }
 0x3e2   : > { %3117 = vst.msk [vmem:[#allocation2 + $0x1b0] sm:$0xff] %vm3089_vm2, %v3048_v28  ;;  %6887 = vmatpush1.bf16.msra.mxu0 %v14213_v20  ;;  %v6472_v31 = vrot.slane %v6470_v4, 1  ;;  %v16964_v50 = vsel %vm7206_vm5, %v7215_v7, %v7219_v32  ;;  %v7800_v5 = vrot.slane %v6482_v18, 1  ;;  %v7801_v12 = vrot.slane %v6470_v4, 2  ;;  %v14224_v7 = vld [vmem:[%s18509_s3 + $0x194] ss:$8 sps:$4 sm:$0xff]  }
 0x3e3   : > { %v5618_v6 = vpop.permute.xlu0 %5617  ;;  %6888 = vmatprep.subr.bf16.mxu0 %v14218_v29  ;;  %v5745_v53 = vld [vmem:[#allocation2 + $0x88] sm:$0xff] }
 0x3e4   : > { %5703 = vst.msk [vmem:[#allocation2 + $0xa8] sm:$0xff] %vm3636_vm3, %v5618_v6  ;;  %v16971_v13 = vsel %vm6417_vm6, %v6468_v9, %v6472_v31  ;;  %v7802_v58 = vor.u32 %v7801_v12, %v7800_v5  ;;  %v6484_v61 = vor.u32 %v6482_v18, %v6472_v31 }
 0x3e5   : > { %v5620_v15 = vpop.permute.xlu1 %5619  ;;  %v5747_v54 = vld [vmem:[#allocation2 + $0x98] sm:$0xff] }
 0x3e6   : > { %5704 = vst.msk [vmem:[#allocation2 + $0xb8] sm:$0xff] %vm3636_vm3, %v5620_v15  ;;  %v5801_v57 = vpack.c.bf16 %v5747_v54, %v5745_v53  ;;  %6889 = vmatpush1.bf16.msra.mxu0 %v14216_v27  ;;  %v16978_v51 = vsel %vm7763_vm4, %v7794_v19, %v7802_v58  ;;  %v14230_v27 = vld [vmem:[%s18509_s3 + $0x1b4] ss:$8 sps:$4 sm:$0xff]   ;;  %v14228_v53 = vld [vmem:[%s18509_s3 + $0x1b0] ss:$8 sps:$4 sm:$0xff]  }
 0x3e7   : > { %18565 = vst [vmem:[#allocation18_spill] sm:$0xff] %v16978_v51  ;;  %v3593_v22 = vpop.permute.xlu0 %3592  ;;  %6890 = vmatprep.subr.bf16.mxu0 %v14221_v39 }
 0x3e8   : > { %3663 = vst.msk [vmem:[#allocation2 + $0x1a0] sm:$0xff] %vm3636_vm3, %v3593_v22  ;;  %6088 = vmatprep.mubr.bf16.mxu0 %v5801_v57  ;;  %v6486_v59 = vshll.u32 %v5801_v57, 16  ;;  %v6498_v11 = vshrl.u32 %v5801_v57, 16  ;;  %v7223_v45 = vrot.slane %v5801_v57, 1 }
 0x3e9   : > { %v3595_v0 = vpop.permute.xlu1 %3594  ;;  %6089 = vmatmul.mubr.bf16.gmra.mrb[248].mxu0 %v16355_v33 }
 0x3ea   : > { %3664 = vst.msk [vmem:[#allocation2 + $0x1b0] sm:$0xff] %vm3636_vm3, %v3595_v0  ;;  %6891 = vmatpush1.bf16.msra.mxu0 %v14219_v26  ;;  %v6488_v40 = vrot.slane %v6486_v59, 1  ;;  %v16990_v34 = vsel %vm7206_vm5, %v7219_v32, %v7223_v45  ;;  %v7808_v19 = vrot.slane %v6498_v11, 1  ;;  %v7809_v44 = vrot.slane %v6486_v59, 2  ;;  %v14225_v32 = vld [vmem:[%s18509_s3 + $0x1a0] ss:$8 sps:$4 sm:$0xff]  }
 0x3eb   : > { %v5622_v1 = vpop.permute.xlu0 %5621  ;;  %6892 = vmatprep.subr.bf16.mxu0 %v14224_v7  ;;  %v5749_v29 = vld [vmem:[#allocation2 + $0xa8] sm:$0xff] }
 0x3ec   : > { %5705 = vst.msk [vmem:[#allocation2 + $0xc8] sm:$0xff] %vm3636_vm3, %v5622_v1  ;;  %v16997_v3 = vsel %vm6417_vm6, %v6484_v61, %v6488_v40  ;;  %v7810_v20 = vor.u32 %v7809_v44, %v7808_v19  ;;  %v6500_v15 = vor.u32 %v6498_v11, %v6488_v40  ;;  %v14233_v59 = vld [vmem:[%s18509_s3 + $0x1c4] ss:$8 sps:$4 sm:$0xff]  }
 0x3ed   : > { %v5624_v47 = vpop.permute.xlu1 %5623  ;;  %v5751_v4 = vld [vmem:[#allocation2 + $0xb8] sm:$0xff] }
 0x3ee   : > { %5706 = vst.msk [vmem:[#allocation2 + $0xd8] sm:$0xff] %vm3636_vm3, %v5624_v47  ;;  %v17000_v18 = vpack.c.bf16 %v5751_v4, %v5749_v29  ;;  %6893 = vmatpush1.bf16.msra.mxu0 %v14222_v14  ;;  %v17006_v28 = vsel %vm7763_vm4, %v7802_v58, %v7810_v20 }
 0x3ef   : > { %18566 = vst [vmem:[#allocation19_spill] sm:$0xff] %v17006_v28  ;;  %v4562_v9 = vpop.permute.xlu0 %4561  ;;  %6894 = vmatprep.subr.bf16.mxu0 %v14227_v16  ;;  %v5780_v39 = vld [vmem:[#allocation2 + $0x1a0] sm:$0xff] }
 0x3f0   : > { %4629 = vst.msk [vmem:[#allocation2 + $0x1c8] sm:$0xff] %vm2542_vm1, %v4562_v9  ;;  %6098 = vmatprep.mubr.bf16.mxu0 %v17000_v18  ;;  %v6502_v31 = vshll.u32 %v17000_v18, 16  ;;  %v6514_v5 = vshrl.u32 %v17000_v18, 16  ;;  %v7227_v12 = vrot.slane %v17000_v18, 1  ;;  %v14231_v16 = vld [vmem:[%s18509_s3 + $0x1c0] ss:$8 sps:$4 sm:$0xff]  }
 0x3f1   : > { %v4564_v6 = vpop.permute.xlu1 %4563  ;;  %6099 = vmatmul.mubr.bf16.gmra.mrb[252].mxu0 %v16381_v30  ;;  %v5782_v58 = vld [vmem:[#allocation2 + $0x1b0] sm:$0xff] }
 0x3f2   : > { %4630 = vst.msk [vmem:[#allocation2 + $0x1d8] sm:$0xff] %vm2542_vm1, %v4564_v6  ;;  %6895 = vmatpush1.bf16.msra.mxu0 %v14225_v32  ;;  %v17021_v54 = vpack.c.bf16 %v5782_v58, %v5780_v39  ;;  %v6504_v57 = vrot.slane %v6502_v31, 1  ;;  %v17024_v26 = vsel %vm7206_vm5, %v7223_v45, %v7227_v12  ;;  %v7816_v22 = vrot.slane %v6514_v5, 1  ;;  %v14236_v18 = vld [vmem:[%s18509_s3 + $0x1d4] ss:$8 sps:$4 sm:$0xff]  }
 0x3f3   : > { %v5626_v7 = vpop.permute.xlu0 %5625  ;;  %6896 = vmatprep.subr.bf16.mxu0 %v14230_v27  ;;  %v7817_v11 = vrot.slane %v6502_v31, 2  ;;  %v5753_v45 = vld [vmem:[#allocation2 + $0xc8] sm:$0xff]  ;;  %v14234_v58 = vld [vmem:[%s18509_s3 + $0x1d0] ss:$8 sps:$4 sm:$0xff]  }
 0x3f4   : > { %18567 = vst [vmem:[#allocation20_spill] sm:$0xff] %v17021_v54  ;;  %5707 = vst.msk [vmem:[#allocation2 + $0xe8] sm:$0xff] %vm3636_vm3, %v5626_v7  ;;  %v17031_v0 = vsel %vm6417_vm6, %v6500_v15, %v6504_v57  ;;  %v18544_v61 = vshll.u32 %v17021_v54, 16  ;;  %v18543_v14 = vshrl.u32 %v17021_v54, 16 }
 0x3f5   : > { %v5628_v40 = vpop.permute.xlu1 %5627  ;;  %v5755_v19 = vld [vmem:[#allocation2 + $0xd8] sm:$0xff]  ;;  %v7818_v44 = vor.u32 %v7817_v11, %v7816_v22 }
 0x3f6   : > { %5708 = vst.msk [vmem:[#allocation2 + $0xf8] sm:$0xff] %vm3636_vm3, %v5628_v40  ;;  %v5805_v1 = vpack.c.bf16 %v5755_v19, %v5753_v45  ;;  %6897 = vmatpush1.bf16.msra.mxu0 %v14228_v53  ;;  %v7876_v47 = vrot.slane %v18543_v14, 1  ;;  %v7877_v29 = vrot.slane %v18544_v61, 2 }
 0x3f7   : > { %v2503_v4 = vpop.permute.xlu0 %2502  ;;  %6898 = vmatprep.subr.bf16.mxu0 %v14233_v59  ;;  %v17047_v32 = vsel %vm7763_vm4, %v7810_v20, %v7818_v44  ;;  %v6516_v20 = vor.u32 %v6514_v5, %v6504_v57  ;;  %v14239_v59 = vld [vmem:[%s18509_s3 + $0x1e4] ss:$8 sps:$4 sm:$0xff]  }
 0x3f8   : > { %18568 = vst [vmem:[#allocation21_spill] sm:$0xff] %v17047_v32  ;;  %2571 = vst.msk [vmem:[#allocation2 + $0x1c0] sm:$0xff] %vm2542_vm1, %v2503_v4  ;;  %6108 = vmatprep.mubr.bf16.mxu0 %v5805_v1  ;;  %v6518_v9 = vshll.u32 %v5805_v1, 16  ;;  %v6530_v27 = vshrl.u32 %v5805_v1, 16  ;;  %v7231_v6 = vrot.slane %v5805_v1, 1  ;;  %v17051_v39 = vor.u32 %v7877_v29, %v7876_v47 }
 0x3f9   : > { %v2505_v31 = vpop.permute.xlu1 %2504  ;;  %6109 = vmatmul.mubr.bf16.gmra.mrb[0].mxu0 %v16408_v56  ;;  %v14242_v29 = vld [vmem:[%s18509_s3 + $0x1f4] ss:$8 sps:$4 sm:$0xff]  }
 0x3fa   : > { %2572 = vst.msk [vmem:[#allocation2 + $0x1d0] sm:$0xff] %vm2542_vm1, %v2505_v31  ;;  %6899 = vmatpush1.bf16.msra.mxu0 %v14231_v16  ;;  %v6520_v15 = vrot.slane %v6518_v9, 1  ;;  %v7824_v53 = vrot.slane %v6530_v27, 1  ;;  %v7825_v22 = vrot.slane %v6518_v9, 2  ;;  %v17061_v11 = vsel %vm7206_vm5, %v7227_v12, %v7231_v6  ;;  %v14237_v12 = vld [vmem:[%s18509_s3 + $0x1e0] ss:$8 sps:$4 sm:$0xff]  }
 0x3fb   : > { %v5630_v7 = vpop.permute.xlu0 %5629  ;;  %6900 = vmatprep.subr.bf16.mxu0 %v14236_v18  ;;  %v17066_v40 = vsel %vm7763_vm4, %v16596_v46, %v17051_v39  ;;  %v5757_v19 = vld [vmem:[#allocation2 + $0xe8] sm:$0xff] }
 0x3fc   : > { %18569 = vst [vmem:[#allocation22_spill] sm:$0xff] %v17066_v40  ;;  %5709 = vst.msk [vmem:[#allocation2 + $0x108] sm:$0xff] %vm3636_vm3, %v5630_v7  ;;  %v17070_v5 = vsel %vm6417_vm6, %v6516_v20, %v6520_v15  ;;  %v7826_v57 = vor.u32 %v7825_v22, %v7824_v53 }
 0x3fd   : > { %v5632_v45 = vpop.permute.xlu1 %5631  ;;  %v5759_v1 = vld [vmem:[#allocation2 + $0xf8] sm:$0xff] }
 0x3fe   : > { %5710 = vst.msk [vmem:[#allocation2 + $0x118] sm:$0xff] %vm3636_vm3, %v5632_v45  ;;  %v5807_v16 = vpack.c.bf16 %v5759_v1, %v5757_v19  ;;  %6901 = vmatpush1.bf16.msra.mxu0 %v14234_v58  ;;  %v17077_v46 = vsel %vm7763_vm4, %v7818_v44, %v7826_v57  ;;  %v6532_v58 = vor.u32 %v6530_v27, %v6520_v15  ;;  %v14240_v44 = vld [vmem:[%s18509_s3 + $0x1f0] ss:$8 sps:$4 sm:$0xff]   ;;  %v14245_v45 = vld [vmem:[%s18509_s3 + $0x204] ss:$8 sps:$4 sm:$0xff]  }
 0x3ff   : > { %18570 = vst [vmem:[#allocation23_spill] sm:$0xff] %v17077_v46  ;;  %v5108_v47 = vpop.permute.xlu0 %5107  ;;  %6902 = vmatprep.subr.bf16.mxu0 %v14239_v59  ;;  %v18545_v46 = vrot.slane %v17021_v54, 1 }
 0x400   : > { %5175 = vst.msk [vmem:[#allocation2 + $0x1c8] sm:$0xff] %vm3089_vm2, %v5108_v47  ;;  %6118 = vmatprep.mubr.bf16.mxu0 %v5807_v16  ;;  %v6534_v4 = vshll.u32 %v5807_v16, 16  ;;  %v6546_v18 = vshrl.u32 %v5807_v16, 16  ;;  %v7235_v9 = vrot.slane %v5807_v16, 1 }
 0x401   : > { %v5110_v31 = vpop.permute.xlu1 %5109  ;;  %6119 = vmatmul.mubr.bf16.gmra.mrb[4].mxu0 %v16435_v17 }
 0x402   : > { %5176 = vst.msk [vmem:[#allocation2 + $0x1d8] sm:$0xff] %vm3089_vm2, %v5110_v31  ;;  %6903 = vmatpush1.bf16.msra.mxu0 %v14237_v12  ;;  %v6536_v20 = vrot.slane %v6534_v4, 1  ;;  %v17089_v53 = vsel %vm7206_vm5, %v7231_v6, %v7235_v9  ;;  %v7832_v22 = vrot.slane %v6546_v18, 1  ;;  %v7833_v7 = vrot.slane %v6534_v4, 2 }
 0x403   : > { %v5634_v59 = vpop.permute.xlu0 %5633  ;;  %6904 = vmatprep.subr.bf16.mxu0 %v14242_v29  ;;  %v5761_v1 = vld [vmem:[#allocation2 + $0x108] sm:$0xff] }
 0x404   : > { %5711 = vst.msk [vmem:[#allocation2 + $0x128] sm:$0xff] %vm3636_vm3, %v5634_v59  ;;  %v17096_v27 = vsel %vm6417_vm6, %v6532_v58, %v6536_v20  ;;  %v7834_v15 = vor.u32 %v7833_v7, %v7832_v22  ;;  %v6548_v22 = vor.u32 %v6546_v18, %v6536_v20 }
 0x405   : > { %v5636_v19 = vpop.permute.xlu1 %5635  ;;  %v5763_v16 = vld [vmem:[#allocation2 + $0x118] sm:$0xff] }
 0x406   : > { %5712 = vst.msk [vmem:[#allocation2 + $0x138] sm:$0xff] %vm3636_vm3, %v5636_v19  ;;  %v5809_v6 = vpack.c.bf16 %v5763_v16, %v5761_v1  ;;  %6905 = vmatpush1.bf16.msra.mxu0 %v14240_v44  ;;  %v17100_v12 = vsel %vm7763_vm4, %v7826_v57, %v7834_v15 }
 0x407   : > { %18571 = vst [vmem:[#allocation24_spill] sm:$0xff] %v17100_v12  ;;  %v3050_v47 = vpop.permute.xlu0 %3049  ;;  %7465 = vmatprep.subr.bf16.mxu0 %v14245_v45  ;;  %v18574_v12 = vshll.u32 %v17021_v54, 16 }
 0x408   : > { %3118 = vst.msk [vmem:[#allocation2 + $0x1c0] sm:$0xff] %vm3089_vm2, %v3050_v47  ;;  %6128 = vmatprep.mubr.bf16.mxu0 %v5809_v6  ;;  %v6550_v29 = vshll.u32 %v5809_v6, 16  ;;  %v6562_v4 = vshrl.u32 %v5809_v6, 16  ;;  %v7239_v31 = vrot.slane %v5809_v6, 1 }
 0x409   : > { %v3052_v58 = vpop.permute.xlu1 %3051  ;;  %6129 = vmatmul.mubr.bf16.gmra.mrb[8].mxu0 %v16462_v25 }
 0x40a   : > { %3119 = vst.msk [vmem:[#allocation2 + $0x1d0] sm:$0xff] %vm3089_vm2, %v3052_v58  ;;  %v6552_v7 = vrot.slane %v6550_v29, 1  ;;  %v17106_v44 = vsel %vm7206_vm5, %v7235_v9, %v7239_v31  ;;  %v7840_v57 = vrot.slane %v6562_v4, 1  ;;  %v7841_v59 = vrot.slane %v6550_v29, 2 }
 0x40b   : > { %v5638_v19 = vpop.permute.xlu0 %5637  ;;  %v5765_v6 = vld [vmem:[#allocation2 + $0x128] sm:$0xff] }
 0x40c   : > { %5713 = vst.msk [vmem:[#allocation2 + $0x148] sm:$0xff] %vm3636_vm3, %v5638_v19  ;;  %v17110_v45 = vsel %vm6417_vm6, %v6548_v22, %v6552_v7  ;;  %v7842_v1 = vor.u32 %v7841_v59, %v7840_v57  ;;  %v6564_v22 = vor.u32 %v6562_v4, %v6552_v7 }
 0x40d   : > { %v5640_v16 = vpop.permute.xlu1 %5639  ;;  %v5767_v47 = vld [vmem:[#allocation2 + $0x138] sm:$0xff] }
 0x40e   : > { %5714 = vst.msk [vmem:[#allocation2 + $0x158] sm:$0xff] %vm3636_vm3, %v5640_v16  ;;  %v5811_v18 = vpack.c.bf16 %v5767_v47, %v5765_v6  ;;  %v17114_v20 = vsel %vm7763_vm4, %v7834_v15, %v7842_v1 }
 0x40f   : > { %18572 = vst [vmem:[#allocation25_spill] sm:$0xff] %v17114_v20  ;;  %v3597_v9 = vpop.permute.xlu0 %3596 }
 0x410   : > { %3665 = vst.msk [vmem:[#allocation2 + $0x1c0] sm:$0xff] %vm3636_vm3, %v3597_v9  ;;  %6138 = vmatprep.mubr.bf16.mxu0 %v5811_v18  ;;  %v6566_v29 = vshll.u32 %v5811_v18, 16  ;;  %v6578_v58 = vshrl.u32 %v5811_v18, 16  ;;  %v7243_v19 = vrot.slane %v5811_v18, 1 }
 0x411   : > { %v3599_v14 = vpop.permute.xlu1 %3598  ;;  %6139 = vmatmul.mubr.bf16.gmra.mrb[12].mxu0 %v16489_v2 }
 0x412   : > { %3666 = vst.msk [vmem:[#allocation2 + $0x1d0] sm:$0xff] %vm3636_vm3, %v3599_v14  ;;  %v6568_v57 = vrot.slane %v6566_v29, 1  ;;  %v17120_v59 = vsel %vm7206_vm5, %v7239_v31, %v7243_v19  ;;  %v7848_v16 = vrot.slane %v6578_v58, 1  ;;  %v7849_v15 = vrot.slane %v6566_v29, 2 }
 0x413   : > { %v5642_v6 = vpop.permute.xlu0 %5641  ;;  %v5769_v61 = vld [vmem:[#allocation2 + $0x148] sm:$0xff] }
 0x414   : > { %5715 = vst.msk [vmem:[#allocation2 + $0x168] sm:$0xff] %vm3636_vm3, %v5642_v6  ;;  %v17124_v47 = vsel %vm6417_vm6, %v6564_v22, %v6568_v57  ;;  %v7850_v9 = vor.u32 %v7849_v15, %v7848_v16  ;;  %v6580_v15 = vor.u32 %v6578_v58, %v6568_v57 }
 0x415   : > { %v5644_v18 = vpop.permute.xlu1 %5643  ;;  %v5771_v40 = vld [vmem:[#allocation2 + $0x158] sm:$0xff] }
 0x416   : > { %5716 = vst.msk [vmem:[#allocation2 + $0x178] sm:$0xff] %vm3636_vm3, %v5644_v18  ;;  %v5813_v4 = vpack.c.bf16 %v5771_v40, %v5769_v61  ;;  %v17128_v14 = vsel %vm7763_vm4, %v7842_v1, %v7850_v9  ;;  %v17134_v18 = vrot.slane %v18574_v12, 1 }
 0x417   : > { %18573 = vst [vmem:[#allocation26_spill] sm:$0xff] %v17128_v14  ;;  %v4566_v31 = vpop.permute.xlu0 %4565  ;;  %v5784_v22 = vld [vmem:[#allocation2 + $0x1c0] sm:$0xff] }
 0x418   : > { %4631 = vst.msk [vmem:[#allocation2 + $0x1e8] sm:$0xff] %vm2542_vm1, %v4566_v31  ;;  %6148 = vmatprep.mubr.bf16.mxu0 %v5813_v4  ;;  %v6582_v7 = vshll.u32 %v5813_v4, 16  ;;  %v6594_v29 = vshrl.u32 %v5813_v4, 16  ;;  %v7247_v6 = vrot.slane %v5813_v4, 1 }
 0x419   : > { %v4568_v20 = vpop.permute.xlu1 %4567  ;;  %6149 = vmatmul.mubr.bf16.gmra.mrb[16].mxu0 %v16516_v21  ;;  %v5786_v16 = vld [vmem:[#allocation2 + $0x1d0] sm:$0xff] }
 0x41a   : > { %4632 = vst.msk [vmem:[#allocation2 + $0x1f8] sm:$0xff] %vm2542_vm1, %v4568_v20  ;;  %v17137_v61 = vpack.c.bf16 %v5786_v16, %v5784_v22  ;;  %v6584_v40 = vrot.slane %v6582_v7, 1  ;;  %v17140_v1 = vsel %vm7206_vm5, %v7243_v19, %v7247_v6  ;;  %v7856_v31 = vrot.slane %v6594_v29, 1 }
 0x41b   : > { %v5646_v4 = vpop.permute.xlu0 %5645  ;;  %v7857_v14 = vrot.slane %v6582_v7, 2  ;;  %v5773_v20 = vld [vmem:[#allocation2 + $0x168] sm:$0xff]  ;;  %v18575_v16 = vshrl.u32 %v17021_v54, 16 }
 0x41c   : > { %5717 = vst.msk [vmem:[#allocation2 + $0x188] sm:$0xff] %vm3636_vm3, %v5646_v4  ;;  %v17144_v24 = vsel %vm6417_vm6, %v6580_v15, %v6584_v40  ;;  %v6638_v58 = vshll.u32 %v17137_v61, 16  ;;  %v18547_v12 = vshrl.u32 %v17137_v61, 16  ;;  %v18546_v7 = vrot.slane %v17137_v61, 1 }
 0x41d   : > { %v5648_v57 = vpop.permute.xlu1 %5647  ;;  %v5775_v22 = vld [vmem:[#allocation2 + $0x178] sm:$0xff]  ;;  %v6636_v19 = vor.u32 %v18575_v16, %v17134_v18  ;;  %v7858_v8 = vor.u32 %v7857_v14, %v7856_v31 }
 0x41e   : > { %5718 = vst.msk [vmem:[#allocation2 + $0x198] sm:$0xff] %vm3636_vm3, %v5648_v57  ;;  %v5815_v15 = vpack.c.bf16 %v5775_v22, %v5773_v20  ;;  %v17154_v4 = vrot.slane %v6638_v58, 1  ;;  %v7884_v32 = vrot.slane %v18547_v12, 1  ;;  %v7885_v10 = vrot.slane %v6638_v58, 2 }
 0x41f   : > { %v2507_v28 = vpop.permute.xlu0 %2506  ;;  %v17163_v16 = vsel %vm7206_vm5, %v18545_v46, %v18546_v7  ;;  %v17166_v35 = vsel %vm7763_vm4, %v7850_v9, %v7858_v8  ;;  %v6596_v46 = vor.u32 %v6594_v29, %v6584_v40 }
 0x420   : > { %18576 = vst [vmem:[#allocation27_spill] sm:$0xff] %v17163_v16  ;;  %18577 = vst [vmem:[#allocation28_spill] sm:$0xff] %v17166_v35  ;;  %6158 = vmatprep.mubr.bf16.mxu0 %v5815_v15  ;;  %v6598_v14 = vshll.u32 %v5815_v15, 16  ;;  %v6610_v31 = vshrl.u32 %v5815_v15, 16  ;;  %v17171_v57 = vsel %vm6417_vm6, %v6636_v19, %v17154_v4  ;;  %v7251_v20 = vrot.slane %v5815_v15, 1 }
 0x421   : > { %2573 = vst.msk [vmem:[#allocation2 + $0x1e0] sm:$0xff] %vm2542_vm1, %v2507_v28  ;;  %v2509_v58 = vpop.permute.xlu1 %2508  ;;  %6159 = vmatmul.mubr.bf16.gmra.mrb[20].mxu0 %v16543_v62  ;;  %v17174_v22 = vor.u32 %v7885_v10, %v7884_v32 }
 0x422   : > { %2574 = vst.msk [vmem:[#allocation2 + $0x1f0] sm:$0xff] %vm2542_vm1, %v2509_v58  ;;  %v6600_v9 = vrot.slane %v6598_v14, 1  ;;  %v7864_v7 = vrot.slane %v6610_v31, 1  ;;  %v7865_v12 = vrot.slane %v6598_v14, 2  ;;  %v17178_v35 = vsel %vm7206_vm5, %v7247_v6, %v7251_v20 }
 0x423   : > { %v5650_v28 = vpop.permute.xlu0 %5649  ;;  %v17183_v19 = vsel %vm7763_vm4, %v17051_v39, %v17174_v22  ;;  %v5777_v29 = vld [vmem:[#allocation2 + $0x188] sm:$0xff] }
 0x424   : > { %18578 = vst [vmem:[#allocation29_spill] sm:$0xff] %v17183_v19  ;;  %5719 = vst.msk [vmem:[#allocation2 + $0x1a8] sm:$0xff] %vm3636_vm3, %v5650_v28  ;;  %v17187_v10 = vsel %vm6417_vm6, %v6596_v46, %v6600_v9  ;;  %v7866_v32 = vor.u32 %v7865_v12, %v7864_v7  ;;  %v6612_v46 = vor.u32 %v6610_v31, %v6600_v9 }
 0x425   : > { %v5652_v15 = vpop.permute.xlu1 %5651  ;;  %v5779_v40 = vld [vmem:[#allocation2 + $0x198] sm:$0xff] }
 0x426   : > { %5720 = vst.msk [vmem:[#allocation2 + $0x1b8] sm:$0xff] %vm3636_vm3, %v5652_v15  ;;  %v5817_v14 = vpack.c.bf16 %v5779_v40, %v5777_v29  ;;  %v17191_v6 = vsel %vm7763_vm4, %v7858_v8, %v7866_v32 }
 0x427   : > { %18579 = vst [vmem:[#allocation30_spill] sm:$0xff] %v17191_v6  ;;  %v5112_v58 = vpop.permute.xlu0 %5111 }
 0x428   : > { %5177 = vst.msk [vmem:[#allocation2 + $0x1e8] sm:$0xff] %vm3089_vm2, %v5112_v58  ;;  %6168 = vmatprep.mubr.bf16.mxu0 %v5817_v14  ;;  %v6614_v39 = vshll.u32 %v5817_v14, 16  ;;  %v6626_v19 = vshrl.u32 %v5817_v14, 16  ;;  %v7255_v28 = vrot.slane %v5817_v14, 1 }
 0x429   : > { %v5114_v51 = vpop.permute.xlu1 %5113  ;;  %6169 = vmatmul.mubr.bf16.gmra.mrb[24].mxu0 %v16567_v55 }
 0x42a   : > { %5178 = vst.msk [vmem:[#allocation2 + $0x1f8] sm:$0xff] %vm3089_vm2, %v5114_v51  ;;  %v6616_v12 = vrot.slane %v6614_v39, 1  ;;  %v17197_v7 = vsel %vm7206_vm5, %v7251_v20, %v7255_v28  ;;  %v7872_v15 = vrot.slane %v6626_v19, 1  ;;  %v7873_v8 = vrot.slane %v6614_v39, 2 }
 0x42b   : > { %18580 = vst [vmem:[#allocation31_spill] sm:$0xff] %v17197_v7  ;;  %v5654_v29 = vpop.permute.xlu0 %5653  ;;  %v5781_v6 = vld [vmem:[#allocation2 + $0x1a8] sm:$0xff] }
 0x42c   : > { %5721 = vst.msk [vmem:[#allocation2 + $0x1c8] sm:$0xff] %vm3636_vm3, %v5654_v29  ;;  %v17201_v40 = vsel %vm6417_vm6, %v6612_v46, %v6616_v12  ;;  %v7874_v58 = vor.u32 %v7873_v8, %v7872_v15  ;;  %v6628_v46 = vor.u32 %v6626_v19, %v6616_v12 }
 0x42d   : > { %v5656_v14 = vpop.permute.xlu1 %5655  ;;  %v5783_v41 = vld [vmem:[#allocation2 + $0x1b8] sm:$0xff] }
 0x42e   : > { %5722 = vst.msk [vmem:[#allocation2 + $0x1d8] sm:$0xff] %vm3636_vm3, %v5656_v14  ;;  %v5819_v31 = vpack.c.bf16 %v5783_v41, %v5781_v6  ;;  %v17205_v51 = vsel %vm7763_vm4, %v7866_v32, %v7874_v58 }
 0x42f   : > { %18581 = vst [vmem:[#allocation32_spill] sm:$0xff] %v17205_v51  ;;  %v3054_v20 = vpop.permute.xlu0 %3053 }
 0x430   : > { %3120 = vst.msk [vmem:[#allocation2 + $0x1e0] sm:$0xff] %vm3089_vm2, %v3054_v20  ;;  %6178 = vmatprep.mubr.bf16.mxu0 %v5819_v31  ;;  %v6630_v9 = vshll.u32 %v5819_v31, 16  ;;  %v6642_v39 = vshrl.u32 %v5819_v31, 16  ;;  %v7259_v29 = vrot.slane %v5819_v31, 1 }
 0x431   : > { %v3056_v42 = vpop.permute.xlu1 %3055  ;;  %6179 = vmatmul.mubr.bf16.gmra.mrb[28].mxu0 %v17021_v54 }
 0x432   : > { %3121 = vst.msk [vmem:[#allocation2 + $0x1f0] sm:$0xff] %vm3089_vm2, %v3056_v42  ;;  %v6632_v15 = vrot.slane %v6630_v9, 1  ;;  %v17211_v8 = vsel %vm7206_vm5, %v7255_v28, %v7259_v29  ;;  %v7880_v41 = vrot.slane %v6642_v39, 1  ;;  %v7881_v32 = vrot.slane %v6630_v9, 2 }
 0x433   : > { %18582 = vst [vmem:[#allocation33_spill] sm:$0xff] %v17211_v8  ;;  %v5658_v6 = vpop.permute.xlu0 %5657  ;;  %v5785_v51 = vld [vmem:[#allocation2 + $0x1c8] sm:$0xff]  ;;  %v18588_v8 = vshll.u32 %v16273_v60, 16 }
 0x434   : > { %5723 = vst.msk [vmem:[#allocation2 + $0x1e8] sm:$0xff] %vm3636_vm3, %v5658_v6  ;;  %v17215_v14 = vsel %vm6417_vm6, %v6628_v46, %v6632_v15  ;;  %v7882_v20 = vor.u32 %v7881_v32, %v7880_v41  ;;  %v6644_v46 = vor.u32 %v6642_v39, %v6632_v15 }
 0x435   : > { %v5660_v31 = vpop.permute.xlu1 %5659  ;;  %v5787_v63 = vld [vmem:[#allocation2 + $0x1d8] sm:$0xff]  ;;  %v6428_v7 = vrot.slane %v18588_v8, 1  ;;  %v14243_v8 = vld [vmem:[%s18509_s3 + $0x200] ss:$8 sps:$4 sm:$0xff]  }
 0x436   : > { %5724 = vst.msk [vmem:[#allocation2 + $0x1f8] sm:$0xff] %vm3636_vm3, %v5660_v31  ;;  %v5821_v19 = vpack.c.bf16 %v5787_v63, %v5785_v51  ;;  %v17219_v42 = vsel %vm7763_vm4, %v7874_v58, %v7882_v20  ;;  %v6284_v51 = vld [vmem:[#allocation2] sm:$0xfe] }
 0x437   : > { %18583 = vst [vmem:[#allocation34_spill] sm:$0xff] %v17219_v42  ;;  %v3601_v28 = vpop.permute.xlu0 %3600 }
 0x438   : > { %3667 = vst.msk [vmem:[#allocation2 + $0x1e0] sm:$0xff] %vm3636_vm3, %v3601_v28  ;;  %6188 = vmatprep.mubr.bf16.mxu0 %v5821_v19  ;;  %v6646_v12 = vshll.u32 %v5821_v19, 16  ;;  %v6658_v9 = vshrl.u32 %v5821_v19, 16  ;;  %v7263_v6 = vrot.slane %v5821_v19, 1  ;;  %v6350_v19 = vpack.c.bf16 %v16883_v49, %v6284_v51 }
 0x439   : > { %v3603_v37 = vpop.permute.xlu1 %3602  ;;  %6189 = vmatmul.mubr.bf16.gmra.mrb[32].mxu0 %v17137_v61 }
 0x43a   : > { %3668 = vst.msk [vmem:[#allocation2 + $0x1f0] sm:$0xff] %vm3636_vm3, %v3603_v37  ;;  %v6648_v41 = vrot.slane %v6646_v12, 1  ;;  %v17225_v32 = vsel %vm7206_vm5, %v7259_v29, %v7263_v6  ;;  %v7888_v63 = vrot.slane %v6658_v9, 1  ;;  %v7889_v58 = vrot.slane %v6646_v12, 2 }
 0x43b   : > { %18584 = vst [vmem:[#allocation35_spill] sm:$0xff] %v17225_v32  ;;  %v5789_v42 = vld [vmem:[#allocation2 + $0x1e8] sm:$0xff] }
 0x43c   : > { %v17228_v31 = vsel %vm6417_vm6, %v6644_v46, %v6648_v41  ;;  %v7890_v28 = vor.u32 %v7889_v58, %v7888_v63  ;;  %v6421_v63 = vshll.u32 %v6350_v19, 16  ;;  %v6660_v32 = vor.u32 %v6658_v9, %v6648_v41 }
 0x43d   : > { %v5791_v16 = vld [vmem:[#allocation2 + $0x1f8] sm:$0xff] }
 0x43e   : > { %v17231_v54 = vpack.c.bf16 %v5791_v16, %v5789_v42  ;;  %v17234_v39 = vsel %vm7763_vm4, %v7882_v20, %v7890_v28  ;;  %v6423_v41 = vrot.slane %v6421_v63, 1 }
 0x43f   : > { %18585 = vst [vmem:[#allocation36_spill] sm:$0xff] %v17234_v39  ;;  %v5788_v12 = vld [vmem:[#allocation2 + $0x1e0] sm:$0xff] }
 0x440   : > { %6198 = vmatprep.mubr.bf16.mxu0 %v17231_v54  ;;  %v6662_v37 = vshll.u32 %v17231_v54, 16  ;;  %v18550_v29 = vshrl.u32 %v17231_v54, 16  ;;  %v18549_v15 = vrot.slane %v17231_v54, 1 }
 0x441   : > { %v5790_v46 = vld [vmem:[#allocation2 + $0x1f0] sm:$0xff] }
 0x442   : > { %v17240_v58 = vpack.c.bf16 %v5790_v46, %v5788_v12  ;;  %v17242_v49 = vrot.slane %v6662_v37, 1  ;;  %v17247_v16 = vsel %vm7206_vm5, %v7263_v6, %v18549_v15  ;;  %v7896_v20 = vrot.slane %v18550_v29, 1 }
 0x443   : > { %18586 = vst [vmem:[#allocation37_spill] sm:$0xff] %v17247_v16  ;;  %v7897_v42 = vrot.slane %v6662_v37, 2  ;;  %v18587_v37 = vshrl.u32 %v17137_v61, 16  ;;  %v6419_v16 = vshrl.u32 %v6350_v19, 16 }
 0x444   : > { %6199 = vmatmul.mubr.bf16.gmra.mrb[36].mxu0 %v17240_v58  ;;  %v17254_v51 = vsel %vm6417_vm6, %v6660_v32, %v17242_v49  ;;  %v6654_v12 = vshll.u32 %v17240_v58, 16  ;;  %v6666_v9 = vshrl.u32 %v17240_v58, 16  ;;  %v7265_v6 = vrot.slane %v17240_v58, 1  ;;  %v18630_v58 = vld [vmem:[#allocation21_spill] sm:$0xff] }
 0x445   : > { %6906 = vmatprep.mubr.bf16.mxu0 %v16919_v23  ;;  %v17260_v46 = vor.u32 %v7897_v42, %v7896_v20  ;;  %v6652_v15 = vor.u32 %v18587_v37, %v17154_v4  ;;  %v18589_v23 = vrot.slane %v17137_v61, 1  ;;  %v6424_v19 = vor.u32 %v6423_v41, %v6419_v16  ;;  %v14248_v61 = vld [vmem:[%s18509_s3 + $0x214] ss:$8 sps:$4 sm:$0xff]  }
 0x446   : > { %v17265_v29 = vrot.slane %v6654_v12, 1  ;;  %v7892_v32 = vrot.slane %v6666_v9, 1  ;;  %v7893_v39 = vrot.slane %v6654_v12, 2  ;;  %v18590_v16 = vshll.u32 %v16298_v43, 16 }
 0x447   : > { %v17276_v63 = vsel %vm7206_vm5, %v18589_v23, %v7265_v6  ;;  %v17280_v4 = vsel %vm7763_vm4, %v7890_v28, %v17260_v46  ;;  %v6429_v12 = vsel %vm6417_vm6, %v6424_v19, %v6428_v7  ;;  %v14257_v19 = vld [vmem:[%s18509_s3 + $0x244] ss:$8 sps:$4 sm:$0xff]  }
 0x448   : > { %v17284_v20 = vsel %vm6417_vm6, %v6652_v15, %v17265_v29  ;;  %v17286_v42 = vor.u32 %v7893_v39, %v7892_v32  ;;  %v14246_v39 = vld [vmem:[%s18509_s3 + $0x210] ss:$8 sps:$4 sm:$0xff]   ;;  %v14251_v15 = vld [vmem:[%s18509_s3 + $0x224] ss:$8 sps:$4 sm:$0xff]   ;;  %v6448_v41 = vrot.slane %v18590_v16, 1 }
 0x449   : > { %v14254_v32 = vld [vmem:[%s18509_s3 + $0x234] ss:$8 sps:$4 sm:$0xff]  }
 0x44a   : > { %v17297_v28 = vsel %vm7763_vm4, %v17174_v22, %v17286_v42  ;;  %v18591_v22 = vshrl.u32 %v16273_v60, 16 }
 0x44c   : > { %6907 = vmatmul.mubr.bf16.vlgmr.msra.gmra.mrb[232].mxu0 %v6429_v12  ;;  %v6444_v37 = vor.u32 %v18591_v22, %v6428_v7  ;;  %v14252_v7 = vld [vmem:[%s18509_s3 + $0x230] ss:$8 sps:$4 sm:$0xff]   ;;  %v18593_v12 = vshrl.u32 %v16298_v43, 16  ;;  %v14263_v22 = vld [vmem:[%s18509_s3 + $0x264] ss:$8 sps:$4 sm:$0xff]  }
 0x44d   : > { %6916 = vmatprep.mubr.bf16.mxu0 %v16945_v52  ;;  %7466 = vmatpush1.bf16.msra.mxu0 %v14243_v8  ;;  %v14249_v52 = vld [vmem:[%s18509_s3 + $0x220] ss:$8 sps:$4 sm:$0xff]   ;;  %v18592_v8 = vshll.u32 %v16327_v36, 16 }
 0x44e   : > { %7467 = vmatprep.subr.bf16.mxu0 %v14248_v61  ;;  %v6449_v23 = vsel %vm6417_vm6, %v6444_v37, %v6448_v41  ;;  %v18594_v37 = vshll.u32 %v16355_v33, 16 }
 0x44f   : > { %v6464_v61 = vrot.slane %v18592_v8, 1  ;;  %v14264_v8 = vld [vmem:[%s18509_s3 + $0x270] ss:$8 sps:$4 sm:$0xff]  }
 0x451   : > { %7468 = vmatpush1.bf16.msra.mxu0 %v14246_v39  ;;  %v6460_v39 = vor.u32 %v18593_v12, %v6448_v41  ;;  %v14258_v41 = vld [vmem:[%s18509_s3 + $0x250] ss:$8 sps:$4 sm:$0xff]   ;;  %v18596_v12 = vshll.u32 %v16381_v30, 16 }
 0x452   : > { %7469 = vmatprep.subr.bf16.mxu0 %v14251_v15  ;;  %v14260_v15 = vld [vmem:[%s18509_s3 + $0x254] ss:$8 sps:$4 sm:$0xff]  }
 0x453   : > { %v6465_v16 = vsel %vm6417_vm6, %v6460_v39, %v6464_v61  ;;  %v6496_v39 = vrot.slane %v18596_v12, 1  ;;  %v18600_v12 = vshll.u32 %v16435_v17, 16 }
 0x454   : > { %6917 = vmatmul.mubr.bf16.gmra.mrb[236].mxu0 %v6449_v23 }
 0x455   : > { %6926 = vmatprep.mubr.bf16.mxu0 %v16971_v13  ;;  %7470 = vmatpush1.bf16.msra.mxu0 %v14249_v52  ;;  %v14255_v13 = vld [vmem:[%s18509_s3 + $0x240] ss:$8 sps:$4 sm:$0xff]   ;;  %v6480_v52 = vrot.slane %v18594_v37, 1  ;;  %v14275_v37 = vld [vmem:[%s18509_s3 + $0x2a4] ss:$8 sps:$4 sm:$0xff]  }
 0x456   : > { %7471 = vmatprep.subr.bf16.mxu0 %v14254_v32  ;;  %v18595_v32 = vshrl.u32 %v16327_v36, 16 }
 0x458   : > { %v6476_v23 = vor.u32 %v18595_v32, %v6464_v61  ;;  %v14269_v61 = vld [vmem:[%s18509_s3 + $0x284] ss:$8 sps:$4 sm:$0xff]  }
 0x459   : > { %7472 = vmatpush1.bf16.msra.mxu0 %v14252_v7  ;;  %v14266_v7 = vld [vmem:[%s18509_s3 + $0x274] ss:$8 sps:$4 sm:$0xff]  }
 0x45a   : > { %7473 = vmatprep.subr.bf16.mxu0 %v14257_v19  ;;  %v6481_v19 = vsel %vm6417_vm6, %v6476_v23, %v6480_v52  ;;  %v18599_v23 = vshrl.u32 %v16381_v30, 16 }
 0x45c   : > { %6927 = vmatmul.mubr.bf16.gmra.mrb[240].mxu0 %v6465_v16  ;;  %v14272_v16 = vld [vmem:[%s18509_s3 + $0x294] ss:$8 sps:$4 sm:$0xff]  }
 0x45d   : > { %6936 = vmatprep.mubr.bf16.mxu0 %v16997_v3  ;;  %7474 = vmatpush1.bf16.msra.mxu0 %v14255_v13  ;;  %v14261_v3 = vld [vmem:[%s18509_s3 + $0x260] ss:$8 sps:$4 sm:$0xff]   ;;  %v18597_v13 = vshrl.u32 %v16355_v33, 16 }
 0x45e   : > { %7475 = vmatprep.subr.bf16.mxu0 %v14260_v15 }
 0x45f   : > { %v6492_v15 = vor.u32 %v18597_v13, %v6480_v52  ;;  %v18598_v52 = vshll.u32 %v16408_v56, 16  ;;  %v18601_v13 = vshrl.u32 %v16408_v56, 16 }
 0x461   : > { %7476 = vmatpush1.bf16.msra.mxu0 %v14258_v41  ;;  %v6497_v41 = vsel %vm6417_vm6, %v6492_v15, %v6496_v39  ;;  %v6512_v32 = vrot.slane %v18598_v52, 1 }
 0x462   : > { %7477 = vmatprep.subr.bf16.mxu0 %v14263_v22  ;;  %v14270_v22 = vld [vmem:[%s18509_s3 + $0x290] ss:$8 sps:$4 sm:$0xff]  }
 0x463   : > { %v6524_v15 = vor.u32 %v18601_v13, %v6512_v32  ;;  %v18606_v13 = vshll.u32 %v16516_v21, 16 }
 0x464   : > { %6937 = vmatmul.mubr.bf16.gmra.mrb[244].mxu0 %v6481_v19 }
 0x465   : > { %6946 = vmatprep.mubr.bf16.mxu0 %v17031_v0  ;;  %7478 = vmatpush1.bf16.msra.mxu0 %v14261_v3  ;;  %v14267_v0 = vld [vmem:[%s18509_s3 + $0x280] ss:$8 sps:$4 sm:$0xff]   ;;  %v6508_v3 = vor.u32 %v18599_v23, %v6496_v39  ;;  %v6528_v39 = vrot.slane %v18600_v12, 1  ;;  %v18605_v12 = vshrl.u32 %v16462_v25, 16 }
 0x466   : > { %7479 = vmatprep.subr.bf16.mxu0 %v14266_v7  ;;  %v14278_v7 = vld [vmem:[%s18509_s3 + $0x2b4] ss:$8 sps:$4 sm:$0xff]  }
 0x467   : > { %v6513_v19 = vsel %vm6417_vm6, %v6508_v3, %v6512_v32  ;;  %v18603_v32 = vshrl.u32 %v16435_v17, 16  ;;  %v14290_v3 = vld [vmem:[%s18509_s3 + $0x2f4] ss:$8 sps:$4 sm:$0xff]  }
 0x469   : > { %7480 = vmatpush1.bf16.msra.mxu0 %v14264_v8  ;;  %v14276_v8 = vld [vmem:[%s18509_s3 + $0x2b0] ss:$8 sps:$4 sm:$0xff]   ;;  %v6540_v23 = vor.u32 %v18603_v32, %v6528_v39 }
 0x46a   : > { %7481 = vmatprep.subr.bf16.mxu0 %v14269_v61  ;;  %v14281_v61 = vld [vmem:[%s18509_s3 + $0x2c4] ss:$8 sps:$4 sm:$0xff]  }
 0x46c   : > { %6947 = vmatmul.mubr.bf16.gmra.mrb[248].mxu0 %v6497_v41  ;;  %v14282_v41 = vld [vmem:[%s18509_s3 + $0x2d0] ss:$8 sps:$4 sm:$0xff]  }
 0x46d   : > { %6956 = vmatprep.mubr.bf16.mxu0 %v17070_v5  ;;  %7482 = vmatpush1.bf16.msra.mxu0 %v14267_v0  ;;  %v14273_v5 = vld [vmem:[%s18509_s3 + $0x2a0] ss:$8 sps:$4 sm:$0xff]   ;;  %v14284_v0 = vld [vmem:[%s18509_s3 + $0x2d4] ss:$8 sps:$4 sm:$0xff]  }
 0x46e   : > { %7483 = vmatprep.subr.bf16.mxu0 %v14272_v16  ;;  %v6529_v16 = vsel %vm6417_vm6, %v6524_v15, %v6528_v39  ;;  %v6576_v15 = vrot.slane %v18606_v13, 1 }
 0x471   : > { %7484 = vmatpush1.bf16.msra.mxu0 %v14270_v22  ;;  %v14287_v22 = vld [vmem:[%s18509_s3 + $0x2e4] ss:$8 sps:$4 sm:$0xff]  }
 0x472   : > { %7485 = vmatprep.subr.bf16.mxu0 %v14275_v37  ;;  %v18602_v37 = vshll.u32 %v16462_v25, 16 }
 0x474   : > { %6957 = vmatmul.mubr.bf16.gmra.mrb[252].mxu0 %v6513_v19  ;;  %v6544_v52 = vrot.slane %v18602_v37, 1  ;;  %v14293_v19 = vld [vmem:[%s18509_s3 + $0x304] ss:$8 sps:$4 sm:$0xff]   ;;  %v18609_v37 = vshrl.u32 %v16516_v21, 16 }
 0x475   : > { %6966 = vmatprep.mubr.bf16.mxu0 %v17096_v27  ;;  %7486 = vmatpush1.bf16.msra.mxu0 %v14273_v5  ;;  %v14279_v27 = vld [vmem:[%s18509_s3 + $0x2c0] ss:$8 sps:$4 sm:$0xff]  }
 0x476   : > { %7487 = vmatprep.subr.bf16.mxu0 %v14278_v7  ;;  %v6545_v5 = vsel %vm6417_vm6, %v6540_v23, %v6544_v52  ;;  %v14288_v7 = vld [vmem:[%s18509_s3 + $0x2f0] ss:$8 sps:$4 sm:$0xff]   ;;  %v6556_v39 = vor.u32 %v18605_v12, %v6544_v52  ;;  %v6588_v52 = vor.u32 %v18609_v37, %v6576_v15  ;;  %v6348_v12 = vld [vmem:[#allocation2 + $0x200] sm:$0x1] }
 0x477   : > { %v14297_v37 = vld [vmem:[%s18509_s3 + $0x320] ss:$8 sps:$4 sm:$0xff]  }
 0x479   : > { %7488 = vmatpush1.bf16.msra.mxu0 %v14276_v8  ;;  %v18604_v8 = vshll.u32 %v16489_v2, 16 }
 0x47a   : > { %7489 = vmatprep.subr.bf16.mxu0 %v14281_v61 }
 0x47b   : > { %v6560_v61 = vrot.slane %v18604_v8, 1 }
 0x47c   : > { %6967 = vmatmul.mubr.bf16.gmra.mrb[0].mxu0 %v6529_v16 }
 0x47d   : > { %6976 = vmatprep.mubr.bf16.mxu0 %v17110_v45  ;;  %7490 = vmatpush1.bf16.msra.mxu0 %v14279_v27  ;;  %v14285_v45 = vld [vmem:[%s18509_s3 + $0x2e0] ss:$8 sps:$4 sm:$0xff]   ;;  %v18607_v27 = vshrl.u32 %v16489_v2, 16 }
 0x47e   : > { %7491 = vmatprep.subr.bf16.mxu0 %v14284_v0 }
 0x47f   : > { %v6572_v0 = vor.u32 %v18607_v27, %v6560_v61 }
 0x481   : > { %7492 = vmatpush1.bf16.msra.mxu0 %v14282_v41  ;;  %v6577_v16 = vsel %vm6417_vm6, %v6572_v0, %v6576_v15  ;;  %v18608_v41 = vshll.u32 %v16543_v62, 16  ;;  %v14633_v0 = vld [vmem:[#allocation2 + $0x10] sm:$0xff] }
 0x482   : > { %7493 = vmatprep.subr.bf16.mxu0 %v14287_v22 }
 0x483   : > { %v6592_v22 = vrot.slane %v18608_v41, 1 }
 0x484   : > { %6977 = vmatmul.mubr.bf16.gmra.mrb[4].mxu0 %v6545_v5 }
 0x485   : > { %6986 = vmatprep.mubr.bf16.mxu0 %v17124_v47  ;;  %7494 = vmatpush1.bf16.msra.mxu0 %v14285_v45  ;;  %v6561_v47 = vsel %vm6417_vm6, %v6556_v39, %v6560_v61  ;;  %v6593_v32 = vsel %vm6417_vm6, %v6588_v52, %v6592_v22  ;;  %v18611_v45 = vshrl.u32 %v16543_v62, 16  ;;  %v6382_v39 = vpack.c.bf16 %v6348_v12, %v6348_v12  ;;  %v14323_v12 = vld [vmem:[%s18509_s3 + $0x3a4] ss:$8 sps:$4 sm:$0xff]  }
 0x486   : > { %7495 = vmatprep.subr.bf16.mxu0 %v14290_v3 }
 0x487   : > { %v6604_v3 = vor.u32 %v18611_v45, %v6592_v22  ;;  %v6670_v15 = vshll.u32 %v6382_v39, 16  ;;  %v7213_v22 = vrot.slane %v16298_v43, 1  ;;  %v14300_v43 = vld [vmem:[%s18509_s3 + $0x330] ss:$8 sps:$4 sm:$0xff]   ;;  %v7229_v39 = vrot.slane %v16408_v56, 1 }
 0x488   : > { %v14324_v56 = vld [vmem:[%s18509_s3 + $0x3b0] ss:$8 sps:$4 sm:$0xff]  }
 0x489   : > { %7496 = vmatpush1.bf16.msra.mxu0 %v14288_v7 }
 0x48a   : > { %8110 = vmatprep.subr.bf16.mxu0 %v14293_v19 }
 0x48c   : > { %6987 = vmatmul.mubr.bf16.gmra.mrb[8].mxu0 %v6561_v47 }
 0x48d   : > { %6996 = vmatprep.mubr.bf16.mxu0 %v17144_v24  ;;  %v18610_v24 = vshll.u32 %v16567_v55, 16 }
 0x48f   : > { %v6608_v23 = vrot.slane %v18610_v24, 1  ;;  %v7217_v24 = vrot.slane %v16327_v36, 1  ;;  %v14306_v36 = vld [vmem:[%s18509_s3 + $0x350] ss:$8 sps:$4 sm:$0xff]  }
 0x491   : > { %v6609_v5 = vsel %vm6417_vm6, %v6604_v3, %v6608_v23  ;;  %v7218_v45 = vsel %vm7206_vm5, %v7213_v22, %v7217_v24  ;;  %v14311_v3 = vld [vmem:[%s18509_s3 + $0x364] ss:$8 sps:$4 sm:$0xff]  }
 0x494   : > { %6997 = vmatmul.mubr.bf16.gmra.mrb[12].mxu0 %v6577_v16  ;;  %v7208_v16 = vrot.slane %v16273_v60, 1  ;;  %v14299_v60 = vld [vmem:[%s18509_s3 + $0x324] ss:$8 sps:$4 sm:$0xff]  }
 0x495   : > { %7006 = vmatprep.mubr.bf16.mxu0 %v17187_v10  ;;  %v18612_v10 = vshrl.u32 %v16567_v55, 16 }
 0x496   : > { %v7214_v52 = vsel %vm7206_vm5, %v7208_v16, %v7213_v22 }
 0x497   : > { %v6620_v7 = vor.u32 %v18612_v10, %v6608_v23  ;;  %v14303_v23 = vld [vmem:[%s18509_s3 + $0x340] ss:$8 sps:$4 sm:$0xff]  }
 0x498   : > { %v14309_v10 = vld [vmem:[%s18509_s3 + $0x360] ss:$8 sps:$4 sm:$0xff]  }
 0x499   : > { %v6625_v19 = vsel %vm6417_vm6, %v6620_v7, %v17134_v18 }
 0x49c   : > { %7007 = vmatmul.mubr.bf16.gmra.mrb[16].mxu0 %v6593_v32  ;;  %v14305_v32 = vld [vmem:[%s18509_s3 + $0x344] ss:$8 sps:$4 sm:$0xff]  }
 0x49d   : > { %7016 = vmatprep.mubr.bf16.mxu0 %v17201_v40  ;;  %v6349_v40 = vld [vmem:[#allocation2 + $0x208] sm:$0x1] }
 0x49e   : > { %v6383_v8 = vpack.c.bf16 %v6349_v40, %v6349_v40  ;;  %v7225_v40 = vrot.slane %v16381_v30, 1  ;;  %v14318_v30 = vld [vmem:[%s18509_s3 + $0x390] ss:$8 sps:$4 sm:$0xff]  }
 0x4a0   : > { %v6678_v61 = vshll.u32 %v6383_v8, 16  ;;  %v14315_v8 = vld [vmem:[%s18509_s3 + $0x380] ss:$8 sps:$4 sm:$0xff]  }
 0x4a2   : > { %v6680_v13 = vrot.slane %v6678_v61, 1 }
 0x4a4   : > { %7017 = vmatmul.mubr.bf16.gmra.mrb[20].mxu0 %v6609_v5  ;;  %v7221_v5 = vrot.slane %v16355_v33, 1  ;;  %v14312_v33 = vld [vmem:[%s18509_s3 + $0x370] ss:$8 sps:$4 sm:$0xff]  }
 0x4a5   : > { %7026 = vmatprep.mubr.bf16.mxu0 %v17215_v14  ;;  %v18613_v14 = vshrl.u32 %v17231_v54, 16 }
 0x4a6   : > { %v7222_v7 = vsel %vm7206_vm5, %v7217_v24, %v7221_v5  ;;  %v7226_v61 = vsel %vm7206_vm5, %v7221_v5, %v7225_v40  ;;  %v18621_v24 = vrot.slane %v17231_v54, 1  ;;  %v18624_v5 = vld [vmem:[#allocation17_spill] sm:$0xff]  ;;  %v18627_v54 = vld [vmem:[#allocation6_spill] sm:$0xff] }
 0x4a7   : > { %v6676_v47 = vor.u32 %v18613_v14, %v17242_v49  ;;  %v14321_v14 = vld [vmem:[%s18509_s3 + $0x3a0] ss:$8 sps:$4 sm:$0xff]  }
 0x4a9   : > { %v6681_v18 = vsel %vm6417_vm6, %v6676_v47, %v6680_v13  ;;  %v7230_v47 = vsel %vm7206_vm5, %v7225_v40, %v7229_v39  ;;  %v14329_v13 = vld [vmem:[%s18509_s3 + $0x3c4] ss:$8 sps:$4 sm:$0xff]   ;;  %v18634_v40 = vld [vmem:[#allocation24_spill] sm:$0xff] }
 0x4ac   : > { %7027 = vmatmul.mubr.bf16.gmra.mrb[24].mxu0 %v6625_v19  ;;  %v14317_v19 = vld [vmem:[%s18509_s3 + $0x384] ss:$8 sps:$4 sm:$0xff]  }
 0x4ad   : > { %7036 = vmatprep.mubr.bf16.mxu0 %v17228_v31  ;;  %v6672_v31 = vrot.slane %v6670_v15, 1  ;;  %v7233_v15 = vrot.slane %v16435_v17, 1  ;;  %v14330_v17 = vld [vmem:[%s18509_s3 + $0x3d0] ss:$8 sps:$4 sm:$0xff]  }
 0x4b4   : > { %7037 = vmatmul.mubr.bf16.gmra.mrb[28].mxu0 %v17171_v57  ;;  %v6668_v57 = vor.u32 %v6666_v9, %v17265_v29  ;;  %v14296_v29 = vld [vmem:[%s18509_s3 + $0x314] ss:$8 sps:$4 sm:$0xff]  }
 0x4b5   : > { %7046 = vmatprep.mubr.bf16.mxu0 %v17254_v51  ;;  %v7131_v51 = vld [vmem:[#allocation2] sm:$0xfc] }
 0x4b6   : > { %v6673_v27 = vsel %vm6417_vm6, %v6668_v57, %v6672_v31  ;;  %v7135_v49 = vpack.c.bf16 %v14633_v0, %v7131_v51  ;;  %v7234_v57 = vsel %vm7206_vm5, %v7229_v39, %v7233_v15  ;;  %v14335_v31 = vld [vmem:[%s18509_s3 + $0x3e4] ss:$8 sps:$4 sm:$0xff]   ;;  %v14333_v51 = vld [vmem:[%s18509_s3 + $0x3e0] ss:$8 sps:$4 sm:$0xff]   ;;  %v18640_v39 = vld [vmem:[#allocation28_spill] sm:$0xff] }
 0x4b8   : > { %v7207_v41 = vrot.slane %v7135_v49, 1  ;;  %v7241_v49 = vrot.slane %v16489_v2, 1  ;;  %v7253_v2 = vrot.slane %v16567_v55, 1  ;;  %v7133_v55 = vld [vmem:[#allocation2 + $0x200] sm:$0x3] }
 0x4ba   : > { %v7209_v9 = vsel %vm7206_vm5, %v7207_v41, %v7208_v16  ;;  %v7245_v41 = vrot.slane %v16516_v21, 1  ;;  %v18616_v21 = vld [vmem:[#allocation20_spill] sm:$0xff] }
 0x4bc   : > { %7047 = vmatmul.mubr.bf16.gmra.mrb[32].mxu0 %v17284_v20  ;;  %v14291_v20 = vld [vmem:[%s18509_s3 + $0x300] ss:$8 sps:$4 sm:$0xff]  }
 0x4bd   : > { %7056 = vmatprep.mubr.bf16.mxu0 %v6681_v18  ;;  %v14327_v18 = vld [vmem:[%s18509_s3 + $0x3c0] ss:$8 sps:$4 sm:$0xff]  }
 0x4c4   : > { %7057 = vmatmul.mubr.bf16.gmra.mrb[36].mxu0 %v6673_v27  ;;  %v7237_v27 = vrot.slane %v16462_v25, 1  ;;  %v14336_v25 = vld [vmem:[%s18509_s3 + $0x3f0] ss:$8 sps:$4 sm:$0xff]  }
 0x4c5   : > { %7497 = vmatprep.mubr.bf16.mxu0 %v16912_v38  ;;  %v14294_v38 = vld [vmem:[%s18509_s3 + $0x310] ss:$8 sps:$4 sm:$0xff]  }
 0x4c6   : > { %v7238_v0 = vsel %vm7206_vm5, %v7233_v15, %v7237_v27  ;;  %v7242_v16 = vsel %vm7206_vm5, %v7237_v27, %v7241_v49  ;;  %v18646_v15 = vld [vmem:[#allocation34_spill] sm:$0xff] }
 0x4cc   : > { %7498 = vmatmul.mubr.bf16.vlgmr.msra.gmra.mrb[232].mxu0 %v7209_v9  ;;  %v18614_v9 = vld [vmem:[#allocation31_spill] sm:$0xff] }
 0x4cd   : > { %7507 = vmatprep.mubr.bf16.mxu0 %v16938_v48  ;;  %8111 = vmatpush1.bf16.msra.mxu0 %v14291_v20  ;;  %v14302_v48 = vld [vmem:[%s18509_s3 + $0x334] ss:$8 sps:$4 sm:$0xff]   ;;  %v7246_v20 = vsel %vm7206_vm5, %v7241_v49, %v7245_v41 }
 0x4ce   : > { %8112 = vmatprep.subr.bf16.mxu0 %v14296_v29 }
 0x4d1   : > { %8113 = vmatpush1.bf16.msra.mxu0 %v14294_v38 }
 0x4d2   : > { %8114 = vmatprep.subr.bf16.mxu0 %v14299_v60  ;;  %v18617_v60 = vrot.slane %v18616_v21, 1 }
 0x4d4   : > { %7508 = vmatmul.mubr.bf16.gmra.mrb[236].mxu0 %v7214_v52  ;;  %v7258_v22 = vsel %vm7206_vm5, %v7253_v2, %v18617_v60  ;;  %v18620_v52 = vld [vmem:[#allocation37_spill] sm:$0xff]  ;;  %v5727_v60 = vld [vmem:[%s18510_s4] sm:$0x3] }
 0x4d5   : > { %7517 = vmatprep.mubr.bf16.mxu0 %v16964_v50  ;;  %8115 = vmatpush1.bf16.msra.mxu0 %v14297_v37  ;;  %v14308_v50 = vld [vmem:[%s18509_s3 + $0x354] ss:$8 sps:$4 sm:$0xff]   ;;  %v18619_v37 = vld [vmem:[#allocation27_spill] sm:$0xff] }
 0x4d6   : > { %8116 = vmatprep.subr.bf16.mxu0 %v14302_v48 }
 0x4d9   : > { %8117 = vmatpush1.bf16.msra.mxu0 %v14300_v43 }
 0x4da   : > { %8118 = vmatprep.subr.bf16.mxu0 %v14305_v32  ;;  %v7137_v32 = vpack.c.bf16 %v7133_v55, %v7133_v55  ;;  %v14341_v55 = vld [vmem:[%s18513_s7 + $0x4] ss:$8 sps:$4 sm:$0xff]  }
 0x4db   : > { %8567 = vmatprep.mubr.bf16.mxu1 %v14341_v55 }
 0x4dc   : > { %7518 = vmatmul.mubr.bf16.gmra.mrb[240].mxu0 %v7218_v45 }
 0x4dd   : > { %7527 = vmatprep.mubr.bf16.mxu0 %v16990_v34  ;;  %8119 = vmatpush1.bf16.msra.mxu0 %v14303_v23  ;;  %v14314_v34 = vld [vmem:[%s18509_s3 + $0x374] ss:$8 sps:$4 sm:$0xff]  }
 0x4de   : > { %8120 = vmatprep.subr.bf16.mxu0 %v14308_v50  ;;  %v7269_v50 = vrot.slane %v7137_v32, 1 }
 0x4e0   : > { %v7270_v45 = vsel %vm7206_vm5, %v7265_v6, %v7269_v50  ;;  %v18631_v6 = vld [vmem:[#allocation8_spill] sm:$0xff] }
 0x4e1   : > { %8121 = vmatpush1.bf16.msra.mxu0 %v14306_v36  ;;  %v18622_v36 = vld [vmem:[#allocation16_spill] sm:$0xff] }
 0x4e2   : > { %8122 = vmatprep.subr.bf16.mxu0 %v14311_v3  ;;  %v18623_v3 = vld [vmem:[#allocation4_spill] sm:$0xff] }
 0x4e4   : > { %7528 = vmatmul.mubr.bf16.gmra.mrb[244].mxu0 %v7222_v7  ;;  %v18629_v7 = vld [vmem:[#allocation7_spill] sm:$0xff] }
 0x4e5   : > { %7537 = vmatprep.mubr.bf16.mxu0 %v17024_v26  ;;  %8123 = vmatpush1.bf16.msra.mxu0 %v14309_v10  ;;  %v14320_v26 = vld [vmem:[%s18509_s3 + $0x394] ss:$8 sps:$4 sm:$0xff]  }
 0x4e6   : > { %8124 = vmatprep.subr.bf16.mxu0 %v14314_v34  ;;  %v18625_v10 = vld [vmem:[#allocation5_spill] sm:$0xff]  ;;  %v18628_v34 = vld [vmem:[#allocation19_spill] sm:$0xff] }
 0x4e9   : > { %8125 = vmatpush1.bf16.msra.mxu0 %v14312_v33  ;;  %v18632_v33 = vld [vmem:[#allocation23_spill] sm:$0xff] }
 0x4ea   : > { %8126 = vmatprep.subr.bf16.mxu0 %v14317_v19  ;;  %v18633_v19 = vld [vmem:[#allocation9_spill] sm:$0xff] }
 0x4ec   : > { %7538 = vmatmul.mubr.bf16.gmra.mrb[248].mxu0 %v7226_v61  ;;  %v18637_v61 = vld [vmem:[#allocation11_spill] sm:$0xff] }
 0x4ed   : > { %7547 = vmatprep.mubr.bf16.mxu0 %v17061_v11  ;;  %8127 = vmatpush1.bf16.msra.mxu0 %v14315_v8  ;;  %v14326_v11 = vld [vmem:[%s18509_s3 + $0x3b4] ss:$8 sps:$4 sm:$0xff]   ;;  %v18635_v8 = vld [vmem:[#allocation10_spill] sm:$0xff] }
 0x4ee   : > { %8128 = vmatprep.subr.bf16.mxu0 %v14320_v26  ;;  %v18636_v26 = vld [vmem:[#allocation25_spill] sm:$0xff] }
 0x4f1   : > { %8129 = vmatpush1.bf16.msra.mxu0 %v14318_v30  ;;  %v18638_v30 = vld [vmem:[#allocation26_spill] sm:$0xff] }
 0x4f2   : > { %8130 = vmatprep.subr.bf16.mxu0 %v14323_v12  ;;  %v18639_v12 = vld [vmem:[#allocation12_spill] sm:$0xff] }
 0x4f4   : > { %7548 = vmatmul.mubr.bf16.gmra.mrb[252].mxu0 %v7230_v47  ;;  %v18643_v47 = vld [vmem:[#allocation14_spill] sm:$0xff] }
 0x4f5   : > { %7557 = vmatprep.mubr.bf16.mxu0 %v17089_v53  ;;  %8131 = vmatpush1.bf16.msra.mxu0 %v14321_v14  ;;  %v14332_v53 = vld [vmem:[%s18509_s3 + $0x3d4] ss:$8 sps:$4 sm:$0xff]  }
 0x4f6   : > { %8132 = vmatprep.subr.bf16.mxu0 %v14326_v11  ;;  %v18641_v14 = vld [vmem:[#allocation13_spill] sm:$0xff]  ;;  %v18642_v11 = vld [vmem:[#allocation30_spill] sm:$0xff] }
 0x4f9   : > { %8133 = vmatpush1.bf16.msra.mxu0 %v14324_v56  ;;  %v18644_v56 = vld [vmem:[#allocation32_spill] sm:$0xff] }
 0x4fa   : > { %8134 = vmatprep.subr.bf16.mxu0 %v14329_v13  ;;  %v18645_v13 = vld [vmem:[#allocation15_spill] sm:$0xff] }
 0x4fc   : > { %7558 = vmatmul.mubr.bf16.gmra.mrb[0].mxu0 %v7234_v57 }
 0x4fd   : > { %7567 = vmatprep.mubr.bf16.mxu0 %v17106_v44  ;;  %8135 = vmatpush1.bf16.msra.mxu0 %v14327_v18  ;;  %v14338_v44 = vld [vmem:[%s18509_s3 + $0x3f4] ss:$8 sps:$4 sm:$0xff]   ;;  %v7725_v18 = vld [vmem:[#allocation2 + $0x208] sm:$0x7] }
 0x4fe   : > { %8136 = vmatprep.subr.bf16.mxu0 %v14332_v53  ;;  %v18647_v53 = vld [vmem:[#allocation22_spill] sm:$0xff]  ;;  %v7729_v57 = vpack.c.bf16 %v7725_v18, %v7725_v18 }
 0x500   : > { %v7913_v27 = vshll.u32 %v7729_v57, 16 }
 0x501   : > { %8137 = vmatpush1.bf16.msra.mxu0 %v14330_v17  ;;  %v18648_v17 = vld [vmem:[#allocation36_spill] sm:$0xff] }
 0x502   : > { %8138 = vmatprep.subr.bf16.mxu0 %v14335_v31  ;;  %v7910_v31 = vshrl.u32 %v7729_v57, 16  ;;  %v7915_v49 = vrot.slane %v7913_v27, 2 }
 0x504   : > { %7568 = vmatmul.mubr.bf16.gmra.mrb[4].mxu0 %v7238_v0  ;;  %v18649_v0 = vld [vmem:[#allocation29_spill] sm:$0xff] }
 0x505   : > { %7577 = vmatprep.mubr.bf16.mxu0 %v17120_v59  ;;  %8139 = vmatpush1.bf16.msra.mxu0 %v14333_v51  ;;  %v7249_v59 = vrot.slane %v16543_v62, 1  ;;  %v7134_v62 = vld [vmem:[#allocation2 + $0x208] sm:$0x3]  ;;  %v7724_v51 = vld [vmem:[#allocation2 + $0x200] sm:$0x7] }
 0x506   : > { %8140 = vmatprep.subr.bf16.mxu0 %v14338_v44  ;;  %v7138_v48 = vpack.c.bf16 %v7134_v62, %v7134_v62  ;;  %v7728_v44 = vpack.c.bf16 %v7724_v51, %v7724_v51 }
 0x507   : > { %v7250_v29 = vsel %vm7206_vm5, %v7245_v41, %v7249_v59  ;;  %v7254_v38 = vsel %vm7206_vm5, %v7249_v59, %v7253_v2 }
 0x508   : > { %v7271_v43 = vrot.slane %v7138_v48, 1  ;;  %v7904_v41 = vshll.u32 %v7728_v44, 16 }
 0x509   : > { %8141 = vmatpush1.bf16.msra.mxu0 %v14336_v25  ;;  %v7912_v25 = vrot.slane %v7910_v31, 1 }
 0x50a   : > { %v7272_v23 = vsel %vm7206_vm5, %v18621_v24, %v7271_v43 }
 0x50c   : > { %7578 = vmatmul.mubr.bf16.gmra.mrb[8].mxu0 %v7242_v16  ;;  %v7901_v16 = vshrl.u32 %v7728_v44, 16 }
 0x50d   : > { %7587 = vmatprep.mubr.bf16.mxu0 %v17140_v1  ;;  %v18615_v1 = vld [vmem:[#allocation33_spill] sm:$0xff] }
 0x50e   : > { %v7903_v59 = vrot.slane %v7901_v16, 1 }
 0x514   : > { %7588 = vmatmul.mubr.bf16.gmra.mrb[12].mxu0 %v7246_v20  ;;  %v7916_v20 = vor.u32 %v7915_v49, %v7912_v25 }
 0x515   : > { %7597 = vmatprep.mubr.bf16.mxu0 %v17178_v35  ;;  %v18618_v35 = vld [vmem:[#allocation35_spill] sm:$0xff] }
 0x51c   : > { %7598 = vmatmul.mubr.bf16.gmra.mrb[16].mxu0 %v7250_v29  ;;  %v7906_v29 = vrot.slane %v7904_v41, 2 }
 0x51d   : > { %7607 = vmatprep.mubr.bf16.mxu0 %v18614_v9  ;;  %v7917_v9 = vsel %vm7763_vm4, %v17260_v46, %v7916_v20 }
 0x51e   : > { %v7907_v2 = vor.u32 %v7906_v29, %v7903_v59 }
 0x524   : > { %7608 = vmatmul.mubr.bf16.gmra.mrb[20].mxu0 %v7254_v38  ;;  %v7908_v38 = vsel %vm7763_vm4, %v17286_v42, %v7907_v2 }
 0x525   : > { %7617 = vmatprep.mubr.bf16.mxu0 %v18615_v1  ;;  %v6210_v1 = vlaneseq }
 0x527   : > { %v17650_v21 = vshrl.u32 %v6210_v1, 7 }
 0x52c   : > { %7618 = vmatmul.mubr.bf16.gmra.mrb[24].mxu0 %v7258_v22 }
 0x52d   : > { %7627 = vmatprep.mubr.bf16.mxu0 %v18618_v35 }
 0x534   : > { %7628 = vmatmul.mubr.bf16.gmra.mrb[28].mxu0 %v18619_v37 }
 0x535   : > { %7637 = vmatprep.mubr.bf16.mxu0 %v18620_v52 }
 0x53c   : > { %7638 = vmatmul.mubr.bf16.gmra.mrb[32].mxu0 %v17276_v63  ;;  %v18626_v63 = vld [vmem:[#allocation18_spill] sm:$0xff] }
 0x53d   : > { %7647 = vmatprep.mubr.bf16.mxu0 %v7272_v23 }
 0x544   : > { %7648 = vmatmul.mubr.bf16.gmra.mrb[36].mxu0 %v7270_v45 }
 0x545   : > { %8142 = vmatprep.mubr.bf16.mxu0 %v18622_v36 }
 0x54c   : > { %8143 = vmatmul.mubr.bf16.vlgmr.msra.gmra.mrb[232].mxu0 %v18623_v3 }
 0x54d   : > { %8152 = vmatprep.mubr.bf16.mxu0 %v18624_v5 }
 0x554   : > { %8153 = vmatmul.mubr.bf16.gmra.mrb[236].mxu0 %v18625_v10 }
 0x555   : > { %8162 = vmatprep.mubr.bf16.mxu0 %v18626_v63 }
 0x55c   : > { %8163 = vmatmul.mubr.bf16.gmra.mrb[240].mxu0 %v18627_v54 }
 0x55d   : > { %8172 = vmatprep.mubr.bf16.mxu0 %v18628_v34 }
 0x564   : > { %8173 = vmatmul.mubr.bf16.gmra.mrb[244].mxu0 %v18629_v7 }
 0x565   : > { %8182 = vmatprep.mubr.bf16.mxu0 %v18630_v58 }
 0x56c   : > { %8183 = vmatmul.mubr.bf16.gmra.mrb[248].mxu0 %v18631_v6 }
 0x56d   : > { %8192 = vmatprep.mubr.bf16.mxu0 %v18632_v33 }
 0x574   : > { %8193 = vmatmul.mubr.bf16.gmra.mrb[252].mxu0 %v18633_v19 }
 0x575   : > { %8202 = vmatprep.mubr.bf16.mxu0 %v18634_v40 }
 0x57c   : > { %8203 = vmatmul.mubr.bf16.gmra.mrb[0].mxu0 %v18635_v8 }
 0x57d   : > { %8212 = vmatprep.mubr.bf16.mxu0 %v18636_v26 }
 0x584   : > { %8213 = vmatmul.mubr.bf16.gmra.mrb[4].mxu0 %v18637_v61 }
 0x585   : > { %8222 = vmatprep.mubr.bf16.mxu0 %v18638_v30 }
 0x58c   : > { %8223 = vmatmul.mubr.bf16.gmra.mrb[8].mxu0 %v18639_v12 }
 0x58d   : > { %8232 = vmatprep.mubr.bf16.mxu0 %v18640_v39 }
 0x594   : > { %8233 = vmatmul.mubr.bf16.gmra.mrb[12].mxu0 %v18641_v14 }
 0x595   : > { %8242 = vmatprep.mubr.bf16.mxu0 %v18642_v11 }
 0x59c   : > { %8243 = vmatmul.mubr.bf16.gmra.mrb[16].mxu0 %v18643_v47 }
 0x59d   : > { %8252 = vmatprep.mubr.bf16.mxu0 %v18644_v56 }
 0x5a4   : > { %8253 = vmatmul.mubr.bf16.gmra.mrb[20].mxu0 %v18645_v13 }
 0x5a5   : > { %8262 = vmatprep.mubr.bf16.mxu0 %v18646_v15 }
 0x5ac   : > { %8263 = vmatmul.mubr.bf16.gmra.mrb[24].mxu0 %v18647_v53 }
 0x5ad   : > { %8272 = vmatprep.mubr.bf16.mxu0 %v18648_v17 }
 0x5b4   : > { %8273 = vmatmul.mubr.bf16.gmra.mrb[28].mxu0 %v18649_v0 }
 0x5b5   : > { %8282 = vmatprep.mubr.bf16.mxu0 %v17280_v4  ;;  %v17653_v4 = vsub.s32 0, %v17650_v21 }
 0x5b7   : > { %v17662_v46 = vrot.slane %v5727_v60, %v17653_v4 }
 0x5bc   : > { %8283 = vmatmul.mubr.bf16.gmra.mrb[32].mxu0 %v17297_v28  ;;  %v17659_v28 = vsub.s32 1, %v17650_v21 }
 0x5bd   : > { %8292 = vmatprep.mubr.bf16.mxu0 %v7917_v9 }
 0x5be   : > { %v17665_v22 = vrot.slane %v5727_v60, %v17659_v28 }
 0x5c4   : > { %8293 = vmatmul.mubr.bf16.gmra.mrb[36].mxu0 %v7908_v38 }
 0x61f   : > { %v8144_v42 = vpop.f32.mrb[232].mxu0 }
 0x620   : > { %v13473_v35 = vadd.f32 %v8144_v42, %v17662_v46  ;;  %v8146_v62 = vpop.f32.mrb[233].mxu0 }
 0x621   : > { %v13474_v37 = vadd.f32 %v8146_v62, %v17665_v22  ;;  %v8148_v48 = vpop.f32.mrb[234].mxu0 }
 0x622   : > { %v13475_v52 = vadd.f32 %v8148_v48, %v17662_v46  ;;  %v8150_v43 = vpop.f32.mrb[235].mxu0  ;;  %v8367_v24 = vmax.f32 %v13473_v35, 0.0 }
 0x623   : > { %v13476_v32 = vadd.f32 %v8150_v43, %v17665_v22  ;;  %v8368_v50 = vmax.f32 %v13474_v37, 0.0 }
 0x624   : > { %v8369_v23 = vmax.f32 %v13475_v52, 0.0 }
 0x625   : > { %v8370_v45 = vmax.f32 %v13476_v32, 0.0 }
 0x626   : > { %v8431_v36 = vpack.c.bf16 %v8369_v23, %v8367_v24 }
 0x627   : > { %v8432_v3 = vpack.c.bf16 %v8370_v45, %v8368_v50  ;;  %v8154_v5 = vpop.f32.mrb[236].mxu0 }
 0x628   : > { %v13477_v10 = vadd.f32 %v8154_v5, %v17662_v46  ;;  %v8156_v63 = vpop.f32.mrb[237].mxu0 }
 0x629   : > { %v13478_v54 = vadd.f32 %v8156_v63, %v17665_v22  ;;  %v8158_v34 = vpop.f32.mrb[238].mxu0  ;;  %8535 = vmatprep.subr.bf16.mxu1 %v8432_v3 }
 0x62a   : > { %v13479_v7 = vadd.f32 %v8158_v34, %v17662_v46  ;;  %v8160_v58 = vpop.f32.mrb[239].mxu0  ;;  %8536 = vmatpush1.bf16.msra.mxu1 %v8431_v36  ;;  %v8371_v33 = vmax.f32 %v13477_v10, 0.0 }
 0x62b   : > { %v13480_v6 = vadd.f32 %v8160_v58, %v17665_v22  ;;  %v8372_v40 = vmax.f32 %v13478_v54, 0.0 }
 0x62c   : > { %v8373_v19 = vmax.f32 %v13479_v7, 0.0 }
 0x62d   : > { %v8374_v8 = vmax.f32 %v13480_v6, 0.0 }
 0x62e   : > { %v8433_v26 = vpack.c.bf16 %v8373_v19, %v8371_v33 }
 0x62f   : > { %v8434_v61 = vpack.c.bf16 %v8374_v8, %v8372_v40  ;;  %v8164_v30 = vpop.f32.mrb[240].mxu0 }
 0x630   : > { %v13481_v12 = vadd.f32 %v8164_v30, %v17662_v46  ;;  %v8166_v39 = vpop.f32.mrb[241].mxu0 }
 0x631   : > { %v13482_v14 = vadd.f32 %v8166_v39, %v17665_v22  ;;  %v8168_v11 = vpop.f32.mrb[242].mxu0  ;;  %8537 = vmatprep.subr.bf16.mxu1 %v8434_v61 }
 0x632   : > { %v13483_v47 = vadd.f32 %v8168_v11, %v17662_v46  ;;  %v8170_v56 = vpop.f32.mrb[243].mxu0  ;;  %8538 = vmatpush1.bf16.msra.mxu1 %v8433_v26  ;;  %v8375_v15 = vmax.f32 %v13481_v12, 0.0 }
 0x633   : > { %v13484_v13 = vadd.f32 %v8170_v56, %v17665_v22  ;;  %v8376_v53 = vmax.f32 %v13482_v14, 0.0 }
 0x634   : > { %v8377_v18 = vmax.f32 %v13483_v47, 0.0 }
 0x635   : > { %v8378_v57 = vmax.f32 %v13484_v13, 0.0 }
 0x636   : > { %v8435_v17 = vpack.c.bf16 %v8377_v18, %v8375_v15 }
 0x637   : > { %v8436_v31 = vpack.c.bf16 %v8378_v57, %v8376_v53  ;;  %v8174_v27 = vpop.f32.mrb[244].mxu0 }
 0x638   : > { %v13485_v51 = vadd.f32 %v8174_v27, %v17662_v46  ;;  %v8176_v44 = vpop.f32.mrb[245].mxu0 }
 0x639   : > { %v13486_v0 = vadd.f32 %v8176_v44, %v17665_v22  ;;  %v8178_v25 = vpop.f32.mrb[246].mxu0  ;;  %8539 = vmatprep.subr.bf16.mxu1 %v8436_v31 }
 0x63a   : > { %v13487_v49 = vadd.f32 %v8178_v25, %v17662_v46  ;;  %v8180_v16 = vpop.f32.mrb[247].mxu0  ;;  %8540 = vmatpush1.bf16.msra.mxu1 %v8435_v17  ;;  %v8379_v20 = vmax.f32 %v13485_v51, 0.0 }
 0x63b   : > { %v13488_v41 = vadd.f32 %v8180_v16, %v17665_v22  ;;  %v8380_v29 = vmax.f32 %v13486_v0, 0.0 }
 0x63c   : > { %v8381_v59 = vmax.f32 %v13487_v49, 0.0 }
 0x63d   : > { %v8382_v9 = vmax.f32 %v13488_v41, 0.0 }
 0x63e   : > { %v8437_v2 = vpack.c.bf16 %v8381_v59, %v8379_v20 }
 0x63f   : > { %v8438_v38 = vpack.c.bf16 %v8382_v9, %v8380_v29  ;;  %v8184_v1 = vpop.f32.mrb[248].mxu0 }
 0x640   : > { %v13489_v60 = vadd.f32 %v8184_v1, %v17662_v46  ;;  %v8186_v42 = vpop.f32.mrb[249].mxu0 }
 0x641   : > { %v13490_v35 = vadd.f32 %v8186_v42, %v17665_v22  ;;  %v8188_v62 = vpop.f32.mrb[250].mxu0  ;;  %8541 = vmatprep.subr.bf16.mxu1 %v8438_v38 }
 0x642   : > { %v13491_v37 = vadd.f32 %v8188_v62, %v17662_v46  ;;  %v8190_v48 = vpop.f32.mrb[251].mxu0  ;;  %8542 = vmatpush1.bf16.msra.mxu1 %v8437_v2  ;;  %v8383_v43 = vmax.f32 %v13489_v60, 0.0 }
 0x643   : > { %v13492_v52 = vadd.f32 %v8190_v48, %v17665_v22  ;;  %v8384_v32 = vmax.f32 %v13490_v35, 0.0 }
 0x644   : > { %v8385_v55 = vmax.f32 %v13491_v37, 0.0 }
 0x645   : > { %v8386_v24 = vmax.f32 %v13492_v52, 0.0 }
 0x646   : > { %v8439_v23 = vpack.c.bf16 %v8385_v55, %v8383_v43 }
 0x647   : > { %v8440_v50 = vpack.c.bf16 %v8386_v24, %v8384_v32  ;;  %v8194_v45 = vpop.f32.mrb[252].mxu0 }
 0x648   : > { %v13493_v36 = vadd.f32 %v8194_v45, %v17662_v46  ;;  %v8196_v3 = vpop.f32.mrb[253].mxu0 }
 0x649   : > { %v13494_v5 = vadd.f32 %v8196_v3, %v17665_v22  ;;  %v8198_v10 = vpop.f32.mrb[254].mxu0  ;;  %8543 = vmatprep.subr.bf16.mxu1 %v8440_v50 }
 0x64a   : > { %v13495_v63 = vadd.f32 %v8198_v10, %v17662_v46  ;;  %v8200_v54 = vpop.f32.mrb[255].mxu0  ;;  %8544 = vmatpush1.bf16.msra.mxu1 %v8439_v23  ;;  %v8387_v7 = vmax.f32 %v13493_v36, 0.0 }
 0x64b   : > { %v13496_v34 = vadd.f32 %v8200_v54, %v17665_v22  ;;  %v8388_v6 = vmax.f32 %v13494_v5, 0.0 }
 0x64c   : > { %v8389_v58 = vmax.f32 %v13495_v63, 0.0 }
 0x64d   : > { %v8390_v33 = vmax.f32 %v13496_v34, 0.0 }
 0x64e   : > { %v8441_v19 = vpack.c.bf16 %v8389_v58, %v8387_v7 }
 0x64f   : > { %v8442_v40 = vpack.c.bf16 %v8390_v33, %v8388_v6  ;;  %v8204_v8 = vpop.f32.mrb[0].mxu0 }
 0x650   : > { %v13497_v26 = vadd.f32 %v8204_v8, %v17662_v46  ;;  %v8206_v61 = vpop.f32.mrb[1].mxu0 }
 0x651   : > { %v13498_v30 = vadd.f32 %v8206_v61, %v17665_v22  ;;  %v8208_v12 = vpop.f32.mrb[2].mxu0  ;;  %8545 = vmatprep.subr.bf16.mxu1 %v8442_v40 }
 0x652   : > { %v13499_v39 = vadd.f32 %v8208_v12, %v17662_v46  ;;  %v8210_v14 = vpop.f32.mrb[3].mxu0  ;;  %8546 = vmatpush1.bf16.msra.mxu1 %v8441_v19  ;;  %v8391_v47 = vmax.f32 %v13497_v26, 0.0 }
 0x653   : > { %v13500_v11 = vadd.f32 %v8210_v14, %v17665_v22  ;;  %v8392_v13 = vmax.f32 %v13498_v30, 0.0 }
 0x654   : > { %v8393_v56 = vmax.f32 %v13499_v39, 0.0 }
 0x655   : > { %v8394_v15 = vmax.f32 %v13500_v11, 0.0 }
 0x656   : > { %v8443_v18 = vpack.c.bf16 %v8393_v56, %v8391_v47 }
 0x657   : > { %v8444_v53 = vpack.c.bf16 %v8394_v15, %v8392_v13  ;;  %v8214_v57 = vpop.f32.mrb[4].mxu0 }
 0x658   : > { %v13501_v17 = vadd.f32 %v8214_v57, %v17662_v46  ;;  %v8216_v31 = vpop.f32.mrb[5].mxu0 }
 0x659   : > { %v13502_v27 = vadd.f32 %v8216_v31, %v17665_v22  ;;  %v8218_v51 = vpop.f32.mrb[6].mxu0  ;;  %8547 = vmatprep.subr.bf16.mxu1 %v8444_v53 }
 0x65a   : > { %v13503_v44 = vadd.f32 %v8218_v51, %v17662_v46  ;;  %v8220_v0 = vpop.f32.mrb[7].mxu0  ;;  %8548 = vmatpush1.bf16.msra.mxu1 %v8443_v18  ;;  %v8395_v49 = vmax.f32 %v13501_v17, 0.0 }
 0x65b   : > { %v13504_v25 = vadd.f32 %v8220_v0, %v17665_v22  ;;  %v8396_v41 = vmax.f32 %v13502_v27, 0.0 }
 0x65c   : > { %v8397_v16 = vmax.f32 %v13503_v44, 0.0 }
 0x65d   : > { %v8398_v20 = vmax.f32 %v13504_v25, 0.0 }
 0x65e   : > { %v8445_v59 = vpack.c.bf16 %v8397_v16, %v8395_v49 }
 0x65f   : > { %v8446_v29 = vpack.c.bf16 %v8398_v20, %v8396_v41  ;;  %v8224_v9 = vpop.f32.mrb[8].mxu0 }
 0x660   : > { %v13505_v2 = vadd.f32 %v8224_v9, %v17662_v46  ;;  %v8226_v38 = vpop.f32.mrb[9].mxu0 }
 0x661   : > { %v13506_v1 = vadd.f32 %v8226_v38, %v17665_v22  ;;  %v8228_v60 = vpop.f32.mrb[10].mxu0  ;;  %8549 = vmatprep.subr.bf16.mxu1 %v8446_v29 }
 0x662   : > { %v13507_v42 = vadd.f32 %v8228_v60, %v17662_v46  ;;  %v8230_v35 = vpop.f32.mrb[11].mxu0  ;;  %8550 = vmatpush1.bf16.msra.mxu1 %v8445_v59  ;;  %v8399_v37 = vmax.f32 %v13505_v2, 0.0 }
 0x663   : > { %v13508_v62 = vadd.f32 %v8230_v35, %v17665_v22  ;;  %v8400_v52 = vmax.f32 %v13506_v1, 0.0 }
 0x664   : > { %v8401_v48 = vmax.f32 %v13507_v42, 0.0 }
 0x665   : > { %v8402_v43 = vmax.f32 %v13508_v62, 0.0 }
 0x666   : > { %v8447_v55 = vpack.c.bf16 %v8401_v48, %v8399_v37 }
 0x667   : > { %v8448_v32 = vpack.c.bf16 %v8402_v43, %v8400_v52  ;;  %v8234_v24 = vpop.f32.mrb[12].mxu0 }
 0x668   : > { %v13509_v23 = vadd.f32 %v8234_v24, %v17662_v46  ;;  %v8236_v50 = vpop.f32.mrb[13].mxu0 }
 0x669   : > { %v13510_v45 = vadd.f32 %v8236_v50, %v17665_v22  ;;  %v8238_v36 = vpop.f32.mrb[14].mxu0  ;;  %8551 = vmatprep.subr.bf16.mxu1 %v8448_v32 }
 0x66a   : > { %v13511_v3 = vadd.f32 %v8238_v36, %v17662_v46  ;;  %v8240_v5 = vpop.f32.mrb[15].mxu0  ;;  %8552 = vmatpush1.bf16.msra.mxu1 %v8447_v55  ;;  %v8403_v63 = vmax.f32 %v13509_v23, 0.0 }
 0x66b   : > { %v13512_v10 = vadd.f32 %v8240_v5, %v17665_v22  ;;  %v8404_v34 = vmax.f32 %v13510_v45, 0.0 }
 0x66c   : > { %v8405_v54 = vmax.f32 %v13511_v3, 0.0 }
 0x66d   : > { %v8406_v7 = vmax.f32 %v13512_v10, 0.0 }
 0x66e   : > { %v8449_v58 = vpack.c.bf16 %v8405_v54, %v8403_v63 }
 0x66f   : > { %v8450_v6 = vpack.c.bf16 %v8406_v7, %v8404_v34  ;;  %v8244_v33 = vpop.f32.mrb[16].mxu0 }
 0x670   : > { %v13513_v19 = vadd.f32 %v8244_v33, %v17662_v46  ;;  %v8246_v40 = vpop.f32.mrb[17].mxu0 }
 0x671   : > { %v13514_v8 = vadd.f32 %v8246_v40, %v17665_v22  ;;  %v8248_v26 = vpop.f32.mrb[18].mxu0  ;;  %8553 = vmatprep.subr.bf16.mxu1 %v8450_v6 }
 0x672   : > { %v13515_v61 = vadd.f32 %v8248_v26, %v17662_v46  ;;  %v8250_v30 = vpop.f32.mrb[19].mxu0  ;;  %8554 = vmatpush1.bf16.msra.mxu1 %v8449_v58  ;;  %v8407_v39 = vmax.f32 %v13513_v19, 0.0 }
 0x673   : > { %v13516_v12 = vadd.f32 %v8250_v30, %v17665_v22  ;;  %v8408_v11 = vmax.f32 %v13514_v8, 0.0 }
 0x674   : > { %v8409_v14 = vmax.f32 %v13515_v61, 0.0 }
 0x675   : > { %v8410_v47 = vmax.f32 %v13516_v12, 0.0 }
 0x676   : > { %v8451_v56 = vpack.c.bf16 %v8409_v14, %v8407_v39 }
 0x677   : > { %v8452_v13 = vpack.c.bf16 %v8410_v47, %v8408_v11  ;;  %v8254_v15 = vpop.f32.mrb[20].mxu0 }
 0x678   : > { %v13517_v18 = vadd.f32 %v8254_v15, %v17662_v46  ;;  %v8256_v53 = vpop.f32.mrb[21].mxu0 }
 0x679   : > { %v13518_v57 = vadd.f32 %v8256_v53, %v17665_v22  ;;  %v8258_v17 = vpop.f32.mrb[22].mxu0  ;;  %8555 = vmatprep.subr.bf16.mxu1 %v8452_v13 }
 0x67a   : > { %v13519_v31 = vadd.f32 %v8258_v17, %v17662_v46  ;;  %v8260_v27 = vpop.f32.mrb[23].mxu0  ;;  %8556 = vmatpush1.bf16.msra.mxu1 %v8451_v56  ;;  %v8411_v44 = vmax.f32 %v13517_v18, 0.0 }
 0x67b   : > { %v13520_v51 = vadd.f32 %v8260_v27, %v17665_v22  ;;  %v8412_v25 = vmax.f32 %v13518_v57, 0.0 }
 0x67c   : > { %v8413_v0 = vmax.f32 %v13519_v31, 0.0 }
 0x67d   : > { %v8414_v49 = vmax.f32 %v13520_v51, 0.0 }
 0x67e   : > { %v8453_v16 = vpack.c.bf16 %v8413_v0, %v8411_v44 }
 0x67f   : > { %v8454_v41 = vpack.c.bf16 %v8414_v49, %v8412_v25  ;;  %v8264_v20 = vpop.f32.mrb[24].mxu0  ;;  %v14357_v49 = vld [vmem:[%s18511_s5 + $0x40] sm:$0xff]  }
 0x680   : > { %v13521_v59 = vadd.f32 %v8264_v20, %v17662_v46  ;;  %v8266_v29 = vpop.f32.mrb[25].mxu0  ;;  %v14360_v20 = vld [vmem:[%s18511_s5 + $0x8] sm:$0xff]  }
 0x681   : > { %v13522_v9 = vadd.f32 %v8266_v29, %v17665_v22  ;;  %v8268_v2 = vpop.f32.mrb[26].mxu0  ;;  %8557 = vmatprep.subr.bf16.mxu1 %v8454_v41  ;;  %v14359_v41 = vld [vmem:[%s18511_s5 + $0x48] sm:$0xff]   ;;  %v14342_v29 = vld [vmem:[%s18513_s7 + $0x10] ss:$8 sps:$4 sm:$0xff]  }
 0x682   : > { %v13523_v38 = vadd.f32 %v8268_v2, %v17662_v46  ;;  %v8270_v1 = vpop.f32.mrb[27].mxu0  ;;  %8558 = vmatpush1.bf16.msra.mxu1 %v8453_v16  ;;  %v8415_v42 = vmax.f32 %v13521_v59, 0.0  ;;  %v14339_v16 = vld [vmem:[%s18513_s7] ss:$8 sps:$4 sm:$0xff]   ;;  %v14361_v59 = vld [vmem:[%s18511_s5 + $0x50] sm:$0xff]  }
 0x683   : > { %v13524_v60 = vadd.f32 %v8270_v1, %v17665_v22  ;;  %v8416_v62 = vmax.f32 %v13522_v9, 0.0  ;;  %v14347_v9 = vld [vmem:[%s18513_s7 + $0x24] ss:$8 sps:$4 sm:$0xff]   ;;  %v14362_v2 = vld [vmem:[%s18511_s5 + $0x10] sm:$0xff]   ;;  %v14364_v1 = vld [vmem:[%s18511_s5 + $0x18] sm:$0xff]  }
 0x684   : > { %v8417_v35 = vmax.f32 %v13523_v38, 0.0  ;;  %v14363_v38 = vld [vmem:[%s18511_s5 + $0x58] sm:$0xff]  }
 0x685   : > { %v8418_v37 = vmax.f32 %v13524_v60, 0.0  ;;  %v14365_v60 = vld [vmem:[%s18511_s5 + $0x60] sm:$0xff]  }
 0x686   : > { %v8455_v48 = vpack.c.bf16 %v8417_v35, %v8415_v42  ;;  %v14345_v42 = vld [vmem:[%s18513_s7 + $0x20] ss:$8 sps:$4 sm:$0xff]   ;;  %v14350_v35 = vld [vmem:[%s18513_s7 + $0x34] ss:$8 sps:$4 sm:$0xff]  }
 0x687   : > { %v8456_v52 = vpack.c.bf16 %v8418_v37, %v8416_v62  ;;  %v8274_v43 = vpop.f32.mrb[28].mxu0  ;;  %v14366_v62 = vld [vmem:[%s18511_s5 + $0x20] sm:$0xff]   ;;  %v14367_v37 = vld [vmem:[%s18511_s5 + $0x68] sm:$0xff]  }
 0x688   : > { %v13525_v55 = vadd.f32 %v8274_v43, %v17662_v46  ;;  %v8276_v32 = vpop.f32.mrb[29].mxu0  ;;  %v14348_v43 = vld [vmem:[%s18513_s7 + $0x30] ss:$8 sps:$4 sm:$0xff]  }
 0x689   : > { %v13526_v24 = vadd.f32 %v8276_v32, %v17665_v22  ;;  %v8278_v23 = vpop.f32.mrb[30].mxu0  ;;  %8559 = vmatprep.subr.bf16.mxu1 %v8456_v52  ;;  %v14369_v52 = vld [vmem:[%s18511_s5 + $0x70] sm:$0xff]  }
 0x68a   : > { %v13527_v50 = vadd.f32 %v8278_v23, %v17662_v46  ;;  %v8280_v45 = vpop.f32.mrb[31].mxu0  ;;  %8560 = vmatpush1.bf16.msra.mxu1 %v8455_v48  ;;  %v8419_v3 = vmax.f32 %v13525_v55, 0.0  ;;  %v14368_v48 = vld [vmem:[%s18511_s5 + $0x28] sm:$0xff]   ;;  %v14370_v32 = vld [vmem:[%s18511_s5 + $0x30] sm:$0xff]  }
 0x68b   : > { %v13528_v36 = vadd.f32 %v8280_v45, %v17665_v22  ;;  %v8420_v10 = vmax.f32 %v13526_v24, 0.0  ;;  %v14353_v55 = vld [vmem:[%s18513_s7 + $0x44] ss:$8 sps:$4 sm:$0xff]   ;;  %v14351_v24 = vld [vmem:[%s18513_s7 + $0x40] ss:$8 sps:$4 sm:$0xff]   ;;  %v14371_v45 = vld [vmem:[%s18511_s5 + $0x78] sm:$0xff]  }
 0x68c   : > { %v8421_v5 = vmax.f32 %v13527_v50, 0.0  ;;  %v14356_v23 = vld [vmem:[%s18513_s7 + $0x54] ss:$8 sps:$4 sm:$0xff]   ;;  %v14354_v50 = vld [vmem:[%s18513_s7 + $0x50] ss:$8 sps:$4 sm:$0xff]  }
 0x68d   : > { %v8422_v63 = vmax.f32 %v13528_v36, 0.0  ;;  %v14372_v36 = vld [vmem:[%s18511_s5 + $0x38] sm:$0xff]  }
 0x68e   : > { %v8457_v54 = vpack.c.bf16 %v8421_v5, %v8419_v3  ;;  %v14373_v3 = vld [vmem:[%s18511_s5 + $0xc0] sm:$0xff]  }
 0x68f   : > { %v8458_v34 = vpack.c.bf16 %v8422_v63, %v8420_v10  ;;  %v8284_v7 = vpop.f32.mrb[32].mxu0 }
 0x690   : > { %v13529_v58 = vadd.f32 %v8284_v7, %v17662_v46  ;;  %v8286_v6 = vpop.f32.mrb[33].mxu0 }
 0x691   : > { %v13530_v33 = vadd.f32 %v8286_v6, %v17665_v22  ;;  %v8288_v19 = vpop.f32.mrb[34].mxu0  ;;  %8561 = vmatprep.subr.bf16.mxu1 %v8458_v34  ;;  %v14375_v6 = vld [vmem:[%s18511_s5 + $0xc8] sm:$0xff]  }
 0x692   : > { %v13531_v40 = vadd.f32 %v8288_v19, %v17662_v46  ;;  %v8290_v8 = vpop.f32.mrb[35].mxu0  ;;  %8562 = vmatpush1.bf16.msra.mxu1 %v8457_v54  ;;  %v8423_v61 = vmax.f32 %v13529_v58, 0.0  ;;  %v14374_v58 = vld [vmem:[%s18511_s5 + $0x80] sm:$0xff]  }
 0x693   : > { %v13532_v26 = vadd.f32 %v8290_v8, %v17665_v22  ;;  %v8424_v12 = vmax.f32 %v13530_v33, 0.0  ;;  %v14376_v33 = vld [vmem:[%s18511_s5 + $0x88] sm:$0xff]  }
 0x694   : > { %v8425_v30 = vmax.f32 %v13531_v40, 0.0  ;;  %v14377_v40 = vld [vmem:[%s18511_s5 + $0xd0] sm:$0xff]  }
 0x695   : > { %v8426_v39 = vmax.f32 %v13532_v26, 0.0 }
 0x696   : > { %v8459_v14 = vpack.c.bf16 %v8425_v30, %v8423_v61 }
 0x697   : > { %v8460_v11 = vpack.c.bf16 %v8426_v39, %v8424_v12  ;;  %v8294_v47 = vpop.f32.mrb[36].mxu0  ;;  %v14378_v12 = vld [vmem:[%s18511_s5 + $0x90] sm:$0xff]  }
 0x698   : > { %v13533_v56 = vadd.f32 %v8294_v47, %v17662_v46  ;;  %v8296_v13 = vpop.f32.mrb[37].mxu0 }
 0x699   : > { %v13534_v15 = vadd.f32 %v8296_v13, %v17665_v22  ;;  %v8298_v18 = vpop.f32.mrb[38].mxu0  ;;  %8563 = vmatprep.subr.bf16.mxu1 %v8460_v11  ;;  %v14380_v11 = vld [vmem:[%s18511_s5 + $0x98] sm:$0xff]  }
 0x69a   : > { %v13535_v53 = vadd.f32 %v8298_v18, %v17662_v46  ;;  %v8300_v57 = vpop.f32.mrb[39].mxu0  ;;  %8564 = vmatpush1.bf16.msra.mxu1 %v8459_v14  ;;  %v8427_v31 = vmax.f32 %v13533_v56, 0.0  ;;  %v14344_v46 = vld [vmem:[%s18513_s7 + $0x14] ss:$8 sps:$4 sm:$0xff]   ;;  %v14381_v56 = vld [vmem:[%s18511_s5 + $0xe0] sm:$0xff]  }
 0x69b   : > { %v13536_v17 = vadd.f32 %v8300_v57, %v17665_v22  ;;  %v8428_v51 = vmax.f32 %v13534_v15, 0.0  ;;  %v14358_v22 = vld [vmem:[%s18511_s5] sm:$0xff]   ;;  %v14379_v14 = vld [vmem:[%s18511_s5 + $0xd8] sm:$0xff]  }
 0x69c   : > { %v8429_v27 = vmax.f32 %v13535_v53, 0.0  ;;  %v14382_v57 = vld [vmem:[%s18511_s5 + $0xa0] sm:$0xff]  }
 0x69d   : > { %v8430_v44 = vmax.f32 %v13536_v17, 0.0 }
 0x69e   : > { %v8461_v0 = vpack.c.bf16 %v8429_v27, %v8427_v31  ;;  %v14383_v31 = vld [vmem:[%s18511_s5 + $0xe8] sm:$0xff]  }
 0x69f   : > { %v8462_v25 = vpack.c.bf16 %v8430_v44, %v8428_v51  ;;  %v14384_v27 = vld [vmem:[%s18511_s5 + $0xa8] sm:$0xff]   ;;  %v14385_v44 = vld [vmem:[%s18511_s5 + $0xf0] sm:$0xff]  }
 0x6a1   : > { %8565 = vmatprep.subr.bf16.mxu1 %v8462_v25 }
 0x6a2   : > { %8566 = vmatpush1.bf16.msra.mxu1 %v8461_v0 }
 0x6a3   : > { %13205 = vmatprep.subr.bf16.mxu1 %v14357_v49 }
 0x6a5   : > { %8568 = vmatmul.mubr.bf16.vlgmr.msra.gmra.mrb[24].mxu1 %v14339_v16 }
 0x6a6   : > { %8577 = vmatprep.mubr.bf16.mxu1 %v14344_v46  ;;  %13206 = vmatpush3.bf16.msra.mxu1 %v14358_v22  ;;  %v14386_v46 = vld [vmem:[%s18511_s5 + $0xb0] sm:$0xff]  }
 0x6a7   : > { %13207 = vmatprep.subr.bf16.mxu1 %v14359_v41  ;;  %v14387_v41 = vld [vmem:[%s18511_s5 + $0xf8] sm:$0xff]  }
 0x6aa   : > { %13208 = vmatpush3.bf16.msra.mxu1 %v14360_v20  ;;  %v14388_v20 = vld [vmem:[%s18511_s5 + $0xb8] sm:$0xff]  }
 0x6ab   : > { %13209 = vmatprep.subr.bf16.mxu1 %v14361_v59 }
 0x6ad   : > { %8578 = vmatmul.mubr.bf16.gmra.mrb[28].mxu1 %v14342_v29  ;;  %v14389_v29 = vld [vmem:[%s18511_s5 + $0x140] sm:$0xff]  }
 0x6ae   : > { %8587 = vmatprep.mubr.bf16.mxu1 %v14347_v9  ;;  %13210 = vmatpush3.bf16.msra.mxu1 %v14362_v2 }
 0x6af   : > { %13211 = vmatprep.subr.bf16.mxu1 %v14363_v38 }
 0x6b2   : > { %13212 = vmatpush3.bf16.msra.mxu1 %v14364_v1 }
 0x6b3   : > { %13213 = vmatprep.subr.bf16.mxu1 %v14365_v60  ;;  %v14390_v60 = vld [vmem:[%s18511_s5 + $0x100] sm:$0xff]  }
 0x6b5   : > { %8588 = vmatmul.mubr.bf16.gmra.mrb[32].mxu1 %v14345_v42 }
 0x6b6   : > { %8597 = vmatprep.mubr.bf16.mxu1 %v14350_v35  ;;  %13214 = vmatpush3.bf16.msra.mxu1 %v14366_v62  ;;  %v14391_v35 = vld [vmem:[%s18511_s5 + $0x148] sm:$0xff]  }
 0x6b7   : > { %13215 = vmatprep.subr.bf16.mxu1 %v14367_v37  ;;  %v14392_v62 = vld [vmem:[%s18511_s5 + $0x108] sm:$0xff]  }
 0x6ba   : > { %13216 = vmatpush3.bf16.msra.mxu1 %v14368_v48  ;;  %v14393_v48 = vld [vmem:[%s18511_s5 + $0x150] sm:$0xff]  }
 0x6bb   : > { %13217 = vmatprep.subr.bf16.mxu1 %v14369_v52 }
 0x6bd   : > { %8598 = vmatmul.mubr.bf16.gmra.mrb[36].mxu1 %v14348_v43 }
 0x6be   : > { %8607 = vmatprep.mubr.bf16.mxu1 %v14353_v55  ;;  %13218 = vmatpush3.bf16.msra.mxu1 %v14370_v32 }
 0x6bf   : > { %13219 = vmatprep.subr.bf16.mxu1 %v14371_v45  ;;  %v14396_v45 = vld [vmem:[%s18511_s5 + $0x118] sm:$0xff]  }
 0x6c2   : > { %13220 = vmatpush3.bf16.msra.mxu1 %v14372_v36  ;;  %v14397_v36 = vld [vmem:[%s18511_s5 + $0x160] sm:$0xff]  }
 0x6c3   : > { %13233 = vmatprep.subr.bf16.mxu1 %v14373_v3  ;;  %v14398_v3 = vld [vmem:[%s18511_s5 + $0x120] sm:$0xff]  }
 0x6c5   : > { %8608 = vmatmul.mubr.bf16.gmra.mrb[40].mxu1 %v14351_v24  ;;  %v14394_v24 = vld [vmem:[%s18511_s5 + $0x110] sm:$0xff]  }
 0x6c6   : > { %8617 = vmatprep.mubr.bf16.mxu1 %v14356_v23 }
 0x6cd   : > { %8618 = vmatmul.mubr.bf16.gmra.mrb[44].mxu1 %v14354_v50  ;;  %v14395_v50 = vld [vmem:[%s18511_s5 + $0x158] sm:$0xff]  }
 0x778   : > { %v8569_v5 = vpop.f32.mrb[24].mxu1 }
 0x779   : > { %v8571_v10 = vpop.f32.mrb[25].mxu1 }
 0x77a   : > { %v8573_v63 = vpop.f32.mrb[26].mxu1 }
 0x77b   : > { %v8628_v54 = vpack.c.bf16 %v8573_v63, %v8569_v5  ;;  %v8575_v34 = vpop.f32.mrb[27].mxu1  ;;  %v14399_v5 = vld [vmem:[%s18511_s5 + $0x168] sm:$0xff]   ;;  %v14401_v63 = vld [vmem:[%s18511_s5 + $0x170] sm:$0xff]  }
 0x77c   : > { %v8629_v7 = vpack.c.bf16 %v8575_v34, %v8571_v10  ;;  %v14400_v10 = vld [vmem:[%s18511_s5 + $0x128] sm:$0xff]   ;;  %v14403_v34 = vld [vmem:[%s18511_s5 + $0x178] sm:$0xff]  }
 0x77e   : > { %8801 = vmatprep.mubr.bf16.mxu1 %v8629_v7  ;;  %v14404_v7 = vld [vmem:[%s18511_s5 + $0x138] sm:$0xff]  }
 0x77f   : > { %8802 = vmatmul.mubr.bf16.vlgmr.msra.gmra.mrb[48].mxu1 %v8628_v54  ;;  %v14402_v54 = vld [vmem:[%s18511_s5 + $0x130] sm:$0xff]  }
 0x780   : > { %13234 = vmatpush3.bf16.msra.mxu1 %v14374_v58  ;;  %v8579_v19 = vpop.f32.mrb[28].mxu1  ;;  %v14405_v58 = vld [vmem:[%s18514_s8] ss:$48 sps:$4 sm:$0xff]  }
 0x781   : > { %13235 = vmatprep.subr.bf16.mxu1 %v14375_v6  ;;  %v8581_v8 = vpop.f32.mrb[29].mxu1  ;;  %v14407_v6 = vld [vmem:[%s18514_s8 + $0x4] ss:$48 sps:$4 sm:$0xff]  }
 0x782   : > { %v8583_v26 = vpop.f32.mrb[30].mxu1 }
 0x783   : > { %v8630_v61 = vpack.c.bf16 %v8583_v26, %v8579_v19  ;;  %v8585_v30 = vpop.f32.mrb[31].mxu1  ;;  %v14410_v19 = vld [vmem:[%s18514_s8 + $0x64] ss:$48 sps:$4 sm:$0xff]  }
 0x784   : > { %13236 = vmatpush3.bf16.msra.mxu1 %v14376_v33  ;;  %v8631_v39 = vpack.c.bf16 %v8585_v30, %v8581_v8  ;;  %v14408_v33 = vld [vmem:[%s18514_s8 + $0x60] ss:$48 sps:$4 sm:$0xff]   ;;  %v14416_v26 = vld [vmem:[%s18514_s8 + $0x124] ss:$48 sps:$4 sm:$0xff]   ;;  %v14419_v30 = vld [vmem:[%s18514_s8 + $0xc] ss:$48 sps:$4 sm:$0xff]  }
 0x785   : > { %13237 = vmatprep.subr.bf16.mxu1 %v14377_v40  ;;  %v14413_v40 = vld [vmem:[%s18514_s8 + $0xc4] ss:$48 sps:$4 sm:$0xff]   ;;  %v14411_v8 = vld [vmem:[%s18514_s8 + $0xc0] ss:$48 sps:$4 sm:$0xff]  }
 0x786   : > { %8809 = vmatprep.mubr.bf16.mxu1 %v8631_v39 }
 0x787   : > { %8810 = vmatmul.mubr.bf16.gmra.mrb[52].mxu1 %v8630_v61  ;;  %v14414_v61 = vld [vmem:[%s18514_s8 + $0x120] ss:$48 sps:$4 sm:$0xff]  }
 0x788   : > { %13238 = vmatpush3.bf16.msra.mxu1 %v14378_v12  ;;  %v8589_v47 = vpop.f32.mrb[32].mxu1  ;;  %v14662_v12 = vmov 0  }
 0x789   : > { %13239 = vmatprep.subr.bf16.mxu1 %v14379_v14  ;;  %v8591_v13 = vpop.f32.mrb[33].mxu1 }
 0x78a   : > { %v8593_v15 = vpop.f32.mrb[34].mxu1 }
 0x78b   : > { %v8632_v18 = vpack.c.bf16 %v8593_v15, %v8589_v47  ;;  %v8595_v53 = vpop.f32.mrb[35].mxu1 }
 0x78c   : > { %13240 = vmatpush3.bf16.msra.mxu1 %v14380_v11  ;;  %v8633_v17 = vpack.c.bf16 %v8595_v53, %v8591_v13 }
 0x78d   : > { %13241 = vmatprep.subr.bf16.mxu1 %v14381_v56 }
 0x78e   : > { %8989 = vmatprep.mubr.bf16.mxu1 %v8633_v17 }
 0x790   : > { %13242 = vmatpush3.bf16.msra.mxu1 %v14382_v57  ;;  %v8599_v51 = vpop.f32.mrb[36].mxu1 }
 0x791   : > { %13243 = vmatprep.subr.bf16.mxu1 %v14383_v31  ;;  %v8601_v0 = vpop.f32.mrb[37].mxu1 }
 0x792   : > { %v8603_v25 = vpop.f32.mrb[38].mxu1 }
 0x793   : > { %v8634_v49 = vpack.c.bf16 %v8603_v25, %v8599_v51  ;;  %v8605_v16 = vpop.f32.mrb[39].mxu1 }
 0x794   : > { %13244 = vmatpush3.bf16.msra.mxu1 %v14384_v27  ;;  %v8635_v22 = vpack.c.bf16 %v8605_v16, %v8601_v0  ;;  %v11919_v27 = vld [vmem:[%s18512_s6] ss:$0 sm:$0xff] }
 0x795   : > { %13245 = vmatprep.subr.bf16.mxu1 %v14385_v44 }
 0x798   : > { %13246 = vmatpush3.bf16.msra.mxu1 %v14386_v46  ;;  %v8609_v59 = vpop.f32.mrb[40].mxu1 }
 0x799   : > { %13247 = vmatprep.subr.bf16.mxu1 %v14387_v41  ;;  %v8611_v9 = vpop.f32.mrb[41].mxu1 }
 0x79a   : > { %v8613_v2 = vpop.f32.mrb[42].mxu1 }
 0x79b   : > { %v8636_v38 = vpack.c.bf16 %v8613_v2, %v8609_v59  ;;  %v8615_v1 = vpop.f32.mrb[43].mxu1 }
 0x79c   : > { %13248 = vmatpush3.bf16.msra.mxu1 %v14388_v20  ;;  %v8637_v42 = vpack.c.bf16 %v8615_v1, %v8611_v9 }
 0x79d   : > { %13261 = vmatprep.subr.bf16.mxu1 %v14389_v29 }
 0x79f   : > { %8990 = vmatmul.mubr.bf16.vlgmr.msra.gmra.mrb[56].mxu1 %v8632_v18 }
 0x7a0   : > { %13262 = vmatpush3.bf16.msra.mxu1 %v14390_v60  ;;  %8997 = vmatprep.mubr.bf16.mxu1 %v8635_v22  ;;  %v8619_v37 = vpop.f32.mrb[44].mxu1 }
 0x7a1   : > { %13263 = vmatprep.subr.bf16.mxu1 %v14391_v35  ;;  %v8621_v52 = vpop.f32.mrb[45].mxu1 }
 0x7a2   : > { %v8623_v43 = vpop.f32.mrb[46].mxu1 }
 0x7a3   : > { %v8638_v55 = vpack.c.bf16 %v8623_v43, %v8619_v37  ;;  %v8625_v32 = vpop.f32.mrb[47].mxu1 }
 0x7a4   : > { %13264 = vmatpush3.bf16.msra.mxu1 %v14392_v62  ;;  %v8639_v23 = vpack.c.bf16 %v8625_v32, %v8621_v52 }
 0x7a5   : > { %13265 = vmatprep.subr.bf16.mxu1 %v14393_v48 }
 0x7a7   : > { %8998 = vmatmul.mubr.bf16.gmra.mrb[60].mxu1 %v8634_v49 }
 0x7a8   : > { %13266 = vmatpush3.bf16.msra.mxu1 %v14394_v24  ;;  %9171 = vmatprep.mubr.bf16.mxu1 %v8637_v42 }
 0x7a9   : > { %13267 = vmatprep.subr.bf16.mxu1 %v14395_v50 }
 0x7ac   : > { %13268 = vmatpush3.bf16.msra.mxu1 %v14396_v45 }
 0x7ad   : > { %13269 = vmatprep.subr.bf16.mxu1 %v14397_v36 }
 0x7b0   : > { %13270 = vmatpush3.bf16.msra.mxu1 %v14398_v3 }
 0x7b1   : > { %13271 = vmatprep.subr.bf16.mxu1 %v14399_v5  ;;  %v14417_v5 = vld [vmem:[%s18514_s8 + $0x8] ss:$48 sps:$4 sm:$0xff]  }
 0x7b4   : > { %13272 = vmatpush3.bf16.msra.mxu1 %v14400_v10 }
 0x7b5   : > { %13273 = vmatprep.subr.bf16.mxu1 %v14401_v63 }
 0x7b8   : > { %13274 = vmatpush3.bf16.msra.mxu1 %v14402_v54 }
 0x7b9   : > { %13275 = vmatprep.subr.bf16.mxu1 %v14403_v34  ;;  %v14422_v34 = vld [vmem:[%s18514_s8 + $0x6c] ss:$48 sps:$4 sm:$0xff]  }
 0x7bc   : > { %13276 = vmatpush3.bf16.msra.mxu1 %v14404_v7 }
 0x7bd   : > { %9557 = vmatprep.subr.bf16.mxu1 %v14407_v6 }
 0x7bf   : > { %9172 = vmatmul.mubr.bf16.vlgmr.msra.gmra.mrb[64].mxu1 %v8636_v38 }
 0x7c0   : > { %9179 = vmatprep.mubr.bf16.mxu1 %v8639_v23  ;;  %9558 = vmatpush1.bf16.msra.mxu1 %v14405_v58 }
 0x7c1   : > { %9559 = vmatprep.subr.bf16.mxu1 %v14410_v19 }
 0x7c4   : > { %9560 = vmatpush1.bf16.msra.mxu1 %v14408_v33  ;;  %v14420_v33 = vld [vmem:[%s18514_s8 + $0x68] ss:$48 sps:$4 sm:$0xff]  }
 0x7c5   : > { %9561 = vmatprep.subr.bf16.mxu1 %v14413_v40  ;;  %v14425_v40 = vld [vmem:[%s18514_s8 + $0xcc] ss:$48 sps:$4 sm:$0xff]  }
 0x7c7   : > { %9180 = vmatmul.mubr.bf16.gmra.mrb[68].mxu1 %v8638_v55 }
 0x7c8   : > { %9562 = vmatpush1.bf16.msra.mxu1 %v14411_v8  ;;  %9589 = vmatprep.mubr.bf16.mxu1 %v14662_v12 }
 0x7c9   : > { %9563 = vmatprep.subr.bf16.mxu1 %v14416_v26 }
 0x7cc   : > { %9564 = vmatpush1.bf16.msra.mxu1 %v14414_v61  ;;  %v14423_v61 = vld [vmem:[%s18514_s8 + $0xc8] ss:$48 sps:$4 sm:$0xff]  }
 0x7cd   : > { %9610 = vmatprep.subr.bf16.mxu1 %v14419_v30 }
 0x852   : > { %v13221_v39 = vpop.f32.mrb[48].mxu1 }
 0x853   : > { %v13222_v14 = vpop.f32.mrb[49].mxu1 }
 0x854   : > { %v13223_v11 = vadd.f32 %v13222_v14, %v13221_v39  ;;  %v13224_v47 = vpop.f32.mrb[50].mxu1  ;;  %v14428_v39 = vld [vmem:[%s18514_s8 + $0x12c] ss:$48 sps:$4 sm:$0xff]   ;;  %v14426_v14 = vld [vmem:[%s18514_s8 + $0x128] ss:$48 sps:$4 sm:$0xff]  }
 0x855   : > { %v13225_v56 = vpop.f32.mrb[51].mxu1 }
 0x856   : > { %v13226_v13 = vadd.f32 %v13225_v56, %v13224_v47  ;;  %v8824_v0 = vadd.f32 %v13223_v11, %v11919_v27  ;;  %v14431_v11 = vld [vmem:[%s18514_s8 + $0x14] ss:$48 sps:$4 sm:$0xff]   ;;  %v14429_v47 = vld [vmem:[%s18514_s8 + $0x10] ss:$48 sps:$4 sm:$0xff]  }
 0x857   : > { %v14434_v56 = vld [vmem:[%s18514_s8 + $0x74] ss:$48 sps:$4 sm:$0xff]  }
 0x858   : > { %v8825_v46 = vadd.f32 %v13226_v13, %v11919_v27  ;;  %v14432_v13 = vld [vmem:[%s18514_s8 + $0x70] ss:$48 sps:$4 sm:$0xff]  }
 0x85a   : > { %v13227_v15 = vpop.f32.mrb[52].mxu1 }
 0x85b   : > { %v13228_v18 = vpop.f32.mrb[53].mxu1 }
 0x85c   : > { %v13229_v53 = vadd.f32 %v13228_v18, %v13227_v15  ;;  %v13230_v57 = vpop.f32.mrb[54].mxu1  ;;  %v14437_v15 = vld [vmem:[%s18514_s8 + $0xd4] ss:$48 sps:$4 sm:$0xff]   ;;  %v14435_v18 = vld [vmem:[%s18514_s8 + $0xd0] ss:$48 sps:$4 sm:$0xff]  }
 0x85d   : > { %v13231_v17 = vpop.f32.mrb[55].mxu1 }
 0x85e   : > { %v13232_v31 = vadd.f32 %v13231_v17, %v13230_v57  ;;  %v8826_v9 = vadd.f32 %v13229_v53, %v11919_v27  ;;  %v14440_v53 = vld [vmem:[%s18514_s8 + $0x134] ss:$48 sps:$4 sm:$0xff]   ;;  %v14438_v57 = vld [vmem:[%s18514_s8 + $0x130] ss:$48 sps:$4 sm:$0xff]   ;;  %v14443_v17 = vld [vmem:[%s18514_s8 + $0x1c] ss:$48 sps:$4 sm:$0xff]  }
 0x860   : > { %v8827_v60 = vadd.f32 %v13232_v31, %v11919_v27  ;;  %v14441_v31 = vld [vmem:[%s18514_s8 + $0x18] ss:$48 sps:$4 sm:$0xff]   ;;  %v14446_v27 = vld [vmem:[%s18514_s8 + $0x7c] ss:$48 sps:$4 sm:$0xff]  }
 0x872   : > { %v13249_v51 = vpop.f32.mrb[56].mxu1 }
 0x873   : > { %v13250_v44 = vpop.f32.mrb[57].mxu1 }
 0x874   : > { %v13251_v25 = vadd.f32 %v13250_v44, %v13249_v51  ;;  %v13252_v49 = vpop.f32.mrb[58].mxu1  ;;  %v14444_v51 = vld [vmem:[%s18514_s8 + $0x78] ss:$48 sps:$4 sm:$0xff]   ;;  %v14449_v44 = vld [vmem:[%s18514_s8 + $0xdc] ss:$48 sps:$4 sm:$0xff]  }
 0x875   : > { %v13253_v16 = vpop.f32.mrb[59].mxu1 }
 0x876   : > { %v9006_v22 = vadd.f32 %v13251_v25, %v8824_v0  ;;  %v13254_v41 = vadd.f32 %v13253_v16, %v13252_v49  ;;  %v14447_v0 = vld [vmem:[%s18514_s8 + $0xd8] ss:$48 sps:$4 sm:$0xff]   ;;  %v14452_v25 = vld [vmem:[%s18514_s8 + $0x13c] ss:$48 sps:$4 sm:$0xff]   ;;  %v14455_v16 = vld [vmem:[%s18514_s8 + $0x24] ss:$48 sps:$4 sm:$0xff]  }
 0x877   : > { %v14450_v49 = vld [vmem:[%s18514_s8 + $0x138] ss:$48 sps:$4 sm:$0xff]  }
 0x878   : > { %v9007_v20 = vadd.f32 %v13254_v41, %v8825_v46  ;;  %v14453_v46 = vld [vmem:[%s18514_s8 + $0x20] ss:$48 sps:$4 sm:$0xff]  }
 0x879   : > { %v14456_v41 = vld [vmem:[%s18514_s8 + $0x80] ss:$48 sps:$4 sm:$0xff]  }
 0x87a   : > { %v13255_v59 = vpop.f32.mrb[60].mxu1 }
 0x87b   : > { %v13256_v29 = vpop.f32.mrb[61].mxu1 }
 0x87c   : > { %v13257_v2 = vadd.f32 %v13256_v29, %v13255_v59  ;;  %v13258_v38 = vpop.f32.mrb[62].mxu1  ;;  %v14459_v59 = vld [vmem:[%s18514_s8 + $0xe0] ss:$48 sps:$4 sm:$0xff]   ;;  %v14464_v29 = vld [vmem:[%s18514_s8 + $0x144] ss:$48 sps:$4 sm:$0xff]  }
 0x87d   : > { %v13259_v1 = vpop.f32.mrb[63].mxu1 }
 0x87e   : > { %v9008_v42 = vadd.f32 %v13257_v2, %v8826_v9  ;;  %v13260_v35 = vadd.f32 %v13259_v1, %v13258_v38  ;;  %v14462_v9 = vld [vmem:[%s18514_s8 + $0x140] ss:$48 sps:$4 sm:$0xff]   ;;  %v14467_v2 = vld [vmem:[%s18514_s8 + $0x2c] ss:$48 sps:$4 sm:$0xff]   ;;  %v14465_v38 = vld [vmem:[%s18514_s8 + $0x28] ss:$48 sps:$4 sm:$0xff]  }
 0x87f   : > { %v14470_v1 = vld [vmem:[%s18514_s8 + $0x8c] ss:$48 sps:$4 sm:$0xff]  }
 0x880   : > { %v9009_v62 = vadd.f32 %v13260_v35, %v8827_v60  ;;  %v14468_v60 = vld [vmem:[%s18514_s8 + $0x88] ss:$48 sps:$4 sm:$0xff]  }
 0x881   : > { %v14471_v35 = vld [vmem:[%s18514_s8 + $0xe8] ss:$48 sps:$4 sm:$0xff]  }
 0x892   : > { %v13277_v37 = vpop.f32.mrb[64].mxu1 }
 0x893   : > { %v13278_v48 = vpop.f32.mrb[65].mxu1 }
 0x894   : > { %v13279_v52 = vadd.f32 %v13278_v48, %v13277_v37  ;;  %v13280_v43 = vpop.f32.mrb[66].mxu1  ;;  %v14474_v37 = vld [vmem:[%s18514_s8 + $0x148] ss:$48 sps:$4 sm:$0xff]   ;;  %v14477_v48 = vld [vmem:[%s18516_s10 + $0x40] sm:$0xff]  }
 0x895   : > { %v13281_v55 = vpop.f32.mrb[67].mxu1 }
 0x896   : > { %v9188_v32 = vadd.f32 %v13279_v52, %v9006_v22  ;;  %v13282_v24 = vadd.f32 %v13281_v55, %v13280_v43  ;;  %v14458_v22 = vld [vmem:[%s18514_s8 + $0x84] ss:$48 sps:$4 sm:$0xff]   ;;  %v14479_v43 = vld [vmem:[%s18516_s10 + $0x48] sm:$0xff]  }
 0x897   : > { %v14478_v52 = vld [vmem:[%s18516_s10] sm:$0xff]   ;;  %v14480_v55 = vld [vmem:[%s18516_s10 + $0x8] sm:$0xff]  }
 0x898   : > { %v9189_v23 = vadd.f32 %v13282_v24, %v9007_v20  ;;  %v9192_v50 = vmax.f32 %v9188_v32, 0.0  ;;  %v14461_v20 = vld [vmem:[%s18514_s8 + $0xe4] ss:$48 sps:$4 sm:$0xff]  }
 0x899   : > { %v14481_v32 = vld [vmem:[%s18516_s10 + $0x50] sm:$0xff]  }
 0x89a   : > { %v9193_v45 = vmax.f32 %v9189_v23, 0.0  ;;  %v13283_v36 = vpop.f32.mrb[68].mxu1  ;;  %v14482_v24 = vld [vmem:[%s18516_s10 + $0x10] sm:$0xff]   ;;  %v14484_v23 = vld [vmem:[%s18516_s10 + $0x18] sm:$0xff]  }
 0x89b   : > { %v13284_v3 = vpop.f32.mrb[69].mxu1 }
 0x89c   : > { %v17945_v10 = vpack.c.bf16 %v9193_v45, %v9192_v50  ;;  %v13285_v63 = vadd.f32 %v13284_v3, %v13283_v36  ;;  %v13286_v54 = vpop.f32.mrb[70].mxu1  ;;  %v14485_v50 = vld [vmem:[%s18516_s10 + $0x60] sm:$0xff]   ;;  %v14487_v36 = vld [vmem:[%s18516_s10 + $0x68] sm:$0xff]  }
 0x89d   : > { %v13287_v7 = vpop.f32.mrb[71].mxu1  ;;  %v14486_v45 = vld [vmem:[%s18516_s10 + $0x20] sm:$0xff]   ;;  %v14488_v3 = vld [vmem:[%s18516_s10 + $0x28] sm:$0xff]  }
 0x89e   : > { %v9190_v58 = vadd.f32 %v13285_v63, %v9008_v42  ;;  %v13288_v6 = vadd.f32 %v13287_v7, %v13286_v54  ;;  %12064 = vmatmul.mubr.msk.bf16.vlgmr.msra.gmra.mrb[72].mxu1 %vm9550_vm7, %v17945_v10  ;;  %v14473_v42 = vld [vmem:[%s18514_s8 + $0xec] ss:$48 sps:$4 sm:$0xff]   ;;  %v18152_v7 = vld [vmem:[%s18515_s9] sm:$0xff] }
 0x89f   : > { %9611 = vmatpush1.bf16.msra.mxu1 %v14417_v5  ;;  %9599 = vmatprep.mubr.bf16.mxu1 %v14662_v12  ;;  %v14489_v5 = vld [vmem:[%s18516_s10 + $0x70] sm:$0xff]   ;;  %v14491_v63 = vld [vmem:[%s18516_s10 + $0x78] sm:$0xff]  }
 0x8a0   : > { %v9191_v19 = vadd.f32 %v13288_v6, %v9009_v62  ;;  %9612 = vmatprep.subr.bf16.mxu1 %v14422_v34  ;;  %v9194_v8 = vmax.f32 %v9190_v58, 0.0  ;;  %v14476_v62 = vld [vmem:[%s18514_s8 + $0x14c] ss:$48 sps:$4 sm:$0xff]   ;;  %v14493_v34 = vld [vmem:[%s18516_s10 + $0xc0] sm:$0xff]   ;;  %v9253_v58 = vrot.slane %v18152_v7, %v17653_v4  ;;  %v9257_v6 = vrot.slane %v18152_v7, %v17659_v28 }
 0x8a1   : > { %v14492_v54 = vld [vmem:[%s18516_s10 + $0x38] sm:$0xff]  }
 0x8a2   : > { %v9195_v26 = vmax.f32 %v9191_v19, 0.0 }
 0x8a3   : > { %9613 = vmatpush1.bf16.msra.mxu1 %v14420_v33 }
 0x8a4   : > { %v17962_v30 = vpack.c.bf16 %v9195_v26, %v9194_v8  ;;  %9614 = vmatprep.subr.bf16.mxu1 %v14425_v40 }
 0x8a6   : > { %12065 = vmatmul.mubr.msk.bf16.gmra.mrb[76].mxu1 %vm9550_vm7, %v17962_v30 }
 0x8a7   : > { %9615 = vmatpush1.bf16.msra.mxu1 %v14423_v61  ;;  %9642 = vmatprep.mubr.bf16.mxu1 %v14662_v12 }
 0x8a8   : > { %9616 = vmatprep.subr.bf16.mxu1 %v14428_v39 }
 0x8ab   : > { %9617 = vmatpush1.bf16.msra.mxu1 %v14426_v14 }
 0x8ac   : > { %9663 = vmatprep.subr.bf16.mxu1 %v14431_v11 }
 0x8ae   : > { %12066 = vmatmul.mubr.msk.bf16.vlgmr.msra.gmra.mrb[80].mxu1 %vm9550_vm7, %v17945_v10 }
 0x8af   : > { %9664 = vmatpush1.bf16.msra.mxu1 %v14429_v47  ;;  %9652 = vmatprep.mubr.bf16.mxu1 %v14662_v12 }
 0x8b0   : > { %9665 = vmatprep.subr.bf16.mxu1 %v14434_v56 }
 0x8b3   : > { %9666 = vmatpush1.bf16.msra.mxu1 %v14432_v13 }
 0x8b4   : > { %9667 = vmatprep.subr.bf16.mxu1 %v14437_v15 }
 0x8b6   : > { %12067 = vmatmul.mubr.msk.bf16.gmra.mrb[84].mxu1 %vm9550_vm7, %v17962_v30 }
 0x8b7   : > { %9668 = vmatpush1.bf16.msra.mxu1 %v14435_v18  ;;  %9695 = vmatprep.mubr.bf16.mxu1 %v14662_v12 }
 0x8b8   : > { %9669 = vmatprep.subr.bf16.mxu1 %v14440_v53  ;;  %v14494_v53 = vld [vmem:[%s18516_s10 + $0x80] sm:$0xff]  }
 0x8bb   : > { %9670 = vmatpush1.bf16.msra.mxu1 %v14438_v57 }
 0x8bc   : > { %9716 = vmatprep.subr.bf16.mxu1 %v14443_v17 }
 0x8be   : > { %12068 = vmatmul.mubr.msk.bf16.vlgmr.msra.gmra.mrb[88].mxu1 %vm9550_vm7, %v17945_v10 }
 0x8bf   : > { %9717 = vmatpush1.bf16.msra.mxu1 %v14441_v31  ;;  %9705 = vmatprep.mubr.bf16.mxu1 %v14662_v12  ;;  %v14495_v31 = vld [vmem:[%s18516_s10 + $0xc8] sm:$0xff]  }
 0x8c0   : > { %9718 = vmatprep.subr.bf16.mxu1 %v14446_v27  ;;  %v9260_v27 = vsub.s32 2, %v17650_v21 }
 0x8c3   : > { %9719 = vmatpush1.bf16.msra.mxu1 %v14444_v51 }
 0x8c4   : > { %9720 = vmatprep.subr.bf16.mxu1 %v14449_v44 }
 0x8c6   : > { %12069 = vmatmul.mubr.msk.bf16.gmra.mrb[92].mxu1 %vm9550_vm7, %v17962_v30 }
 0x8c7   : > { %9721 = vmatpush1.bf16.msra.mxu1 %v14447_v0  ;;  %9748 = vmatprep.mubr.bf16.mxu1 %v14662_v12  ;;  %v9264_v0 = vsub.s32 3, %v17650_v21 }
 0x8c8   : > { %9722 = vmatprep.subr.bf16.mxu1 %v14452_v25 }
 0x8cb   : > { %9723 = vmatpush1.bf16.msra.mxu1 %v14450_v49 }
 0x8cc   : > { %9769 = vmatprep.subr.bf16.mxu1 %v14455_v16 }
 0x8ce   : > { %12070 = vmatmul.mubr.msk.bf16.vlgmr.msra.gmra.mrb[96].mxu1 %vm9550_vm7, %v17945_v10 }
 0x8cf   : > { %9770 = vmatpush1.bf16.msra.mxu1 %v14453_v46  ;;  %9758 = vmatprep.mubr.bf16.mxu1 %v14662_v12  ;;  %v14496_v46 = vld [vmem:[%s18516_s10 + $0x88] sm:$0xff]  }
 0x8d0   : > { %9771 = vmatprep.subr.bf16.mxu1 %v14458_v22 }
 0x8d3   : > { %9772 = vmatpush1.bf16.msra.mxu1 %v14456_v41 }
 0x8d4   : > { %9773 = vmatprep.subr.bf16.mxu1 %v14461_v20  ;;  %v9261_v20 = vrot.slane %v18152_v7, %v9260_v27 }
 0x8d6   : > { %12071 = vmatmul.mubr.msk.bf16.gmra.mrb[100].mxu1 %vm9550_vm7, %v17962_v30 }
 0x8d7   : > { %9774 = vmatpush1.bf16.msra.mxu1 %v14459_v59  ;;  %9801 = vmatprep.mubr.bf16.mxu1 %v14662_v12  ;;  %v14497_v59 = vld [vmem:[%s18516_s10 + $0xd0] sm:$0xff]  }
 0x8d8   : > { %9775 = vmatprep.subr.bf16.mxu1 %v14464_v29 }
 0x8db   : > { %9776 = vmatpush1.bf16.msra.mxu1 %v14462_v9 }
 0x8dc   : > { %9822 = vmatprep.subr.bf16.mxu1 %v14467_v2  ;;  %v9265_v2 = vrot.slane %v18152_v7, %v9264_v0 }
 0x8de   : > { %12072 = vmatmul.mubr.msk.bf16.vlgmr.msra.gmra.mrb[104].mxu1 %vm9550_vm7, %v17945_v10 }
 0x8df   : > { %9823 = vmatpush1.bf16.msra.mxu1 %v14465_v38  ;;  %9811 = vmatprep.mubr.bf16.mxu1 %v14662_v12 }
 0x8e0   : > { %9824 = vmatprep.subr.bf16.mxu1 %v14470_v1 }
 0x8e3   : > { %9825 = vmatpush1.bf16.msra.mxu1 %v14468_v60 }
 0x8e4   : > { %9826 = vmatprep.subr.bf16.mxu1 %v14473_v42  ;;  %v14498_v42 = vld [vmem:[%s18516_s10 + $0x90] sm:$0xff]  }
 0x8e6   : > { %12073 = vmatmul.mubr.msk.bf16.gmra.mrb[108].mxu1 %vm9550_vm7, %v17962_v30 }
 0x8e7   : > { %9827 = vmatpush1.bf16.msra.mxu1 %v14471_v35  ;;  %9854 = vmatprep.mubr.bf16.mxu1 %v14662_v12 }
 0x8e8   : > { %9828 = vmatprep.subr.bf16.mxu1 %v14476_v62 }
 0x8eb   : > { %9829 = vmatpush1.bf16.msra.mxu1 %v14474_v37  ;;  %v14499_v37 = vld [vmem:[%s18516_s10 + $0xd8] sm:$0xff]  }
 0x8ec   : > { %13289 = vmatprep.subr.bf16.mxu1 %v14477_v48 }
 0x8ee   : > { %12074 = vmatmul.mubr.msk.bf16.vlgmr.msra.gmra.mrb[112].mxu1 %vm9550_vm7, %v17945_v10  ;;  %v14490_v10 = vld [vmem:[%s18516_s10 + $0x30] sm:$0xff]  }
 0x8ef   : > { %9864 = vmatprep.mubr.bf16.mxu1 %v14662_v12  ;;  %13290 = vmatpush3.bf16.msra.mxu1 %v14478_v52  ;;  %v14483_v12 = vld [vmem:[%s18516_s10 + $0x58] sm:$0xff]  }
 0x8f0   : > { %13291 = vmatprep.subr.bf16.mxu1 %v14479_v43 }
 0x8f3   : > { %13292 = vmatpush3.bf16.msra.mxu1 %v14480_v55 }
 0x8f4   : > { %13293 = vmatprep.subr.bf16.mxu1 %v14481_v32 }
 0x8f6   : > { %12075 = vmatmul.mubr.msk.bf16.gmra.mrb[116].mxu1 %vm9550_vm7, %v17962_v30 }
 0x8f7   : > { %13294 = vmatpush3.bf16.msra.mxu1 %v14482_v24  ;;  %v14500_v24 = vld [vmem:[%s18516_s10 + $0x98] sm:$0xff]  }
 0x8f8   : > { %13295 = vmatprep.subr.bf16.mxu1 %v14483_v12 }
 0x8fb   : > { %13296 = vmatpush3.bf16.msra.mxu1 %v14484_v23 }
 0x8fc   : > { %13297 = vmatprep.subr.bf16.mxu1 %v14485_v50  ;;  %v14501_v50 = vld [vmem:[%s18516_s10 + $0xe0] sm:$0xff]  }
 0x8ff   : > { %13298 = vmatpush3.bf16.msra.mxu1 %v14486_v45 }
 0x900   : > { %13299 = vmatprep.subr.bf16.mxu1 %v14487_v36 }
 0x903   : > { %13300 = vmatpush3.bf16.msra.mxu1 %v14488_v3 }
 0x904   : > { %13301 = vmatprep.subr.bf16.mxu1 %v14489_v5 }
 0x907   : > { %13302 = vmatpush3.bf16.msra.mxu1 %v14490_v10 }
 0x908   : > { %13303 = vmatprep.subr.bf16.mxu1 %v14491_v63  ;;  %v14502_v63 = vld [vmem:[%s18516_s10 + $0xa0] sm:$0xff]  }
 0x90b   : > { %13304 = vmatpush3.bf16.msra.mxu1 %v14492_v54 }
 0x90c   : > { %13317 = vmatprep.subr.bf16.mxu1 %v14493_v34 }
 0x971   : > { %v9591_v33 = vpop.f32.mrb[72].mxu1 }
 0x972   : > { %v9592_v19 = vadd.f32 %v9591_v33, %v9253_v58  ;;  %v9593_v40 = vpop.f32.mrb[73].mxu1 }
 0x973   : > { %v9594_v8 = vadd.f32 %v9593_v40, %v9257_v6  ;;  %v9595_v26 = vpop.f32.mrb[74].mxu1  ;;  %v9272_v40 = vsub.s32 5, %v17650_v21 }
 0x974   : > { %v9596_v61 = vadd.f32 %v9595_v26, %v9253_v58  ;;  %v9597_v30 = vpop.f32.mrb[75].mxu1  ;;  %v9875_v14 = vmax.f32 %v9592_v19, 0.0 }
 0x975   : > { %v9598_v39 = vadd.f32 %v9597_v30, %v9257_v6  ;;  %v9876_v47 = vmax.f32 %v9594_v8, 0.0  ;;  %v14504_v30 = vld [vmem:[%s18516_s10 + $0xa8] sm:$0xff]  }
 0x976   : > { %v9887_v11 = vmax.f32 %v9596_v61, 0.0 }
 0x977   : > { %v9888_v56 = vmax.f32 %v9598_v39, 0.0 }
 0x978   : > { %v9923_v13 = vpack.c.bf16 %v9887_v11, %v9875_v14 }
 0x979   : > { %v9924_v15 = vpack.c.bf16 %v9888_v56, %v9876_v47  ;;  %v9601_v18 = vpop.f32.mrb[76].mxu1  ;;  %v14505_v47 = vld [vmem:[%s18516_s10 + $0xf0] sm:$0xff]  }
 0x97a   : > { %v9602_v57 = vadd.f32 %v9601_v18, %v9253_v58  ;;  %v9603_v17 = vpop.f32.mrb[77].mxu1 }
 0x97b   : > { %v9604_v51 = vadd.f32 %v9603_v17, %v9257_v6  ;;  %v9605_v44 = vpop.f32.mrb[78].mxu1  ;;  %10242 = vmatprep.mubr.bf16.mxu1 %v9924_v15  ;;  %v9273_v15 = vrot.slane %v18152_v7, %v9272_v40  ;;  %v14506_v17 = vld [vmem:[%s18516_s10 + $0xb0] sm:$0xff]   ;;  %v14515_v40 = vld [vmem:[%s18516_s10 + $0x158] sm:$0xff]  }
 0x97c   : > { %v9606_v25 = vadd.f32 %v9605_v44, %v9253_v58  ;;  %v9607_v49 = vpop.f32.mrb[79].mxu1  ;;  %10243 = vmatmul.mubr.bf16.vlgmr.msra.gmra.mrb[120].mxu1 %v9923_v13  ;;  %v9899_v22 = vmax.f32 %v9602_v57, 0.0  ;;  %v14503_v58 = vld [vmem:[%s18516_s10 + $0xe8] sm:$0xff]   ;;  %v14507_v44 = vld [vmem:[%s18516_s10 + $0xf8] sm:$0xff]  }
 0x97d   : > { %v9608_v16 = vadd.f32 %v9607_v49, %v9257_v6  ;;  %13318 = vmatpush3.bf16.msra.mxu1 %v14494_v53  ;;  %v9900_v29 = vmax.f32 %v9604_v51, 0.0  ;;  %v9268_v6 = vsub.s32 4, %v17650_v21 }
 0x97e   : > { %v9911_v41 = vmax.f32 %v9606_v25, 0.0  ;;  %13319 = vmatprep.subr.bf16.mxu1 %v14495_v31 }
 0x97f   : > { %v9912_v9 = vmax.f32 %v9608_v16, 0.0  ;;  %v9269_v11 = vrot.slane %v18152_v7, %v9268_v6  ;;  %v14514_v6 = vld [vmem:[%s18516_s10 + $0x110] sm:$0xff]  }
 0x980   : > { %v9935_v38 = vpack.c.bf16 %v9911_v41, %v9899_v22  ;;  %v14508_v41 = vld [vmem:[%s18516_s10 + $0xb8] sm:$0xff]  }
 0x981   : > { %v9936_v1 = vpack.c.bf16 %v9912_v9, %v9900_v29  ;;  %13320 = vmatpush3.bf16.msra.mxu1 %v14496_v46  ;;  %v9644_v60 = vpop.f32.mrb[80].mxu1  ;;  %v14509_v29 = vld [vmem:[%s18516_s10 + $0x140] sm:$0xff]  }
 0x982   : > { %v9645_v35 = vadd.f32 %v9644_v60, %v9261_v20  ;;  %v9646_v62 = vpop.f32.mrb[81].mxu1  ;;  %13321 = vmatprep.subr.bf16.mxu1 %v14497_v59 }
 0x983   : > { %v9647_v48 = vadd.f32 %v9646_v62, %v9265_v2  ;;  %v9648_v52 = vpop.f32.mrb[82].mxu1  ;;  %10250 = vmatprep.mubr.bf16.mxu1 %v9936_v1 }
 0x984   : > { %v9649_v43 = vadd.f32 %v9648_v52, %v9261_v20  ;;  %v9650_v55 = vpop.f32.mrb[83].mxu1  ;;  %10251 = vmatmul.mubr.bf16.gmra.mrb[124].mxu1 %v9935_v38  ;;  %v9877_v12 = vmax.f32 %v9645_v35, 0.0 }
 0x985   : > { %v9651_v32 = vadd.f32 %v9650_v55, %v9265_v2  ;;  %13322 = vmatpush3.bf16.msra.mxu1 %v14498_v42  ;;  %v9878_v45 = vmax.f32 %v9647_v48, 0.0  ;;  %v14510_v42 = vld [vmem:[%s18516_s10 + $0x100] sm:$0xff]   ;;  %v9276_v48 = vsub.s32 6, %v17650_v21  ;;  %v9280_v55 = vsub.s32 7, %v17650_v21 }
 0x986   : > { %v9889_v23 = vmax.f32 %v9649_v43, 0.0  ;;  %13323 = vmatprep.subr.bf16.mxu1 %v14499_v37  ;;  %v14511_v37 = vld [vmem:[%s18516_s10 + $0x148] sm:$0xff]  }
 0x987   : > { %v9890_v36 = vmax.f32 %v9651_v32, 0.0 }
 0x988   : > { %v18190_v3 = vpack.c.bf16 %v9889_v23, %v9877_v12  ;;  %v14512_v23 = vld [vmem:[%s18516_s10 + $0x108] sm:$0xff]  }
 0x989   : > { %v9926_v5 = vpack.c.bf16 %v9890_v36, %v9878_v45  ;;  %13324 = vmatpush3.bf16.msra.mxu1 %v14500_v24  ;;  %v9654_v10 = vpop.f32.mrb[84].mxu1  ;;  %v9277_v36 = vrot.slane %v18152_v7, %v9276_v48 }
 0x98a   : > { %v9655_v54 = vadd.f32 %v9654_v10, %v9261_v20  ;;  %v9656_v34 = vpop.f32.mrb[85].mxu1  ;;  %13325 = vmatprep.subr.bf16.mxu1 %v14501_v50 }
 0x98b   : > { %v9657_v33 = vadd.f32 %v9656_v34, %v9265_v2  ;;  %v9658_v19 = vpop.f32.mrb[86].mxu1  ;;  %10291 = vmatprep.mubr.bf16.mxu1 %v9926_v5  ;;  %v14513_v5 = vld [vmem:[%s18516_s10 + $0x150] sm:$0xff]  }
 0x98c   : > { %v9659_v8 = vadd.f32 %v9658_v19, %v9261_v20  ;;  %v9660_v26 = vpop.f32.mrb[87].mxu1  ;;  %v9901_v39 = vmax.f32 %v9655_v54, 0.0 }
 0x98d   : > { %v9661_v61 = vadd.f32 %v9660_v26, %v9265_v2  ;;  %13326 = vmatpush3.bf16.msra.mxu1 %v14502_v63  ;;  %v9902_v56 = vmax.f32 %v9657_v33, 0.0 }
 0x98e   : > { %v9913_v14 = vmax.f32 %v9659_v8, 0.0  ;;  %13327 = vmatprep.subr.bf16.mxu1 %v14503_v58 }
 0x98f   : > { %v9914_v13 = vmax.f32 %v9661_v61, 0.0 }
 0x990   : > { %v9937_v18 = vpack.c.bf16 %v9913_v14, %v9901_v39  ;;  %v14516_v39 = vld [vmem:[%s18516_s10 + $0x118] sm:$0xff]  }
 0x991   : > { %v9938_v53 = vpack.c.bf16 %v9914_v13, %v9902_v56  ;;  %13328 = vmatpush3.bf16.msra.mxu1 %v14504_v30  ;;  %v9697_v57 = vpop.f32.mrb[88].mxu1 }
 0x992   : > { %v9698_v31 = vadd.f32 %v9697_v57, %v9269_v11  ;;  %v9699_v51 = vpop.f32.mrb[89].mxu1  ;;  %13329 = vmatprep.subr.bf16.mxu1 %v14505_v47  ;;  %v14517_v47 = vld [vmem:[%s18516_s10 + $0x160] sm:$0xff]  }
 0x993   : > { %v9700_v25 = vadd.f32 %v9699_v51, %v9273_v15  ;;  %v9701_v49 = vpop.f32.mrb[90].mxu1  ;;  %v14518_v57 = vld [vmem:[%s18516_s10 + $0x120] sm:$0xff]   ;;  %v14519_v51 = vld [vmem:[%s18516_s10 + $0x168] sm:$0xff]  }
 0x994   : > { %v9702_v16 = vadd.f32 %v9701_v49, %v9269_v11  ;;  %v9703_v46 = vpop.f32.mrb[91].mxu1  ;;  %v9879_v20 = vmax.f32 %v9698_v31, 0.0  ;;  %v9247_v49 = vld [vmem:[%s18515_s9 + $0x8] sm:$0xf] }
 0x995   : > { %v9704_v22 = vadd.f32 %v9703_v46, %v9273_v15  ;;  %13330 = vmatpush3.bf16.msra.mxu1 %v14506_v17  ;;  %v9880_v9 = vmax.f32 %v9700_v25, 0.0 }
 0x996   : > { %v9891_v59 = vmax.f32 %v9702_v16, 0.0  ;;  %13331 = vmatprep.subr.bf16.mxu1 %v14507_v44 }
 0x997   : > { %v9892_v2 = vmax.f32 %v9704_v22, 0.0 }
 0x998   : > { %v18220_v38 = vpack.c.bf16 %v9891_v59, %v9879_v20 }
 0x999   : > { %v9928_v1 = vpack.c.bf16 %v9892_v2, %v9880_v9  ;;  %13332 = vmatpush3.bf16.msra.mxu1 %v14508_v41  ;;  %v9707_v60 = vpop.f32.mrb[92].mxu1  ;;  %v14520_v41 = vld [vmem:[%s18516_s10 + $0x128] sm:$0xff]   ;;  %v14521_v9 = vld [vmem:[%s18516_s10 + $0x170] sm:$0xff]  }
 0x99a   : > { %v9708_v35 = vadd.f32 %v9707_v60, %v9269_v11  ;;  %v9709_v62 = vpop.f32.mrb[93].mxu1  ;;  %13345 = vmatprep.subr.bf16.mxu1 %v14509_v29  ;;  %v9285_v29 = vrot.slane %v9247_v49, %v17653_v4  ;;  %v9289_v60 = vrot.slane %v9247_v49, %v17659_v28 }
 0x99b   : > { %v9710_v52 = vadd.f32 %v9709_v62, %v9273_v15  ;;  %v9711_v43 = vpop.f32.mrb[94].mxu1 }
 0x99c   : > { %v9712_v32 = vadd.f32 %v9711_v43, %v9269_v11  ;;  %10292 = vmatmul.mubr.bf16.vlgmr.msra.gmra.mrb[128].mxu1 %v18190_v3  ;;  %v9713_v24 = vpop.f32.mrb[95].mxu1  ;;  %v9903_v50 = vmax.f32 %v9708_v35, 0.0  ;;  %v9281_v3 = vrot.slane %v18152_v7, %v9280_v55 }
 0x99d   : > { %v9714_v12 = vadd.f32 %v9713_v24, %v9273_v15  ;;  %10299 = vmatprep.mubr.bf16.mxu1 %v9938_v53  ;;  %13346 = vmatpush3.bf16.msra.mxu1 %v14510_v42  ;;  %v9904_v10 = vmax.f32 %v9710_v52, 0.0  ;;  %v14523_v52 = vld [vmem:[%s18516_s10 + $0x178] sm:$0xff]  }
 0x99e   : > { %v9915_v45 = vmax.f32 %v9712_v32, 0.0  ;;  %13347 = vmatprep.subr.bf16.mxu1 %v14511_v37  ;;  %v14522_v37 = vld [vmem:[%s18516_s10 + $0x130] sm:$0xff]  }
 0x99f   : > { %v9916_v63 = vmax.f32 %v9714_v12, 0.0  ;;  %v14524_v12 = vld [vmem:[%s18516_s10 + $0x138] sm:$0xff]  }
 0x9a0   : > { %v18239_v54 = vpack.c.bf16 %v9915_v45, %v9903_v50  ;;  %v14525_v45 = vld [vmem:[%s18516_s10 + $0x1c0] sm:$0xff]  }
 0x9a1   : > { %v18241_v34 = vpack.c.bf16 %v9916_v63, %v9904_v10  ;;  %13348 = vmatpush3.bf16.msra.mxu1 %v14512_v23  ;;  %v9750_v58 = vpop.f32.mrb[96].mxu1 }
 0x9a2   : > { %v9751_v33 = vadd.f32 %v9750_v58, %v9277_v36  ;;  %v9752_v19 = vpop.f32.mrb[97].mxu1  ;;  %13349 = vmatprep.subr.bf16.mxu1 %v14513_v5  ;;  %v14526_v58 = vld [vmem:[%s18516_s10 + $0x180] sm:$0xff]  }
 0x9a3   : > { %v9753_v8 = vadd.f32 %v9752_v19, %v9281_v3  ;;  %v9754_v26 = vpop.f32.mrb[98].mxu1  ;;  %v14527_v19 = vld [vmem:[%s18516_s10 + $0x1c8] sm:$0xff]  }
 0x9a4   : > { %v9755_v7 = vadd.f32 %v9754_v26, %v9277_v36  ;;  %10300 = vmatmul.mubr.bf16.gmra.mrb[132].mxu1 %v9937_v18  ;;  %v9756_v61 = vpop.f32.mrb[99].mxu1  ;;  %v9881_v14 = vmax.f32 %v9751_v33, 0.0 }
 0x9a5   : > { %v9757_v30 = vadd.f32 %v9756_v61, %v9281_v3  ;;  %13350 = vmatpush3.bf16.msra.mxu1 %v14514_v6  ;;  %10605 = vmatprep.mubr.bf16.mxu1 %v9928_v1  ;;  %v9882_v56 = vmax.f32 %v9753_v8, 0.0 }
 0x9a6   : > { %v9893_v11 = vmax.f32 %v9755_v7, 0.0  ;;  %13351 = vmatprep.subr.bf16.mxu1 %v14515_v40 }
 0x9a7   : > { %v9894_v13 = vmax.f32 %v9757_v30, 0.0  ;;  %v14528_v30 = vld [vmem:[%s18516_s10 + $0x188] sm:$0xff]  }
 0x9a8   : > { %v18255_v15 = vpack.c.bf16 %v9893_v11, %v9881_v14  ;;  %v9293_v11 = vrot.slane %v9247_v49, %v9260_v27 }
 0x9a9   : > { %v18257_v18 = vpack.c.bf16 %v9894_v13, %v9882_v56  ;;  %13352 = vmatpush3.bf16.msra.mxu1 %v14516_v39  ;;  %v9760_v53 = vpop.f32.mrb[100].mxu1 }
 0x9aa   : > { %v9761_v17 = vadd.f32 %v9760_v53, %v9277_v36  ;;  %v9762_v31 = vpop.f32.mrb[101].mxu1  ;;  %13353 = vmatprep.subr.bf16.mxu1 %v14517_v47  ;;  %v14529_v47 = vld [vmem:[%s18516_s10 + $0x1d0] sm:$0xff]  }
 0x9ab   : > { %v9763_v44 = vadd.f32 %v9762_v31, %v9281_v3  ;;  %v9764_v25 = vpop.f32.mrb[102].mxu1 }
 0x9ac   : > { %v9765_v16 = vadd.f32 %v9764_v25, %v9277_v36  ;;  %v9766_v46 = vpop.f32.mrb[103].mxu1  ;;  %v9905_v20 = vmax.f32 %v9761_v17, 0.0  ;;  %v14530_v17 = vld [vmem:[%s18516_s10 + $0x190] sm:$0xff]  }
 0x9ad   : > { %v9767_v22 = vadd.f32 %v9766_v46, %v9281_v3  ;;  %13354 = vmatpush3.bf16.msra.mxu1 %v14518_v57  ;;  %v9906_v2 = vmax.f32 %v9763_v44, 0.0 }
 0x9ae   : > { %v9917_v59 = vmax.f32 %v9765_v16, 0.0  ;;  %13355 = vmatprep.subr.bf16.mxu1 %v14519_v51  ;;  %v14531_v51 = vld [vmem:[%s18516_s10 + $0x1d8] sm:$0xff]  }
 0x9af   : > { %v9918_v1 = vmax.f32 %v9767_v22, 0.0  ;;  %v14532_v16 = vld [vmem:[%s18516_s10 + $0x198] sm:$0xff]  }
 0x9b0   : > { %v18276_v42 = vpack.c.bf16 %v9917_v59, %v9905_v20 }
 0x9b1   : > { %v18278_v35 = vpack.c.bf16 %v9918_v1, %v9906_v2  ;;  %13356 = vmatpush3.bf16.msra.mxu1 %v14520_v41  ;;  %v9803_v62 = vpop.f32.mrb[104].mxu1  ;;  %v14533_v41 = vld [vmem:[%s18516_s10 + $0x1e0] sm:$0xff]  }
 0x9b2   : > { %v9804_v48 = vadd.f32 %v9803_v62, %v9285_v29  ;;  %v9805_v4 = vpop.f32.mrb[105].mxu1  ;;  %13357 = vmatprep.subr.bf16.mxu1 %v14521_v9 }
 0x9b3   : > { %v9806_v43 = vadd.f32 %v9805_v4, %v9289_v60  ;;  %v9807_v55 = vpop.f32.mrb[106].mxu1 }
 0x9b4   : > { %v9808_v28 = vadd.f32 %v9807_v55, %v9285_v29  ;;  %v9809_v32 = vpop.f32.mrb[107].mxu1  ;;  %v9883_v23 = vmax.f32 %v9804_v48, 0.0 }
 0x9b5   : > { %v9810_v24 = vadd.f32 %v9809_v32, %v9289_v60  ;;  %13358 = vmatpush3.bf16.msra.mxu1 %v14522_v37  ;;  %v9884_v36 = vmax.f32 %v9806_v43, 0.0  ;;  %v14536_v43 = vld [vmem:[%s18516_s10 + $0x1a8] sm:$0xff]   ;;  %v14537_v32 = vld [vmem:[%s18516_s10 + $0x1f0] sm:$0xff]  }
 0x9b6   : > { %v9895_v50 = vmax.f32 %v9808_v28, 0.0  ;;  %13359 = vmatprep.subr.bf16.mxu1 %v14523_v52 }
 0x9b7   : > { %v9896_v5 = vmax.f32 %v9810_v24, 0.0 }
 0x9b8   : > { %v18292_v10 = vpack.c.bf16 %v9895_v50, %v9883_v23 }
 0x9b9   : > { %v18294_v63 = vpack.c.bf16 %v9896_v5, %v9884_v36  ;;  %13360 = vmatpush3.bf16.msra.mxu1 %v14524_v12  ;;  %v9813_v3 = vpop.f32.mrb[108].mxu1  ;;  %v14539_v36 = vld [vmem:[%s18516_s10 + $0x1f8] sm:$0xff]  }
 0x9ba   : > { %v9814_v6 = vadd.f32 %v9813_v3, %v9285_v29  ;;  %v9815_v33 = vpop.f32.mrb[109].mxu1  ;;  %13373 = vmatprep.subr.bf16.mxu1 %v14525_v45  ;;  %v14538_v45 = vld [vmem:[%s18516_s10 + $0x1b0] sm:$0xff]   ;;  %v14540_v5 = vld [vmem:[%s18516_s10 + $0x1b8] sm:$0xff]   ;;  %v14541_v3 = vld [vmem:[%s18516_s10 + $0x240] sm:$0xff]  }
 0x9bb   : > { %v9816_v40 = vadd.f32 %v9815_v33, %v9289_v60  ;;  %v9817_v8 = vpop.f32.mrb[110].mxu1  ;;  %v14544_v33 = vld [vmem:[%s18516_s10 + $0x208] sm:$0xff]  }
 0x9bc   : > { %v9818_v26 = vadd.f32 %v9817_v8, %v9285_v29  ;;  %10606 = vmatmul.mubr.bf16.vlgmr.msra.gmra.mrb[136].mxu1 %v18220_v38  ;;  %v9819_v7 = vpop.f32.mrb[111].mxu1  ;;  %v9907_v39 = vmax.f32 %v9814_v6, 0.0  ;;  %v14543_v6 = vld [vmem:[%s18516_s10 + $0x248] sm:$0xff]   ;;  %v14549_v8 = vld [vmem:[%s18516_s10 + $0x260] sm:$0xff]  }
 0x9bd   : > { %v9820_v61 = vadd.f32 %v9819_v7, %v9289_v60  ;;  %10613 = vmatprep.mubr.bf16.mxu1 %v18241_v34  ;;  %13374 = vmatpush3.bf16.msra.mxu1 %v14526_v58  ;;  %v9908_v38 = vmax.f32 %v9816_v40, 0.0  ;;  %v9297_v34 = vrot.slane %v9247_v49, %v9264_v0  ;;  %v14535_v60 = vld [vmem:[%s18516_s10 + $0x1e8] sm:$0xff]   ;;  %v14542_v58 = vld [vmem:[%s18516_s10 + $0x200] sm:$0xff]   ;;  %v14546_v40 = vld [vmem:[%s18516_s10 + $0x210] sm:$0xff]  }
 0x9be   : > { %v9919_v14 = vmax.f32 %v9818_v26, 0.0  ;;  %13375 = vmatprep.subr.bf16.mxu1 %v14527_v19  ;;  %v14545_v19 = vld [vmem:[%s18516_s10 + $0x250] sm:$0xff]   ;;  %v14550_v26 = vld [vmem:[%s18516_s10 + $0x220] sm:$0xff]  }
 0x9bf   : > { %v9920_v56 = vmax.f32 %v9820_v61, 0.0  ;;  %v14553_v7 = vld [vmem:[%s18516_s10 + $0x270] sm:$0xff]  }
 0x9c0   : > { %v18314_v13 = vpack.c.bf16 %v9919_v14, %v9907_v39  ;;  %v14554_v61 = vld [vmem:[%s18516_s10 + $0x230] sm:$0xff]   ;;  %v14556_v39 = vld [vmem:[%s18516_s10 + $0x238] sm:$0xff]   ;;  %v14557_v14 = vld [vmem:[%s18516_s10 + $0x2c0] sm:$0xff]  }
 0x9c1   : > { %v18316_v53 = vpack.c.bf16 %v9920_v56, %v9908_v38  ;;  %13376 = vmatpush3.bf16.msra.mxu1 %v14528_v30  ;;  %v9856_v57 = vpop.f32.mrb[112].mxu1  ;;  %v14555_v30 = vld [vmem:[%s18516_s10 + $0x278] sm:$0xff]   ;;  %v14560_v38 = vld [vmem:[%s18516_s10 + $0x288] sm:$0xff]   ;;  %v14561_v56 = vld [vmem:[%s18516_s10 + $0x2d0] sm:$0xff]  }
 0x9c2   : > { %v9857_v27 = vadd.f32 %v9856_v57, %v9293_v11  ;;  %v9858_v31 = vpop.f32.mrb[113].mxu1  ;;  %13377 = vmatprep.subr.bf16.mxu1 %v14529_v47  ;;  %v14559_v47 = vld [vmem:[%s18516_s10 + $0x2c8] sm:$0xff]   ;;  %v14565_v57 = vld [vmem:[%s18516_s10 + $0x2e0] sm:$0xff]  }
 0x9c3   : > { %v9859_v44 = vadd.f32 %v9858_v31, %v9297_v34  ;;  %v9860_v21 = vpop.f32.mrb[114].mxu1  ;;  %v14569_v31 = vld [vmem:[%s18516_s10 + $0x2f0] sm:$0xff]  }
 0x9c4   : > { %v9861_v0 = vadd.f32 %v9860_v21, %v9293_v11  ;;  %10614 = vmatmul.mubr.bf16.gmra.mrb[140].mxu1 %v18239_v54  ;;  %v9862_v25 = vpop.f32.mrb[115].mxu1  ;;  %v9885_v46 = vmax.f32 %v9857_v27, 0.0  ;;  %v14568_v27 = vld [vmem:[%s18516_s10 + $0x2a8] sm:$0xff]   ;;  %v14572_v21 = vld [vmem:[%s18516_s10 + $0x2b8] sm:$0xff]  }
 0x9c5   : > { %v9863_v49 = vadd.f32 %v9862_v25, %v9297_v34  ;;  %13378 = vmatpush3.bf16.msra.mxu1 %v14530_v17  ;;  %10654 = vmatprep.mubr.bf16.mxu1 %v18257_v18  ;;  %v9886_v20 = vmax.f32 %v9859_v44, 0.0  ;;  %v14534_v18 = vld [vmem:[%s18516_s10 + $0x1a0] sm:$0xff]   ;;  %v14571_v44 = vld [vmem:[%s18516_s10 + $0x2f8] sm:$0xff]  }
 0x9c6   : > { %v9897_v22 = vmax.f32 %v9861_v0, 0.0  ;;  %13379 = vmatprep.subr.bf16.mxu1 %v14531_v51  ;;  %v14566_v17 = vld [vmem:[%s18516_s10 + $0x2a0] sm:$0xff]   ;;  %v14570_v51 = vld [vmem:[%s18516_s10 + $0x2b0] sm:$0xff]  }
 0x9c7   : > { %v9898_v59 = vmax.f32 %v9863_v49, 0.0 }
 0x9c8   : > { %v18332_v29 = vpack.c.bf16 %v9897_v22, %v9885_v46 }
 0x9c9   : > { %v18334_v54 = vpack.c.bf16 %v9898_v59, %v9886_v20  ;;  %13380 = vmatpush3.bf16.msra.mxu1 %v14532_v16  ;;  %v9866_v9 = vpop.f32.mrb[116].mxu1 }
 0x9ca   : > { %v9867_v2 = vadd.f32 %v9866_v9, %v9293_v11  ;;  %v9868_v1 = vpop.f32.mrb[117].mxu1  ;;  %13381 = vmatprep.subr.bf16.mxu1 %v14533_v41 }
 0x9cb   : > { %v9869_v62 = vadd.f32 %v9868_v1, %v9297_v34  ;;  %v9870_v37 = vpop.f32.mrb[118].mxu1 }
 0x9cc   : > { %v9871_v48 = vadd.f32 %v9870_v37, %v9293_v11  ;;  %v9872_v4 = vpop.f32.mrb[119].mxu1  ;;  %v9909_v55 = vmax.f32 %v9867_v2, 0.0  ;;  %v14558_v11 = vld [vmem:[%s18516_s10 + $0x280] sm:$0xff]  }
 0x9cd   : > { %v9873_v52 = vadd.f32 %v9872_v4, %v9297_v34  ;;  %13382 = vmatpush3.bf16.msra.mxu1 %v14534_v18  ;;  %v9910_v24 = vmax.f32 %v9869_v62, 0.0  ;;  %v14562_v34 = vld [vmem:[%s18516_s10 + $0x290] sm:$0xff]  }
 0x9ce   : > { %v9921_v28 = vmax.f32 %v9871_v48, 0.0  ;;  %13383 = vmatprep.subr.bf16.mxu1 %v14535_v60 }
 0x9cf   : > { %v9922_v12 = vmax.f32 %v9873_v52, 0.0 }
 0x9d0   : > { %v18348_v23 = vpack.c.bf16 %v9921_v28, %v9909_v55 }
 0x9d1   : > { %v18350_v50 = vpack.c.bf16 %v9922_v12, %v9910_v24  ;;  %13384 = vmatpush3.bf16.msra.mxu1 %v14536_v43 }
 0x9d2   : > { %13385 = vmatprep.subr.bf16.mxu1 %v14537_v32 }
 0x9d5   : > { %13386 = vmatpush3.bf16.msra.mxu1 %v14538_v45 }
 0x9d6   : > { %13387 = vmatprep.subr.bf16.mxu1 %v14539_v36 }
 0x9d9   : > { %13388 = vmatpush3.bf16.msra.mxu1 %v14540_v5 }
 0x9da   : > { %13401 = vmatprep.subr.bf16.mxu1 %v14541_v3 }
 0x9dc   : > { %10655 = vmatmul.mubr.bf16.vlgmr.msra.gmra.mrb[144].mxu1 %v18255_v15  ;;  %v14547_v15 = vld [vmem:[%s18516_s10 + $0x258] sm:$0xff]  }
 0x9dd   : > { %10662 = vmatprep.mubr.bf16.mxu1 %v18278_v35  ;;  %13402 = vmatpush3.bf16.msra.mxu1 %v14542_v58  ;;  %v14548_v35 = vld [vmem:[%s18516_s10 + $0x218] sm:$0xff]  }
 0x9de   : > { %13403 = vmatprep.subr.bf16.mxu1 %v14543_v6 }
 0x9e1   : > { %13404 = vmatpush3.bf16.msra.mxu1 %v14544_v33 }
 0x9e2   : > { %13405 = vmatprep.subr.bf16.mxu1 %v14545_v19 }
 0x9e4   : > { %10663 = vmatmul.mubr.bf16.gmra.mrb[148].mxu1 %v18276_v42  ;;  %v14551_v42 = vld [vmem:[%s18516_s10 + $0x268] sm:$0xff]  }
 0x9e5   : > { %13406 = vmatpush3.bf16.msra.mxu1 %v14546_v40  ;;  %10968 = vmatprep.mubr.bf16.mxu1 %v18294_v63  ;;  %v14552_v63 = vld [vmem:[%s18516_s10 + $0x228] sm:$0xff]  }
 0x9e6   : > { %13407 = vmatprep.subr.bf16.mxu1 %v14547_v15 }
 0x9e9   : > { %13408 = vmatpush3.bf16.msra.mxu1 %v14548_v35 }
 0x9ea   : > { %13409 = vmatprep.subr.bf16.mxu1 %v14549_v8 }
 0x9ed   : > { %13410 = vmatpush3.bf16.msra.mxu1 %v14550_v26 }
 0x9ee   : > { %13411 = vmatprep.subr.bf16.mxu1 %v14551_v42 }
 0x9f1   : > { %13412 = vmatpush3.bf16.msra.mxu1 %v14552_v63 }
 0x9f2   : > { %13413 = vmatprep.subr.bf16.mxu1 %v14553_v7 }
 0x9f5   : > { %13414 = vmatpush3.bf16.msra.mxu1 %v14554_v61 }
 0x9f6   : > { %13415 = vmatprep.subr.bf16.mxu1 %v14555_v30 }
 0x9f9   : > { %13416 = vmatpush3.bf16.msra.mxu1 %v14556_v39 }
 0x9fa   : > { %13429 = vmatprep.subr.bf16.mxu1 %v14557_v14 }
 0x9fc   : > { %10969 = vmatmul.mubr.bf16.vlgmr.msra.gmra.mrb[152].mxu1 %v18292_v10  ;;  %v14563_v10 = vld [vmem:[%s18516_s10 + $0x2d8] sm:$0xff]  }
 0x9fd   : > { %10976 = vmatprep.mubr.bf16.mxu1 %v18316_v53  ;;  %13430 = vmatpush3.bf16.msra.mxu1 %v14558_v11  ;;  %v14564_v53 = vld [vmem:[%s18516_s10 + $0x298] sm:$0xff]   ;;  %v12174_v11 = vld [vmem:[%s18517_s11 + $0x1] ss:$0 sm:$0xff] }
 0x9fe   : > { %13431 = vmatprep.subr.bf16.mxu1 %v14559_v47 }
 0xa01   : > { %13432 = vmatpush3.bf16.msra.mxu1 %v14560_v38 }
 0xa02   : > { %13433 = vmatprep.subr.bf16.mxu1 %v14561_v56 }
 0xa04   : > { %10977 = vmatmul.mubr.bf16.gmra.mrb[156].mxu1 %v18314_v13  ;;  %v14567_v13 = vld [vmem:[%s18516_s10 + $0x2e8] sm:$0xff]  }
 0xa05   : > { %13434 = vmatpush3.bf16.msra.mxu1 %v14562_v34  ;;  %11017 = vmatprep.mubr.bf16.mxu1 %v18334_v54 }
 0xa06   : > { %13435 = vmatprep.subr.bf16.mxu1 %v14563_v10 }
 0xa09   : > { %13436 = vmatpush3.bf16.msra.mxu1 %v14564_v53 }
 0xa0a   : > { %13437 = vmatprep.subr.bf16.mxu1 %v14565_v57 }
 0xa0d   : > { %13438 = vmatpush3.bf16.msra.mxu1 %v14566_v17 }
 0xa0e   : > { %13439 = vmatprep.subr.bf16.mxu1 %v14567_v13 }
 0xa11   : > { %13440 = vmatpush3.bf16.msra.mxu1 %v14568_v27 }
 0xa12   : > { %13441 = vmatprep.subr.bf16.mxu1 %v14569_v31 }
 0xa15   : > { %13442 = vmatpush3.bf16.msra.mxu1 %v14570_v51 }
 0xa16   : > { %13443 = vmatprep.subr.bf16.mxu1 %v14571_v44 }
 0xa19   : > { %13444 = vmatpush3.bf16.msra.mxu1 %v14572_v21 }
 0xa1c   : > { %11018 = vmatmul.mubr.bf16.vlgmr.msra.gmra.mrb[160].mxu1 %v18332_v29  ;;  %v12076_v29 = vld [vmem:[%s18517_s11] ss:$0 sm:$0xff] }
 0xa1d   : > { %11025 = vmatprep.mubr.bf16.mxu1 %v18350_v50 }
 0xa24   : > { %11026 = vmatmul.mubr.bf16.gmra.mrb[164].mxu1 %v18348_v23 }
 0xa4f   : > { %v13305_v0 = vpop.f32.mrb[120].mxu1 }
 0xa50   : > { %v13306_v25 = vpop.f32.mrb[121].mxu1 }
 0xa51   : > { %v13307_v49 = vadd.f32 %v13306_v25, %v13305_v0  ;;  %v13308_v16 = vpop.f32.mrb[122].mxu1 }
 0xa52   : > { %v13309_v46 = vpop.f32.mrb[123].mxu1 }
 0xa53   : > { %v13310_v22 = vadd.f32 %v13309_v46, %v13308_v16  ;;  %v10245_v60 = vadd.f32 %v13307_v49, %v12076_v29 }
 0xa55   : > { %v10248_v4 = vadd.f32 %v13310_v22, %v12076_v29 }
 0xa57   : > { %v13311_v41 = vpop.f32.mrb[124].mxu1 }
 0xa58   : > { %v13312_v20 = vpop.f32.mrb[125].mxu1 }
 0xa59   : > { %v13313_v59 = vadd.f32 %v13312_v20, %v13311_v41  ;;  %v13314_v54 = vpop.f32.mrb[126].mxu1 }
 0xa5a   : > { %v13315_v9 = vpop.f32.mrb[127].mxu1 }
 0xa5b   : > { %v13316_v18 = vadd.f32 %v13315_v9, %v13314_v54  ;;  %v10253_v24 = vadd.f32 %v13313_v59, %v12076_v29 }
 0xa5d   : > { %v10256_v45 = vadd.f32 %v13316_v18, %v12076_v29 }
 0xa6f   : > { %v13333_v2 = vpop.f32.mrb[128].mxu1 }
 0xa70   : > { %v13334_v1 = vpop.f32.mrb[129].mxu1 }
 0xa71   : > { %v13335_v62 = vadd.f32 %v13334_v1, %v13333_v2  ;;  %v13336_v37 = vpop.f32.mrb[130].mxu1 }
 0xa72   : > { %v13337_v48 = vpop.f32.mrb[131].mxu1 }
 0xa73   : > { %v10294_v52 = vadd.f32 %v13335_v62, %v10245_v60  ;;  %v13338_v43 = vadd.f32 %v13337_v48, %v13336_v37 }
 0xa75   : > { %14573 = vtanh.f32 %v10294_v52  ;;  %v10297_v55 = vadd.f32 %v13338_v43, %v10248_v4 }
 0xa77   : > { %14575 = vtanh.f32 %v10297_v55  ;;  %v13339_v28 = vpop.f32.mrb[132].mxu1 }
 0xa78   : > { %v13340_v32 = vpop.f32.mrb[133].mxu1 }
 0xa79   : > { %v13341_v12 = vadd.f32 %v13340_v32, %v13339_v28  ;;  %v13342_v23 = vpop.f32.mrb[134].mxu1 }
 0xa7a   : > { %v13343_v50 = vpop.f32.mrb[135].mxu1 }
 0xa7b   : > { %v10302_v36 = vadd.f32 %v13341_v12, %v10253_v24  ;;  %v13344_v5 = vadd.f32 %v13343_v50, %v13342_v23 }
 0xa7d   : > { %14577 = vtanh.f32 %v10302_v36  ;;  %v10305_v3 = vadd.f32 %v13344_v5, %v10256_v45 }
 0xa7f   : > { %v14574_v58 = vpop.eup %14573  ;;  %14579 = vtanh.f32 %v10305_v3 }
 0xa80   : > { %11038 = vst [vmem:[%s18476_s26] sm:$0xff] %v14574_v58 }
 0xa81   : > { %v14576_v6 = vpop.eup %14575 }
 0xa82   : > { %11039 = vst [vmem:[%s18476_s26 + $0x18] sm:$0xff] %v14576_v6 }
 0xa87   : > { %v14578_v33 = vpop.eup %14577 }
 0xa88   : > { %11040 = vst [vmem:[%s18476_s26 + $0x30] sm:$0xff] %v14578_v33 }
 0xa89   : > { %v14580_v19 = vpop.eup %14579 }
 0xa8a   : > { %11041 = vst [vmem:[%s18476_s26 + $0x48] sm:$0xff] %v14580_v19 }
 0xa8f   : > { %v13361_v40 = vpop.f32.mrb[136].mxu1 }
 0xa90   : > { %v13362_v15 = vpop.f32.mrb[137].mxu1 }
 0xa91   : > { %v13363_v35 = vadd.f32 %v13362_v15, %v13361_v40  ;;  %v13364_v8 = vpop.f32.mrb[138].mxu1 }
 0xa92   : > { %v13365_v26 = vpop.f32.mrb[139].mxu1 }
 0xa93   : > { %v13366_v42 = vadd.f32 %v13365_v26, %v13364_v8  ;;  %v10608_v56 = vadd.f32 %v13363_v35, %v12174_v11 }
 0xa95   : > { %v10611_v57 = vadd.f32 %v13366_v42, %v12174_v11 }
 0xa97   : > { %v13367_v63 = vpop.f32.mrb[140].mxu1 }
 0xa98   : > { %v13368_v7 = vpop.f32.mrb[141].mxu1 }
 0xa99   : > { %v13369_v61 = vadd.f32 %v13368_v7, %v13367_v63  ;;  %v13370_v30 = vpop.f32.mrb[142].mxu1 }
 0xa9a   : > { %v13371_v39 = vpop.f32.mrb[143].mxu1 }
 0xa9b   : > { %v13372_v14 = vadd.f32 %v13371_v39, %v13370_v30  ;;  %v10616_v25 = vadd.f32 %v13369_v61, %v12174_v11 }
 0xa9d   : > { %v10619_v41 = vadd.f32 %v13372_v14, %v12174_v11 }
 0xaaf   : > { %v13389_v47 = vpop.f32.mrb[144].mxu1 }
 0xab0   : > { %v13390_v38 = vpop.f32.mrb[145].mxu1 }
 0xab1   : > { %v13391_v34 = vadd.f32 %v13390_v38, %v13389_v47  ;;  %v13392_v10 = vpop.f32.mrb[146].mxu1 }
 0xab2   : > { %v13393_v53 = vpop.f32.mrb[147].mxu1 }
 0xab3   : > { %v10657_v17 = vadd.f32 %v13391_v34, %v10608_v56  ;;  %v13394_v13 = vadd.f32 %v13393_v53, %v13392_v10 }
 0xab5   : > { %v11042_v27 = vand.u32 2147483647, %v10657_v17  ;;  %v10660_v31 = vadd.f32 %v13394_v13, %v10611_v57  ;;  %v11078_v33 = vmax.f32 %v10657_v17, 0.0  ;;  %v12272_v13 = vld [vmem:[%s18517_s11 + $0x2] ss:$0 sm:$0xff] }
 0xab7   : > { %v11046_v51 = vsub.f32 0.0, %v11042_v27  ;;  %v11043_v44 = vand.u32 2147483647, %v10660_v31  ;;  %v13395_v21 = vpop.f32.mrb[148].mxu1  ;;  %v11079_v35 = vmax.f32 %v10660_v31, 0.0 }
 0xab8   : > { %v13396_v0 = vpop.f32.mrb[149].mxu1 }
 0xab9   : > { %v11050_v49 = vmul.f32 1.442695, %v11046_v51  ;;  %v11047_v16 = vsub.f32 0.0, %v11043_v44  ;;  %v13397_v46 = vadd.f32 %v13396_v0, %v13395_v21  ;;  %v13398_v22 = vpop.f32.mrb[150].mxu1 }
 0xaba   : > { %v13399_v20 = vpop.f32.mrb[151].mxu1 }
 0xabb   : > { %14581 = vpow2.f32 %v11050_v49  ;;  %v11052_v59 = vmul.f32 1.442695, %v11047_v16  ;;  %v10665_v54 = vadd.f32 %v13397_v46, %v10616_v25  ;;  %v13400_v9 = vadd.f32 %v13399_v20, %v13398_v22 }
 0xabd   : > { %14583 = vpow2.f32 %v11052_v59  ;;  %v11044_v18 = vand.u32 2147483647, %v10665_v54  ;;  %v10668_v29 = vadd.f32 %v13400_v9, %v10619_v41  ;;  %v11080_v38 = vmax.f32 %v10665_v54, 0.0 }
 0xabf   : > { %v11048_v2 = vsub.f32 0.0, %v11044_v18  ;;  %v11045_v1 = vand.u32 2147483647, %v10668_v29  ;;  %v11081_v53 = vmax.f32 %v10668_v29, 0.0 }
 0xac1   : > { %v11054_v60 = vmul.f32 1.442695, %v11048_v2  ;;  %v11049_v62 = vsub.f32 0.0, %v11045_v1 }
 0xac3   : > { %14585 = vpow2.f32 %v11054_v60  ;;  %v11056_v37 = vmul.f32 1.442695, %v11049_v62 }
 0xac5   : > { %v14582_v48 = vpop.eup %14581  ;;  %14587 = vpow2.f32 %v11056_v37 }
 0xac6   : > { %v11062_v4 = vadd.f32 1.0, %v14582_v48  ;;  %vm11058_vm8 = vcmp.lt.f32.partialorder %v14582_v48, 0.0001 }
 0xac7   : > { %v14584_v52 = vpop.eup %14583 }
 0xac8   : > { %14589 = vlog2.f32 %v11062_v4  ;;  %v11063_v43 = vadd.f32 1.0, %v14584_v52  ;;  %vm11059_vm9 = vcmp.lt.f32.partialorder %v14584_v52, 0.0001 }
 0xaca   : > { %14591 = vlog2.f32 %v11063_v43 }
 0xacd   : > { %v14586_v55 = vpop.eup %14585 }
 0xace   : > { %v11064_v28 = vadd.f32 1.0, %v14586_v55  ;;  %vm11060_vm10 = vcmp.lt.f32.partialorder %v14586_v55, 0.0001 }
 0xacf   : > { %v14588_v32 = vpop.eup %14587  ;;  %v13417_v24 = vpop.f32.mrb[152].mxu1 }
 0xad0   : > { %14593 = vlog2.f32 %v11064_v28  ;;  %v11065_v12 = vadd.f32 1.0, %v14588_v32  ;;  %v13418_v23 = vpop.f32.mrb[153].mxu1  ;;  %vm11061_vm11 = vcmp.lt.f32.partialorder %v14588_v32, 0.0001 }
 0xad1   : > { %v13419_v50 = vadd.f32 %v13418_v23, %v13417_v24  ;;  %v13420_v45 = vpop.f32.mrb[154].mxu1 }
 0xad2   : > { %v14590_v36 = vpop.eup %14589  ;;  %14595 = vlog2.f32 %v11065_v12  ;;  %v13421_v5 = vpop.f32.mrb[155].mxu1 }
 0xad3   : > { %v11067_v3 = vmul.f32 0.6931472, %v14590_v36  ;;  %v13422_v58 = vadd.f32 %v13421_v5, %v13420_v45  ;;  %v10971_v51 = vadd.f32 %v13419_v50, %v12272_v13 }
 0xad4   : > { %v14592_v6 = vpop.eup %14591 }
 0xad5   : > { %v11074_v19 = vsel %vm11058_vm8, %v14582_v48, %v11067_v3  ;;  %v11069_v40 = vmul.f32 0.6931472, %v14592_v6  ;;  %v10974_v25 = vadd.f32 %v13422_v58, %v12272_v13 }
 0xad6   : > { %v11082_v15 = vadd.f32 %v11078_v33, %v11074_v19 }
 0xad7   : > { %v11075_v8 = vsel %vm11059_vm9, %v14584_v52, %v11069_v40  ;;  %v13423_v26 = vpop.f32.mrb[156].mxu1 }
 0xad8   : > { %11086 = vst [vmem:[%s18476_s26 + $0x8] sm:$0xff] %v11082_v15  ;;  %v11083_v42 = vadd.f32 %v11079_v35, %v11075_v8  ;;  %v13424_v63 = vpop.f32.mrb[157].mxu1 }
 0xad9   : > { %v13425_v7 = vadd.f32 %v13424_v63, %v13423_v26  ;;  %v13426_v61 = vpop.f32.mrb[158].mxu1 }
 0xada   : > { %v14594_v30 = vpop.eup %14593  ;;  %11087 = vst [vmem:[%s18476_s26 + $0x20] sm:$0xff] %v11083_v42  ;;  %v13427_v39 = vpop.f32.mrb[159].mxu1 }
 0xadb   : > { %v11071_v14 = vmul.f32 0.6931472, %v14594_v30  ;;  %v13428_v11 = vadd.f32 %v13427_v39, %v13426_v61  ;;  %v10979_v20 = vadd.f32 %v13425_v7, %v12272_v13 }
 0xadc   : > { %v14596_v47 = vpop.eup %14595 }
 0xadd   : > { %v11076_v56 = vsel %vm11060_vm10, %v14586_v55, %v11071_v14  ;;  %v11073_v34 = vmul.f32 0.6931472, %v14596_v47  ;;  %v10982_v18 = vadd.f32 %v13428_v11, %v12272_v13 }
 0xade   : > { %v11084_v10 = vadd.f32 %v11080_v38, %v11076_v56 }
 0xadf   : > { %v11077_v57 = vsel %vm11061_vm11, %v14588_v32, %v11073_v34 }
 0xae0   : > { %11088 = vst [vmem:[%s18476_s26 + $0x38] sm:$0xff] %v11084_v10  ;;  %v11085_v17 = vadd.f32 %v11081_v53, %v11077_v57 }
 0xae2   : > { %11089 = vst [vmem:[%s18476_s26 + $0x50] sm:$0xff] %v11085_v17 }
 0xaef   : > { %v13445_v27 = vpop.f32.mrb[160].mxu1 }
 0xaf0   : > { %v13446_v31 = vpop.f32.mrb[161].mxu1 }
 0xaf1   : > { %v13447_v44 = vadd.f32 %v13446_v31, %v13445_v27  ;;  %v13448_v21 = vpop.f32.mrb[162].mxu1 }
 0xaf2   : > { %v13449_v0 = vpop.f32.mrb[163].mxu1 }
 0xaf3   : > { %v11020_v49 = vadd.f32 %v13447_v44, %v10971_v51  ;;  %v13450_v16 = vadd.f32 %v13449_v0, %v13448_v21 }
 0xaf5   : > { %11090 = vst [vmem:[%s18476_s26 + $0x10] sm:$0xff] %v11020_v49  ;;  %v11023_v46 = vadd.f32 %v13450_v16, %v10974_v25 }
 0xaf7   : > { %11091 = vst [vmem:[%s18476_s26 + $0x28] sm:$0xff] %v11023_v46  ;;  %v13451_v22 = vpop.f32.mrb[164].mxu1 }
 0xaf8   : > { %v13452_v41 = vpop.f32.mrb[165].mxu1 }
 0xaf9   : > { %v13453_v59 = vadd.f32 %v13452_v41, %v13451_v22  ;;  %v13454_v54 = vpop.f32.mrb[166].mxu1 }
 0xafa   : > { %v13455_v9 = vpop.f32.mrb[167].mxu1 }
 0xafb   : > { %v11028_v29 = vadd.f32 %v13453_v59, %v10979_v20  ;;  %v13456_v2 = vadd.f32 %v13455_v9, %v13454_v54 }
 0xafd   : > { %11092 = vst [vmem:[%s18476_s26 + $0x40] sm:$0xff] %v11028_v29  ;;  %v11031_v1 = vadd.f32 %v13456_v2, %v10982_v18 }
 0xaff   : > { %11093 = vst [vmem:[%s18476_s26 + $0x58] sm:$0xff] %v11031_v1 }
 0xb00 PF: > { %p19_p9 = scmp.ge.s32.totalorder %s14745_s25, 4   ;;  %s18650_s21 = smov %s14652_s22 }
 0xb01   : > { %s18651_s22 = smov %s14754_s28  ;;  %s18652_s23 = smov %s14745_s25 }
 0xb02   :  { %21 = sbr.rel (!%p19_p9) target bundleno = 2 (0x2), region = 157 }

</bundles_post_ra>
